<compile_context>
chip_gen: v5e
topology: v5e:2x2
jax: 0.10.0
libtpu: 0.0.40
codegen_flags: <defaults>
</compile_context>

<pallas_src>
import jax
import jax.numpy as jnp
from jax.experimental import pallas as pl
from jax.experimental.pallas import tpu as pltpu

H_DIM = 1000   # hidden width from the module definition
LANE = 128
SUBLANE = 8
TB_MAX = 512   # max batch-tile size (fits VMEM budget on all generations w/ bf16)

# Flipped to False (once) if this JAX build rejects pl.Buffered(1) on a BlockSpec.
_SINGLE_BUFFER_OK = True


def _round_up(x, m):
    return (x + m - 1) // m * m


def _cdiv(a, b):
    return -(-a // b)


def _pick_vmem_limit():
    """~3/4 of physical VMEM: 96 MiB on v5e/v6e (128 MiB), 48 MiB on v7x (64 MiB)."""
    try:
        cap = pltpu.get_tpu_info().vmem_capacity_bytes
    except Exception:
        cap = 64 << 20   # assume the smallest (v7x per-core VMEM)
    return min((cap * 3) // 4, 96 << 20)


def _choose_batch_tiling(B):
    """Pick (padded batch, tile size, #tiles) minimising padding, >=2 even tiles
    when the batch is big enough so the v7x megacore can shard the grid."""
    bp0 = _round_up(B, SUBLANE)
    n_tiles = _cdiv(bp0, TB_MAX)
    if n_tiles == 1 and bp0 >= 2 * SUBLANE:
        n_tiles = 2                      # keep both v7x TensorCores busy
    if n_tiles > 1 and n_tiles % 2:
        n_tiles += 1                     # even tile count shards cleanly across 2 TCs
    tb = _round_up(_cdiv(bp0, n_tiles), SUBLANE)
    return tb * n_tiles, tb, n_tiles


def _make_kernel(precision):
    def _mlp_kernel(y_ref, w1_ref, b1_ref, w2_ref, b2_ref, out_ref):
        # linear1 + relu: MXU matmul (bf16 operands, f32 accumulation), f32 epilogue
        h = jnp.dot(y_ref[...], w1_ref[...],
                    preferred_element_type=jnp.float32, precision=precision)
        h = jnp.maximum(h + b1_ref[...], 0.0)
        # linear2 + relu
        o = jnp.dot(h.astype(w2_ref.dtype), w2_ref[...],
                    preferred_element_type=jnp.float32, precision=precision)
        o = jnp.maximum(o + b2_ref[...], 0.0)
        out_ref[...] = o.astype(out_ref.dtype)
    return _mlp_kernel


def pycifar_forward(y, w1, b1, w2, b2, *, compute_dtype=jnp.bfloat16,
                    trim_output=True):
    """y: (B, dim_y); w1: (dim_y, H); b1: (1, H); w2: (H, H); b2: (1, H).

    Computes relu(relu(y @ w1 + b1) @ w2 + b2), matching PYCIFAR.forward with
    weights stored transposed ((in, out))."""
    global _SINGLE_BUFFER_OK
    B, dim_y = y.shape
    H = w1.shape[1]
    HP = _round_up(H, LANE)         # 1000 -> 1024 : lane-dense hidden width
    DYP = _round_up(dim_y, LANE)    # lane/K-dense input width (e.g. 32 -> 128)

    # --- zero-pad feature dims (exact: pads contribute 0) and cast MXU operands ---
    w1p = jnp.pad(w1, ((0, DYP - dim_y), (0, HP - H))).astype(compute_dtype)
    w2p = jnp.pad(w2, ((0, HP - H), (0, HP - H))).astype(compute_dtype)
    b1p = jnp.pad(b1, ((0, 0), (0, HP - H))).astype(jnp.float32)
    b2p = jnp.pad(b2, ((0, 0), (0, HP - H))).astype(jnp.float32)

    Bp, TB, n_tiles = _choose_batch_tiling(B)
    yp = jnp.pad(y, ((0, Bp - B), (0, DYP - dim_y))).astype(compute_dtype)

    # f32 fidelity path: force HIGHEST so the MXU doesn't silently run bf16 passes.
    precision = (jax.lax.Precision.HIGHEST
                 if jnp.dtype(compute_dtype) == jnp.dtype(jnp.float32) else None)

    itemsize = jnp.dtype(compute_dtype).itemsize
    flops = 2 * Bp * HP * (DYP + HP)
    bytes_accessed = (itemsize * (Bp * DYP + DYP * HP + HP * HP)
                      + 4 * (2 * HP + Bp * HP))
    cost = pl.CostEstimate(flops=flops, transcendentals=0,
                           bytes_accessed=bytes_accessed)

    def run(single_buffer_weights):
        weight_kwargs = ({"pipeline_mode": pl.Buffered(buffer_count=1)}
                         if single_buffer_weights else {})

        def resident(shape):
            # constant index_map -> DMA'd once, stays VMEM-resident over the grid
            return pl.BlockSpec(shape, lambda i: (0, 0), **weight_kwargs)

        return pl.pallas_call(
            _make_kernel(precision),
            out_shape=jax.ShapeDtypeStruct((Bp, HP), jnp.float32),
            grid=(n_tiles,),
            in_specs=[
                pl.BlockSpec((TB, DYP), lambda i: (i, 0)),   # activations stream
                resident((DYP, HP)),                         # w1
                resident((1, HP)),                           # b1
                resident((HP, HP)),                          # w2
                resident((1, HP)),                           # b2
            ],
            out_specs=pl.BlockSpec((TB, HP), lambda i: (i, 0)),
            compiler_params=pltpu.CompilerParams(
                dimension_semantics=("parallel",),   # batch tiles split across TCs
                vmem_limit_bytes=_pick_vmem_limit(),
            ),
            cost_estimate=cost,
        )(yp, w1p, b1p, w2p, b2p)

    if _SINGLE_BUFFER_OK:
        try:
            out_p = run(True)
        except Exception:
            # This JAX/Mosaic build rejects Buffered(1); fall back to the default
            # double-buffered (still correct, just more VMEM).
            _SINGLE_BUFFER_OK = False
            out_p = run(False)
    else:
        out_p = run(False)

    if not trim_output:
        # Consumers that accept the padded (Bp, 1024) layout skip an extra copy.
        return out_p
    return out_p[:B, :H]


def init_params(key, dim_y, h_dim=H_DIM):
    """Deterministic init mimicking nn.Linear's U(-1/sqrt(fan_in), 1/sqrt(fan_in))."""
    k1, k2, k3, k4 = jax.random.split(key, 4)
    bound1 = 1.0 / jnp.sqrt(dim_y)
    bound2 = 1.0 / jnp.sqrt(h_dim)
    # stored as (in, out) == PyTorch weight.T
    w1 = jax.random.uniform(k1, (dim_y, h_dim), jnp.float32, -bound1, bound1)
    b1 = jax.random.uniform(k2, (1, h_dim), jnp.float32, -bound1, bound1)
    w2 = jax.random.uniform(k3, (h_dim, h_dim), jnp.float32, -bound2, bound2)
    b2 = jax.random.uniform(k4, (1, h_dim), jnp.float32, -bound2, bound2)
    return w1, b1, w2, b2


if __name__ == "__main__":
    key = jax.random.PRNGKey(0)
    k_in, k_par = jax.random.split(key)

    batch, dim_y = 2, 32
    y = jax.random.normal(k_in, (batch, dim_y), jnp.float32)
    w1, b1, w2, b2 = init_params(k_par, dim_y)

    out = pycifar_forward(y, w1, b1, w2, b2)      # default bf16-MXU path
    out = jax.block_until_ready(out)
    assert out.shape == (batch, H_DIM)

    # Matched reference: same bf16 rounding of MXU operands, f32 accumulation.
    yb, w1b, w2b = (a.astype(jnp.bfloat16) for a in (y, w1, w2))
    h_ref = jnp.maximum(jnp.dot(yb, w1b, preferred_element_type=jnp.float32) + b1, 0.0)
    ref = jnp.maximum(
        jnp.dot(h_ref.astype(jnp.bfloat16), w2b,
                preferred_element_type=jnp.float32) + b2, 0.0)
    assert jnp.allclose(out, ref, atol=1e-3, rtol=1e-3), "mismatch vs bf16 reference"

    # Loose sanity check vs the exact f32 module semantics.
    ref32 = jnp.maximum(jnp.maximum(y @ w1 + b1, 0.0) @ w2 + b2, 0.0)
    assert jnp.allclose(out, ref32, atol=5e-2, rtol=5e-2), "mismatch vs f32 reference"

    print("KERNEL_OK")
</pallas_src>

<mosaic_0001>
module attributes {stable_mosaic.version = 11 : i64} {
  func.func @_mlp_kernel(%arg0: i32, %arg1: memref<8x128xbf16, #tpu.memory_space<vmem>>, %arg2: memref<128x1024xbf16, #tpu.memory_space<vmem>>, %arg3: memref<1x1024xf32, #tpu.memory_space<vmem>>, %arg4: memref<1024x1024xbf16, #tpu.memory_space<vmem>>, %arg5: memref<1x1024xf32, #tpu.memory_space<vmem>>, %arg6: memref<8x1024xf32, #tpu.memory_space<vmem>>) attributes {dimension_semantics = [#tpu.dimension_semantics<parallel>], iteration_bounds = array<i64: 1>, scalar_prefetch = 0 : i64, scratch_operands = 0 : i64, tpu.core_type = #tpu.core_type<tc>, window_params = [{transform_indices = @transform_0, window_bounds = array<i64: 8, 128>}, {pipeline_mode = #tpu.pipeline_mode<synchronous>, transform_indices = @transform_1, window_bounds = array<i64: 128, 1024>}, {pipeline_mode = #tpu.pipeline_mode<synchronous>, transform_indices = @transform_2, window_bounds = array<i64: 1, 1024>}, {pipeline_mode = #tpu.pipeline_mode<synchronous>, transform_indices = @transform_3, window_bounds = array<i64: 1024, 1024>}, {pipeline_mode = #tpu.pipeline_mode<synchronous>, transform_indices = @transform_4, window_bounds = array<i64: 1, 1024>}, {transform_indices = @transform_5, window_bounds = array<i64: 8, 1024>}]} {
    %c0 = arith.constant 0 : index
    %c0_0 = arith.constant 0 : index
    %0 = vector.load %arg1[%c0, %c0_0] : memref<8x128xbf16, #tpu.memory_space<vmem>>, vector<8x128xbf16>
    %c0_1 = arith.constant 0 : index
    %c0_2 = arith.constant 0 : index
    %1 = vector.load %arg2[%c0_1, %c0_2] : memref<128x1024xbf16, #tpu.memory_space<vmem>>, vector<128x1024xbf16>
    %cst = arith.constant dense<0.000000e+00> : vector<8x1024xf32>
    %2 = tpu.matmul %0, %1, %cst {dimension_numbers = #tpu.dot_dimension_numbers<[1], [0], [0], [1], [0, 0, 1, 1], [], []>} : vector<8x128xbf16>, vector<128x1024xbf16>, vector<8x1024xf32> -> vector<8x1024xf32>
    %c0_3 = arith.constant 0 : index
    %c0_4 = arith.constant 0 : index
    %3 = vector.load %arg3[%c0_3, %c0_4] : memref<1x1024xf32, #tpu.memory_space<vmem>>, vector<1x1024xf32>
    %4 = vector.broadcast %3 : vector<1x1024xf32> to vector<8x1024xf32>
    %5 = arith.addf %2, %4 : vector<8x1024xf32>
    %cst_5 = arith.constant 0.000000e+00 : f32
    %6 = vector.broadcast %cst_5 : f32 to vector<8x1024xf32>
    %7 = arith.maximumf %5, %6 : vector<8x1024xf32>
    %8 = arith.truncf %7 : vector<8x1024xf32> to vector<8x1024xbf16>
    %c0_6 = arith.constant 0 : index
    %c0_7 = arith.constant 0 : index
    %9 = vector.load %arg4[%c0_6, %c0_7] : memref<1024x1024xbf16, #tpu.memory_space<vmem>>, vector<1024x1024xbf16>
    %cst_8 = arith.constant dense<0.000000e+00> : vector<8x1024xf32>
    %10 = tpu.matmul %8, %9, %cst_8 {dimension_numbers = #tpu.dot_dimension_numbers<[1], [0], [0], [1], [0, 0, 1, 1], [], []>} : vector<8x1024xbf16>, vector<1024x1024xbf16>, vector<8x1024xf32> -> vector<8x1024xf32>
    %c0_9 = arith.constant 0 : index
    %c0_10 = arith.constant 0 : index
    %11 = vector.load %arg5[%c0_9, %c0_10] : memref<1x1024xf32, #tpu.memory_space<vmem>>, vector<1x1024xf32>
    %12 = vector.broadcast %11 : vector<1x1024xf32> to vector<8x1024xf32>
    %13 = arith.addf %10, %12 : vector<8x1024xf32>
    %cst_11 = arith.constant 0.000000e+00 : f32
    %14 = vector.broadcast %cst_11 : f32 to vector<8x1024xf32>
    %15 = arith.maximumf %13, %14 : vector<8x1024xf32>
    %c0_12 = arith.constant 0 : index
    %c0_13 = arith.constant 0 : index
    %16 = vector.load %arg6[%c0_12, %c0_13] : memref<8x1024xf32, #tpu.memory_space<vmem>>, vector<8x1024xf32>
    tpu.vector_store %arg6[%c0_12, %c0_13], %15 {strides = array<i32>} : memref<8x1024xf32, #tpu.memory_space<vmem>>, vector<8x1024xf32>,
    return
  }
  func.func @transform_0(%arg0: i32) -> (i32, i32) {
    %c0_i32 = arith.constant 0 : i32
    %c0_i32_0 = arith.constant 0 : i32
    return %arg0, %c0_i32 : i32, i32
  }
  func.func @transform_1(%arg0: i32) -> (i32, i32) {
    %c0_i32 = arith.constant 0 : i32
    %c0_i32_0 = arith.constant 0 : i32
    %c0_i32_1 = arith.constant 0 : i32
    return %c0_i32, %c0_i32_0 : i32, i32
  }
  func.func @transform_2(%arg0: i32) -> (i32, i32) {
    %c0_i32 = arith.constant 0 : i32
    %c0_i32_0 = arith.constant 0 : i32
    %c0_i32_1 = arith.constant 0 : i32
    return %c0_i32, %c0_i32_0 : i32, i32
  }
  func.func @transform_3(%arg0: i32) -> (i32, i32) {
    %c0_i32 = arith.constant 0 : i32
    %c0_i32_0 = arith.constant 0 : i32
    %c0_i32_1 = arith.constant 0 : i32
    return %c0_i32, %c0_i32_0 : i32, i32
  }
  func.func @transform_4(%arg0: i32) -> (i32, i32) {
    %c0_i32 = arith.constant 0 : i32
    %c0_i32_0 = arith.constant 0 : i32
    %c0_i32_1 = arith.constant 0 : i32
    return %c0_i32, %c0_i32_0 : i32, i32
  }
  func.func @transform_5(%arg0: i32) -> (i32, i32) {
    %c0_i32 = arith.constant 0 : i32
    %c0_i32_0 = arith.constant 0 : i32
    return %arg0, %c0_i32 : i32, i32
  }
}

module attributes {stable_mosaic.version = 11 : i64} {
  func.func @_mlp_kernel(%arg0: i32, %arg1: memref<8x128xbf16, #tpu.memory_space<vmem>>, %arg2: memref<128x1024xbf16, #tpu.memory_space<vmem>>, %arg3: memref<1x1024xf32, #tpu.memory_space<vmem>>, %arg4: memref<1024x1024xbf16, #tpu.memory_space<vmem>>, %arg5: memref<1x1024xf32, #tpu.memory_space<vmem>>, %arg6: memref<8x1024xf32, #tpu.memory_space<vmem>>) attributes {dimension_semantics = [#tpu.dimension_semantics<parallel>], iteration_bounds = array<i64: 1>, scalar_prefetch = 0 : i64, scratch_operands = 0 : i64, tpu.core_type = #tpu.core_type<tc>, window_params = [{transform_indices = @transform_0, window_bounds = array<i64: 8, 128>}, {pipeline_mode = #tpu.pipeline_mode<synchronous>, transform_indices = @transform_1, window_bounds = array<i64: 128, 1024>}, {pipeline_mode = #tpu.pipeline_mode<synchronous>, transform_indices = @transform_2, window_bounds = array<i64: 1, 1024>}, {pipeline_mode = #tpu.pipeline_mode<synchronous>, transform_indices = @transform_3, window_bounds = array<i64: 1024, 1024>}, {pipeline_mode = #tpu.pipeline_mode<synchronous>, transform_indices = @transform_4, window_bounds = array<i64: 1, 1024>}, {transform_indices = @transform_5, window_bounds = array<i64: 8, 1024>}]} {
    %c0 = arith.constant 0 : index
    %c0_0 = arith.constant 0 : index
    %0 = vector.load %arg1[%c0, %c0_0] : memref<8x128xbf16, #tpu.memory_space<vmem>>, vector<8x128xbf16>
    %c0_1 = arith.constant 0 : index
    %c0_2 = arith.constant 0 : index
    %1 = vector.load %arg2[%c0_1, %c0_2] : memref<128x1024xbf16, #tpu.memory_space<vmem>>, vector<128x1024xbf16>
    %cst = arith.constant dense<0.000000e+00> : vector<8x1024xf32>
    %2 = tpu.matmul %0, %1, %cst {dimension_numbers = #tpu.dot_dimension_numbers<[1], [0], [0], [1], [0, 0, 1, 1], [], []>} : vector<8x128xbf16>, vector<128x1024xbf16>, vector<8x1024xf32> -> vector<8x1024xf32>
    %c0_3 = arith.constant 0 : index
    %c0_4 = arith.constant 0 : index
    %3 = vector.load %arg3[%c0_3, %c0_4] : memref<1x1024xf32, #tpu.memory_space<vmem>>, vector<1x1024xf32>
    %4 = vector.broadcast %3 : vector<1x1024xf32> to vector<8x1024xf32>
    %5 = arith.addf %2, %4 : vector<8x1024xf32>
    %cst_5 = arith.constant 0.000000e+00 : f32
    %6 = vector.broadcast %cst_5 : f32 to vector<8x1024xf32>
    %7 = arith.maximumf %5, %6 : vector<8x1024xf32>
    %8 = arith.truncf %7 : vector<8x1024xf32> to vector<8x1024xbf16>
    %c0_6 = arith.constant 0 : index
    %c0_7 = arith.constant 0 : index
    %9 = vector.load %arg4[%c0_6, %c0_7] : memref<1024x1024xbf16, #tpu.memory_space<vmem>>, vector<1024x1024xbf16>
    %cst_8 = arith.constant dense<0.000000e+00> : vector<8x1024xf32>
    %10 = tpu.matmul %8, %9, %cst_8 {dimension_numbers = #tpu.dot_dimension_numbers<[1], [0], [0], [1], [0, 0, 1, 1], [], []>} : vector<8x1024xbf16>, vector<1024x1024xbf16>, vector<8x1024xf32> -> vector<8x1024xf32>
    %c0_9 = arith.constant 0 : index
    %c0_10 = arith.constant 0 : index
    %11 = vector.load %arg5[%c0_9, %c0_10] : memref<1x1024xf32, #tpu.memory_space<vmem>>, vector<1x1024xf32>
    %12 = vector.broadcast %11 : vector<1x1024xf32> to vector<8x1024xf32>
    %13 = arith.addf %10, %12 : vector<8x1024xf32>
    %cst_11 = arith.constant 0.000000e+00 : f32
    %14 = vector.broadcast %cst_11 : f32 to vector<8x1024xf32>
    %15 = arith.maximumf %13, %14 : vector<8x1024xf32>
    %c0_12 = arith.constant 0 : index
    %c0_13 = arith.constant 0 : index
    %16 = vector.load %arg6[%c0_12, %c0_13] : memref<8x1024xf32, #tpu.memory_space<vmem>>, vector<8x1024xf32>
    tpu.vector_store %arg6[%c0_12, %c0_13], %15 {strides = array<i32>} : memref<8x1024xf32, #tpu.memory_space<vmem>>, vector<8x1024xf32>,
    return
  }
  func.func @transform_0(%arg0: i32) -> (i32, i32) {
    %c0_i32 = arith.constant 0 : i32
    %c0_i32_0 = arith.constant 0 : i32
    return %arg0, %c0_i32 : i32, i32
  }
  func.func @transform_1(%arg0: i32) -> (i32, i32) {
    %c0_i32 = arith.constant 0 : i32
    %c0_i32_0 = arith.constant 0 : i32
    %c0_i32_1 = arith.constant 0 : i32
    return %c0_i32, %c0_i32_0 : i32, i32
  }
  func.func @transform_2(%arg0: i32) -> (i32, i32) {
    %c0_i32 = arith.constant 0 : i32
    %c0_i32_0 = arith.constant 0 : i32
    %c0_i32_1 = arith.constant 0 : i32
    return %c0_i32, %c0_i32_0 : i32, i32
  }
  func.func @transform_3(%arg0: i32) -> (i32, i32) {
    %c0_i32 = arith.constant 0 : i32
    %c0_i32_0 = arith.constant 0 : i32
    %c0_i32_1 = arith.constant 0 : i32
    return %c0_i32, %c0_i32_0 : i32, i32
  }
  func.func @transform_4(%arg0: i32) -> (i32, i32) {
    %c0_i32 = arith.constant 0 : i32
    %c0_i32_0 = arith.constant 0 : i32
    %c0_i32_1 = arith.constant 0 : i32
    return %c0_i32, %c0_i32_0 : i32, i32
  }
  func.func @transform_5(%arg0: i32) -> (i32, i32) {
    %c0_i32 = arith.constant 0 : i32
    %c0_i32_0 = arith.constant 0 : i32
    return %arg0, %c0_i32 : i32, i32
  }
}

</mosaic_0001>

<bundles_post_ra>
// kernel: tpu_custom_call.1
= control target key start
LH: loop header
LB: loop body
LE: loop exit
PB: predicated region body
PF: predicated region fallthrough
CT: control target
= control target key end

     0   :  { %10 = vsyncpa [#allocation3], 0  ;;  %s7842_s0 = inlined_call_operand.hbm [shape: bf16[8,128], index: 0, kind: input, shape index: {}]   ;;  %s7843_s1 = inlined_call_operand.hbm [shape: bf16[128,1024], index: 1, kind: input, shape index: {}]   ;;  %s7844_s2 = inlined_call_operand.hbm [shape: f32[1,1024], index: 2, kind: input, shape index: {}]   ;;  %s7845_s3 = inlined_call_operand.hbm [shape: bf16[1024,1024], index: 3, kind: input, shape index: {}]   ;;  %s7846_s4 = inlined_call_operand.hbm [shape: f32[1,1024], index: 4, kind: input, shape index: {}]   ;;  %s7847_s5 = inlined_call_operand.hbm [shape: f32[8,1024], index: 5, kind: output, shape index: {}]  }
   0x1   :  { %11 = vsyncpa [#allocation6], 0 }
   0x2   :  { %12 = vsyncpa [#allocation9], 0  ;;  %s29_s20 = sshll.u32 %s7843_s1, 4  ;;  %s30_s20 = int_to_ptr.hbm [resolvable:$true] %s29_s20 }
   0x3   :  { %13 = vsyncpa [#allocation4], 0  ;;  %s7615_s21 = smov [#allocation5]   ;;  %s53_s25 = sshll.u32 %s7845_s3, 4  ;;  %s54_s25 = int_to_ptr.hbm [resolvable:$true] %s53_s25 }
   0x4   :  { %s31_s22 = sshll.u32 %s7615_s21, 4  ;;  %s7616_s26 = smov 512   ;;  %s32_s22 = int_to_ptr.vmem [resolvable:$true] %s31_s22 }
   0x5   :  { %s7617_s27 = smov 32   ;;  %s7618_s28 = smov [#allocation8]  }
   0x6   :  { %37 = dma.hbm_to_vmem [thread:$0]  %s30_s20, 8192, %s32_s22, [#allocation6], %s7616_s26, %s7616_s26, %s7617_s27  }
   0x7   :  { %s55_s29 = sshll.u32 %s7618_s28, 4  ;;  %s19_s7 = sshll.u32 %s7842_s0, 4  ;;  %s56_s29 = int_to_ptr.vmem [resolvable:$true] %s55_s29  ;;  %s20_s7 = int_to_ptr.hbm [resolvable:$true] %s19_s7 }
   0x8   :  { %61 = dma.hbm_to_vmem [thread:$0]  %s54_s25, 65536, %s56_s29, [#allocation9], %s7616_s26, %s7616_s26, %s7617_s27  }
   0x9   :  { %s43_s9 = sshll.u32 %s7844_s2, 4  ;;  %s7619_s10 = smov [#allocation2]   ;;  %s44_s9 = int_to_ptr.hbm [resolvable:$true] %s43_s9 }
   0xa   :  { %s21_s11 = sshll.u32 %s7619_s10, 4  ;;  %s7620_s3 = smov [#allocation7]   ;;  %s22_s11 = int_to_ptr.vmem [resolvable:$true] %s21_s11 }
   0xb   :  { %24 = dma.hbm_to_vmem [thread:$0]  %s20_s7, 64, %s22_s11, [#allocation3]  }
   0xc   :  { %s45_s12 = sshll.u32 %s7620_s3, 4  ;;  %s67_s15 = sshll.u32 %s7846_s4, 4  ;;  %s46_s12 = int_to_ptr.vmem [resolvable:$true] %s45_s12  ;;  %s68_s15 = int_to_ptr.hbm [resolvable:$true] %s67_s15 }
   0xd   :  { %48 = dma.hbm_to_vmem [thread:$0]  %s44_s9, 128, %s46_s12, [#allocation6]  }
   0xe   :  { %s7621_s0 = smov [#allocation10]  }
   0xf   :  { %s69_s16 = sshll.u32 %s7621_s0, 4  ;;  %s70_s16 = int_to_ptr.vmem [resolvable:$true] %s69_s16 }
  0x10   :  { %72 = dma.hbm_to_vmem [thread:$0]  %s68_s15, 128, %s70_s16, [#allocation9]  }
  0x11   :  { %7607 = dma.done.wait [#allocation3], 64  }
  0x12   :  { %7608 = vsyncadd [#allocation3], 4294967232 }
  0x13   :  { %7609 = dma.done.wait [#allocation6], 8320  }
  0x14   :  { %7610 = vsyncadd [#allocation6], 4294958976 }
  0x15   :  { %7611 = dma.done.wait [#allocation9], 65664  }
  0x16   :  { %7612 = vsyncadd [#allocation9], 4294901632  ;;  %v4799_v0 = vld [vmem:[#allocation5 + $0x1c0] sm:$0xf]  ;;  %v6933_v2 = vld [vmem:[#allocation5 + $0x1c4] sm:$0xf] }
  0x17   :  { %v6937_v1 = vld [vmem:[#allocation5 + $0x1dc] sm:$0xf0]  ;;  %v4801_v4 = vld [vmem:[#allocation5 + $0x1e0] sm:$0xf0]  ;;  %v4807_v5 = vld [vmem:[#allocation5 + $0x1c8] sm:$0xf] }
  0x18   :  { %v4800_v3 = vor.u32 %v6937_v1, %v4799_v0  ;;  %v6938_v6 = vld [vmem:[#allocation5 + $0x1e4] sm:$0xf0]  ;;  %v4804_v7 = vor.u32 %v6933_v2, %v4801_v4  ;;  %v6934_v9 = vld [vmem:[#allocation5 + $0x1cc] sm:$0xf]  ;;  %v4767_v11 = vld [vmem:[#allocation5 + $0x180] sm:$0xf] }
  0x19   :  { %v4808_v8 = vor.u32 %v6938_v6, %v4807_v5  ;;  %v4809_v10 = vld [vmem:[#allocation5 + $0x1e8] sm:$0xf0]  ;;  %v6929_v13 = vld [vmem:[#allocation5 + $0x19c] sm:$0xf0]  ;;  %v6925_v14 = vld [vmem:[#allocation5 + $0x184] sm:$0xf] }
  0x1a   :  { %496 = vmatpush.bf16.msra.mxu0 %v4800_v3  ;;  %v4812_v12 = vor.u32 %v6934_v9, %v4809_v10  ;;  %v4769_v15 = vld [vmem:[#allocation5 + $0x1a0] sm:$0xf0]  ;;  %509 = vmatpush.bf16.msra.mxu1 %v4804_v7  ;;  %v4768_v16 = vor.u32 %v6929_v13, %v4767_v11  ;;  %v4775_v18 = vld [vmem:[#allocation5 + $0x188] sm:$0xf]  ;;  %v6926_v20 = vld [vmem:[#allocation5 + $0x18c] sm:$0xf] }
  0x1b   :  { %522 = vmatpush.bf16.msra.mxu2 %v4808_v8  ;;  %v4772_v17 = vor.u32 %v6925_v14, %v4769_v15  ;;  %v6930_v19 = vld [vmem:[#allocation5 + $0x1a4] sm:$0xf0]  ;;  %v4777_v22 = vld [vmem:[#allocation5 + $0x1a8] sm:$0xf0]  ;;  %v4735_v23 = vld [vmem:[#allocation5 + $0x140] sm:$0xf] }
  0x1c   :  { %535 = vmatpush.bf16.msra.mxu3 %v4812_v12  ;;  %v4776_v21 = vor.u32 %v6930_v19, %v4775_v18  ;;  %v6921_v24 = vld [vmem:[#allocation5 + $0x15c] sm:$0xf0]  ;;  %v4780_v25 = vor.u32 %v6926_v20, %v4777_v22  ;;  %v6917_v26 = vld [vmem:[#allocation5 + $0x144] sm:$0xf]  ;;  %v4743_v28 = vld [vmem:[#allocation5 + $0x148] sm:$0xf] }
  0x1d   :  { %v4737_v27 = vld [vmem:[#allocation5 + $0x160] sm:$0xf0]  ;;  %v4736_v29 = vor.u32 %v6921_v24, %v4735_v23  ;;  %v6922_v30 = vld [vmem:[#allocation5 + $0x164] sm:$0xf0]  ;;  %v6918_v31 = vld [vmem:[#allocation5 + $0x14c] sm:$0xf] }
  0x1e   :  { %497 = vmatpush.bf16.msra.mxu0 %v4768_v16  ;;  %v4745_v32 = vld [vmem:[#allocation5 + $0x168] sm:$0xf0]  ;;  %510 = vmatpush.bf16.msra.mxu1 %v4772_v17  ;;  %v4740_v33 = vor.u32 %v6917_v26, %v4737_v27  ;;  %v4744_v34 = vor.u32 %v6922_v30, %v4743_v28  ;;  %v4703_v35 = vld [vmem:[#allocation5 + $0x100] sm:$0xf]  ;;  %v6909_v37 = vld [vmem:[#allocation5 + $0x104] sm:$0xf] }
  0x1f   :  { %523 = vmatpush.bf16.msra.mxu2 %v4776_v21  ;;  %v6913_v36 = vld [vmem:[#allocation5 + $0x11c] sm:$0xf0]  ;;  %v4748_v38 = vor.u32 %v6918_v31, %v4745_v32  ;;  %v4705_v39 = vld [vmem:[#allocation5 + $0x120] sm:$0xf0]  ;;  %v4711_v40 = vld [vmem:[#allocation5 + $0x108] sm:$0xf] }
  0x20   :  { %536 = vmatpush.bf16.msra.mxu3 %v4780_v25  ;;  %v6914_v41 = vld [vmem:[#allocation5 + $0x124] sm:$0xf0]  ;;  %v6910_v42 = vld [vmem:[#allocation5 + $0x10c] sm:$0xf]  ;;  %v4704_v44 = vor.u32 %v6913_v36, %v4703_v35  ;;  %v4708_v45 = vor.u32 %v6909_v37, %v4705_v39  ;;  %v4671_v47 = vld [vmem:[#allocation5 + $0xc0] sm:$0xf] }
  0x21   :  { %v4713_v43 = vld [vmem:[#allocation5 + $0x128] sm:$0xf0]  ;;  %v4712_v46 = vor.u32 %v6914_v41, %v4711_v40  ;;  %v6905_v48 = vld [vmem:[#allocation5 + $0xdc] sm:$0xf0]  ;;  %v6901_v49 = vld [vmem:[#allocation5 + $0xc4] sm:$0xf] }
  0x22   :  { %498 = vmatpush.bf16.msra.mxu0 %v4736_v29  ;;  %511 = vmatpush.bf16.msra.mxu1 %v4740_v33  ;;  %v4716_v50 = vor.u32 %v6910_v42, %v4713_v43  ;;  %v4673_v51 = vld [vmem:[#allocation5 + $0xe0] sm:$0xf0]  ;;  %v4679_v52 = vld [vmem:[#allocation5 + $0xc8] sm:$0xf]  ;;  %v6902_v54 = vld [vmem:[#allocation5 + $0xcc] sm:$0xf]  ;;  %v4672_v56 = vor.u32 %v6905_v48, %v4671_v47 }
  0x23   :  { %524 = vmatpush.bf16.msra.mxu2 %v4744_v34  ;;  %v6906_v53 = vld [vmem:[#allocation5 + $0xe4] sm:$0xf0]  ;;  %v4681_v55 = vld [vmem:[#allocation5 + $0xe8] sm:$0xf0]  ;;  %v4676_v57 = vor.u32 %v6901_v49, %v4673_v51  ;;  %v4639_v59 = vld [vmem:[#allocation5 + $0x80] sm:$0xf] }
  0x24   :  { %537 = vmatpush.bf16.msra.mxu3 %v4748_v38  ;;  %v4680_v58 = vor.u32 %v6906_v53, %v4679_v52  ;;  %v6897_v60 = vld [vmem:[#allocation5 + $0x9c] sm:$0xf0]  ;;  %v6893_v61 = vld [vmem:[#allocation5 + $0x84] sm:$0xf]  ;;  %v4684_v62 = vor.u32 %v6902_v54, %v4681_v55  ;;  %v4647_v0 = vld [vmem:[#allocation5 + $0x88] sm:$0xf] }
  0x25   :  { %v4641_v63 = vld [vmem:[#allocation5 + $0xa0] sm:$0xf0]  ;;  %v6898_v1 = vld [vmem:[#allocation5 + $0xa4] sm:$0xf0]  ;;  %v6894_v2 = vld [vmem:[#allocation5 + $0x8c] sm:$0xf]  ;;  %v4640_v4 = vor.u32 %v6897_v60, %v4639_v59 }
  0x26   :  { %499 = vmatpush.bf16.msra.mxu0 %v4704_v44  ;;  %512 = vmatpush.bf16.msra.mxu1 %v4708_v45  ;;  %v4649_v3 = vld [vmem:[#allocation5 + $0xa8] sm:$0xf0]  ;;  %v4644_v5 = vor.u32 %v6893_v61, %v4641_v63  ;;  %v4648_v6 = vor.u32 %v6898_v1, %v4647_v0  ;;  %v4607_v7 = vld [vmem:[#allocation5 + $0x40] sm:$0xf]  ;;  %v6885_v9 = vld [vmem:[#allocation5 + $0x44] sm:$0xf] }
  0x27   :  { %525 = vmatpush.bf16.msra.mxu2 %v4712_v46  ;;  %v6889_v8 = vld [vmem:[#allocation5 + $0x5c] sm:$0xf0]  ;;  %v4652_v10 = vor.u32 %v6894_v2, %v4649_v3  ;;  %v4609_v11 = vld [vmem:[#allocation5 + $0x60] sm:$0xf0]  ;;  %v4615_v12 = vld [vmem:[#allocation5 + $0x48] sm:$0xf] }
  0x28   :  { %538 = vmatpush.bf16.msra.mxu3 %v4716_v50  ;;  %v6890_v13 = vld [vmem:[#allocation5 + $0x64] sm:$0xf0]  ;;  %v6886_v14 = vld [vmem:[#allocation5 + $0x4c] sm:$0xf]  ;;  %v4608_v16 = vor.u32 %v6889_v8, %v4607_v7  ;;  %v4575_v17 = vld [vmem:[#allocation5] sm:$0xf]  ;;  %v4612_v19 = vor.u32 %v6885_v9, %v4609_v11 }
  0x29   :  { %v4617_v15 = vld [vmem:[#allocation5 + $0x68] sm:$0xf0]  ;;  %v6881_v18 = vld [vmem:[#allocation5 + $0x1c] sm:$0xf0]  ;;  %v4616_v20 = vor.u32 %v6890_v13, %v4615_v12  ;;  %v6877_v21 = vld [vmem:[#allocation5 + $0x4] sm:$0xf] }
  0x2a   :  { %500 = vmatpush.bf16.msra.mxu0 %v4672_v56  ;;  %513 = vmatpush.bf16.msra.mxu1 %v4676_v57  ;;  %v4577_v22 = vld [vmem:[#allocation5 + $0x20] sm:$0xf0]  ;;  %v4583_v23 = vld [vmem:[#allocation5 + $0x8] sm:$0xf]  ;;  %v4620_v24 = vor.u32 %v6886_v14, %v4617_v15  ;;  %v6878_v26 = vld [vmem:[#allocation5 + $0xc] sm:$0xf]  ;;  %v4576_v31 = vor.u32 %v6881_v18, %v4575_v17 }
  0x2b   :  { %526 = vmatpush.bf16.msra.mxu2 %v4680_v58  ;;  %v6882_v25 = vld [vmem:[#allocation5 + $0x24] sm:$0xf0]  ;;  %v4585_v27 = vld [vmem:[#allocation5 + $0x28] sm:$0xf0]  ;;  %v4815_v28 = vld [vmem:[#allocation5 + $0x1d0] sm:$0xf]  ;;  %v4580_v35 = vor.u32 %v6877_v21, %v4577_v22 }
  0x2c   :  { %539 = vmatpush.bf16.msra.mxu3 %v4684_v62  ;;  %v6939_v29 = vld [vmem:[#allocation5 + $0x1ec] sm:$0xf0]  ;;  %v6935_v30 = vld [vmem:[#allocation5 + $0x1d4] sm:$0xf]  ;;  %v4823_v33 = vld [vmem:[#allocation5 + $0x1d8] sm:$0xf]  ;;  %v4584_v36 = vor.u32 %v6882_v25, %v4583_v23  ;;  %v4588_v39 = vor.u32 %v6878_v26, %v4585_v27 }
  0x2d   :  { %v4817_v32 = vld [vmem:[#allocation5 + $0x1f0] sm:$0xf0]  ;;  %v6940_v34 = vld [vmem:[#allocation5 + $0x1f4] sm:$0xf0]  ;;  %v6936_v37 = vld [vmem:[#allocation5 + $0x1dc] sm:$0xf]  ;;  %v4816_v40 = vor.u32 %v6939_v29, %v4815_v28 }
  0x2e   :  { %501 = vmatpush.bf16.msra.mxu0 %v4640_v4  ;;  %514 = vmatpush.bf16.msra.mxu1 %v4644_v5  ;;  %v4825_v38 = vld [vmem:[#allocation5 + $0x1f8] sm:$0xf0]  ;;  %v4820_v41 = vor.u32 %v6935_v30, %v4817_v32  ;;  %v4824_v42 = vor.u32 %v6940_v34, %v4823_v33  ;;  %v4783_v43 = vld [vmem:[#allocation5 + $0x190] sm:$0xf]  ;;  %v6927_v45 = vld [vmem:[#allocation5 + $0x194] sm:$0xf] }
  0x2f   :  { %527 = vmatpush.bf16.msra.mxu2 %v4648_v6  ;;  %v6931_v44 = vld [vmem:[#allocation5 + $0x1ac] sm:$0xf0]  ;;  %v4828_v46 = vor.u32 %v6936_v37, %v4825_v38  ;;  %v4785_v47 = vld [vmem:[#allocation5 + $0x1b0] sm:$0xf0]  ;;  %v4791_v48 = vld [vmem:[#allocation5 + $0x198] sm:$0xf] }
  0x30   :  { %540 = vmatpush.bf16.msra.mxu3 %v4652_v10  ;;  %v6932_v49 = vld [vmem:[#allocation5 + $0x1b4] sm:$0xf0]  ;;  %v7668_v50 = vld [vmem:[#allocation2] sm:$0xf]  ;;  %v4784_v53 = vor.u32 %v6931_v44, %v4783_v43  ;;  %v4788_v54 = vor.u32 %v6927_v45, %v4785_v47  ;;  %v4751_v56 = vld [vmem:[#allocation5 + $0x150] sm:$0xf] }
  0x31   :  { %v6928_v51 = vld [vmem:[#allocation5 + $0x19c] sm:$0xf]  ;;  %v4792_v55 = vor.u32 %v6932_v49, %v4791_v48  ;;  %v6923_v57 = vld [vmem:[#allocation5 + $0x16c] sm:$0xf0]  ;;  %v6919_v58 = vld [vmem:[#allocation5 + $0x154] sm:$0xf] }
  0x32   :  { %502 = vmatpush.bf16.msra.mxu0 %v4608_v16  ;;  %515 = vmatpush.bf16.msra.mxu1 %v4612_v19  ;;  %v4793_v52 = vld [vmem:[#allocation5 + $0x1b8] sm:$0xf0]  ;;  %v4753_v60 = vld [vmem:[#allocation5 + $0x170] sm:$0xf0]  ;;  %v4759_v61 = vld [vmem:[#allocation5 + $0x158] sm:$0xf]  ;;  %v4752_v1 = vor.u32 %v6923_v57, %v4751_v56 }
  0x33   :  { %528 = vmatpush.bf16.msra.mxu2 %v4616_v20  ;;  %v4796_v59 = vor.u32 %v6928_v51, %v4793_v52  ;;  %v6924_v62 = vld [vmem:[#allocation5 + $0x174] sm:$0xf0]  ;;  %v6920_v63 = vld [vmem:[#allocation5 + $0x15c] sm:$0xf]  ;;  %v4756_v2 = vor.u32 %v6919_v58, %v4753_v60  ;;  %v4719_v4 = vld [vmem:[#allocation5 + $0x110] sm:$0xf] }
  0x34   :  { %541 = vmatpush.bf16.msra.mxu3 %v4620_v24  ;;  %v4761_v0 = vld [vmem:[#allocation5 + $0x178] sm:$0xf0]  ;;  %v4760_v3 = vor.u32 %v6924_v62, %v4759_v61  ;;  %v6915_v5 = vld [vmem:[#allocation5 + $0x12c] sm:$0xf0]  ;;  %v6911_v6 = vld [vmem:[#allocation5 + $0x114] sm:$0xf] }
  0x35   :  { %v4764_v7 = vor.u32 %v6920_v63, %v4761_v0  ;;  %v4721_v8 = vld [vmem:[#allocation5 + $0x130] sm:$0xf0]  ;;  %v4727_v9 = vld [vmem:[#allocation5 + $0x118] sm:$0xf]  ;;  %v6912_v11 = vld [vmem:[#allocation5 + $0x11c] sm:$0xf]  ;;  %v4720_v13 = vor.u32 %v6915_v5, %v4719_v4 }
  0x36   :  { %503 = vmatpush.bf16.msra.mxu0 %v4576_v31  ;;  %516 = vmatpush.bf16.msra.mxu1 %v4580_v35  ;;  %v6916_v10 = vld [vmem:[#allocation5 + $0x134] sm:$0xf0]  ;;  %v4729_v12 = vld [vmem:[#allocation5 + $0x138] sm:$0xf0]  ;;  %v4724_v14 = vor.u32 %v6911_v6, %v4721_v8  ;;  %v4687_v16 = vld [vmem:[#allocation5 + $0xd0] sm:$0xf] }
  0x37   :  { %529 = vmatpush.bf16.msra.mxu2 %v4584_v36  ;;  %v4728_v15 = vor.u32 %v6916_v10, %v4727_v9  ;;  %v6907_v17 = vld [vmem:[#allocation5 + $0xec] sm:$0xf0]  ;;  %v6903_v18 = vld [vmem:[#allocation5 + $0xd4] sm:$0xf]  ;;  %v4732_v19 = vor.u32 %v6912_v11, %v4729_v12  ;;  %v4695_v21 = vld [vmem:[#allocation5 + $0xd8] sm:$0xf] }
  0x38   :  { %542 = vmatpush.bf16.msra.mxu3 %v4588_v39  ;;  %v4689_v20 = vld [vmem:[#allocation5 + $0xf0] sm:$0xf0]  ;;  %v6908_v22 = vld [vmem:[#allocation5 + $0xf4] sm:$0xf0]  ;;  %v6904_v23 = vld [vmem:[#allocation5 + $0xdc] sm:$0xf]  ;;  %v4688_v25 = vor.u32 %v6907_v17, %v4687_v16 }
  0x39   :  { %504 = vmatmul.bf16.vlgmr.msra.gmra.mxu0 %v7668_v50  ;;  %517 = vmatmul.bf16.vlgmr.msra.gmra.mxu1 %v7668_v50  ;;  %v4697_v24 = vld [vmem:[#allocation5 + $0xf8] sm:$0xf0]  ;;  %v4692_v26 = vor.u32 %v6903_v18, %v4689_v20  ;;  %v4696_v27 = vor.u32 %v6908_v22, %v4695_v21  ;;  %v4655_v28 = vld [vmem:[#allocation5 + $0x90] sm:$0xf]  ;;  %v6895_v30 = vld [vmem:[#allocation5 + $0x94] sm:$0xf] }
  0x3a   :  { %548 = vmatpush.bf16.msrb.mxu0 %v4816_v40  ;;  %561 = vmatpush.bf16.msrb.mxu1 %v4820_v41  ;;  %v6899_v29 = vld [vmem:[#allocation5 + $0xac] sm:$0xf0]  ;;  %v4700_v31 = vor.u32 %v6904_v23, %v4697_v24  ;;  %v4657_v32 = vld [vmem:[#allocation5 + $0xb0] sm:$0xf0]  ;;  %v4663_v33 = vld [vmem:[#allocation5 + $0x98] sm:$0xf] }
  0x3b   :  { %574 = vmatpush.bf16.msrb.mxu2 %v4824_v42  ;;  %543 = vmatmul.bf16.vlgmr.msra.gmra.mxu3 %v7668_v50  ;;  %v6900_v34 = vld [vmem:[#allocation5 + $0xb4] sm:$0xf0]  ;;  %v6896_v35 = vld [vmem:[#allocation5 + $0x9c] sm:$0xf]  ;;  %v4656_v37 = vor.u32 %v6899_v29, %v4655_v28  ;;  %v4660_v38 = vor.u32 %v6895_v30, %v4657_v32  ;;  %v4623_v40 = vld [vmem:[#allocation5 + $0x50] sm:$0xf] }
  0x3c   :  { %587 = vmatpush.bf16.msrb.mxu3 %v4828_v46  ;;  %530 = vmatmul.bf16.vlgmr.msra.gmra.mxu2 %v7668_v50  ;;  %v4665_v36 = vld [vmem:[#allocation5 + $0xb8] sm:$0xf0]  ;;  %v4664_v39 = vor.u32 %v6900_v34, %v4663_v33  ;;  %v6891_v41 = vld [vmem:[#allocation5 + $0x6c] sm:$0xf0]  ;;  %v6887_v42 = vld [vmem:[#allocation5 + $0x54] sm:$0xf] }
  0x3d   :  { %v4668_v43 = vor.u32 %v6896_v35, %v4665_v36  ;;  %v4625_v44 = vld [vmem:[#allocation5 + $0x70] sm:$0xf0]  ;;  %v4631_v45 = vld [vmem:[#allocation5 + $0x58] sm:$0xf]  ;;  %v6888_v47 = vld [vmem:[#allocation5 + $0x5c] sm:$0xf]  ;;  %v4624_v49 = vor.u32 %v6891_v41, %v4623_v40 }
  0x3e   :  { %549 = vmatpush.bf16.msrb.mxu0 %v4784_v53  ;;  %562 = vmatpush.bf16.msrb.mxu1 %v4788_v54  ;;  %v6892_v46 = vld [vmem:[#allocation5 + $0x74] sm:$0xf0]  ;;  %v4633_v48 = vld [vmem:[#allocation5 + $0x78] sm:$0xf0]  ;;  %v4591_v51 = vld [vmem:[#allocation5 + $0x10] sm:$0xf]  ;;  %v4628_v52 = vor.u32 %v6887_v42, %v4625_v44 }
  0x3f   :  { %575 = vmatpush.bf16.msrb.mxu2 %v4792_v55  ;;  %v4632_v53 = vor.u32 %v6892_v46, %v4631_v45  ;;  %v6883_v54 = vld [vmem:[#allocation5 + $0x2c] sm:$0xf0]  ;;  %v6879_v55 = vld [vmem:[#allocation5 + $0x14] sm:$0xf]  ;;  %v4636_v57 = vor.u32 %v6888_v47, %v4633_v48  ;;  %v4599_v58 = vld [vmem:[#allocation5 + $0x18] sm:$0xf] }
  0x40   :  { %588 = vmatpush.bf16.msrb.mxu3 %v4796_v59  ;;  %v4593_v56 = vld [vmem:[#allocation5 + $0x30] sm:$0xf0]  ;;  %v6884_v59 = vld [vmem:[#allocation5 + $0x34] sm:$0xf0]  ;;  %v6880_v60 = vld [vmem:[#allocation5 + $0x1c] sm:$0xf]  ;;  %v4592_v0 = vor.u32 %v6883_v54, %v4591_v51 }
  0x41   :  { %v4601_v61 = vld [vmem:[#allocation5 + $0x38] sm:$0xf0]  ;;  %v5055_v62 = vld [vmem:[#allocation8 + $0x1c0] sm:$0xf]  ;;  %v4600_v4 = vor.u32 %v6884_v59, %v4599_v58  ;;  %s7622_s2 = smov [#allocation11]   ;;  %s4561_s19 = sshll.u32 %s7847_s5, 4  ;;  %s4562_s19 = int_to_ptr.hbm [resolvable:$true] %s4561_s19 }
  0x42   :  { %550 = vmatpush.bf16.msrb.mxu0 %v4752_v1  ;;  %563 = vmatpush.bf16.msrb.mxu1 %v4756_v2  ;;  %v7001_v63 = vld [vmem:[#allocation8 + $0x1dc] sm:$0xf0]  ;;  %v4604_v5 = vor.u32 %v6880_v60, %v4601_v61  ;;  %s4559_s4 = sshll.u32 %s7622_s2, 4  ;;  %s4560_s4 = int_to_ptr.vmem [resolvable:$true] %s4559_s4 }
  0x43   :  { %576 = vmatpush.bf16.msrb.mxu2 %v4760_v3  ;;  %v5311_v1 = vld [vmem:[#allocation8 + $0x3c0] sm:$0xf]  ;;  %v4596_v3 = vor.u32 %v6879_v55, %v4593_v56  ;;  %v5056_v6 = vor.u32 %v7001_v63, %v5055_v62 }
  0x44   :  { %589 = vmatpush.bf16.msrb.mxu3 %v4764_v7  ;;  %v7065_v2 = vld [vmem:[#allocation8 + $0x3dc] sm:$0xf0] }
  0x45   :  { %v5023_v7 = vld [vmem:[#allocation8 + $0x180] sm:$0xf]  ;;  %v5312_v10 = vor.u32 %v7065_v2, %v5311_v1 }
  0x46   :  { %551 = vmatpush.bf16.msrb.mxu0 %v4720_v13  ;;  %564 = vmatpush.bf16.msrb.mxu1 %v4724_v14  ;;  %v5567_v8 = vld [vmem:[#allocation8 + $0x5c0] sm:$0xf] }
  0x47   :  { %577 = vmatpush.bf16.msrb.mxu2 %v4728_v15  ;;  %v7129_v9 = vld [vmem:[#allocation8 + $0x5dc] sm:$0xf0] }
  0x48   :  { %590 = vmatpush.bf16.msrb.mxu3 %v4732_v19  ;;  %v6993_v11 = vld [vmem:[#allocation8 + $0x19c] sm:$0xf0]  ;;  %v5568_v16 = vor.u32 %v7129_v9, %v5567_v8 }
  0x49   :  { %v5823_v12 = vld [vmem:[#allocation8 + $0x7c0] sm:$0xf]  ;;  %v5024_v17 = vor.u32 %v6993_v11, %v5023_v7 }
  0x4a   :  { %552 = vmatpush.bf16.msrb.mxu0 %v4688_v25  ;;  %565 = vmatpush.bf16.msrb.mxu1 %v4692_v26  ;;  %v7193_v13 = vld [vmem:[#allocation8 + $0x7dc] sm:$0xf0] }
  0x4b   :  { %578 = vmatpush.bf16.msrb.mxu2 %v4696_v27  ;;  %v5279_v14 = vld [vmem:[#allocation8 + $0x380] sm:$0xf]  ;;  %v5824_v18 = vor.u32 %v7193_v13, %v5823_v12 }
  0x4c   :  { %591 = vmatpush.bf16.msrb.mxu3 %v4700_v31  ;;  %v7057_v15 = vld [vmem:[#allocation8 + $0x39c] sm:$0xf0] }
  0x4d   :  { %v4991_v19 = vld [vmem:[#allocation8 + $0x140] sm:$0xf]  ;;  %v5280_v22 = vor.u32 %v7057_v15, %v5279_v14 }
  0x4e   :  { %553 = vmatpush.bf16.msrb.mxu0 %v4656_v37  ;;  %566 = vmatpush.bf16.msrb.mxu1 %v4660_v38  ;;  %v5535_v20 = vld [vmem:[#allocation8 + $0x580] sm:$0xf] }
  0x4f   :  { %579 = vmatpush.bf16.msrb.mxu2 %v4664_v39  ;;  %v7121_v21 = vld [vmem:[#allocation8 + $0x59c] sm:$0xf0] }
  0x50   :  { %592 = vmatpush.bf16.msrb.mxu3 %v4668_v43  ;;  %v6985_v23 = vld [vmem:[#allocation8 + $0x15c] sm:$0xf0]  ;;  %v5536_v28 = vor.u32 %v7121_v21, %v5535_v20 }
  0x51   :  { %v5791_v24 = vld [vmem:[#allocation8 + $0x780] sm:$0xf]  ;;  %v4992_v29 = vor.u32 %v6985_v23, %v4991_v19 }
  0x52   :  { %554 = vmatpush.bf16.msrb.mxu0 %v4624_v49  ;;  %567 = vmatpush.bf16.msrb.mxu1 %v4628_v52  ;;  %v7185_v25 = vld [vmem:[#allocation8 + $0x79c] sm:$0xf0] }
  0x53   :  { %580 = vmatpush.bf16.msrb.mxu2 %v4632_v53  ;;  %v5247_v26 = vld [vmem:[#allocation8 + $0x340] sm:$0xf]  ;;  %v5792_v30 = vor.u32 %v7185_v25, %v5791_v24 }
  0x54   :  { %593 = vmatpush.bf16.msrb.mxu3 %v4636_v57  ;;  %v7049_v27 = vld [vmem:[#allocation8 + $0x35c] sm:$0xf0] }
  0x55   :  { %v4959_v31 = vld [vmem:[#allocation8 + $0x100] sm:$0xf]  ;;  %v5248_v34 = vor.u32 %v7049_v27, %v5247_v26 }
  0x56   :  { %555 = vmatpush.bf16.msrb.mxu0 %v4592_v0  ;;  %568 = vmatpush.bf16.msrb.mxu1 %v4596_v3  ;;  %v5503_v32 = vld [vmem:[#allocation8 + $0x540] sm:$0xf] }
  0x57   :  { %581 = vmatpush.bf16.msrb.mxu2 %v4600_v4  ;;  %v7113_v33 = vld [vmem:[#allocation8 + $0x55c] sm:$0xf0] }
  0x58   :  { %594 = vmatpush.bf16.msrb.mxu3 %v4604_v5  ;;  %v6977_v35 = vld [vmem:[#allocation8 + $0x11c] sm:$0xf0]  ;;  %v5504_v40 = vor.u32 %v7113_v33, %v5503_v32 }
  0x59   :  { %556 = vmatmul.bf16.vlgmr.msrb.gmra.mxu0 %v7668_v50  ;;  %569 = vmatmul.bf16.vlgmr.msrb.gmra.mxu1 %v7668_v50  ;;  %v5759_v36 = vld [vmem:[#allocation8 + $0x740] sm:$0xf] }
  0x5a   :  { %3706 = vmatpush.bf16.msra.mxu0 %v5056_v6  ;;  %3719 = vmatpush.bf16.msra.mxu1 %v5312_v10  ;;  %v7177_v37 = vld [vmem:[#allocation8 + $0x75c] sm:$0xf0] }
  0x5b   :  { %582 = vmatmul.bf16.vlgmr.msrb.gmra.mxu2 %v7668_v50  ;;  %595 = vmatmul.bf16.vlgmr.msrb.gmra.mxu3 %v7668_v50  ;;  %v5215_v38 = vld [vmem:[#allocation8 + $0x300] sm:$0xf]  ;;  %v4960_v50 = vor.u32 %v6977_v35, %v4959_v31  ;;  %v5760_v41 = vor.u32 %v7177_v37, %v5759_v36 }
  0x5c   :  { %3732 = vmatpush.bf16.msra.mxu2 %v5568_v16  ;;  %3745 = vmatpush.bf16.msra.mxu3 %v5824_v18  ;;  %v7041_v39 = vld [vmem:[#allocation8 + $0x31c] sm:$0xf0] }
  0x5d   :  { %v4927_v42 = vld [vmem:[#allocation8 + $0xc0] sm:$0xf]  ;;  %v5216_v45 = vor.u32 %v7041_v39, %v5215_v38 }
  0x5e   :  { %3707 = vmatpush.bf16.msra.mxu0 %v5024_v17  ;;  %3720 = vmatpush.bf16.msra.mxu1 %v5280_v22  ;;  %v5471_v43 = vld [vmem:[#allocation8 + $0x500] sm:$0xf] }
  0x5f   :  { %v7105_v44 = vld [vmem:[#allocation8 + $0x51c] sm:$0xf0] }
  0x60   :  { %3733 = vmatpush.bf16.msra.mxu2 %v5536_v28  ;;  %3746 = vmatpush.bf16.msra.mxu3 %v5792_v30  ;;  %v6969_v46 = vld [vmem:[#allocation8 + $0xdc] sm:$0xf0]  ;;  %v5472_v52 = vor.u32 %v7105_v44, %v5471_v43 }
  0x61   :  { %v5727_v47 = vld [vmem:[#allocation8 + $0x700] sm:$0xf]  ;;  %v4928_v53 = vor.u32 %v6969_v46, %v4927_v42 }
  0x62   :  { %3708 = vmatpush.bf16.msra.mxu0 %v4992_v29  ;;  %3721 = vmatpush.bf16.msra.mxu1 %v5248_v34  ;;  %v7169_v48 = vld [vmem:[#allocation8 + $0x71c] sm:$0xf0] }
  0x63   :  { %v5183_v49 = vld [vmem:[#allocation8 + $0x2c0] sm:$0xf]  ;;  %v5728_v54 = vor.u32 %v7169_v48, %v5727_v47 }
  0x64   :  { %v7033_v51 = vld [vmem:[#allocation8 + $0x2dc] sm:$0xf0]  ;;  %3734 = vmatpush.bf16.msra.mxu2 %v5504_v40  ;;  %3747 = vmatpush.bf16.msra.mxu3 %v5760_v41 }
  0x65   :  { %v4895_v55 = vld [vmem:[#allocation8 + $0x80] sm:$0xf]  ;;  %v5184_v58 = vor.u32 %v7033_v51, %v5183_v49 }
  0x66   :  { %3709 = vmatpush.bf16.msra.mxu0 %v4960_v50  ;;  %v5439_v56 = vld [vmem:[#allocation8 + $0x4c0] sm:$0xf]  ;;  %3722 = vmatpush.bf16.msra.mxu1 %v5216_v45 }
  0x67   :  { %v7097_v57 = vld [vmem:[#allocation8 + $0x4dc] sm:$0xf0] }
  0x68   :  { %v6961_v59 = vld [vmem:[#allocation8 + $0x9c] sm:$0xf0]  ;;  %3735 = vmatpush.bf16.msra.mxu2 %v5472_v52  ;;  %v5440_v0 = vor.u32 %v7097_v57, %v5439_v56  ;;  %3748 = vmatpush.bf16.msra.mxu3 %v5728_v54 }
  0x69   :  { %v5695_v60 = vld [vmem:[#allocation8 + $0x6c0] sm:$0xf]  ;;  %v4896_v1 = vor.u32 %v6961_v59, %v4895_v55 }
  0x6a   :  { %v7161_v61 = vld [vmem:[#allocation8 + $0x6dc] sm:$0xf0]  ;;  %3710 = vmatpush.bf16.msra.mxu0 %v4928_v53  ;;  %3723 = vmatpush.bf16.msra.mxu1 %v5184_v58 }
  0x6b   :  { %v5151_v62 = vld [vmem:[#allocation8 + $0x280] sm:$0xf]  ;;  %v5696_v2 = vor.u32 %v7161_v61, %v5695_v60 }
  0x6c   :  { %v7025_v63 = vld [vmem:[#allocation8 + $0x29c] sm:$0xf0]  ;;  %3736 = vmatpush.bf16.msra.mxu2 %v5440_v0 }
  0x6d   :  { %v4863_v3 = vld [vmem:[#allocation8 + $0x40] sm:$0xf]  ;;  %v5152_v6 = vor.u32 %v7025_v63, %v5151_v62  ;;  %3749 = vmatpush.bf16.msra.mxu3 %v5696_v2 }
  0x6e   :  { %v5407_v4 = vld [vmem:[#allocation8 + $0x480] sm:$0xf]  ;;  %3711 = vmatpush.bf16.msra.mxu0 %v4896_v1 }
  0x6f   :  { %v7089_v5 = vld [vmem:[#allocation8 + $0x49c] sm:$0xf0]  ;;  %3724 = vmatpush.bf16.msra.mxu1 %v5152_v6 }
  0x70   :  { %v6953_v7 = vld [vmem:[#allocation8 + $0x5c] sm:$0xf0]  ;;  %v5408_v12 = vor.u32 %v7089_v5, %v5407_v4 }
  0x71   :  { %v5663_v8 = vld [vmem:[#allocation8 + $0x680] sm:$0xf]  ;;  %v4864_v14 = vor.u32 %v6953_v7, %v4863_v3 }
  0x72   :  { %v7153_v9 = vld [vmem:[#allocation8 + $0x69c] sm:$0xf0]  ;;  %3737 = vmatpush.bf16.msra.mxu2 %v5408_v12 }
  0x73   :  { %v5119_v10 = vld [vmem:[#allocation8 + $0x240] sm:$0xf]  ;;  %v5664_v15 = vor.u32 %v7153_v9, %v5663_v8  ;;  %3712 = vmatpush.bf16.msra.mxu0 %v4864_v14 }
  0x74   :  { %v7017_v11 = vld [vmem:[#allocation8 + $0x25c] sm:$0xf0] }
  0x75   :  { %v4831_v13 = vld [vmem:[#allocation8] sm:$0xf]  ;;  %v5120_v19 = vor.u32 %v7017_v11, %v5119_v10  ;;  %3750 = vmatpush.bf16.msra.mxu3 %v5664_v15 }
  0x76   :  { %v6945_v16 = vld [vmem:[#allocation8 + $0x1c] sm:$0xf0] }
  0x77   :  { %v5375_v17 = vld [vmem:[#allocation8 + $0x440] sm:$0xf]  ;;  %v4832_v29 = vor.u32 %v6945_v16, %v4831_v13  ;;  %3725 = vmatpush.bf16.msra.mxu1 %v5120_v19 }
  0x78   :  { %v7081_v18 = vld [vmem:[#allocation8 + $0x45c] sm:$0xf0] }
  0x79   :  { %v5087_v20 = vld [vmem:[#allocation8 + $0x200] sm:$0xf]  ;;  %v5376_v28 = vor.u32 %v7081_v18, %v5375_v17  ;;  %3713 = vmatpush.bf16.msra.mxu0 %v4832_v29 }
  0x7a   :  { %v5631_v21 = vld [vmem:[#allocation8 + $0x640] sm:$0xf] }
  0x7b   :  { %v7145_v22 = vld [vmem:[#allocation8 + $0x65c] sm:$0xf0]  ;;  %3738 = vmatpush.bf16.msra.mxu2 %v5376_v28 }
  0x7c   :  { %v7009_v23 = vld [vmem:[#allocation8 + $0x21c] sm:$0xf0]  ;;  %v5632_v30 = vor.u32 %v7145_v22, %v5631_v21 }
  0x7d   :  { %v6079_v24 = vld [vmem:[#allocation8 + $0x9c0] sm:$0xf]  ;;  %v5088_v35 = vor.u32 %v7009_v23, %v5087_v20 }
  0x7e   :  { %v7257_v25 = vld [vmem:[#allocation8 + $0x9dc] sm:$0xf0]  ;;  %3751 = vmatpush.bf16.msra.mxu3 %v5632_v30 }
  0x7f   :  { %v6335_v26 = vld [vmem:[#allocation8 + $0xbc0] sm:$0xf]  ;;  %v6080_v36 = vor.u32 %v7257_v25, %v6079_v24  ;;  %3726 = vmatpush.bf16.msra.mxu1 %v5088_v35 }
  0x80   :  { %v7321_v27 = vld [vmem:[#allocation8 + $0xbdc] sm:$0xf0] }
  0x81   :  { %v6047_v31 = vld [vmem:[#allocation8 + $0x980] sm:$0xf]  ;;  %v6336_v40 = vor.u32 %v7321_v27, %v6335_v26  ;;  %3758 = vmatpush.bf16.msrb.mxu0 %v6080_v36 }
  0x82   :  { %v5343_v32 = vld [vmem:[#allocation8 + $0x400] sm:$0xf] }
  0x83   :  { %v7073_v33 = vld [vmem:[#allocation8 + $0x41c] sm:$0xf0]  ;;  %3771 = vmatpush.bf16.msrb.mxu1 %v6336_v40 }
  0x84   :  { %v5599_v34 = vld [vmem:[#allocation8 + $0x600] sm:$0xf]  ;;  %v5344_v45 = vor.u32 %v7073_v33, %v5343_v32 }
  0x85   :  { %v7137_v37 = vld [vmem:[#allocation8 + $0x61c] sm:$0xf0] }
  0x86   :  { %v6591_v38 = vld [vmem:[#allocation8 + $0xdc0] sm:$0xf]  ;;  %v5600_v46 = vor.u32 %v7137_v37, %v5599_v34  ;;  %3739 = vmatpush.bf16.msra.mxu2 %v5344_v45 }
  0x87   :  { %v7385_v39 = vld [vmem:[#allocation8 + $0xddc] sm:$0xf0] }
  0x88   :  { %v7249_v50 = vld [vmem:[#allocation8 + $0x99c] sm:$0xf0]  ;;  %v6592_v47 = vor.u32 %v7385_v39, %v6591_v38  ;;  %3752 = vmatpush.bf16.msra.mxu3 %v5600_v46 }
  0x89   :  { %v6847_v41 = vld [vmem:[#allocation8 + $0xfc0] sm:$0xf]  ;;  %v6048_v48 = vor.u32 %v7249_v50, %v6047_v31 }
  0x8a   :  { %v7449_v42 = vld [vmem:[#allocation8 + $0xfdc] sm:$0xf0]  ;;  %3784 = vmatpush.bf16.msrb.mxu2 %v6592_v47 }
  0x8b   :  { %v6303_v43 = vld [vmem:[#allocation8 + $0xb80] sm:$0xf]  ;;  %v6848_v49 = vor.u32 %v7449_v42, %v6847_v41  ;;  %3759 = vmatpush.bf16.msrb.mxu0 %v6048_v48 }
  0x8c   :  { %v7313_v44 = vld [vmem:[#allocation8 + $0xb9c] sm:$0xf0] }
  0x8d   :  { %v6015_v51 = vld [vmem:[#allocation8 + $0x940] sm:$0xf]  ;;  %v6304_v54 = vor.u32 %v7313_v44, %v6303_v43  ;;  %3797 = vmatpush.bf16.msrb.mxu3 %v6848_v49 }
  0x8e   :  { %v6559_v52 = vld [vmem:[#allocation8 + $0xd80] sm:$0xf] }
  0x8f   :  { %v7377_v53 = vld [vmem:[#allocation8 + $0xd9c] sm:$0xf0]  ;;  %3772 = vmatpush.bf16.msrb.mxu1 %v6304_v54 }
  0x90   :  { %v7241_v55 = vld [vmem:[#allocation8 + $0x95c] sm:$0xf0]  ;;  %v6560_v60 = vor.u32 %v7377_v53, %v6559_v52 }
  0x91   :  { %v6815_v56 = vld [vmem:[#allocation8 + $0xf80] sm:$0xf]  ;;  %v6016_v61 = vor.u32 %v7241_v55, %v6015_v51 }
  0x92   :  { %v7441_v57 = vld [vmem:[#allocation8 + $0xf9c] sm:$0xf0]  ;;  %3785 = vmatpush.bf16.msrb.mxu2 %v6560_v60 }
  0x93   :  { %v6271_v58 = vld [vmem:[#allocation8 + $0xb40] sm:$0xf]  ;;  %v6816_v62 = vor.u32 %v7441_v57, %v6815_v56  ;;  %3760 = vmatpush.bf16.msrb.mxu0 %v6016_v61 }
  0x94   :  { %v7305_v59 = vld [vmem:[#allocation8 + $0xb5c] sm:$0xf0] }
  0x95   :  { %v5983_v63 = vld [vmem:[#allocation8 + $0x900] sm:$0xf]  ;;  %v6272_v2 = vor.u32 %v7305_v59, %v6271_v58  ;;  %3798 = vmatpush.bf16.msrb.mxu3 %v6816_v62 }
  0x96   :  { %v6527_v0 = vld [vmem:[#allocation8 + $0xd40] sm:$0xf] }
  0x97   :  { %v7369_v1 = vld [vmem:[#allocation8 + $0xd5c] sm:$0xf0]  ;;  %3773 = vmatpush.bf16.msrb.mxu1 %v6272_v2  ;;  %v7678_v2 = vld [vmem:[#allocation7] sm:$0xff] }
  0x98   :  { %v7233_v3 = vld [vmem:[#allocation8 + $0x91c] sm:$0xf0]  ;;  %v6528_v8 = vor.u32 %v7369_v1, %v6527_v0 }
  0x99   :  { %v6783_v4 = vld [vmem:[#allocation8 + $0xf40] sm:$0xf]  ;;  %v5984_v9 = vor.u32 %v7233_v3, %v5983_v63  ;;  %v160_v3 = vperm.slane %v7678_v2, 0 }
  0x9a   :  { %v7433_v5 = vld [vmem:[#allocation8 + $0xf5c] sm:$0xf0]  ;;  %3786 = vmatpush.bf16.msrb.mxu2 %v6528_v8  ;;  %v6997_v8 = vld [vmem:[#allocation8 + $0x1c4] sm:$0xf] }
  0x9b   :  { %v6239_v6 = vld [vmem:[#allocation8 + $0xb00] sm:$0xf]  ;;  %v6784_v10 = vor.u32 %v7433_v5, %v6783_v4  ;;  %3761 = vmatpush.bf16.msrb.mxu0 %v5984_v9  ;;  %v161_v4 = vperm.slane %v7678_v2, 1  ;;  %v5057_v9 = vld [vmem:[#allocation8 + $0x1e0] sm:$0xf0] }
  0x9c   :  { %v7297_v7 = vld [vmem:[#allocation8 + $0xb1c] sm:$0xf0] }
  0x9d   :  { %v5951_v11 = vld [vmem:[#allocation8 + $0x8c0] sm:$0xf]  ;;  %v6240_v14 = vor.u32 %v7297_v7, %v6239_v6  ;;  %3799 = vmatpush.bf16.msrb.mxu3 %v6784_v10 }
  0x9e   :  { %v6495_v12 = vld [vmem:[#allocation8 + $0xd00] sm:$0xf] }
  0x9f   :  { %v7361_v13 = vld [vmem:[#allocation8 + $0xd1c] sm:$0xf0]  ;;  %3774 = vmatpush.bf16.msrb.mxu1 %v6240_v14 }
  0xa0   :  { %v7225_v15 = vld [vmem:[#allocation8 + $0x8dc] sm:$0xf0]  ;;  %v6496_v20 = vor.u32 %v7361_v13, %v6495_v12  ;;  %v5313_v12 = vld [vmem:[#allocation8 + $0x3e0] sm:$0xf0] }
  0xa1   :  { %v6751_v16 = vld [vmem:[#allocation8 + $0xf00] sm:$0xf]  ;;  %v5952_v21 = vor.u32 %v7225_v15, %v5951_v11  ;;  %v7061_v11 = vld [vmem:[#allocation8 + $0x3c4] sm:$0xf]  ;;  %v162_v15 = vperm.slane %v7678_v2, 2 }
  0xa2   :  { %v7425_v17 = vld [vmem:[#allocation8 + $0xf1c] sm:$0xf0]  ;;  %3787 = vmatpush.bf16.msrb.mxu2 %v6496_v20  ;;  %v6989_v20 = vld [vmem:[#allocation8 + $0x184] sm:$0xf] }
  0xa3   :  { %v6207_v18 = vld [vmem:[#allocation8 + $0xac0] sm:$0xf]  ;;  %v6752_v22 = vor.u32 %v7425_v17, %v6751_v16  ;;  %3762 = vmatpush.bf16.msrb.mxu0 %v5952_v21  ;;  %v5060_v16 = vor.u32 %v6997_v8, %v5057_v9  ;;  %v5025_v21 = vld [vmem:[#allocation8 + $0x1a0] sm:$0xf0] }
  0xa4   :  { %v7289_v19 = vld [vmem:[#allocation8 + $0xadc] sm:$0xf0] }
  0xa5   :  { %v6208_v23 = vor.u32 %v7289_v19, %v6207_v18  ;;  %v5919_v24 = vld [vmem:[#allocation8 + $0x880] sm:$0xf]  ;;  %3800 = vmatpush.bf16.msrb.mxu3 %v6752_v22  ;;  %v163_v18 = vperm.slane %v7678_v2, 3  ;;  %v5316_v19 = vor.u32 %v7061_v11, %v5313_v12  ;;  %v7101_v11 = vld [vmem:[#allocation8 + $0x504] sm:$0xf] }
  0xa6   :  { %v7217_v25 = vld [vmem:[#allocation8 + $0x89c] sm:$0xf0]  ;;  %v5473_v12 = vld [vmem:[#allocation8 + $0x520] sm:$0xf0] }
  0xa7   :  { %v6175_v26 = vld [vmem:[#allocation8 + $0xa80] sm:$0xf]  ;;  %v5920_v28 = vor.u32 %v7217_v25, %v5919_v24  ;;  %3775 = vmatpush.bf16.msrb.mxu1 %v6208_v23  ;;  %v7053_v23 = vld [vmem:[#allocation8 + $0x384] sm:$0xf] }
  0xa8   :  { %v7281_v27 = vld [vmem:[#allocation8 + $0xa9c] sm:$0xf0]  ;;  %v5281_v24 = vld [vmem:[#allocation8 + $0x3a0] sm:$0xf0] }
  0xa9   :  { %v6176_v29 = vor.u32 %v7281_v27, %v6175_v26  ;;  %3763 = vmatpush.bf16.msrb.mxu0 %v5920_v28  ;;  %v6463_v30 = vld [vmem:[#allocation8 + $0xcc0] sm:$0xf] }
  0xaa   :  { %v7353_v31 = vld [vmem:[#allocation8 + $0xcdc] sm:$0xf0] }
  0xab   :  { %3776 = vmatpush.bf16.msrb.mxu1 %v6176_v29  ;;  %v6719_v32 = vld [vmem:[#allocation8 + $0xec0] sm:$0xf]  ;;  %v6464_v33 = vor.u32 %v7353_v31, %v6463_v30  ;;  %v5028_v29 = vor.u32 %v6989_v20, %v5025_v21  ;;  %v7125_v30 = vld [vmem:[#allocation8 + $0x5c4] sm:$0xf]  ;;  %v5476_v21 = vor.u32 %v7101_v11, %v5473_v12 }
  0xac   :  { %v7417_v34 = vld [vmem:[#allocation8 + $0xedc] sm:$0xf0]  ;;  %v5569_v31 = vld [vmem:[#allocation8 + $0x5e0] sm:$0xf0] }
  0xad   :  { %v6720_v35 = vor.u32 %v7417_v34, %v6719_v32  ;;  %v5887_v36 = vld [vmem:[#allocation8 + $0x840] sm:$0xf]  ;;  %3788 = vmatpush.bf16.msrb.mxu2 %v6464_v33  ;;  %v7189_v32 = vld [vmem:[#allocation8 + $0x7c4] sm:$0xf] }
  0xae   :  { %v7209_v37 = vld [vmem:[#allocation8 + $0x85c] sm:$0xf0]  ;;  %v5153_v20 = vld [vmem:[#allocation8 + $0x2a0] sm:$0xf0] }
  0xaf   :  { %v5888_v38 = vor.u32 %v7209_v37, %v5887_v36  ;;  %v6143_v39 = vld [vmem:[#allocation8 + $0xa40] sm:$0xf]  ;;  %3801 = vmatpush.bf16.msrb.mxu3 %v6720_v35  ;;  %v5284_v35 = vor.u32 %v7053_v23, %v5281_v24  ;;  %v5825_v36 = vld [vmem:[#allocation8 + $0x7e0] sm:$0xf0] }
  0xb0   :  { %v7273_v40 = vld [vmem:[#allocation8 + $0xa5c] sm:$0xf0]  ;;  %v6981_v37 = vld [vmem:[#allocation8 + $0x144] sm:$0xf] }
  0xb1   :  { %v6144_v50 = vor.u32 %v7273_v40, %v6143_v39  ;;  %v6431_v41 = vld [vmem:[#allocation8 + $0xc80] sm:$0xf]  ;;  %3764 = vmatpush.bf16.msrb.mxu0 %v5888_v38  ;;  %v4993_v38 = vld [vmem:[#allocation8 + $0x160] sm:$0xf0] }
  0xb2   :  { %v7345_v42 = vld [vmem:[#allocation8 + $0xc9c] sm:$0xf0]  ;;  %v7045_v40 = vld [vmem:[#allocation8 + $0x344] sm:$0xf] }
  0xb3   :  { %v6687_v43 = vld [vmem:[#allocation8 + $0xe80] sm:$0xf]  ;;  %v6432_v44 = vor.u32 %v7345_v42, %v6431_v41  ;;  %3777 = vmatpush.bf16.msrb.mxu1 %v6144_v50  ;;  %v5249_v50 = vld [vmem:[#allocation8 + $0x360] sm:$0xf0]  ;;  %v5572_v42 = vor.u32 %v7125_v30, %v5569_v31 }
  0xb4   :  { %v7409_v45 = vld [vmem:[#allocation8 + $0xe9c] sm:$0xf0]  ;;  %v6949_v30 = vld [vmem:[#allocation8 + $0x44] sm:$0xf] }
  0xb5   :  { %v6688_v46 = vor.u32 %v7409_v45, %v6687_v43  ;;  %v5855_v47 = vld [vmem:[#allocation8 + $0x800] sm:$0xf]  ;;  %3789 = vmatpush.bf16.msrb.mxu2 %v6432_v44  ;;  %v5828_v44 = vor.u32 %v7189_v32, %v5825_v36  ;;  %v4996_v45 = vor.u32 %v6981_v37, %v4993_v38  ;;  %v4865_v31 = vld [vmem:[#allocation8 + $0x60] sm:$0xf0]  ;;  %v164_v32 = vperm.slane %v7678_v2, 4 }
  0xb6   :  { %v7201_v48 = vld [vmem:[#allocation8 + $0x81c] sm:$0xf0]  ;;  %v505_v5 = vpop.f32.mrf.mxu0  ;;  %v518_v7 = vpop.f32.mrf.mxu1  ;;  %v4868_v38 = vor.u32 %v6949_v30, %v4865_v31  ;;  %v7245_v12 = vld [vmem:[#allocation8 + $0x984] sm:$0xf] }
  0xb7   :  { %v6111_v49 = vld [vmem:[#allocation8 + $0xa00] sm:$0xf]  ;;  %v5856_v51 = vor.u32 %v7201_v48, %v5855_v47  ;;  %3802 = vmatpush.bf16.msrb.mxu3 %v6688_v46  ;;  %v506_v6 = vadd.f32 %v505_v5, %v160_v3  ;;  %v519_v10 = vadd.f32 %v518_v7, %v161_v4  ;;  %v7117_v46 = vld [vmem:[#allocation8 + $0x584] sm:$0xf] }
  0xb8   :  { %v7265_v52 = vld [vmem:[#allocation8 + $0xa1c] sm:$0xf0]  ;;  %v5537_v47 = vld [vmem:[#allocation8 + $0x5a0] sm:$0xf0] }
  0xb9   :  { %v6112_v53 = vor.u32 %v7265_v52, %v6111_v49  ;;  %3765 = vmatpush.bf16.msrb.mxu0 %v5856_v51  ;;  %v6399_v54 = vld [vmem:[#allocation8 + $0xc40] sm:$0xf]  ;;  %v600_v13 = vmax.f32 %v506_v6, 0.0  ;;  %v601_v14 = vmax.f32 %v519_v10, 0.0  ;;  %v7181_v48 = vld [vmem:[#allocation8 + $0x784] sm:$0xf]  ;;  %v5252_v51 = vor.u32 %v7045_v40, %v5249_v50 }
  0xba   :  { %v7337_v55 = vld [vmem:[#allocation8 + $0xc5c] sm:$0xf0]  ;;  %v5793_v52 = vld [vmem:[#allocation8 + $0x7a0] sm:$0xf0] }
  0xbb   :  { %3778 = vmatpush.bf16.msrb.mxu1 %v6112_v53  ;;  %v6400_v56 = vor.u32 %v7337_v55, %v6399_v54  ;;  %v6655_v57 = vld [vmem:[#allocation8 + $0xe40] sm:$0xf]  ;;  %v7683_v17 = vpack.c.bf16 %v600_v13, %v600_v13  ;;  %v7686_v22 = vpack.c.bf16 %v601_v14, %v601_v14  ;;  %v6973_v53 = vld [vmem:[#allocation8 + $0x104] sm:$0xf] }
  0xbc   :  { %v7401_v58 = vld [vmem:[#allocation8 + $0xe5c] sm:$0xf0]  ;;  %v4961_v54 = vld [vmem:[#allocation8 + $0x120] sm:$0xf0] }
  0xbd   :  { %v6656_v59 = vor.u32 %v7401_v58, %v6655_v57  ;;  %3790 = vmatpush.bf16.msrb.mxu2 %v6400_v56  ;;  %v6367_v60 = vld [vmem:[#allocation8 + $0xc00] sm:$0xf]  ;;  %3714 = vmatmul.bf16.vlgmr.msra.gmra.mxu0 %v7683_v17  ;;  %v7037_v55 = vld [vmem:[#allocation8 + $0x304] sm:$0xf]  ;;  %v5540_v58 = vor.u32 %v7117_v46, %v5537_v47 }
  0xbe   :  { %v7329_v61 = vld [vmem:[#allocation8 + $0xc1c] sm:$0xf0]  ;;  %v544_v27 = vpop.f32.mrf.mxu3  ;;  %3727 = vmatmul.bf16.vlgmr.msra.gmra.mxu1 %v7686_v22  ;;  %3810 = vmatpush.bf16.msra.mxu0 %v5060_v16  ;;  %v507_v28 = vpop.f32.mrf.mxu0  ;;  %v5217_v56 = vld [vmem:[#allocation8 + $0x320] sm:$0xf0] }
  0xbf   :  { %3803 = vmatpush.bf16.msrb.mxu3 %v6656_v59  ;;  %v6368_v62 = vor.u32 %v7329_v61, %v6367_v60  ;;  %v6623_v63 = vld [vmem:[#allocation8 + $0xe00] sm:$0xf]  ;;  %v531_v25 = vpop.f32.mrf.mxu2  ;;  %v545_v33 = vadd.f32 %v544_v27, %v163_v18  ;;  %3823 = vmatpush.bf16.msra.mxu1 %v5316_v19  ;;  %v520_v34 = vpop.f32.mrf.mxu1  ;;  %v5796_v60 = vor.u32 %v7181_v48, %v5793_v52  ;;  %v5761_v3 = vld [vmem:[#allocation8 + $0x760] sm:$0xf0] }
  0xc0   :  { %v7393_v0 = vld [vmem:[#allocation8 + $0xe1c] sm:$0xf0]  ;;  %v532_v26 = vadd.f32 %v531_v25, %v162_v15  ;;  %v4964_v61 = vor.u32 %v6973_v53, %v4961_v54  ;;  %v6965_v4 = vld [vmem:[#allocation8 + $0xc4] sm:$0xf] }
  0xc1   :  { %v6624_v1 = vor.u32 %v7393_v0, %v6623_v63  ;;  %3791 = vmatpush.bf16.msrb.mxu2 %v6368_v62  ;;  %v603_v41 = vmax.f32 %v545_v33, 0.0  ;;  %v7109_v62 = vld [vmem:[#allocation8 + $0x544] sm:$0xf] }
  0xc2   :  { %v602_v39 = vmax.f32 %v532_v26, 0.0  ;;  %3811 = vmatpush.bf16.msra.mxu0 %v5028_v29  ;;  %v5505_v63 = vld [vmem:[#allocation8 + $0x560] sm:$0xf0] }
  0xc3   :  { %3804 = vmatpush.bf16.msrb.mxu3 %v6624_v1  ;;  %v7692_v49 = vpack.c.bf16 %v603_v41, %v603_v41  ;;  %3824 = vmatpush.bf16.msra.mxu1 %v5284_v35  ;;  %v7173_v0 = vld [vmem:[#allocation8 + $0x744] sm:$0xf]  ;;  %v5220_v1 = vor.u32 %v7037_v55, %v5217_v56  ;;  %v5508_v8 = vor.u32 %v7109_v62, %v5505_v63  ;;  %v165_v35 = vperm.slane %v7678_v2, 5 }
  0xc4   :  { %v7690_v43 = vpack.c.bf16 %v602_v39, %v602_v39  ;;  %v4929_v5 = vld [vmem:[#allocation8 + $0xe0] sm:$0xf0]  ;;  %v5764_v9 = vor.u32 %v7173_v0, %v5761_v3 }
  0xc5   :  { %3753 = vmatmul.bf16.vlgmr.msra.gmra.mxu3 %v7692_v49  ;;  %v7029_v6 = vld [vmem:[#allocation8 + $0x2c4] sm:$0xf]  ;;  %v4932_v10 = vor.u32 %v6965_v4, %v4929_v5 }
  0xc6   :  { %3740 = vmatmul.bf16.vlgmr.msra.gmra.mxu2 %v7690_v43  ;;  %v546_v59 = vpop.f32.mrf.mxu3  ;;  %3812 = vmatpush.bf16.msra.mxu0 %v4996_v45  ;;  %v5185_v7 = vld [vmem:[#allocation8 + $0x2e0] sm:$0xf0] }
  0xc7   :  { %3836 = vmatpush.bf16.msra.mxu2 %v5572_v42  ;;  %v533_v57 = vpop.f32.mrf.mxu2  ;;  %3849 = vmatpush.bf16.msra.mxu3 %v5828_v44  ;;  %v7165_v13 = vld [vmem:[#allocation8 + $0x704] sm:$0xf]  ;;  %v5188_v14 = vor.u32 %v7029_v6, %v5185_v7  ;;  %v167_v7 = vperm.slane %v7678_v2, 7 }
  0xc8   :  { %3825 = vmatpush.bf16.msra.mxu1 %v5252_v51  ;;  %v5729_v15 = vld [vmem:[#allocation8 + $0x720] sm:$0xf0] }
  0xc9   :  { %v6957_v16 = vld [vmem:[#allocation8 + $0x84] sm:$0xf]  ;;  %v5732_v23 = vor.u32 %v7165_v13, %v5729_v15 }
  0xca   :  { %3813 = vmatpush.bf16.msra.mxu0 %v4964_v61  ;;  %v4897_v18 = vld [vmem:[#allocation8 + $0xa0] sm:$0xf0] }
  0xcb   :  { %3837 = vmatpush.bf16.msra.mxu2 %v5540_v58  ;;  %3850 = vmatpush.bf16.msra.mxu3 %v5796_v60  ;;  %v7021_v19 = vld [vmem:[#allocation8 + $0x284] sm:$0xf]  ;;  %v4900_v24 = vor.u32 %v6957_v16, %v4897_v18 }
  0xcc   :  { %3826 = vmatpush.bf16.msra.mxu1 %v5220_v1  ;;  %v7093_v25 = vld [vmem:[#allocation8 + $0x4c4] sm:$0xf]  ;;  %v5156_v28 = vor.u32 %v7021_v19, %v5153_v20  ;;  %v166_v1 = vperm.slane %v7678_v2, 6 }
  0xcd   :  { %v5441_v26 = vld [vmem:[#allocation8 + $0x4e0] sm:$0xf0] }
  0xce   :  { %3814 = vmatpush.bf16.msra.mxu0 %v4932_v10  ;;  %v7157_v27 = vld [vmem:[#allocation8 + $0x6c4] sm:$0xf]  ;;  %v5444_v36 = vor.u32 %v7093_v25, %v5441_v26 }
  0xcf   :  { %3838 = vmatpush.bf16.msra.mxu2 %v5508_v8  ;;  %3851 = vmatpush.bf16.msra.mxu3 %v5764_v9  ;;  %v5697_v29 = vld [vmem:[#allocation8 + $0x6e0] sm:$0xf0] }
  0xd0   :  { %3827 = vmatpush.bf16.msra.mxu1 %v5188_v14  ;;  %v7013_v33 = vld [vmem:[#allocation8 + $0x244] sm:$0xf]  ;;  %v5700_v37 = vor.u32 %v7157_v27, %v5697_v29 }
  0xd1   :  { %v5121_v34 = vld [vmem:[#allocation8 + $0x260] sm:$0xf0] }
  0xd2   :  { %3815 = vmatpush.bf16.msra.mxu0 %v4900_v24  ;;  %v7085_v39 = vld [vmem:[#allocation8 + $0x484] sm:$0xf]  ;;  %v5124_v42 = vor.u32 %v7013_v33, %v5121_v34 }
  0xd3   :  { %3839 = vmatpush.bf16.msra.mxu2 %v5476_v21  ;;  %3852 = vmatpush.bf16.msra.mxu3 %v5732_v23  ;;  %v5409_v40 = vld [vmem:[#allocation8 + $0x4a0] sm:$0xf0] }
  0xd4   :  { %v7149_v50 = vld [vmem:[#allocation8 + $0x684] sm:$0xf]  ;;  %3828 = vmatpush.bf16.msra.mxu1 %v5156_v28  ;;  %v5412_v55 = vor.u32 %v7085_v39, %v5409_v40 }
  0xd5   :  { %v5665_v44 = vld [vmem:[#allocation8 + $0x6a0] sm:$0xf0] }
  0xd6   :  { %v557_v41 = vpop.f32.mrf.mxu0  ;;  %v6941_v45 = vld [vmem:[#allocation8 + $0x4] sm:$0xf]  ;;  %v570_v48 = vpop.f32.mrf.mxu1  ;;  %3816 = vmatpush.bf16.msra.mxu0 %v4868_v38  ;;  %v5668_v60 = vor.u32 %v7149_v50, %v5665_v44 }
  0xd7   :  { %v4833_v46 = vld [vmem:[#allocation8 + $0x20] sm:$0xf0]  ;;  %v558_v47 = vadd.f32 %v557_v41, %v164_v32  ;;  %v571_v54 = vadd.f32 %v570_v48, %v165_v35  ;;  %3840 = vmatpush.bf16.msra.mxu2 %v5444_v36  ;;  %3853 = vmatpush.bf16.msra.mxu3 %v5700_v37 }
  0xd8   :  { %v7005_v51 = vld [vmem:[#allocation8 + $0x204] sm:$0xf]  ;;  %v4836_v61 = vor.u32 %v6941_v45, %v4833_v46  ;;  %3829 = vmatpush.bf16.msra.mxu1 %v5124_v42 }
  0xd9   :  { %v5089_v52 = vld [vmem:[#allocation8 + $0x220] sm:$0xf0]  ;;  %v604_v59 = vmax.f32 %v558_v47, 0.0  ;;  %v605_v0 = vmax.f32 %v571_v54, 0.0 }
  0xda   :  { %v7253_v53 = vld [vmem:[#allocation8 + $0x9c4] sm:$0xf]  ;;  %v5092_v3 = vor.u32 %v7005_v51, %v5089_v52  ;;  %3817 = vmatpush.bf16.msra.mxu0 %v4836_v61 }
  0xdb   :  { %v6081_v56 = vld [vmem:[#allocation8 + $0x9e0] sm:$0xf0]  ;;  %v7699_v6 = vpack.c.bf16 %v604_v59, %v604_v59  ;;  %v7702_v9 = vpack.c.bf16 %v605_v0, %v605_v0  ;;  %3841 = vmatpush.bf16.msra.mxu2 %v5412_v55  ;;  %3854 = vmatpush.bf16.msra.mxu3 %v5668_v60 }
  0xdc   :  { %v7317_v57 = vld [vmem:[#allocation8 + $0xbc4] sm:$0xf]  ;;  %v6084_v8 = vor.u32 %v7253_v53, %v6081_v56  ;;  %3830 = vmatpush.bf16.msra.mxu1 %v5092_v3 }
  0xdd   :  { %v6337_v58 = vld [vmem:[#allocation8 + $0xbe0] sm:$0xf0]  ;;  %3766 = vmatmul.bf16.vlgmr.msrb.gmra.mxu0 %v7699_v6  ;;  %3779 = vmatmul.bf16.vlgmr.msrb.gmra.mxu1 %v7702_v9 }
  0xde   :  { %v7077_v62 = vld [vmem:[#allocation8 + $0x444] sm:$0xf]  ;;  %v6340_v10 = vor.u32 %v7317_v57, %v6337_v58  ;;  %v583_v15 = vpop.f32.mrf.mxu2  ;;  %v596_v23 = vpop.f32.mrf.mxu3  ;;  %3862 = vmatpush.bf16.msrb.mxu0 %v6084_v8 }
  0xdf   :  { %v5377_v63 = vld [vmem:[#allocation8 + $0x460] sm:$0xf0]  ;;  %v584_v21 = vadd.f32 %v583_v15, %v166_v1  ;;  %v559_v2 = vpop.f32.mrf.mxu0  ;;  %v597_v27 = vadd.f32 %v596_v23, %v167_v7  ;;  %v572_v28 = vpop.f32.mrf.mxu1 }
  0xe0   :  { %v7141_v4 = vld [vmem:[#allocation8 + $0x644] sm:$0xf]  ;;  %v5380_v11 = vor.u32 %v7077_v62, %v5377_v63  ;;  %3875 = vmatpush.bf16.msrb.mxu1 %v6340_v10 }
  0xe1   :  { %v5633_v5 = vld [vmem:[#allocation8 + $0x660] sm:$0xf0]  ;;  %v606_v33 = vmax.f32 %v584_v21, 0.0  ;;  %v607_v38 = vmax.f32 %v597_v27, 0.0 }
  0xe2   :  { %v6049_v13 = vld [vmem:[#allocation8 + $0x9a0] sm:$0xf0]  ;;  %v5636_v16 = vor.u32 %v7141_v4, %v5633_v5  ;;  %3842 = vmatpush.bf16.msra.mxu2 %v5380_v11 }
  0xe3   :  { %v7309_v14 = vld [vmem:[#allocation8 + $0xb84] sm:$0xf]  ;;  %v6052_v29 = vor.u32 %v7245_v12, %v6049_v13  ;;  %v7706_v41 = vpack.c.bf16 %v606_v33, %v606_v33  ;;  %v7708_v44 = vpack.c.bf16 %v607_v38, %v607_v38 }
  0xe4   :  { %v6305_v18 = vld [vmem:[#allocation8 + $0xba0] sm:$0xf0]  ;;  %3855 = vmatpush.bf16.msra.mxu3 %v5636_v16 }
  0xe5   :  { %v7069_v19 = vld [vmem:[#allocation8 + $0x404] sm:$0xf]  ;;  %v6308_v34 = vor.u32 %v7309_v14, %v6305_v18  ;;  %3863 = vmatpush.bf16.msrb.mxu0 %v6052_v29  ;;  %3792 = vmatmul.bf16.vlgmr.msrb.gmra.mxu2 %v7706_v41 }
  0xe6   :  { %v5345_v20 = vld [vmem:[#allocation8 + $0x420] sm:$0xf0]  ;;  %v585_v56 = vpop.f32.mrf.mxu2  ;;  %3805 = vmatmul.bf16.vlgmr.msrb.gmra.mxu3 %v7708_v44  ;;  %v598_v59 = vpop.f32.mrf.mxu3 }
  0xe7   :  { %v7133_v24 = vld [vmem:[#allocation8 + $0x604] sm:$0xf]  ;;  %v5348_v35 = vor.u32 %v7069_v19, %v5345_v20  ;;  %3876 = vmatpush.bf16.msrb.mxu1 %v6308_v34  ;;  %v7066_v56 = vld [vmem:[#allocation8 + $0x3e4] sm:$0xf0] }
  0xe8   :  { %v5601_v25 = vld [vmem:[#allocation8 + $0x620] sm:$0xf0] }
  0xe9   :  { %v7381_v26 = vld [vmem:[#allocation8 + $0xdc4] sm:$0xf]  ;;  %v5604_v39 = vor.u32 %v7133_v24, %v5601_v25  ;;  %3843 = vmatpush.bf16.msra.mxu2 %v5348_v35 }
  0xea   :  { %v6593_v30 = vld [vmem:[#allocation8 + $0xde0] sm:$0xf0] }
  0xeb   :  { %v7445_v31 = vld [vmem:[#allocation8 + $0xfc4] sm:$0xf]  ;;  %v6596_v42 = vor.u32 %v7381_v26, %v6593_v30  ;;  %3856 = vmatpush.bf16.msra.mxu3 %v5604_v39 }
  0xec   :  { %v6849_v32 = vld [vmem:[#allocation8 + $0xfe0] sm:$0xf0] }
  0xed   :  { %v7237_v36 = vld [vmem:[#allocation8 + $0x944] sm:$0xf]  ;;  %v6852_v45 = vor.u32 %v7445_v31, %v6849_v32  ;;  %3888 = vmatpush.bf16.msrb.mxu2 %v6596_v42  ;;  %3818 = vmatmul.bf16.vlgmr.msra.gmra.mxu0 %v7683_v17 }
  0xee   :  { %v6017_v37 = vld [vmem:[#allocation8 + $0x960] sm:$0xf0]  ;;  %3831 = vmatmul.bf16.vlgmr.msra.gmra.mxu1 %v7686_v22 }
  0xef   :  { %v7301_v40 = vld [vmem:[#allocation8 + $0xb44] sm:$0xf]  ;;  %v6020_v46 = vor.u32 %v7237_v36, %v6017_v37  ;;  %3901 = vmatpush.bf16.msrb.mxu3 %v6852_v45 }
  0xf0   :  { %v6273_v50 = vld [vmem:[#allocation8 + $0xb60] sm:$0xf0] }
  0xf1   :  { %v7373_v47 = vld [vmem:[#allocation8 + $0xd84] sm:$0xf]  ;;  %v6276_v52 = vor.u32 %v7301_v40, %v6273_v50  ;;  %3864 = vmatpush.bf16.msrb.mxu0 %v6020_v46 }
  0xf2   :  { %v6561_v48 = vld [vmem:[#allocation8 + $0xda0] sm:$0xf0] }
  0xf3   :  { %v7437_v51 = vld [vmem:[#allocation8 + $0xf84] sm:$0xf]  ;;  %v6564_v60 = vor.u32 %v7373_v47, %v6561_v48  ;;  %3877 = vmatpush.bf16.msrb.mxu1 %v6276_v52  ;;  %v5063_v52 = vld [vmem:[#allocation8 + $0x1c8] sm:$0xf] }
  0xf4   :  { %v6817_v53 = vld [vmem:[#allocation8 + $0xfa0] sm:$0xf0] }
  0xf5   :  { %v7229_v54 = vld [vmem:[#allocation8 + $0x904] sm:$0xf]  ;;  %v6820_v61 = vor.u32 %v7437_v51, %v6817_v53  ;;  %3889 = vmatpush.bf16.msrb.mxu2 %v6564_v60 }
  0xf6   :  { %v5985_v55 = vld [vmem:[#allocation8 + $0x920] sm:$0xf0]  ;;  %3844 = vmatmul.bf16.vlgmr.msra.gmra.mxu2 %v7690_v43  ;;  %3857 = vmatmul.bf16.vlgmr.msra.gmra.mxu3 %v7692_v49 }
  0xf7   :  { %v7293_v57 = vld [vmem:[#allocation8 + $0xb04] sm:$0xf]  ;;  %v5988_v62 = vor.u32 %v7229_v54, %v5985_v55  ;;  %3902 = vmatpush.bf16.msrb.mxu3 %v6820_v61  ;;  %v7002_v54 = vld [vmem:[#allocation8 + $0x1e4] sm:$0xf0] }
  0xf8   :  { %v6241_v58 = vld [vmem:[#allocation8 + $0xb20] sm:$0xf0]  ;;  %v5319_v55 = vld [vmem:[#allocation8 + $0x3c8] sm:$0xf] }
  0xf9   :  { %v7365_v63 = vld [vmem:[#allocation8 + $0xd44] sm:$0xf]  ;;  %v6244_v1 = vor.u32 %v7293_v57, %v6241_v58  ;;  %3865 = vmatpush.bf16.msrb.mxu0 %v5988_v62 }
  0xfa   :  { %v6529_v0 = vld [vmem:[#allocation8 + $0xd60] sm:$0xf0] }
  0xfb   :  { %v7429_v3 = vld [vmem:[#allocation8 + $0xf44] sm:$0xf]  ;;  %v6532_v11 = vor.u32 %v7365_v63, %v6529_v0  ;;  %3878 = vmatpush.bf16.msrb.mxu1 %v6244_v1  ;;  %v5064_v0 = vor.u32 %v7002_v54, %v5063_v52  ;;  %v5320_v1 = vor.u32 %v7066_v56, %v5319_v55  ;;  %v4935_v52 = vld [vmem:[#allocation8 + $0xc8] sm:$0xf] }
  0xfc   :  { %v6785_v4 = vld [vmem:[#allocation8 + $0xf60] sm:$0xf0]  ;;  %v5191_v54 = vld [vmem:[#allocation8 + $0x2c8] sm:$0xf] }
  0xfd   :  { %v7221_v5 = vld [vmem:[#allocation8 + $0x8c4] sm:$0xf]  ;;  %v6788_v12 = vor.u32 %v7429_v3, %v6785_v4  ;;  %3890 = vmatpush.bf16.msrb.mxu2 %v6532_v11  ;;  %v5031_v3 = vld [vmem:[#allocation8 + $0x188] sm:$0xf] }
  0xfe   :  { %v5953_v7 = vld [vmem:[#allocation8 + $0x8e0] sm:$0xf0]  ;;  %v7034_v55 = vld [vmem:[#allocation8 + $0x2e4] sm:$0xf0] }
  0xff   :  { %v7285_v8 = vld [vmem:[#allocation8 + $0xac4] sm:$0xf]  ;;  %v5956_v15 = vor.u32 %v7221_v5, %v5953_v7  ;;  %3903 = vmatpush.bf16.msrb.mxu3 %v6788_v12  ;;  %v6994_v5 = vld [vmem:[#allocation8 + $0x1a4] sm:$0xf0] }
 0x100   :  { %v6209_v10 = vld [vmem:[#allocation8 + $0xae0] sm:$0xf0]  ;;  %v5287_v7 = vld [vmem:[#allocation8 + $0x388] sm:$0xf] }
 0x101   :  { %v7357_v13 = vld [vmem:[#allocation8 + $0xd04] sm:$0xf]  ;;  %v6212_v16 = vor.u32 %v7285_v8, %v6209_v10  ;;  %3866 = vmatpush.bf16.msrb.mxu0 %v5956_v15  ;;  %v7058_v8 = vld [vmem:[#allocation8 + $0x3a4] sm:$0xf0] }
 0x102   :  { %v6497_v14 = vld [vmem:[#allocation8 + $0xd20] sm:$0xf0]  ;;  %v5575_v15 = vld [vmem:[#allocation8 + $0x5c8] sm:$0xf] }
 0x103   :  { %v7421_v18 = vld [vmem:[#allocation8 + $0xf04] sm:$0xf]  ;;  %v6500_v24 = vor.u32 %v7357_v13, %v6497_v14  ;;  %3879 = vmatpush.bf16.msrb.mxu1 %v6212_v16  ;;  %v7130_v16 = vld [vmem:[#allocation8 + $0x5e4] sm:$0xf0] }
 0x104   :  { %v6753_v19 = vld [vmem:[#allocation8 + $0xf20] sm:$0xf0] }
 0x105   :  { %v7213_v20 = vld [vmem:[#allocation8 + $0x884] sm:$0xf]  ;;  %v6756_v25 = vor.u32 %v7421_v18, %v6753_v19  ;;  %3891 = vmatpush.bf16.msrb.mxu2 %v6500_v24  ;;  %v5032_v18 = vor.u32 %v6994_v5, %v5031_v3  ;;  %v5288_v19 = vor.u32 %v7058_v8, %v5287_v7  ;;  %v6986_v24 = vld [vmem:[#allocation8 + $0x164] sm:$0xf0] }
 0x106   :  { %v5921_v21 = vld [vmem:[#allocation8 + $0x8a0] sm:$0xf0]  ;;  %v5159_v3 = vld [vmem:[#allocation8 + $0x288] sm:$0xf] }
 0x107   :  { %v7277_v23 = vld [vmem:[#allocation8 + $0xa84] sm:$0xf]  ;;  %v5924_v28 = vor.u32 %v7213_v20, %v5921_v21  ;;  %3904 = vmatpush.bf16.msrb.mxu3 %v6756_v25  ;;  %v5831_v20 = vld [vmem:[#allocation8 + $0x7c8] sm:$0xf] }
 0x108   :  { %v6177_v2 = vld [vmem:[#allocation8 + $0xaa0] sm:$0xf0]  ;;  %v7194_v21 = vld [vmem:[#allocation8 + $0x7e4] sm:$0xf0] }
 0x109   :  { %v7349_v26 = vld [vmem:[#allocation8 + $0xcc4] sm:$0xf]  ;;  %v6180_v29 = vor.u32 %v7277_v23, %v6177_v2  ;;  %3867 = vmatpush.bf16.msrb.mxu0 %v5924_v28  ;;  %v4999_v23 = vld [vmem:[#allocation8 + $0x148] sm:$0xf]  ;;  %v5576_v28 = vor.u32 %v7130_v16, %v5575_v15 }
 0x10a   :  { %v6465_v27 = vld [vmem:[#allocation8 + $0xce0] sm:$0xf0]  ;;  %v5255_v25 = vld [vmem:[#allocation8 + $0x348] sm:$0xf] }
 0x10b   :  { %v7413_v30 = vld [vmem:[#allocation8 + $0xec4] sm:$0xf]  ;;  %v6468_v36 = vor.u32 %v7349_v26, %v6465_v27  ;;  %3880 = vmatpush.bf16.msrb.mxu1 %v6180_v29  ;;  %v7050_v26 = vld [vmem:[#allocation8 + $0x364] sm:$0xf0]  ;;  %v5832_v29 = vor.u32 %v7194_v21, %v5831_v20 }
 0x10c   :  { %v6721_v31 = vld [vmem:[#allocation8 + $0xee0] sm:$0xf0]  ;;  %v5447_v8 = vld [vmem:[#allocation8 + $0x4c8] sm:$0xf] }
 0x10d   :  { %v7205_v32 = vld [vmem:[#allocation8 + $0x844] sm:$0xf]  ;;  %v6724_v37 = vor.u32 %v7413_v30, %v6721_v31  ;;  %3892 = vmatpush.bf16.msrb.mxu2 %v6468_v36  ;;  %v5543_v30 = vld [vmem:[#allocation8 + $0x588] sm:$0xf] }
 0x10e   :  { %v5889_v33 = vld [vmem:[#allocation8 + $0x860] sm:$0xf0]  ;;  %v7122_v31 = vld [vmem:[#allocation8 + $0x5a4] sm:$0xf0] }
 0x10f   :  { %v7269_v34 = vld [vmem:[#allocation8 + $0xa44] sm:$0xf]  ;;  %v5892_v50 = vor.u32 %v7205_v32, %v5889_v33  ;;  %3905 = vmatpush.bf16.msrb.mxu3 %v6724_v37  ;;  %v5000_v32 = vor.u32 %v6986_v24, %v4999_v23  ;;  %v5256_v33 = vor.u32 %v7050_v26, %v5255_v25  ;;  %v4967_v36 = vld [vmem:[#allocation8 + $0x108] sm:$0xf] }
 0x110   :  { %v6145_v35 = vld [vmem:[#allocation8 + $0xa60] sm:$0xf0]  ;;  %v6978_v37 = vld [vmem:[#allocation8 + $0x124] sm:$0xf0] }
 0x111   :  { %v7341_v38 = vld [vmem:[#allocation8 + $0xc84] sm:$0xf]  ;;  %v6148_v42 = vor.u32 %v7269_v34, %v6145_v35  ;;  %3868 = vmatpush.bf16.msrb.mxu0 %v5892_v50  ;;  %v5799_v34 = vld [vmem:[#allocation8 + $0x788] sm:$0xf] }
 0x112   :  { %v6433_v39 = vld [vmem:[#allocation8 + $0xca0] sm:$0xf0]  ;;  %v7186_v35 = vld [vmem:[#allocation8 + $0x7a4] sm:$0xf0] }
 0x113   :  { %v7405_v40 = vld [vmem:[#allocation8 + $0xe84] sm:$0xf]  ;;  %v6436_v53 = vor.u32 %v7341_v38, %v6433_v39  ;;  %3881 = vmatpush.bf16.msrb.mxu1 %v6148_v42  ;;  %v5223_v38 = vld [vmem:[#allocation8 + $0x308] sm:$0xf]  ;;  %v5800_v50 = vor.u32 %v7186_v35, %v5799_v34 }
 0x114   :  { %v6689_v45 = vld [vmem:[#allocation8 + $0xea0] sm:$0xf0]  ;;  %v7042_v39 = vld [vmem:[#allocation8 + $0x324] sm:$0xf0] }
 0x115   :  { %v7197_v46 = vld [vmem:[#allocation8 + $0x804] sm:$0xf]  ;;  %v6692_v57 = vor.u32 %v7405_v40, %v6689_v45  ;;  %3893 = vmatpush.bf16.msrb.mxu2 %v6436_v53  ;;  %v5544_v40 = vor.u32 %v7122_v31, %v5543_v30  ;;  %v5511_v42 = vld [vmem:[#allocation8 + $0x548] sm:$0xf] }
 0x116   :  { %v5857_v47 = vld [vmem:[#allocation8 + $0x820] sm:$0xf0]  ;;  %v7114_v45 = vld [vmem:[#allocation8 + $0x564] sm:$0xf0] }
 0x117   :  { %v7261_v48 = vld [vmem:[#allocation8 + $0xa04] sm:$0xf]  ;;  %v5860_v60 = vor.u32 %v7197_v46, %v5857_v47  ;;  %3906 = vmatpush.bf16.msrb.mxu3 %v6692_v57  ;;  %v4968_v46 = vor.u32 %v6978_v37, %v4967_v36  ;;  %v5224_v47 = vor.u32 %v7042_v39, %v5223_v38  ;;  %v6970_v53 = vld [vmem:[#allocation8 + $0xe4] sm:$0xf0]  ;;  %v5512_v56 = vor.u32 %v7114_v45, %v5511_v42 }
 0x118   :  { %v6113_v51 = vld [vmem:[#allocation8 + $0xa20] sm:$0xf0]  ;;  %v4871_v15 = vld [vmem:[#allocation8 + $0x48] sm:$0xf] }
 0x119   :  { %v7333_v58 = vld [vmem:[#allocation8 + $0xc44] sm:$0xf]  ;;  %v6116_v61 = vor.u32 %v7261_v48, %v6113_v51  ;;  %3869 = vmatpush.bf16.msrb.mxu0 %v5860_v60  ;;  %v5767_v48 = vld [vmem:[#allocation8 + $0x748] sm:$0xf]  ;;  %v4936_v60 = vor.u32 %v6970_v53, %v4935_v52 }
 0x11a   :  { %v6401_v59 = vld [vmem:[#allocation8 + $0xc60] sm:$0xf0]  ;;  %v7178_v51 = vld [vmem:[#allocation8 + $0x764] sm:$0xf0] }
 0x11b   :  { %v7397_v62 = vld [vmem:[#allocation8 + $0xe44] sm:$0xf]  ;;  %v6404_v4 = vor.u32 %v7333_v58, %v6401_v59  ;;  %3882 = vmatpush.bf16.msrb.mxu1 %v6116_v61  ;;  %v5768_v57 = vor.u32 %v7178_v51, %v5767_v48  ;;  %v5479_v58 = vld [vmem:[#allocation8 + $0x508] sm:$0xf]  ;;  %v5192_v61 = vor.u32 %v7034_v55, %v5191_v54 }
 0x11c   :  { %v6657_v63 = vld [vmem:[#allocation8 + $0xe60] sm:$0xf0]  ;;  %3870 = vmatmul.bf16.vlgmr.msrb.gmra.mxu0 %v7699_v6  ;;  %v7106_v59 = vld [vmem:[#allocation8 + $0x524] sm:$0xf0] }
 0x11d   :  { %v6660_v10 = vor.u32 %v7397_v62, %v6657_v63  ;;  %v7325_v11 = vld [vmem:[#allocation8 + $0xc04] sm:$0xf]  ;;  %3914 = vmatpush.bf16.msra.mxu0 %v5064_v0  ;;  %3894 = vmatpush.bf16.msrb.mxu2 %v6404_v4  ;;  %v5735_v62 = vld [vmem:[#allocation8 + $0x708] sm:$0xf]  ;;  %v5480_v5 = vor.u32 %v7106_v59, %v5479_v58 }
 0x11e   :  { %v6369_v12 = vld [vmem:[#allocation8 + $0xc20] sm:$0xf0]  ;;  %3883 = vmatmul.bf16.vlgmr.msrb.gmra.mxu1 %v7702_v9  ;;  %v7170_v63 = vld [vmem:[#allocation8 + $0x724] sm:$0xf0] }
 0x11f   :  { %v7389_v13 = vld [vmem:[#allocation8 + $0xe04] sm:$0xf]  ;;  %3927 = vmatpush.bf16.msra.mxu1 %v5320_v1  ;;  %v6372_v2 = vor.u32 %v7325_v11, %v6369_v12  ;;  %3907 = vmatpush.bf16.msrb.mxu3 %v6660_v10  ;;  %v4903_v0 = vld [vmem:[#allocation8 + $0x88] sm:$0xf]  ;;  %v5736_v7 = vor.u32 %v7170_v63, %v5735_v62 }
 0x120   :  { %v6625_v14 = vld [vmem:[#allocation8 + $0xe20] sm:$0xf0]  ;;  %v6962_v1 = vld [vmem:[#allocation8 + $0xa4] sm:$0xf0] }
 0x121   :  { %v6628_v27 = vor.u32 %v7389_v13, %v6625_v14  ;;  %3915 = vmatpush.bf16.msra.mxu0 %v5032_v18  ;;  %3895 = vmatpush.bf16.msrb.mxu2 %v6372_v2  ;;  %v7026_v4 = vld [vmem:[#allocation8 + $0x2a4] sm:$0xf0]  ;;  %v4904_v11 = vor.u32 %v6962_v1, %v4903_v0 }
 0x122   :  { %v7098_v10 = vld [vmem:[#allocation8 + $0x4e4] sm:$0xf0]  ;;  %v5160_v12 = vor.u32 %v7026_v4, %v5159_v3 }
 0x123   :  { %3928 = vmatpush.bf16.msra.mxu1 %v5288_v19  ;;  %3908 = vmatpush.bf16.msrb.mxu3 %v6628_v27  ;;  %v5703_v13 = vld [vmem:[#allocation8 + $0x6c8] sm:$0xf]  ;;  %v5448_v20 = vor.u32 %v7098_v10, %v5447_v8 }
 0x124   :  { %3896 = vmatmul.bf16.vlgmr.msrb.gmra.mxu2 %v7706_v41  ;;  %v7162_v14 = vld [vmem:[#allocation8 + $0x6e4] sm:$0xf0] }
 0x125   :  { %3940 = vmatpush.bf16.msra.mxu2 %v5576_v28  ;;  %3916 = vmatpush.bf16.msra.mxu0 %v5000_v32  ;;  %v6954_v16 = vld [vmem:[#allocation8 + $0x64] sm:$0xf0]  ;;  %v5704_v21 = vor.u32 %v7162_v14, %v5703_v13 }
 0x126   :  { %3909 = vmatmul.bf16.vlgmr.msrb.gmra.mxu3 %v7708_v44  ;;  %v5127_v18 = vld [vmem:[#allocation8 + $0x248] sm:$0xf]  ;;  %v4872_v25 = vor.u32 %v6954_v16, %v4871_v15 }
 0x127   :  { %3953 = vmatpush.bf16.msra.mxu3 %v5832_v29  ;;  %3929 = vmatpush.bf16.msra.mxu1 %v5256_v33  ;;  %v7018_v19 = vld [vmem:[#allocation8 + $0x264] sm:$0xf0] }
 0x128   :  { %v5415_v23 = vld [vmem:[#allocation8 + $0x488] sm:$0xf]  ;;  %v5128_v26 = vor.u32 %v7018_v19, %v5127_v18 }
 0x129   :  { %3941 = vmatpush.bf16.msra.mxu2 %v5544_v40  ;;  %3917 = vmatpush.bf16.msra.mxu0 %v4968_v46  ;;  %v7090_v2 = vld [vmem:[#allocation8 + $0x4a4] sm:$0xf0] }
 0x12a   :  { %v5671_v24 = vld [vmem:[#allocation8 + $0x688] sm:$0xf]  ;;  %v5416_v33 = vor.u32 %v7090_v2, %v5415_v23 }
 0x12b   :  { %3954 = vmatpush.bf16.msra.mxu3 %v5800_v50  ;;  %3930 = vmatpush.bf16.msra.mxu1 %v5224_v47  ;;  %v7154_v27 = vld [vmem:[#allocation8 + $0x6a4] sm:$0xf0] }
 0x12c   :  { %v4839_v28 = vld [vmem:[#allocation8 + $0x8] sm:$0xf]  ;;  %v5672_v37 = vor.u32 %v7154_v27, %v5671_v24 }
 0x12d   :  { %3942 = vmatpush.bf16.msra.mxu2 %v5512_v56  ;;  %3918 = vmatpush.bf16.msra.mxu0 %v4936_v60  ;;  %v6946_v29 = vld [vmem:[#allocation8 + $0x24] sm:$0xf0] }
 0x12e   :  { %v5095_v30 = vld [vmem:[#allocation8 + $0x208] sm:$0xf]  ;;  %v4840_v40 = vor.u32 %v6946_v29, %v4839_v28 }
 0x12f   :  { %3955 = vmatpush.bf16.msra.mxu3 %v5768_v57  ;;  %3931 = vmatpush.bf16.msra.mxu1 %v5192_v61  ;;  %v7010_v31 = vld [vmem:[#allocation8 + $0x224] sm:$0xf0] }
 0x130   :  { %v6087_v32 = vld [vmem:[#allocation8 + $0x9c8] sm:$0xf]  ;;  %v5096_v50 = vor.u32 %v7010_v31, %v5095_v30 }
 0x131   :  { %3943 = vmatpush.bf16.msra.mxu2 %v5480_v5  ;;  %3919 = vmatpush.bf16.msra.mxu0 %v4904_v11  ;;  %v7258_v34 = vld [vmem:[#allocation8 + $0x9e4] sm:$0xf0] }
 0x132   :  { %v6343_v35 = vld [vmem:[#allocation8 + $0xbc8] sm:$0xf]  ;;  %v6088_v46 = vor.u32 %v7258_v34, %v6087_v32 }
 0x133   :  { %3956 = vmatpush.bf16.msra.mxu3 %v5736_v7  ;;  %3932 = vmatpush.bf16.msra.mxu1 %v5160_v12  ;;  %v7322_v36 = vld [vmem:[#allocation8 + $0xbe4] sm:$0xf0] }
 0x134   :  { %v5383_v38 = vld [vmem:[#allocation8 + $0x448] sm:$0xf]  ;;  %v6344_v47 = vor.u32 %v7322_v36, %v6343_v35 }
 0x135   :  { %3944 = vmatpush.bf16.msra.mxu2 %v5448_v20  ;;  %v7082_v39 = vld [vmem:[#allocation8 + $0x464] sm:$0xf0]  ;;  %3920 = vmatpush.bf16.msra.mxu0 %v4872_v25 }
 0x136   :  { %v5639_v42 = vld [vmem:[#allocation8 + $0x648] sm:$0xf]  ;;  %v5384_v51 = vor.u32 %v7082_v39, %v5383_v38 }
 0x137   :  { %3957 = vmatpush.bf16.msra.mxu3 %v5704_v21  ;;  %3933 = vmatpush.bf16.msra.mxu1 %v5128_v26  ;;  %v7146_v45 = vld [vmem:[#allocation8 + $0x664] sm:$0xf0] }
 0x138   :  { %v6055_v48 = vld [vmem:[#allocation8 + $0x988] sm:$0xf]  ;;  %v5640_v55 = vor.u32 %v7146_v45, %v5639_v42 }
 0x139   :  { %3945 = vmatpush.bf16.msra.mxu2 %v5416_v33  ;;  %v7250_v52 = vld [vmem:[#allocation8 + $0x9a4] sm:$0xf0]  ;;  %3921 = vmatpush.bf16.msra.mxu0 %v4840_v40 }
 0x13a   :  { %v6311_v53 = vld [vmem:[#allocation8 + $0xb88] sm:$0xf]  ;;  %v6056_v62 = vor.u32 %v7250_v52, %v6055_v48 }
 0x13b   :  { %v7314_v54 = vld [vmem:[#allocation8 + $0xba4] sm:$0xf0]  ;;  %3958 = vmatpush.bf16.msra.mxu3 %v5672_v37  ;;  %3934 = vmatpush.bf16.msra.mxu1 %v5096_v50 }
 0x13c   :  { %v5351_v56 = vld [vmem:[#allocation8 + $0x408] sm:$0xf]  ;;  %v6312_v63 = vor.u32 %v7314_v54, %v6311_v53  ;;  %3922 = vmatmul.bf16.vlgmr.msra.gmra.mxu0 %v7683_v17 }
 0x13d   :  { %v7074_v57 = vld [vmem:[#allocation8 + $0x424] sm:$0xf0]  ;;  %3966 = vmatpush.bf16.msrb.mxu0 %v6088_v46  ;;  %3946 = vmatpush.bf16.msra.mxu2 %v5384_v51 }
 0x13e   :  { %v5607_v58 = vld [vmem:[#allocation8 + $0x608] sm:$0xf]  ;;  %v5352_v3 = vor.u32 %v7074_v57, %v5351_v56  ;;  %3935 = vmatmul.bf16.vlgmr.msra.gmra.mxu1 %v7686_v22 }
 0x13f   :  { %v7138_v59 = vld [vmem:[#allocation8 + $0x624] sm:$0xf0]  ;;  %3979 = vmatpush.bf16.msrb.mxu1 %v6344_v47  ;;  %3959 = vmatpush.bf16.msra.mxu3 %v5640_v55 }
 0x140   :  { %v6599_v60 = vld [vmem:[#allocation8 + $0xdc8] sm:$0xf]  ;;  %v5608_v7 = vor.u32 %v7138_v59, %v5607_v58 }
 0x141   :  { %v7386_v61 = vld [vmem:[#allocation8 + $0xde4] sm:$0xf0]  ;;  %3967 = vmatpush.bf16.msrb.mxu0 %v6056_v62  ;;  %3947 = vmatpush.bf16.msra.mxu2 %v5352_v3 }
 0x142   :  { %v6855_v0 = vld [vmem:[#allocation8 + $0xfc8] sm:$0xf]  ;;  %v6600_v8 = vor.u32 %v7386_v61, %v6599_v60 }
 0x143   :  { %v7450_v1 = vld [vmem:[#allocation8 + $0xfe4] sm:$0xf0]  ;;  %3980 = vmatpush.bf16.msrb.mxu1 %v6312_v63  ;;  %3960 = vmatpush.bf16.msra.mxu3 %v5608_v7 }
 0x144   :  { %v6023_v4 = vld [vmem:[#allocation8 + $0x948] sm:$0xf]  ;;  %v6856_v12 = vor.u32 %v7450_v1, %v6855_v0  ;;  %3948 = vmatmul.bf16.vlgmr.msra.gmra.mxu2 %v7690_v43 }
 0x145   :  { %v7242_v5 = vld [vmem:[#allocation8 + $0x964] sm:$0xf0]  ;;  %3992 = vmatpush.bf16.msrb.mxu2 %v6600_v8 }
 0x146   :  { %v6279_v10 = vld [vmem:[#allocation8 + $0xb48] sm:$0xf]  ;;  %v6024_v15 = vor.u32 %v7242_v5, %v6023_v4  ;;  %3961 = vmatmul.bf16.vlgmr.msra.gmra.mxu3 %v7692_v49 }
 0x147   :  { %v7306_v11 = vld [vmem:[#allocation8 + $0xb64] sm:$0xf0]  ;;  %4005 = vmatpush.bf16.msrb.mxu3 %v6856_v12 }
 0x148   :  { %v6567_v13 = vld [vmem:[#allocation8 + $0xd88] sm:$0xf]  ;;  %v6280_v19 = vor.u32 %v7306_v11, %v6279_v10  ;;  %3968 = vmatpush.bf16.msrb.mxu0 %v6024_v15 }
 0x149   :  { %v7378_v14 = vld [vmem:[#allocation8 + $0xda4] sm:$0xf0] }
 0x14a   :  { %v6823_v16 = vld [vmem:[#allocation8 + $0xf88] sm:$0xf]  ;;  %v6568_v23 = vor.u32 %v7378_v14, %v6567_v13  ;;  %3981 = vmatpush.bf16.msrb.mxu1 %v6280_v19  ;;  %v7062_v19 = vld [vmem:[#allocation8 + $0x3cc] sm:$0xf] }
 0x14b   :  { %v7442_v18 = vld [vmem:[#allocation8 + $0xfa4] sm:$0xf0] }
 0x14c   :  { %v5991_v20 = vld [vmem:[#allocation8 + $0x908] sm:$0xf]  ;;  %v6824_v25 = vor.u32 %v7442_v18, %v6823_v16  ;;  %3993 = vmatpush.bf16.msrb.mxu2 %v6568_v23  ;;  %v6998_v16 = vld [vmem:[#allocation8 + $0x1cc] sm:$0xf] }
 0x14d   :  { %v7234_v21 = vld [vmem:[#allocation8 + $0x924] sm:$0xf0]  ;;  %v5065_v18 = vld [vmem:[#allocation8 + $0x1e8] sm:$0xf0] }
 0x14e   :  { %v6247_v2 = vld [vmem:[#allocation8 + $0xb08] sm:$0xf]  ;;  %v5992_v28 = vor.u32 %v7234_v21, %v5991_v20  ;;  %4006 = vmatpush.bf16.msrb.mxu3 %v6824_v25  ;;  %v5321_v21 = vld [vmem:[#allocation8 + $0x3e8] sm:$0xf0] }
 0x14f   :  { %v7298_v24 = vld [vmem:[#allocation8 + $0xb24] sm:$0xf0] }
 0x150   :  { %v6535_v26 = vld [vmem:[#allocation8 + $0xd48] sm:$0xf]  ;;  %v6248_v31 = vor.u32 %v7298_v24, %v6247_v2  ;;  %3969 = vmatpush.bf16.msrb.mxu0 %v5992_v28  ;;  %v5068_v28 = vor.u32 %v6998_v16, %v5065_v18  ;;  %v6966_v18 = vld [vmem:[#allocation8 + $0xcc] sm:$0xf] }
 0x151   :  { %v7370_v27 = vld [vmem:[#allocation8 + $0xd64] sm:$0xf0] }
 0x152   :  { %v6791_v29 = vld [vmem:[#allocation8 + $0xf48] sm:$0xf]  ;;  %v6536_v34 = vor.u32 %v7370_v27, %v6535_v26  ;;  %3982 = vmatpush.bf16.msrb.mxu1 %v6248_v31 }
 0x153   :  { %v7434_v30 = vld [vmem:[#allocation8 + $0xf64] sm:$0xf0] }
 0x154   :  { %v5959_v32 = vld [vmem:[#allocation8 + $0x8c8] sm:$0xf]  ;;  %v6792_v37 = vor.u32 %v7434_v30, %v6791_v29  ;;  %3994 = vmatpush.bf16.msrb.mxu2 %v6536_v34  ;;  %v6990_v29 = vld [vmem:[#allocation8 + $0x18c] sm:$0xf]  ;;  %v5324_v30 = vor.u32 %v7062_v19, %v5321_v21 }
 0x155   :  { %v7226_v33 = vld [vmem:[#allocation8 + $0x8e4] sm:$0xf0]  ;;  %v5289_v34 = vld [vmem:[#allocation8 + $0x3a8] sm:$0xf0] }
 0x156   :  { %v6215_v35 = vld [vmem:[#allocation8 + $0xac8] sm:$0xf]  ;;  %v5960_v40 = vor.u32 %v7226_v33, %v5959_v32  ;;  %4007 = vmatpush.bf16.msrb.mxu3 %v6792_v37  ;;  %v5033_v32 = vld [vmem:[#allocation8 + $0x1a8] sm:$0xf0] }
 0x157   :  { %v7290_v36 = vld [vmem:[#allocation8 + $0xae4] sm:$0xf0]  ;;  %v7054_v33 = vld [vmem:[#allocation8 + $0x38c] sm:$0xf] }
 0x158   :  { %v6503_v38 = vld [vmem:[#allocation8 + $0xd08] sm:$0xf]  ;;  %v6216_v45 = vor.u32 %v7290_v36, %v6215_v35  ;;  %3970 = vmatpush.bf16.msrb.mxu0 %v5960_v40  ;;  %v7126_v40 = vld [vmem:[#allocation8 + $0x5cc] sm:$0xf] }
 0x159   :  { %v7362_v39 = vld [vmem:[#allocation8 + $0xd24] sm:$0xf0]  ;;  %v4937_v19 = vld [vmem:[#allocation8 + $0xe8] sm:$0xf0] }
 0x15a   :  { %v6759_v50 = vld [vmem:[#allocation8 + $0xf08] sm:$0xf]  ;;  %v6504_v48 = vor.u32 %v7362_v39, %v6503_v38  ;;  %3983 = vmatpush.bf16.msrb.mxu1 %v6216_v45  ;;  %v7190_v45 = vld [vmem:[#allocation8 + $0x7cc] sm:$0xf] }
 0x15b   :  { %v7426_v42 = vld [vmem:[#allocation8 + $0xf24] sm:$0xf0]  ;;  %v7030_v21 = vld [vmem:[#allocation8 + $0x2cc] sm:$0xf] }
 0x15c   :  { %v5927_v46 = vld [vmem:[#allocation8 + $0x888] sm:$0xf]  ;;  %v6760_v53 = vor.u32 %v7426_v42, %v6759_v50  ;;  %3995 = vmatpush.bf16.msrb.mxu2 %v6504_v48  ;;  %v5577_v50 = vld [vmem:[#allocation8 + $0x5e8] sm:$0xf0]  ;;  %v5036_v42 = vor.u32 %v6990_v29, %v5033_v32 }
 0x15d   :  { %v7218_v47 = vld [vmem:[#allocation8 + $0x8a4] sm:$0xf0] }
 0x15e   :  { %v6183_v51 = vld [vmem:[#allocation8 + $0xa88] sm:$0xf]  ;;  %v5928_v56 = vor.u32 %v7218_v47, %v5927_v46  ;;  %4008 = vmatpush.bf16.msrb.mxu3 %v6760_v53  ;;  %v5833_v46 = vld [vmem:[#allocation8 + $0x7e8] sm:$0xf0]  ;;  %v5292_v47 = vor.u32 %v7054_v33, %v5289_v34 }
 0x15f   :  { %v7282_v52 = vld [vmem:[#allocation8 + $0xaa4] sm:$0xf0]  ;;  %v7022_v34 = vld [vmem:[#allocation8 + $0x28c] sm:$0xf] }
 0x160   :  { %v6471_v54 = vld [vmem:[#allocation8 + $0xcc8] sm:$0xf]  ;;  %v6184_v59 = vor.u32 %v7282_v52, %v6183_v51  ;;  %3971 = vmatpush.bf16.msrb.mxu0 %v5928_v56  ;;  %v6982_v51 = vld [vmem:[#allocation8 + $0x14c] sm:$0xf] }
 0x161   :  { %v7354_v55 = vld [vmem:[#allocation8 + $0xce4] sm:$0xf0]  ;;  %v5001_v52 = vld [vmem:[#allocation8 + $0x168] sm:$0xf0] }
 0x162   :  { %v6727_v57 = vld [vmem:[#allocation8 + $0xec8] sm:$0xf]  ;;  %v6472_v62 = vor.u32 %v7354_v55, %v6471_v54  ;;  %3984 = vmatpush.bf16.msrb.mxu1 %v6184_v59  ;;  %v5580_v54 = vor.u32 %v7126_v40, %v5577_v50  ;;  %v7046_v55 = vld [vmem:[#allocation8 + $0x34c] sm:$0xf] }
 0x163   :  { %v7418_v58 = vld [vmem:[#allocation8 + $0xee4] sm:$0xf0]  ;;  %v5257_v56 = vld [vmem:[#allocation8 + $0x368] sm:$0xf0] }
 0x164   :  { %v5895_v60 = vld [vmem:[#allocation8 + $0x848] sm:$0xf]  ;;  %v6728_v1 = vor.u32 %v7418_v58, %v6727_v57  ;;  %3996 = vmatpush.bf16.msrb.mxu2 %v6472_v62  ;;  %v5836_v57 = vor.u32 %v7190_v45, %v5833_v46  ;;  %v7118_v58 = vld [vmem:[#allocation8 + $0x58c] sm:$0xf] }
 0x165   :  { %v7210_v61 = vld [vmem:[#allocation8 + $0x864] sm:$0xf0]  ;;  %v5545_v59 = vld [vmem:[#allocation8 + $0x5a8] sm:$0xf0] }
 0x166   :  { %v6151_v63 = vld [vmem:[#allocation8 + $0xa48] sm:$0xf]  ;;  %v5896_v5 = vor.u32 %v7210_v61, %v5895_v60  ;;  %4009 = vmatpush.bf16.msrb.mxu3 %v6728_v1  ;;  %v5004_v60 = vor.u32 %v6982_v51, %v5001_v52  ;;  %v7182_v61 = vld [vmem:[#allocation8 + $0x78c] sm:$0xf] }
 0x167   :  { %v7274_v0 = vld [vmem:[#allocation8 + $0xa64] sm:$0xf0]  ;;  %v5801_v62 = vld [vmem:[#allocation8 + $0x7a8] sm:$0xf0] }
 0x168   :  { %v6439_v3 = vld [vmem:[#allocation8 + $0xc88] sm:$0xf]  ;;  %v6152_v11 = vor.u32 %v7274_v0, %v6151_v63  ;;  %3972 = vmatpush.bf16.msrb.mxu0 %v5896_v5  ;;  %v5260_v63 = vor.u32 %v7046_v55, %v5257_v56  ;;  %v6974_v0 = vld [vmem:[#allocation8 + $0x10c] sm:$0xf] }
 0x169   :  { %v7346_v4 = vld [vmem:[#allocation8 + $0xca4] sm:$0xf0]  ;;  %v4969_v1 = vld [vmem:[#allocation8 + $0x128] sm:$0xf0] }
 0x16a   :  { %v6695_v7 = vld [vmem:[#allocation8 + $0xe88] sm:$0xf]  ;;  %v6440_v15 = vor.u32 %v7346_v4, %v6439_v3  ;;  %3985 = vmatpush.bf16.msrb.mxu1 %v6152_v11  ;;  %v7726_v3 = vpop.f32.mrf.mxu0  ;;  %v5548_v4 = vor.u32 %v7118_v58, %v5545_v59  ;;  %v7038_v5 = vld [vmem:[#allocation8 + $0x30c] sm:$0xf]  ;;  %v7736_v58 = vpop.f32.mrf.mxu3 }
 0x16b   :  { %v7410_v8 = vld [vmem:[#allocation8 + $0xea4] sm:$0xf0]  ;;  %v7110_v11 = vld [vmem:[#allocation8 + $0x54c] sm:$0xf] }
 0x16c   :  { %v5863_v10 = vld [vmem:[#allocation8 + $0x808] sm:$0xf]  ;;  %v6696_v20 = vor.u32 %v7410_v8, %v6695_v7  ;;  %3997 = vmatpush.bf16.msrb.mxu2 %v6440_v15  ;;  %v5225_v7 = vld [vmem:[#allocation8 + $0x328] sm:$0xf0]  ;;  %v5804_v8 = vor.u32 %v7182_v61, %v5801_v62 }
 0x16d   :  { %v7202_v12 = vld [vmem:[#allocation8 + $0x824] sm:$0xf0]  ;;  %v5769_v15 = vld [vmem:[#allocation8 + $0x768] sm:$0xf0]  ;;  %v5228_v16 = vor.u32 %v7038_v5, %v5225_v7 }
 0x16e   :  { %v6119_v13 = vld [vmem:[#allocation8 + $0xa08] sm:$0xf]  ;;  %v5864_v24 = vor.u32 %v7202_v12, %v5863_v10  ;;  %4010 = vmatpush.bf16.msrb.mxu3 %v6696_v20  ;;  %v7728_v10 = vpop.f32.mrf.mxu1  ;;  %v5513_v12 = vld [vmem:[#allocation8 + $0x568] sm:$0xf0] }
 0x16f   :  { %v7266_v14 = vld [vmem:[#allocation8 + $0xa24] sm:$0xf0]  ;;  %v5516_v20 = vor.u32 %v7110_v11, %v5513_v12  ;;  %v7158_v50 = vld [vmem:[#allocation8 + $0x6cc] sm:$0xf] }
 0x170   :  { %v6407_v23 = vld [vmem:[#allocation8 + $0xc48] sm:$0xf]  ;;  %v6120_v27 = vor.u32 %v7266_v14, %v6119_v13  ;;  %3973 = vmatpush.bf16.msrb.mxu0 %v5864_v24  ;;  %v4972_v13 = vor.u32 %v6974_v0, %v4969_v1  ;;  %v7174_v14 = vld [vmem:[#allocation8 + $0x74c] sm:$0xf] }
 0x171   :  { %v7338_v2 = vld [vmem:[#allocation8 + $0xc64] sm:$0xf0]  ;;  %v7102_v24 = vld [vmem:[#allocation8 + $0x50c] sm:$0xf] }
 0x172   :  { %v6663_v25 = vld [vmem:[#allocation8 + $0xe48] sm:$0xf]  ;;  %v6408_v31 = vor.u32 %v7338_v2, %v6407_v23  ;;  %3986 = vmatpush.bf16.msrb.mxu1 %v6120_v27  ;;  %v5193_v23 = vld [vmem:[#allocation8 + $0x2e8] sm:$0xf0]  ;;  %v5772_v2 = vor.u32 %v7174_v14, %v5769_v15  ;;  %v3717_v32 = vpop.f32.mrf.mxu0 }
 0x173   :  { %v7402_v26 = vld [vmem:[#allocation8 + $0xe64] sm:$0xf0]  ;;  %3974 = vmatmul.bf16.vlgmr.msrb.gmra.mxu0 %v7699_v6  ;;  %v7166_v27 = vld [vmem:[#allocation8 + $0x70c] sm:$0xf]  ;;  %v5196_v29 = vor.u32 %v7030_v21, %v5193_v23 }
 0x174   :  { %v6664_v35 = vor.u32 %v7402_v26, %v6663_v25  ;;  %v6375_v36 = vld [vmem:[#allocation8 + $0xc08] sm:$0xf]  ;;  %4018 = vmatpush.bf16.msra.mxu0 %v5068_v28  ;;  %3998 = vmatpush.bf16.msrb.mxu2 %v6408_v31  ;;  %v5481_v25 = vld [vmem:[#allocation8 + $0x528] sm:$0xf0]  ;;  %v4940_v26 = vor.u32 %v6966_v18, %v4937_v19 }
 0x175   :  { %v7330_v37 = vld [vmem:[#allocation8 + $0xc24] sm:$0xf0]  ;;  %3987 = vmatmul.bf16.vlgmr.msrb.gmra.mxu1 %v7702_v9  ;;  %v5737_v28 = vld [vmem:[#allocation8 + $0x728] sm:$0xf0]  ;;  %v5484_v33 = vor.u32 %v7102_v24, %v5481_v25 }
 0x176   :  { %v6631_v38 = vld [vmem:[#allocation8 + $0xe08] sm:$0xf]  ;;  %4031 = vmatpush.bf16.msra.mxu1 %v5324_v30  ;;  %v6376_v48 = vor.u32 %v7330_v37, %v6375_v36  ;;  %4011 = vmatpush.bf16.msrb.mxu3 %v6664_v35  ;;  %v6958_v30 = vld [vmem:[#allocation8 + $0x8c] sm:$0xf]  ;;  %v5740_v36 = vor.u32 %v7166_v27, %v5737_v28  ;;  %v3730_v37 = vpop.f32.mrf.mxu1 }
 0x177   :  { %v7394_v39 = vld [vmem:[#allocation8 + $0xe24] sm:$0xf0]  ;;  %v4905_v31 = vld [vmem:[#allocation8 + $0xa8] sm:$0xf0] }
 0x178   :  { %v6632_v53 = vor.u32 %v7394_v39, %v6631_v38  ;;  %4019 = vmatpush.bf16.msra.mxu0 %v5036_v42  ;;  %3999 = vmatpush.bf16.msrb.mxu2 %v6376_v48  ;;  %v5161_v35 = vld [vmem:[#allocation8 + $0x2a8] sm:$0xf0]  ;;  %v4908_v40 = vor.u32 %v6958_v30, %v4905_v31 }
 0x179   :  { %v7094_v38 = vld [vmem:[#allocation8 + $0x4cc] sm:$0xf]  ;;  %v5164_v45 = vor.u32 %v7022_v34, %v5161_v35  ;;  %v3756_v34 = vpop.f32.mrf.mxu3 }
 0x17a   :  { %4032 = vmatpush.bf16.msra.mxu1 %v5292_v47  ;;  %4012 = vmatpush.bf16.msrb.mxu3 %v6632_v53  ;;  %v5449_v39 = vld [vmem:[#allocation8 + $0x4e8] sm:$0xf0]  ;;  %v7732_v53 = vpop.f32.mrf.mxu2 }
 0x17b   :  { %4000 = vmatmul.bf16.vlgmr.msrb.gmra.mxu2 %v7706_v41  ;;  %v5705_v42 = vld [vmem:[#allocation8 + $0x6e8] sm:$0xf0]  ;;  %v5452_v48 = vor.u32 %v7094_v38, %v5449_v39 }
 0x17c   :  { %4044 = vmatpush.bf16.msra.mxu2 %v5580_v54  ;;  %4020 = vmatpush.bf16.msra.mxu0 %v5004_v60  ;;  %v6950_v46 = vld [vmem:[#allocation8 + $0x4c] sm:$0xf]  ;;  %v5708_v54 = vor.u32 %v7158_v50, %v5705_v42 }
 0x17d   :  { %4013 = vmatmul.bf16.vlgmr.msrb.gmra.mxu3 %v7708_v44  ;;  %v4873_v47 = vld [vmem:[#allocation8 + $0x68] sm:$0xf0] }
 0x17e   :  { %4057 = vmatpush.bf16.msra.mxu3 %v5836_v57  ;;  %4033 = vmatpush.bf16.msra.mxu1 %v5260_v63  ;;  %v7014_v51 = vld [vmem:[#allocation8 + $0x24c] sm:$0xf]  ;;  %v7734_v57 = vld [vmem:[#allocation10] sm:$0xff]  ;;  %v4876_v59 = vor.u32 %v6950_v46, %v4873_v47 }
 0x17f   :  { %v5129_v52 = vld [vmem:[#allocation8 + $0x268] sm:$0xf0] }
 0x180   :  { %4045 = vmatpush.bf16.msra.mxu2 %v5548_v4  ;;  %4021 = vmatpush.bf16.msra.mxu0 %v4972_v13  ;;  %v7086_v55 = vld [vmem:[#allocation8 + $0x48c] sm:$0xf]  ;;  %v5132_v63 = vor.u32 %v7014_v51, %v5129_v52 }
 0x181   :  { %v5417_v56 = vld [vmem:[#allocation8 + $0x4a8] sm:$0xf0] }
 0x182   :  { %4058 = vmatpush.bf16.msra.mxu3 %v5804_v8  ;;  %4034 = vmatpush.bf16.msra.mxu1 %v5228_v16  ;;  %v7150_v60 = vld [vmem:[#allocation8 + $0x68c] sm:$0xf]  ;;  %v5420_v5 = vor.u32 %v7086_v55, %v5417_v56 }
 0x183   :  { %v5673_v61 = vld [vmem:[#allocation8 + $0x6a8] sm:$0xf0] }
 0x184   :  { %4046 = vmatpush.bf16.msra.mxu2 %v5516_v20  ;;  %4022 = vmatpush.bf16.msra.mxu0 %v4940_v26  ;;  %v6942_v62 = vld [vmem:[#allocation8 + $0xc] sm:$0xf]  ;;  %v5676_v12 = vor.u32 %v7150_v60, %v5673_v61  ;;  %v1130_v20 = vperm.slane %v7734_v57, 0 }
 0x185   :  { %v4841_v0 = vld [vmem:[#allocation8 + $0x28] sm:$0xf0] }
 0x186   :  { %4059 = vmatpush.bf16.msra.mxu3 %v5772_v2  ;;  %4035 = vmatpush.bf16.msra.mxu1 %v5196_v29  ;;  %v7006_v1 = vld [vmem:[#allocation8 + $0x20c] sm:$0xf]  ;;  %v4844_v16 = vor.u32 %v6942_v62, %v4841_v0  ;;  %v3743_v29 = vpop.f32.mrf.mxu2  ;;  %v3716_v50 = vadd.f32 %v7726_v3, %v1130_v20 }
 0x187   :  { %v5097_v4 = vld [vmem:[#allocation8 + $0x228] sm:$0xf0] }
 0x188   :  { %4047 = vmatpush.bf16.msra.mxu2 %v5484_v33  ;;  %4023 = vmatpush.bf16.msra.mxu0 %v4908_v40  ;;  %v7254_v7 = vld [vmem:[#allocation8 + $0x9cc] sm:$0xf]  ;;  %v5100_v21 = vor.u32 %v7006_v1, %v5097_v4  ;;  %v3729_v62 = vadd.f32 %v7728_v10, %v3716_v50 }
 0x189   :  { %v6089_v8 = vld [vmem:[#allocation8 + $0x9e8] sm:$0xf0] }
 0x18a   :  { %4060 = vmatpush.bf16.msra.mxu3 %v5740_v36  ;;  %4036 = vmatpush.bf16.msra.mxu1 %v5164_v45  ;;  %v7318_v11 = vld [vmem:[#allocation8 + $0xbcc] sm:$0xf]  ;;  %v6092_v23 = vor.u32 %v7254_v7, %v6089_v8  ;;  %v3767_v8 = vpop.f32.mrf.mxu0 }
 0x18b   :  { %v6345_v13 = vld [vmem:[#allocation8 + $0xbe8] sm:$0xf0] }
 0x18c   :  { %4048 = vmatpush.bf16.msra.mxu2 %v5452_v48  ;;  %v7078_v14 = vld [vmem:[#allocation8 + $0x44c] sm:$0xf]  ;;  %4024 = vmatpush.bf16.msra.mxu0 %v4876_v59  ;;  %v6348_v24 = vor.u32 %v7318_v11, %v6345_v13 }
 0x18d   :  { %v5385_v15 = vld [vmem:[#allocation8 + $0x468] sm:$0xf0] }
 0x18e   :  { %4061 = vmatpush.bf16.msra.mxu3 %v5708_v54  ;;  %v7142_v18 = vld [vmem:[#allocation8 + $0x64c] sm:$0xf]  ;;  %4037 = vmatpush.bf16.msra.mxu1 %v5132_v63  ;;  %v5388_v25 = vor.u32 %v7078_v14, %v5385_v15  ;;  %v3780_v14 = vpop.f32.mrf.mxu1 }
 0x18f   :  { %v5641_v19 = vld [vmem:[#allocation8 + $0x668] sm:$0xf0] }
 0x190   :  { %v7246_v2 = vld [vmem:[#allocation8 + $0x98c] sm:$0xf]  ;;  %4049 = vmatpush.bf16.msra.mxu2 %v5420_v5  ;;  %v5644_v30 = vor.u32 %v7142_v18, %v5641_v19  ;;  %4025 = vmatpush.bf16.msra.mxu0 %v4844_v16  ;;  %v3742_v18 = vadd.f32 %v7732_v53, %v3729_v62 }
 0x191   :  { %v6057_v26 = vld [vmem:[#allocation8 + $0x9a8] sm:$0xf0] }
 0x192   :  { %v7310_v27 = vld [vmem:[#allocation8 + $0xb8c] sm:$0xf]  ;;  %4062 = vmatpush.bf16.msra.mxu3 %v5676_v12  ;;  %4038 = vmatpush.bf16.msra.mxu1 %v5100_v21  ;;  %v6060_v38 = vor.u32 %v7246_v2, %v6057_v26  ;;  %v3755_v53 = vadd.f32 %v7736_v58, %v3742_v18 }
 0x193   :  { %v6313_v28 = vld [vmem:[#allocation8 + $0xba8] sm:$0xf0]  ;;  %4026 = vmatmul.bf16.vlgmr.msra.gmra.mxu0 %v7683_v17 }
 0x194   :  { %v7070_v31 = vld [vmem:[#allocation8 + $0x40c] sm:$0xf]  ;;  %4070 = vmatpush.bf16.msrb.mxu0 %v6092_v23  ;;  %4050 = vmatpush.bf16.msra.mxu2 %v5388_v25  ;;  %v6316_v42 = vor.u32 %v7310_v27, %v6313_v28 }
 0x195   :  { %v5353_v32 = vld [vmem:[#allocation8 + $0x428] sm:$0xf0]  ;;  %4039 = vmatmul.bf16.vlgmr.msra.gmra.mxu1 %v7686_v22 }
 0x196   :  { %v7134_v33 = vld [vmem:[#allocation8 + $0x60c] sm:$0xf]  ;;  %4083 = vmatpush.bf16.msrb.mxu1 %v6348_v24  ;;  %v5356_v45 = vor.u32 %v7070_v31, %v5353_v32  ;;  %4063 = vmatpush.bf16.msra.mxu3 %v5644_v30 }
 0x197   :  { %v5609_v35 = vld [vmem:[#allocation8 + $0x628] sm:$0xf0] }
 0x198   :  { %v7382_v36 = vld [vmem:[#allocation8 + $0xdcc] sm:$0xf]  ;;  %v5612_v48 = vor.u32 %v7134_v33, %v5609_v35  ;;  %4071 = vmatpush.bf16.msrb.mxu0 %v6060_v38  ;;  %4051 = vmatpush.bf16.msra.mxu2 %v5356_v45  ;;  %v3769_v38 = vpop.f32.mrf.mxu0 }
 0x199   :  { %v6601_v37 = vld [vmem:[#allocation8 + $0xde8] sm:$0xf0] }
 0x19a   :  { %v7446_v39 = vld [vmem:[#allocation8 + $0xfcc] sm:$0xf]  ;;  %v6604_v51 = vor.u32 %v7382_v36, %v6601_v37  ;;  %4084 = vmatpush.bf16.msrb.mxu1 %v6316_v42  ;;  %4064 = vmatpush.bf16.msra.mxu3 %v5612_v48  ;;  %v3768_v37 = vadd.f32 %v3767_v8, %v3755_v53  ;;  %v3782_v42 = vpop.f32.mrf.mxu1  ;;  %v6995_v53 = vld [vmem:[#allocation8 + $0x1ac] sm:$0xf0] }
 0x19b   :  { %v6857_v40 = vld [vmem:[#allocation8 + $0xfe8] sm:$0xf0]  ;;  %4052 = vmatmul.bf16.vlgmr.msra.gmra.mxu2 %v7690_v43  ;;  %v7131_v42 = vld [vmem:[#allocation8 + $0x5ec] sm:$0xf0] }
 0x19c   :  { %v7238_v46 = vld [vmem:[#allocation8 + $0x94c] sm:$0xf]  ;;  %v6860_v55 = vor.u32 %v7446_v39, %v6857_v40  ;;  %4096 = vmatpush.bf16.msrb.mxu2 %v6604_v51 }
 0x19d   :  { %v6025_v47 = vld [vmem:[#allocation8 + $0x968] sm:$0xf0]  ;;  %4065 = vmatmul.bf16.vlgmr.msra.gmra.mxu3 %v7692_v49 }
 0x19e   :  { %v7302_v52 = vld [vmem:[#allocation8 + $0xb4c] sm:$0xf]  ;;  %v6028_v3 = vor.u32 %v7238_v46, %v6025_v47  ;;  %4109 = vmatpush.bf16.msrb.mxu3 %v6860_v55 }
 0x19f   :  { %v6281_v54 = vld [vmem:[#allocation8 + $0xb68] sm:$0xf0] }
 0x1a0   :  { %v7374_v56 = vld [vmem:[#allocation8 + $0xd8c] sm:$0xf]  ;;  %v6284_v63 = vor.u32 %v7302_v52, %v6281_v54  ;;  %4072 = vmatpush.bf16.msrb.mxu0 %v6028_v3  ;;  %v3819_v18 = vpop.f32.mrf.mxu0 }
 0x1a1   :  { %v6569_v59 = vld [vmem:[#allocation8 + $0xda8] sm:$0xf0] }
 0x1a2   :  { %v7438_v60 = vld [vmem:[#allocation8 + $0xf8c] sm:$0xf]  ;;  %v6572_v4 = vor.u32 %v7374_v56, %v6569_v59  ;;  %4085 = vmatpush.bf16.msrb.mxu1 %v6284_v63  ;;  %v3781_v56 = vadd.f32 %v3780_v14, %v3768_v37  ;;  %v5071_v14 = vld [vmem:[#allocation8 + $0x1d0] sm:$0xf] }
 0x1a3   :  { %v6825_v61 = vld [vmem:[#allocation8 + $0xfa8] sm:$0xf0] }
 0x1a4   :  { %v7230_v0 = vld [vmem:[#allocation8 + $0x90c] sm:$0xf]  ;;  %v6828_v11 = vor.u32 %v7438_v60, %v6825_v61  ;;  %4097 = vmatpush.bf16.msrb.mxu2 %v6572_v4  ;;  %v3793_v61 = vpop.f32.mrf.mxu2 }
 0x1a5   :  { %v5993_v1 = vld [vmem:[#allocation8 + $0x928] sm:$0xf0]  ;;  %v3794_v4 = vadd.f32 %v3793_v61, %v3781_v56  ;;  %v7051_v61 = vld [vmem:[#allocation8 + $0x36c] sm:$0xf0] }
 0x1a6   :  { %v7294_v5 = vld [vmem:[#allocation8 + $0xb0c] sm:$0xf]  ;;  %v5996_v10 = vor.u32 %v7230_v0, %v5993_v1  ;;  %4110 = vmatpush.bf16.msrb.mxu3 %v6828_v11 }
 0x1a7   :  { %v6249_v7 = vld [vmem:[#allocation8 + $0xb28] sm:$0xf0] }
 0x1a8   :  { %v7366_v12 = vld [vmem:[#allocation8 + $0xd4c] sm:$0xf]  ;;  %v6252_v19 = vor.u32 %v7294_v5, %v6249_v7  ;;  %4073 = vmatpush.bf16.msrb.mxu0 %v5996_v10  ;;  %v3806_v5 = vpop.f32.mrf.mxu3  ;;  %v7003_v10 = vld [vmem:[#allocation8 + $0x1ec] sm:$0xf0]  ;;  %v3821_v56 = vpop.f32.mrf.mxu0 }
 0x1a9   :  { %v6537_v13 = vld [vmem:[#allocation8 + $0xd68] sm:$0xf0] }
 0x1aa   :  { %v7430_v15 = vld [vmem:[#allocation8 + $0xf4c] sm:$0xf]  ;;  %v6540_v23 = vor.u32 %v7366_v12, %v6537_v13  ;;  %4086 = vmatpush.bf16.msrb.mxu1 %v6252_v19 }
 0x1ab   :  { %v6793_v16 = vld [vmem:[#allocation8 + $0xf68] sm:$0xf0] }
 0x1ac   :  { %v7222_v20 = vld [vmem:[#allocation8 + $0x8cc] sm:$0xf]  ;;  %v6796_v25 = vor.u32 %v7430_v15, %v6793_v16  ;;  %4098 = vmatpush.bf16.msrb.mxu2 %v6540_v23  ;;  %v5327_v15 = vld [vmem:[#allocation8 + $0x3d0] sm:$0xf]  ;;  %v3807_v16 = vadd.f32 %v3806_v5, %v3794_v4 }
 0x1ad   :  { %v5961_v21 = vld [vmem:[#allocation8 + $0x8e8] sm:$0xf0]  ;;  %v5807_v5 = vld [vmem:[#allocation8 + $0x790] sm:$0xf] }
 0x1ae   :  { %v7286_v2 = vld [vmem:[#allocation8 + $0xacc] sm:$0xf]  ;;  %v5964_v28 = vor.u32 %v7222_v20, %v5961_v21  ;;  %4111 = vmatpush.bf16.msrb.mxu3 %v6796_v25  ;;  %v7067_v20 = vld [vmem:[#allocation8 + $0x3ec] sm:$0xf0] }
 0x1af   :  { %v6217_v24 = vld [vmem:[#allocation8 + $0xae8] sm:$0xf0] }
 0x1b0   :  { %v7358_v26 = vld [vmem:[#allocation8 + $0xd0c] sm:$0xf]  ;;  %v6220_v31 = vor.u32 %v7286_v2, %v6217_v24  ;;  %4074 = vmatpush.bf16.msrb.mxu0 %v5964_v28  ;;  %v7747_v2 = vpop.f32.mrf.mxu1 }
 0x1b1   :  { %v6505_v27 = vld [vmem:[#allocation8 + $0xd28] sm:$0xf0] }
 0x1b2   :  { %v7422_v29 = vld [vmem:[#allocation8 + $0xf0c] sm:$0xf]  ;;  %v6508_v34 = vor.u32 %v7358_v26, %v6505_v27  ;;  %4087 = vmatpush.bf16.msrb.mxu1 %v6220_v31  ;;  %v4538_v27 = vmax.f32 %v3807_v16, 0.0  ;;  %v5328_v31 = vor.u32 %v7067_v20, %v5327_v15  ;;  %v7043_v15 = vld [vmem:[#allocation8 + $0x32c] sm:$0xf0] }
 0x1b3   :  { %v6761_v30 = vld [vmem:[#allocation8 + $0xf28] sm:$0xf0]  ;;  %v5519_v20 = vld [vmem:[#allocation8 + $0x550] sm:$0xf] }
 0x1b4   :  { %v7214_v32 = vld [vmem:[#allocation8 + $0x88c] sm:$0xf]  ;;  %v6764_v39 = vor.u32 %v7422_v29, %v6761_v30  ;;  %4099 = vmatpush.bf16.msrb.mxu2 %v6508_v34  ;;  %v5072_v29 = vor.u32 %v7003_v10, %v5071_v14  ;;  %v5039_v30 = vld [vmem:[#allocation8 + $0x190] sm:$0xf]  ;;  %4546 = vst [vmem:[#allocation11] sm:$0xff] %v4538_v27 }
 0x1b5   :  { %v5929_v33 = vld [vmem:[#allocation8 + $0x8a8] sm:$0xf0]  ;;  %v7059_v34 = vld [vmem:[#allocation8 + $0x3ac] sm:$0xf0] }
 0x1b6   :  { %v7278_v35 = vld [vmem:[#allocation8 + $0xa8c] sm:$0xf]  ;;  %v5932_v45 = vor.u32 %v7214_v32, %v5929_v33  ;;  %4112 = vmatpush.bf16.msrb.mxu3 %v6764_v39  ;;  %v5295_v33 = vld [vmem:[#allocation8 + $0x390] sm:$0xf]  ;;  %v3795_v39 = vpop.f32.mrf.mxu2 }
 0x1b7   :  { %v6185_v36 = vld [vmem:[#allocation8 + $0xaa8] sm:$0xf0]  ;;  %v5231_v10 = vld [vmem:[#allocation8 + $0x310] sm:$0xf] }
 0x1b8   :  { %v7350_v40 = vld [vmem:[#allocation8 + $0xccc] sm:$0xf]  ;;  %v6188_v58 = vor.u32 %v7278_v35, %v6185_v36  ;;  %4075 = vmatpush.bf16.msrb.mxu0 %v5932_v45  ;;  %v3808_v45 = vpop.f32.mrf.mxu3  ;;  %v5232_v27 = vor.u32 %v7043_v15, %v5231_v10  ;;  %v7171_v39 = vld [vmem:[#allocation8 + $0x72c] sm:$0xf0] }
 0x1b9   :  { %v6473_v50 = vld [vmem:[#allocation8 + $0xce8] sm:$0xf0]  ;;  %v7155_v10 = vld [vmem:[#allocation8 + $0x6ac] sm:$0xf0] }
 0x1ba   :  { %v7414_v46 = vld [vmem:[#allocation8 + $0xecc] sm:$0xf]  ;;  %v6476_v52 = vor.u32 %v7350_v40, %v6473_v50  ;;  %4088 = vmatpush.bf16.msrb.mxu1 %v6188_v58  ;;  %v5583_v50 = vld [vmem:[#allocation8 + $0x5d0] sm:$0xf] }
 0x1bb   :  { %v6729_v47 = vld [vmem:[#allocation8 + $0xee8] sm:$0xf0]  ;;  %v7195_v58 = vld [vmem:[#allocation8 + $0x7ec] sm:$0xf0] }
 0x1bc   :  { %v7206_v48 = vld [vmem:[#allocation8 + $0x84c] sm:$0xf]  ;;  %v6732_v59 = vor.u32 %v7414_v46, %v6729_v47  ;;  %4100 = vmatpush.bf16.msrb.mxu2 %v6476_v52  ;;  %v5040_v46 = vor.u32 %v6995_v53, %v5039_v30  ;;  %v5839_v47 = vld [vmem:[#allocation8 + $0x7d0] sm:$0xf] }
 0x1bd   :  { %v5897_v51 = vld [vmem:[#allocation8 + $0x868] sm:$0xf0]  ;;  %v5199_v53 = vld [vmem:[#allocation8 + $0x2d0] sm:$0xf] }
 0x1be   :  { %v7270_v54 = vld [vmem:[#allocation8 + $0xa4c] sm:$0xf]  ;;  %v5900_v62 = vor.u32 %v7206_v48, %v5897_v51  ;;  %4113 = vmatpush.bf16.msrb.mxu3 %v6732_v59  ;;  %v1131_v48 = vperm.slane %v7734_v57, 1  ;;  %v5296_v51 = vor.u32 %v7059_v34, %v5295_v33  ;;  %v3845_v16 = vpop.f32.mrf.mxu2  ;;  %v3871_v33 = vpop.f32.mrf.mxu0  ;;  %v4847_v15 = vld [vmem:[#allocation8 + $0x10] sm:$0xf] }
 0x1bf   :  { %v6153_v55 = vld [vmem:[#allocation8 + $0xa68] sm:$0xf0] }
 0x1c0   :  { %v7342_v3 = vld [vmem:[#allocation8 + $0xc8c] sm:$0xf]  ;;  %v6156_v7 = vor.u32 %v7270_v54, %v6153_v55  ;;  %4076 = vmatpush.bf16.msrb.mxu0 %v5900_v62  ;;  %v5007_v54 = vld [vmem:[#allocation8 + $0x150] sm:$0xf]  ;;  %v3834_v62 = vpop.f32.mrf.mxu1 }
 0x1c1   :  { %v6441_v60 = vld [vmem:[#allocation8 + $0xca8] sm:$0xf0]  ;;  %v6987_v55 = vld [vmem:[#allocation8 + $0x16c] sm:$0xf0] }
 0x1c2   :  { %v7406_v63 = vld [vmem:[#allocation8 + $0xe8c] sm:$0xf]  ;;  %v6444_v13 = vor.u32 %v7342_v3, %v6441_v60  ;;  %4089 = vmatpush.bf16.msrb.mxu1 %v6156_v7  ;;  %v5584_v3 = vor.u32 %v7131_v42, %v5583_v50  ;;  %v5263_v60 = vld [vmem:[#allocation8 + $0x350] sm:$0xf]  ;;  %v5008_v4 = vor.u32 %v6987_v55, %v5007_v54 }
 0x1c3   :  { %v6697_v0 = vld [vmem:[#allocation8 + $0xea8] sm:$0xf0]  ;;  %v7187_v7 = vld [vmem:[#allocation8 + $0x7ac] sm:$0xf0] }
 0x1c4   :  { %v7198_v1 = vld [vmem:[#allocation8 + $0x80c] sm:$0xf]  ;;  %v6700_v19 = vor.u32 %v7406_v63, %v6697_v0  ;;  %4101 = vmatpush.bf16.msrb.mxu2 %v6444_v13  ;;  %v5840_v63 = vor.u32 %v7195_v58, %v5839_v47  ;;  %v5551_v0 = vld [vmem:[#allocation8 + $0x590] sm:$0xf] }
 0x1c5   :  { %v5865_v8 = vld [vmem:[#allocation8 + $0x828] sm:$0xf0]  ;;  %v6979_v13 = vld [vmem:[#allocation8 + $0x12c] sm:$0xf0] }
 0x1c6   :  { %v7262_v11 = vld [vmem:[#allocation8 + $0xa0c] sm:$0xf]  ;;  %v5868_v24 = vor.u32 %v7198_v1, %v5865_v8  ;;  %4114 = vmatpush.bf16.msrb.mxu3 %v6700_v19  ;;  %v7123_v1 = vld [vmem:[#allocation8 + $0x5ac] sm:$0xf0]  ;;  %v3820_v8 = vadd.f32 %v3819_v18, %v1131_v48  ;;  %v5808_v19 = vor.u32 %v7187_v7, %v5807_v5  ;;  %v3847_v48 = vpop.f32.mrf.mxu2  ;;  %v3873_v5 = vpop.f32.mrf.mxu0 }
 0x1c7   :  { %v6121_v12 = vld [vmem:[#allocation8 + $0xa28] sm:$0xf0]  ;;  %v5552_v14 = vor.u32 %v7123_v1, %v5551_v0  ;;  %v4911_v50 = vld [vmem:[#allocation8 + $0x90] sm:$0xf] }
 0x1c8   :  { %v7334_v21 = vld [vmem:[#allocation8 + $0xc4c] sm:$0xf]  ;;  %v6124_v28 = vor.u32 %v7262_v11, %v6121_v12  ;;  %4077 = vmatpush.bf16.msrb.mxu0 %v5868_v24  ;;  %v5264_v11 = vor.u32 %v7051_v61, %v5263_v60  ;;  %v4975_v12 = vld [vmem:[#allocation8 + $0x110] sm:$0xf] }
 0x1c9   :  { %v6409_v23 = vld [vmem:[#allocation8 + $0xc68] sm:$0xf0]  ;;  %v4976_v18 = vor.u32 %v6979_v13, %v4975_v12  ;;  %v5775_v24 = vld [vmem:[#allocation8 + $0x750] sm:$0xf] }
 0x1ca   :  { %v7398_v25 = vld [vmem:[#allocation8 + $0xe4c] sm:$0xf]  ;;  %v6412_v32 = vor.u32 %v7334_v21, %v6409_v23  ;;  %4090 = vmatpush.bf16.msrb.mxu1 %v6124_v28  ;;  %v7115_v21 = vld [vmem:[#allocation8 + $0x56c] sm:$0xf0]  ;;  %v3858_v23 = vpop.f32.mrf.mxu3 }
 0x1cb   :  { %v6665_v26 = vld [vmem:[#allocation8 + $0xe68] sm:$0xf0]  ;;  %4078 = vmatmul.bf16.vlgmr.msrb.gmra.mxu0 %v7699_v6  ;;  %v4943_v28 = vld [vmem:[#allocation8 + $0xd0] sm:$0xf]  ;;  %v5520_v30 = vor.u32 %v7115_v21, %v5519_v20 }
 0x1cc   :  { %v7326_v35 = vld [vmem:[#allocation8 + $0xc0c] sm:$0xf]  ;;  %v6668_v36 = vor.u32 %v7398_v25, %v6665_v26  ;;  %4122 = vmatpush.bf16.msra.mxu0 %v5072_v29  ;;  %4102 = vmatpush.bf16.msrb.mxu2 %v6412_v32  ;;  %v7179_v25 = vld [vmem:[#allocation8 + $0x76c] sm:$0xf0]  ;;  %v3833_v26 = vadd.f32 %v7747_v2, %v3820_v8 }
 0x1cd   :  { %v6377_v37 = vld [vmem:[#allocation8 + $0xc28] sm:$0xf0]  ;;  %4091 = vmatmul.bf16.vlgmr.msrb.gmra.mxu1 %v7702_v9  ;;  %v6971_v29 = vld [vmem:[#allocation8 + $0xec] sm:$0xf0]  ;;  %v5776_v34 = vor.u32 %v7179_v25, %v5775_v24 }
 0x1ce   :  { %v7390_v38 = vld [vmem:[#allocation8 + $0xe0c] sm:$0xf]  ;;  %4135 = vmatpush.bf16.msra.mxu1 %v5328_v31  ;;  %v6380_v52 = vor.u32 %v7326_v35, %v6377_v37  ;;  %4115 = vmatpush.bf16.msrb.mxu3 %v6668_v36  ;;  %v7035_v31 = vld [vmem:[#allocation8 + $0x2ec] sm:$0xf0]  ;;  %v3846_v32 = vadd.f32 %v3845_v16, %v3833_v26  ;;  %v3884_v37 = vpop.f32.mrf.mxu1 }
 0x1cf   :  { %v6633_v40 = vld [vmem:[#allocation8 + $0xe28] sm:$0xf0]  ;;  %v5487_v35 = vld [vmem:[#allocation8 + $0x510] sm:$0xf] }
 0x1d0   :  { %v6636_v59 = vor.u32 %v7390_v38, %v6633_v40  ;;  %4123 = vmatpush.bf16.msra.mxu0 %v5040_v46  ;;  %4103 = vmatpush.bf16.msrb.mxu2 %v6380_v52  ;;  %v7107_v36 = vld [vmem:[#allocation8 + $0x52c] sm:$0xf0]  ;;  %v4944_v38 = vor.u32 %v6971_v29, %v4943_v28  ;;  %v5200_v40 = vor.u32 %v7035_v31, %v5199_v53  ;;  %v3897_v53 = vpop.f32.mrf.mxu2 }
 0x1d1   :  { %v5743_v2 = vld [vmem:[#allocation8 + $0x710] sm:$0xf]  ;;  %v5488_v45 = vor.u32 %v7107_v36, %v5487_v35  ;;  %v3859_v58 = vadd.f32 %v3858_v23, %v3846_v32 }
 0x1d2   :  { %4136 = vmatpush.bf16.msra.mxu1 %v5296_v51  ;;  %4116 = vmatpush.bf16.msrb.mxu3 %v6636_v59  ;;  %v6963_v42 = vld [vmem:[#allocation8 + $0xac] sm:$0xf0]  ;;  %v5744_v51 = vor.u32 %v7171_v39, %v5743_v2  ;;  %v3860_v55 = vpop.f32.mrf.mxu3 }
 0x1d3   :  { %4104 = vmatmul.bf16.vlgmr.msrb.gmra.mxu2 %v7706_v41  ;;  %v5167_v46 = vld [vmem:[#allocation8 + $0x290] sm:$0xf]  ;;  %v4912_v56 = vor.u32 %v6963_v42, %v4911_v50 }
 0x1d4   :  { %4148 = vmatpush.bf16.msra.mxu2 %v5584_v3  ;;  %4124 = vmatpush.bf16.msra.mxu0 %v5008_v4  ;;  %v7027_v47 = vld [vmem:[#allocation8 + $0x2ac] sm:$0xf0]  ;;  %v3872_v4 = vadd.f32 %v3871_v33, %v3859_v58 }
 0x1d5   :  { %4117 = vmatmul.bf16.vlgmr.msrb.gmra.mxu3 %v7708_v44  ;;  %v5455_v52 = vld [vmem:[#allocation8 + $0x4d0] sm:$0xf]  ;;  %v5168_v60 = vor.u32 %v7027_v47, %v5167_v46 }
 0x1d6   :  { %4161 = vmatpush.bf16.msra.mxu3 %v5840_v63  ;;  %4137 = vmatpush.bf16.msra.mxu1 %v5264_v11  ;;  %v7099_v54 = vld [vmem:[#allocation8 + $0x4ec] sm:$0xf0]  ;;  %v3886_v12 = vpop.f32.mrf.mxu1  ;;  %v3885_v26 = vadd.f32 %v3884_v37, %v3872_v4 }
 0x1d7   :  { %v5711_v59 = vld [vmem:[#allocation8 + $0x6d0] sm:$0xf]  ;;  %v5456_v63 = vor.u32 %v7099_v54, %v5455_v52 }
 0x1d8   :  { %4149 = vmatpush.bf16.msra.mxu2 %v5552_v14  ;;  %4125 = vmatpush.bf16.msra.mxu0 %v4976_v18  ;;  %v7163_v3 = vld [vmem:[#allocation8 + $0x6ec] sm:$0xf0]  ;;  %v3898_v35 = vadd.f32 %v3897_v53, %v3885_v26 }
 0x1d9   :  { %v4879_v61 = vld [vmem:[#allocation8 + $0x50] sm:$0xf]  ;;  %v5712_v7 = vor.u32 %v7163_v3, %v5711_v59 }
 0x1da   :  { %4162 = vmatpush.bf16.msra.mxu3 %v5808_v19  ;;  %4138 = vmatpush.bf16.msra.mxu1 %v5232_v27  ;;  %v6955_v62 = vld [vmem:[#allocation8 + $0x6c] sm:$0xf0]  ;;  %v3910_v31 = vpop.f32.mrf.mxu3 }
 0x1db   :  { %v5135_v0 = vld [vmem:[#allocation8 + $0x250] sm:$0xf]  ;;  %v4880_v13 = vor.u32 %v6955_v62, %v4879_v61 }
 0x1dc   :  { %4150 = vmatpush.bf16.msra.mxu2 %v5520_v30  ;;  %4126 = vmatpush.bf16.msra.mxu0 %v4944_v38  ;;  %v7019_v1 = vld [vmem:[#allocation8 + $0x26c] sm:$0xf0] }
 0x1dd   :  { %v5423_v8 = vld [vmem:[#allocation8 + $0x490] sm:$0xf]  ;;  %v5136_v16 = vor.u32 %v7019_v1, %v5135_v0 }
 0x1de   :  { %4163 = vmatpush.bf16.msra.mxu3 %v5776_v34  ;;  %4139 = vmatpush.bf16.msra.mxu1 %v5200_v40  ;;  %v7091_v11 = vld [vmem:[#allocation8 + $0x4ac] sm:$0xf0] }
 0x1df   :  { %v5679_v14 = vld [vmem:[#allocation8 + $0x690] sm:$0xf]  ;;  %v5424_v23 = vor.u32 %v7091_v11, %v5423_v8 }
 0x1e0   :  { %4151 = vmatpush.bf16.msra.mxu2 %v5488_v45  ;;  %4127 = vmatpush.bf16.msra.mxu0 %v4912_v56  ;;  %v6947_v19 = vld [vmem:[#allocation8 + $0x2c] sm:$0xf0]  ;;  %v5680_v27 = vor.u32 %v7155_v10, %v5679_v14  ;;  %v3911_v45 = vadd.f32 %v3910_v31, %v3898_v35  ;;  %v7759_v35 = vpop.f32.mrf.mxu0 }
 0x1e1   :  { %v5103_v20 = vld [vmem:[#allocation8 + $0x210] sm:$0xf]  ;;  %v4848_v32 = vor.u32 %v6947_v19, %v4847_v15 }
 0x1e2   :  { %4164 = vmatpush.bf16.msra.mxu3 %v5744_v51  ;;  %4140 = vmatpush.bf16.msra.mxu1 %v5168_v60  ;;  %v7011_v21 = vld [vmem:[#allocation8 + $0x22c] sm:$0xf0]  ;;  %v4539_v55 = vmax.f32 %v3911_v45, 0.0  ;;  %v3912_v8 = vpop.f32.mrf.mxu3 }
 0x1e3   :  { %v6095_v18 = vld [vmem:[#allocation8 + $0x9d0] sm:$0xf]  ;;  %v5104_v36 = vor.u32 %v7011_v21, %v5103_v20 }
 0x1e4   :  { %4152 = vmatpush.bf16.msra.mxu2 %v5456_v63  ;;  %v7259_v24 = vld [vmem:[#allocation8 + $0x9ec] sm:$0xf0]  ;;  %4128 = vmatpush.bf16.msra.mxu0 %v4880_v13  ;;  %4547 = vst [vmem:[#allocation11 + $0x8] sm:$0xff] %v4539_v55 }
 0x1e5   :  { %v6351_v25 = vld [vmem:[#allocation8 + $0xbd0] sm:$0xf]  ;;  %v6096_v38 = vor.u32 %v7259_v24, %v6095_v18 }
 0x1e6   :  { %4165 = vmatpush.bf16.msra.mxu3 %v5712_v7  ;;  %v7323_v28 = vld [vmem:[#allocation8 + $0xbec] sm:$0xf0]  ;;  %4141 = vmatpush.bf16.msra.mxu1 %v5136_v16  ;;  %v3899_v7 = vpop.f32.mrf.mxu2 }
 0x1e7   :  { %v5391_v29 = vld [vmem:[#allocation8 + $0x450] sm:$0xf]  ;;  %v6352_v39 = vor.u32 %v7323_v28, %v6351_v25 }
 0x1e8   :  { %v7083_v30 = vld [vmem:[#allocation8 + $0x46c] sm:$0xf0]  ;;  %4153 = vmatpush.bf16.msra.mxu2 %v5424_v23  ;;  %4129 = vmatpush.bf16.msra.mxu0 %v4848_v32 }
 0x1e9   :  { %v5647_v33 = vld [vmem:[#allocation8 + $0x650] sm:$0xf]  ;;  %v5392_v40 = vor.u32 %v7083_v30, %v5391_v29 }
 0x1ea   :  { %v7147_v34 = vld [vmem:[#allocation8 + $0x66c] sm:$0xf0]  ;;  %4166 = vmatpush.bf16.msra.mxu3 %v5680_v27  ;;  %4142 = vmatpush.bf16.msra.mxu1 %v5104_v36 }
 0x1eb   :  { %v6063_v2 = vld [vmem:[#allocation8 + $0x990] sm:$0xf]  ;;  %v5648_v46 = vor.u32 %v7147_v34, %v5647_v33  ;;  %4130 = vmatmul.bf16.vlgmr.msra.gmra.mxu0 %v7683_v17 }
 0x1ec   :  { %v7251_v37 = vld [vmem:[#allocation8 + $0x9ac] sm:$0xf0]  ;;  %4174 = vmatpush.bf16.msrb.mxu0 %v6096_v38  ;;  %4154 = vmatpush.bf16.msra.mxu2 %v5392_v40 }
 0x1ed   :  { %v6319_v50 = vld [vmem:[#allocation8 + $0xb90] sm:$0xf]  ;;  %v6064_v56 = vor.u32 %v7251_v37, %v6063_v2  ;;  %4143 = vmatmul.bf16.vlgmr.msra.gmra.mxu1 %v7686_v22 }
 0x1ee   :  { %v7315_v42 = vld [vmem:[#allocation8 + $0xbac] sm:$0xf0]  ;;  %4187 = vmatpush.bf16.msrb.mxu1 %v6352_v39  ;;  %4167 = vmatpush.bf16.msra.mxu3 %v5648_v46  ;;  %v7761_v39 = vpop.f32.mrf.mxu1 }
 0x1ef   :  { %v5359_v47 = vld [vmem:[#allocation8 + $0x410] sm:$0xf]  ;;  %v6320_v60 = vor.u32 %v7315_v42, %v6319_v50 }
 0x1f0   :  { %v7075_v58 = vld [vmem:[#allocation8 + $0x42c] sm:$0xf0]  ;;  %4175 = vmatpush.bf16.msrb.mxu0 %v6064_v56 }
 0x1f1   :  { %v5615_v48 = vld [vmem:[#allocation8 + $0x610] sm:$0xf]  ;;  %v5360_v61 = vor.u32 %v7075_v58, %v5359_v47 }
 0x1f2   :  { %v7139_v51 = vld [vmem:[#allocation8 + $0x62c] sm:$0xf0]  ;;  %4188 = vmatpush.bf16.msrb.mxu1 %v6320_v60 }
 0x1f3   :  { %v6607_v52 = vld [vmem:[#allocation8 + $0xdd0] sm:$0xf]  ;;  %v5616_v0 = vor.u32 %v7139_v51, %v5615_v48  ;;  %4155 = vmatpush.bf16.msra.mxu2 %v5360_v61 }
 0x1f4   :  { %v7387_v54 = vld [vmem:[#allocation8 + $0xdec] sm:$0xf0] }
 0x1f5   :  { %v6863_v59 = vld [vmem:[#allocation8 + $0xfd0] sm:$0xf]  ;;  %v6608_v1 = vor.u32 %v7387_v54, %v6607_v52  ;;  %4168 = vmatpush.bf16.msra.mxu3 %v5616_v0 }
 0x1f6   :  { %v7451_v3 = vld [vmem:[#allocation8 + $0xfec] sm:$0xf0]  ;;  %4156 = vmatmul.bf16.vlgmr.msra.gmra.mxu2 %v7690_v43  ;;  %v3938_v8 = vpop.f32.mrf.mxu1 }
 0x1f7   :  { %v6031_v62 = vld [vmem:[#allocation8 + $0x950] sm:$0xf]  ;;  %v6864_v11 = vor.u32 %v7451_v3, %v6863_v59  ;;  %4200 = vmatpush.bf16.msrb.mxu2 %v6608_v1  ;;  %v3925_v1 = vpop.f32.mrf.mxu0  ;;  %v5553_v8 = vld [vmem:[#allocation8 + $0x5b0] sm:$0xf0] }
 0x1f8   :  { %v7243_v63 = vld [vmem:[#allocation8 + $0x96c] sm:$0xf0]  ;;  %4169 = vmatmul.bf16.vlgmr.msra.gmra.mxu3 %v7692_v49  ;;  %v5265_v1 = vld [vmem:[#allocation8 + $0x370] sm:$0xf0] }
 0x1f9   :  { %v6287_v4 = vld [vmem:[#allocation8 + $0xb50] sm:$0xf]  ;;  %v6032_v14 = vor.u32 %v7243_v63, %v6031_v62  ;;  %4213 = vmatpush.bf16.msrb.mxu3 %v6864_v11 }
 0x1fa   :  { %v7307_v5 = vld [vmem:[#allocation8 + $0xb6c] sm:$0xf0] }
 0x1fb   :  { %v6575_v12 = vld [vmem:[#allocation8 + $0xd90] sm:$0xf]  ;;  %v6288_v16 = vor.u32 %v7307_v5, %v6287_v4  ;;  %4176 = vmatpush.bf16.msrb.mxu0 %v6032_v14 }
 0x1fc   :  { %v7379_v13 = vld [vmem:[#allocation8 + $0xdac] sm:$0xf0] }
 0x1fd   :  { %v6831_v10 = vld [vmem:[#allocation8 + $0xf90] sm:$0xf]  ;;  %v6576_v21 = vor.u32 %v7379_v13, %v6575_v12  ;;  %4189 = vmatpush.bf16.msrb.mxu1 %v6288_v16 }
 0x1fe   :  { %v7443_v15 = vld [vmem:[#allocation8 + $0xfac] sm:$0xf0] }
 0x1ff   :  { %v5999_v19 = vld [vmem:[#allocation8 + $0x910] sm:$0xf]  ;;  %v6832_v24 = vor.u32 %v7443_v15, %v6831_v10  ;;  %4201 = vmatpush.bf16.msrb.mxu2 %v6576_v21  ;;  %v6999_v21 = vld [vmem:[#allocation8 + $0x1d4] sm:$0xf] }
 0x200   :  { %v7235_v20 = vld [vmem:[#allocation8 + $0x92c] sm:$0xf0] }
 0x201   :  { %v6255_v23 = vld [vmem:[#allocation8 + $0xb10] sm:$0xf]  ;;  %v6000_v27 = vor.u32 %v7235_v20, %v5999_v19  ;;  %4214 = vmatpush.bf16.msrb.mxu3 %v6832_v24  ;;  %v7763_v24 = vpop.f32.mrf.mxu2 }
 0x202   :  { %v7299_v18 = vld [vmem:[#allocation8 + $0xb2c] sm:$0xf0] }
 0x203   :  { %v6543_v25 = vld [vmem:[#allocation8 + $0xd50] sm:$0xf]  ;;  %v6256_v30 = vor.u32 %v7299_v18, %v6255_v23  ;;  %4177 = vmatpush.bf16.msrb.mxu0 %v6000_v27  ;;  %v5073_v23 = vld [vmem:[#allocation8 + $0x1f0] sm:$0xf0] }
 0x204   :  { %v7371_v26 = vld [vmem:[#allocation8 + $0xd6c] sm:$0xf0]  ;;  %v7063_v18 = vld [vmem:[#allocation8 + $0x3d4] sm:$0xf] }
 0x205   :  { %v6799_v28 = vld [vmem:[#allocation8 + $0xf50] sm:$0xf]  ;;  %v6544_v32 = vor.u32 %v7371_v26, %v6543_v25  ;;  %4190 = vmatpush.bf16.msrb.mxu1 %v6256_v30  ;;  %v5329_v26 = vld [vmem:[#allocation8 + $0x3f0] sm:$0xf0] }
 0x206   :  { %v7435_v29 = vld [vmem:[#allocation8 + $0xf6c] sm:$0xf0] }
 0x207   :  { %v5967_v53 = vld [vmem:[#allocation8 + $0x8d0] sm:$0xf]  ;;  %v6800_v36 = vor.u32 %v7435_v29, %v6799_v28  ;;  %4202 = vmatpush.bf16.msrb.mxu2 %v6544_v32  ;;  %v7765_v29 = vpop.f32.mrf.mxu3 }
 0x208   :  { %v7227_v31 = vld [vmem:[#allocation8 + $0x8ec] sm:$0xf0] }
 0x209   :  { %v6223_v33 = vld [vmem:[#allocation8 + $0xad0] sm:$0xf]  ;;  %v5968_v40 = vor.u32 %v7227_v31, %v5967_v53  ;;  %4215 = vmatpush.bf16.msrb.mxu3 %v6800_v36  ;;  %v5332_v36 = vor.u32 %v7063_v18, %v5329_v26  ;;  %v5521_v18 = vld [vmem:[#allocation8 + $0x570] sm:$0xf0] }
 0x20a   :  { %v7291_v34 = vld [vmem:[#allocation8 + $0xaec] sm:$0xf0]  ;;  %v7175_v26 = vld [vmem:[#allocation8 + $0x754] sm:$0xf] }
 0x20b   :  { %v6511_v38 = vld [vmem:[#allocation8 + $0xd10] sm:$0xf]  ;;  %v6224_v42 = vor.u32 %v7291_v34, %v6223_v33  ;;  %4178 = vmatpush.bf16.msrb.mxu0 %v5968_v40  ;;  %v5076_v33 = vor.u32 %v6999_v21, %v5073_v23  ;;  %v6991_v34 = vld [vmem:[#allocation8 + $0x194] sm:$0xf] }
 0x20c   :  { %v7363_v2 = vld [vmem:[#allocation8 + $0xd2c] sm:$0xf0]  ;;  %v7055_v40 = vld [vmem:[#allocation8 + $0x394] sm:$0xf] }
 0x20d   :  { %v6767_v37 = vld [vmem:[#allocation8 + $0xf10] sm:$0xf]  ;;  %v6512_v47 = vor.u32 %v7363_v2, %v6511_v38  ;;  %4191 = vmatpush.bf16.msrb.mxu1 %v6224_v42  ;;  %v5041_v2 = vld [vmem:[#allocation8 + $0x1b0] sm:$0xf0] }
 0x20e   :  { %v7427_v50 = vld [vmem:[#allocation8 + $0xf2c] sm:$0xf0]  ;;  %v7111_v23 = vld [vmem:[#allocation8 + $0x554] sm:$0xf] }
 0x20f   :  { %v5935_v45 = vld [vmem:[#allocation8 + $0x890] sm:$0xf]  ;;  %v6768_v51 = vor.u32 %v7427_v50, %v6767_v37  ;;  %4203 = vmatpush.bf16.msrb.mxu2 %v6512_v47  ;;  %v5297_v37 = vld [vmem:[#allocation8 + $0x3b0] sm:$0xf0] }
 0x210   :  { %v7219_v46 = vld [vmem:[#allocation8 + $0x8ac] sm:$0xf0] }
 0x211   :  { %v6191_v58 = vld [vmem:[#allocation8 + $0xa90] sm:$0xf]  ;;  %v5936_v55 = vor.u32 %v7219_v46, %v5935_v45  ;;  %4216 = vmatpush.bf16.msrb.mxu3 %v6768_v51  ;;  %v5044_v51 = vor.u32 %v6991_v34, %v5041_v2  ;;  %v3975_v34 = vpop.f32.mrf.mxu0  ;;  %v5489_v2 = vld [vmem:[#allocation8 + $0x530] sm:$0xf0] }
 0x212   :  { %v7283_v48 = vld [vmem:[#allocation8 + $0xaac] sm:$0xf0] }
 0x213   :  { %v6479_v52 = vld [vmem:[#allocation8 + $0xcd0] sm:$0xf]  ;;  %v6192_v3 = vor.u32 %v7283_v48, %v6191_v58  ;;  %4179 = vmatpush.bf16.msrb.mxu0 %v5936_v55  ;;  %v7127_v58 = vld [vmem:[#allocation8 + $0x5d4] sm:$0xf]  ;;  %v5300_v55 = vor.u32 %v7055_v40, %v5297_v37  ;;  %v3988_v37 = vpop.f32.mrf.mxu1 }
 0x214   :  { %v7355_v54 = vld [vmem:[#allocation8 + $0xcec] sm:$0xf0]  ;;  %v5585_v48 = vld [vmem:[#allocation8 + $0x5f0] sm:$0xf0] }
 0x215   :  { %v6735_v56 = vld [vmem:[#allocation8 + $0xed0] sm:$0xf]  ;;  %v6480_v62 = vor.u32 %v7355_v54, %v6479_v52  ;;  %4192 = vmatpush.bf16.msrb.mxu1 %v6192_v3  ;;  %v7191_v52 = vld [vmem:[#allocation8 + $0x7d4] sm:$0xf] }
 0x216   :  { %v7419_v59 = vld [vmem:[#allocation8 + $0xeec] sm:$0xf0]  ;;  %v5841_v54 = vld [vmem:[#allocation8 + $0x7f0] sm:$0xf0] }
 0x217   :  { %v5903_v60 = vld [vmem:[#allocation8 + $0x850] sm:$0xf]  ;;  %v6736_v4 = vor.u32 %v7419_v59, %v6735_v56  ;;  %4204 = vmatpush.bf16.msrb.mxu2 %v6480_v62  ;;  %v6983_v59 = vld [vmem:[#allocation8 + $0x154] sm:$0xf] }
 0x218   :  { %v7211_v61 = vld [vmem:[#allocation8 + $0x86c] sm:$0xf0]  ;;  %v5009_v3 = vld [vmem:[#allocation8 + $0x170] sm:$0xf0] }
 0x219   :  { %v6159_v63 = vld [vmem:[#allocation8 + $0xa50] sm:$0xf]  ;;  %v5904_v11 = vor.u32 %v7211_v61, %v5903_v60  ;;  %4217 = vmatpush.bf16.msrb.mxu3 %v6736_v4  ;;  %v1132_v60 = vperm.slane %v7734_v57, 2  ;;  %v3951_v61 = vpop.f32.mrf.mxu2  ;;  %v3964_v4 = vpop.f32.mrf.mxu3 }
 0x21a   :  { %v7275_v0 = vld [vmem:[#allocation8 + $0xa6c] sm:$0xf0]  ;;  %v6951_v61 = vld [vmem:[#allocation8 + $0x54] sm:$0xf] }
 0x21b   :  { %v6447_v5 = vld [vmem:[#allocation8 + $0xc90] sm:$0xf]  ;;  %v6160_v10 = vor.u32 %v7275_v0, %v6159_v63  ;;  %4180 = vmatpush.bf16.msrb.mxu0 %v5904_v11  ;;  %v5588_v63 = vor.u32 %v7127_v58, %v5585_v48  ;;  %v7047_v0 = vld [vmem:[#allocation8 + $0x354] sm:$0xf]  ;;  %v5012_v11 = vor.u32 %v6983_v59, %v5009_v3 }
 0x21c   :  { %v7347_v7 = vld [vmem:[#allocation8 + $0xcac] sm:$0xf0]  ;;  %v5268_v57 = vor.u32 %v7047_v0, %v5265_v1  ;;  %v7023_v48 = vld [vmem:[#allocation8 + $0x294] sm:$0xf] }
 0x21d   :  { %v6703_v12 = vld [vmem:[#allocation8 + $0xe90] sm:$0xf]  ;;  %v6448_v20 = vor.u32 %v7347_v7, %v6447_v5  ;;  %4193 = vmatpush.bf16.msrb.mxu1 %v6160_v10  ;;  %v5844_v5 = vor.u32 %v7191_v52, %v5841_v54  ;;  %v7119_v7 = vld [vmem:[#allocation8 + $0x594] sm:$0xf] }
 0x21e   :  { %v7411_v13 = vld [vmem:[#allocation8 + $0xeac] sm:$0xf0]  ;;  %v4977_v10 = vld [vmem:[#allocation8 + $0x130] sm:$0xf0] }
 0x21f   :  { %v5871_v14 = vld [vmem:[#allocation8 + $0x810] sm:$0xf]  ;;  %v6704_v25 = vor.u32 %v7411_v13, %v6703_v12  ;;  %4205 = vmatpush.bf16.msrb.mxu2 %v6448_v20  ;;  %v7183_v12 = vld [vmem:[#allocation8 + $0x794] sm:$0xf] }
 0x220   :  { %v7203_v15 = vld [vmem:[#allocation8 + $0x82c] sm:$0xf0]  ;;  %v5809_v13 = vld [vmem:[#allocation8 + $0x7b0] sm:$0xf0] }
 0x221   :  { %v6127_v16 = vld [vmem:[#allocation8 + $0xa10] sm:$0xf]  ;;  %v5872_v30 = vor.u32 %v7203_v15, %v5871_v14  ;;  %4218 = vmatpush.bf16.msrb.mxu3 %v6704_v25  ;;  %v6975_v14 = vld [vmem:[#allocation8 + $0x114] sm:$0xf]  ;;  %v3924_v15 = vadd.f32 %v7759_v35, %v1132_v60  ;;  %v5812_v21 = vor.u32 %v7183_v12, %v5809_v13  ;;  %v3990_v12 = vpop.f32.mrf.mxu1 }
 0x222   :  { %v7267_v19 = vld [vmem:[#allocation8 + $0xa2c] sm:$0xf0]  ;;  %v5233_v20 = vld [vmem:[#allocation8 + $0x330] sm:$0xf0]  ;;  %v4980_v25 = vor.u32 %v6975_v14, %v4977_v10 }
 0x223   :  { %v6415_v27 = vld [vmem:[#allocation8 + $0xc50] sm:$0xf]  ;;  %v6128_v32 = vor.u32 %v7267_v19, %v6127_v16  ;;  %4181 = vmatpush.bf16.msrb.mxu0 %v5872_v30  ;;  %v5556_v16 = vor.u32 %v7119_v7, %v5553_v8  ;;  %v7039_v19 = vld [vmem:[#allocation8 + $0x314] sm:$0xf] }
 0x224   :  { %v7339_v28 = vld [vmem:[#allocation8 + $0xc6c] sm:$0xf0]  ;;  %v6967_v35 = vld [vmem:[#allocation8 + $0xd4] sm:$0xf] }
 0x225   :  { %v6671_v53 = vld [vmem:[#allocation8 + $0xe50] sm:$0xf]  ;;  %v6416_v38 = vor.u32 %v7339_v28, %v6415_v27  ;;  %4194 = vmatpush.bf16.msrb.mxu1 %v6128_v32  ;;  %v5777_v27 = vld [vmem:[#allocation8 + $0x770] sm:$0xf0]  ;;  %v5236_v28 = vor.u32 %v7039_v19, %v5233_v20 }
 0x226   :  { %v7403_v31 = vld [vmem:[#allocation8 + $0xe6c] sm:$0xf0]  ;;  %4182 = vmatmul.bf16.vlgmr.msrb.gmra.mxu0 %v7699_v6  ;;  %v4945_v30 = vld [vmem:[#allocation8 + $0xf0] sm:$0xf0] }
 0x227   :  { %v6672_v50 = vor.u32 %v7403_v31, %v6671_v53  ;;  %v6383_v42 = vld [vmem:[#allocation8 + $0xc10] sm:$0xf]  ;;  %4226 = vmatpush.bf16.msra.mxu0 %v5076_v33  ;;  %4206 = vmatpush.bf16.msrb.mxu2 %v6416_v38  ;;  %v3937_v53 = vadd.f32 %v7761_v39, %v3924_v15  ;;  %v5524_v31 = vor.u32 %v7111_v23, %v5521_v18  ;;  %v7031_v32 = vld [vmem:[#allocation8 + $0x2d4] sm:$0xf] }
 0x228   :  { %v7331_v45 = vld [vmem:[#allocation8 + $0xc2c] sm:$0xf0]  ;;  %4195 = vmatmul.bf16.vlgmr.msrb.gmra.mxu1 %v7702_v9  ;;  %v5201_v33 = vld [vmem:[#allocation8 + $0x2f0] sm:$0xf0] }
 0x229   :  { %v6639_v46 = vld [vmem:[#allocation8 + $0xe10] sm:$0xf]  ;;  %4239 = vmatpush.bf16.msra.mxu1 %v5332_v36  ;;  %v6384_v56 = vor.u32 %v7331_v45, %v6383_v42  ;;  %4219 = vmatpush.bf16.msrb.mxu3 %v6672_v50  ;;  %v5780_v36 = vor.u32 %v7175_v26, %v5777_v27  ;;  %v7103_v38 = vld [vmem:[#allocation8 + $0x514] sm:$0xf]  ;;  %v3950_v40 = vadd.f32 %v7763_v24, %v3937_v53  ;;  %v4001_v26 = vpop.f32.mrf.mxu2 }
 0x22a   :  { %v7395_v47 = vld [vmem:[#allocation8 + $0xe2c] sm:$0xf0]  ;;  %v4948_v50 = vor.u32 %v6967_v35, %v4945_v30  ;;  %v7167_v42 = vld [vmem:[#allocation8 + $0x714] sm:$0xf]  ;;  %v5492_v58 = vor.u32 %v7103_v38, %v5489_v2 }
 0x22b   :  { %v6640_v62 = vor.u32 %v7395_v47, %v6639_v46  ;;  %4227 = vmatpush.bf16.msra.mxu0 %v5044_v51  ;;  %4207 = vmatpush.bf16.msrb.mxu2 %v6384_v56  ;;  %v5745_v45 = vld [vmem:[#allocation8 + $0x730] sm:$0xf0]  ;;  %v5204_v46 = vor.u32 %v7031_v32, %v5201_v33  ;;  %v3963_v56 = vadd.f32 %v7765_v29, %v3950_v40 }
 0x22c   :  { %v6959_v47 = vld [vmem:[#allocation8 + $0x94] sm:$0xf]  ;;  %v5748_v52 = vor.u32 %v7167_v42, %v5745_v45 }
 0x22d   :  { %4240 = vmatpush.bf16.msra.mxu1 %v5300_v55  ;;  %4220 = vmatpush.bf16.msrb.mxu3 %v6640_v62  ;;  %v4913_v39 = vld [vmem:[#allocation8 + $0xb0] sm:$0xf0] }
 0x22e   :  { %4208 = vmatmul.bf16.vlgmr.msrb.gmra.mxu2 %v7706_v41  ;;  %v5169_v51 = vld [vmem:[#allocation8 + $0x2b0] sm:$0xf0]  ;;  %v4916_v24 = vor.u32 %v6959_v47, %v4913_v39 }
 0x22f   :  { %4252 = vmatpush.bf16.msra.mxu2 %v5588_v63  ;;  %4228 = vmatpush.bf16.msra.mxu0 %v5012_v11  ;;  %v7095_v54 = vld [vmem:[#allocation8 + $0x4d4] sm:$0xf]  ;;  %v5172_v60 = vor.u32 %v7023_v48, %v5169_v51  ;;  %v3976_v63 = vadd.f32 %v3975_v34, %v3963_v56 }
 0x230   :  { %4221 = vmatmul.bf16.vlgmr.msrb.gmra.mxu3 %v7708_v44  ;;  %v5457_v55 = vld [vmem:[#allocation8 + $0x4f0] sm:$0xf0] }
 0x231   :  { %4265 = vmatpush.bf16.msra.mxu3 %v5844_v5  ;;  %4241 = vmatpush.bf16.msra.mxu1 %v5268_v57  ;;  %v7159_v59 = vld [vmem:[#allocation8 + $0x6d4] sm:$0xf]  ;;  %v5460_v0 = vor.u32 %v7095_v54, %v5457_v55  ;;  %v3977_v5 = vpop.f32.mrf.mxu0  ;;  %v3989_v20 = vadd.f32 %v3988_v37, %v3976_v63  ;;  %v4003_v63 = vpop.f32.mrf.mxu2 }
 0x232   :  { %v5713_v3 = vld [vmem:[#allocation8 + $0x6f0] sm:$0xf0] }
 0x233   :  { %4253 = vmatpush.bf16.msra.mxu2 %v5556_v16  ;;  %4229 = vmatpush.bf16.msra.mxu0 %v4980_v25  ;;  %v4881_v62 = vld [vmem:[#allocation8 + $0x70] sm:$0xf0]  ;;  %v5716_v7 = vor.u32 %v7159_v59, %v5713_v3  ;;  %v4002_v53 = vadd.f32 %v4001_v26, %v3989_v20 }
 0x234   :  { %v7015_v1 = vld [vmem:[#allocation8 + $0x254] sm:$0xf]  ;;  %v4884_v29 = vor.u32 %v6951_v61, %v4881_v62 }
 0x235   :  { %4266 = vmatpush.bf16.msra.mxu3 %v5812_v21  ;;  %4242 = vmatpush.bf16.msra.mxu1 %v5236_v28  ;;  %v5137_v4 = vld [vmem:[#allocation8 + $0x270] sm:$0xf0] }
 0x236   :  { %v7087_v8 = vld [vmem:[#allocation8 + $0x494] sm:$0xf]  ;;  %v5140_v10 = vor.u32 %v7015_v1, %v5137_v4 }
 0x237   :  { %4254 = vmatpush.bf16.msra.mxu2 %v5524_v31  ;;  %4230 = vmatpush.bf16.msra.mxu0 %v4948_v50  ;;  %v5425_v11 = vld [vmem:[#allocation8 + $0x4b0] sm:$0xf0]  ;;  %v4014_v31 = vpop.f32.mrf.mxu3 }
 0x238   :  { %v7151_v13 = vld [vmem:[#allocation8 + $0x694] sm:$0xf]  ;;  %v5428_v21 = vor.u32 %v7087_v8, %v5425_v11  ;;  %v4015_v37 = vadd.f32 %v4014_v31, %v4002_v53 }
 0x239   :  { %4267 = vmatpush.bf16.msra.mxu3 %v5780_v36  ;;  %4243 = vmatpush.bf16.msra.mxu1 %v5204_v46  ;;  %v5681_v57 = vld [vmem:[#allocation8 + $0x6b0] sm:$0xf0] }
 0x23a   :  { %v6943_v14 = vld [vmem:[#allocation8 + $0x14] sm:$0xf]  ;;  %v5684_v27 = vor.u32 %v7151_v13, %v5681_v57 }
 0x23b   :  { %4255 = vmatpush.bf16.msra.mxu2 %v5492_v58  ;;  %4231 = vmatpush.bf16.msra.mxu0 %v4916_v24  ;;  %v4849_v15 = vld [vmem:[#allocation8 + $0x30] sm:$0xf0] }
 0x23c   :  { %v7007_v16 = vld [vmem:[#allocation8 + $0x214] sm:$0xf]  ;;  %v4852_v32 = vor.u32 %v6943_v14, %v4849_v15 }
 0x23d   :  { %4268 = vmatpush.bf16.msra.mxu3 %v5748_v52  ;;  %4244 = vmatpush.bf16.msra.mxu1 %v5172_v60  ;;  %v5105_v19 = vld [vmem:[#allocation8 + $0x230] sm:$0xf0]  ;;  %v4540_v52 = vmax.f32 %v4015_v37, 0.0 }
 0x23e   :  { %v7255_v23 = vld [vmem:[#allocation8 + $0x9d4] sm:$0xf]  ;;  %v5108_v36 = vor.u32 %v7007_v16, %v5105_v19 }
 0x23f   :  { %4256 = vmatpush.bf16.msra.mxu2 %v5460_v0  ;;  %v6097_v18 = vld [vmem:[#allocation8 + $0x9f0] sm:$0xf0]  ;;  %4232 = vmatpush.bf16.msra.mxu0 %v4884_v29  ;;  %4548 = vst [vmem:[#allocation11 + $0x10] sm:$0xff] %v4540_v52 }
 0x240   :  { %v7319_v25 = vld [vmem:[#allocation8 + $0xbd4] sm:$0xf]  ;;  %v6100_v38 = vor.u32 %v7255_v23, %v6097_v18 }
 0x241   :  { %4269 = vmatpush.bf16.msra.mxu3 %v5716_v7  ;;  %v6353_v28 = vld [vmem:[#allocation8 + $0xbf0] sm:$0xf0]  ;;  %4245 = vmatpush.bf16.msra.mxu1 %v5140_v10  ;;  %v4016_v7 = vpop.f32.mrf.mxu3 }
 0x242   :  { %v7079_v35 = vld [vmem:[#allocation8 + $0x454] sm:$0xf]  ;;  %v6356_v50 = vor.u32 %v7319_v25, %v6353_v28 }
 0x243   :  { %v5393_v30 = vld [vmem:[#allocation8 + $0x470] sm:$0xf0]  ;;  %4257 = vmatpush.bf16.msra.mxu2 %v5428_v21  ;;  %4233 = vmatpush.bf16.msra.mxu0 %v4852_v32 }
 0x244   :  { %v7143_v33 = vld [vmem:[#allocation8 + $0x654] sm:$0xf]  ;;  %v5396_v42 = vor.u32 %v7079_v35, %v5393_v30 }
 0x245   :  { %v5649_v34 = vld [vmem:[#allocation8 + $0x670] sm:$0xf0]  ;;  %4270 = vmatpush.bf16.msra.mxu3 %v5684_v27  ;;  %4246 = vmatpush.bf16.msra.mxu1 %v5108_v36 }
 0x246   :  { %v7247_v2 = vld [vmem:[#allocation8 + $0x994] sm:$0xf]  ;;  %v5652_v39 = vor.u32 %v7143_v33, %v5649_v34  ;;  %4234 = vmatmul.bf16.vlgmr.msra.gmra.mxu0 %v7683_v17  ;;  %v7780_v33 = vpop.f32.mrf.mxu0 }
 0x247   :  { %v6065_v40 = vld [vmem:[#allocation8 + $0x9b0] sm:$0xf0]  ;;  %4278 = vmatpush.bf16.msrb.mxu0 %v6100_v38  ;;  %4258 = vmatpush.bf16.msra.mxu2 %v5396_v42 }
 0x248   :  { %v7311_v45 = vld [vmem:[#allocation8 + $0xb94] sm:$0xf]  ;;  %v6068_v56 = vor.u32 %v7247_v2, %v6065_v40  ;;  %4247 = vmatmul.bf16.vlgmr.msra.gmra.mxu1 %v7686_v22  ;;  %v7782_v2 = vpop.f32.mrf.mxu1 }
 0x249   :  { %v6321_v46 = vld [vmem:[#allocation8 + $0xbb0] sm:$0xf0]  ;;  %4291 = vmatpush.bf16.msrb.mxu1 %v6356_v50  ;;  %4271 = vmatpush.bf16.msra.mxu3 %v5652_v39 }
 0x24a   :  { %v7071_v47 = vld [vmem:[#allocation8 + $0x414] sm:$0xf]  ;;  %v6324_v3 = vor.u32 %v7311_v45, %v6321_v46 }
 0x24b   :  { %v5361_v58 = vld [vmem:[#allocation8 + $0x430] sm:$0xf0]  ;;  %4279 = vmatpush.bf16.msrb.mxu0 %v6068_v56 }
 0x24c   :  { %v7135_v48 = vld [vmem:[#allocation8 + $0x614] sm:$0xf]  ;;  %v5364_v60 = vor.u32 %v7071_v47, %v5361_v58 }
 0x24d   :  { %v5617_v51 = vld [vmem:[#allocation8 + $0x630] sm:$0xf0]  ;;  %4292 = vmatpush.bf16.msrb.mxu1 %v6324_v3 }
 0x24e   :  { %v7383_v54 = vld [vmem:[#allocation8 + $0xdd4] sm:$0xf]  ;;  %v5620_v0 = vor.u32 %v7135_v48, %v5617_v51  ;;  %4259 = vmatpush.bf16.msra.mxu2 %v5364_v60  ;;  %v4029_v63 = vpop.f32.mrf.mxu0 }
 0x24f   :  { %v6609_v55 = vld [vmem:[#allocation8 + $0xdf0] sm:$0xf0]  ;;  %v7052_v63 = vld [vmem:[#allocation8 + $0x374] sm:$0xf0] }
 0x250   :  { %v7447_v24 = vld [vmem:[#allocation8 + $0xfd4] sm:$0xf]  ;;  %v6612_v1 = vor.u32 %v7383_v54, %v6609_v55  ;;  %4272 = vmatpush.bf16.msra.mxu3 %v5620_v0 }
 0x251   :  { %v6865_v59 = vld [vmem:[#allocation8 + $0xff0] sm:$0xf0]  ;;  %4260 = vmatmul.bf16.vlgmr.msra.gmra.mxu2 %v7690_v43 }
 0x252   :  { %v7239_v61 = vld [vmem:[#allocation8 + $0x954] sm:$0xf]  ;;  %v6868_v8 = vor.u32 %v7447_v24, %v6865_v59  ;;  %4304 = vmatpush.bf16.msrb.mxu2 %v6612_v1 }
 0x253   :  { %v6033_v62 = vld [vmem:[#allocation8 + $0x970] sm:$0xf0]  ;;  %4273 = vmatmul.bf16.vlgmr.msra.gmra.mxu3 %v7692_v49 }
 0x254   :  { %v7303_v4 = vld [vmem:[#allocation8 + $0xb54] sm:$0xf]  ;;  %v6036_v29 = vor.u32 %v7239_v61, %v6033_v62  ;;  %4317 = vmatpush.bf16.msrb.mxu3 %v6868_v8 }
 0x255   :  { %v6289_v5 = vld [vmem:[#allocation8 + $0xb70] sm:$0xf0] }
 0x256   :  { %v7375_v11 = vld [vmem:[#allocation8 + $0xd94] sm:$0xf]  ;;  %v6292_v14 = vor.u32 %v7303_v4, %v6289_v5  ;;  %4280 = vmatpush.bf16.msrb.mxu0 %v6036_v29  ;;  %v4042_v5 = vpop.f32.mrf.mxu1 }
 0x257   :  { %v6577_v12 = vld [vmem:[#allocation8 + $0xdb0] sm:$0xf0]  ;;  %v7124_v5 = vld [vmem:[#allocation8 + $0x5b4] sm:$0xf0] }
 0x258   :  { %v7439_v13 = vld [vmem:[#allocation8 + $0xf94] sm:$0xf]  ;;  %v6580_v16 = vor.u32 %v7375_v11, %v6577_v12  ;;  %4293 = vmatpush.bf16.msrb.mxu1 %v6292_v14 }
 0x259   :  { %v6833_v57 = vld [vmem:[#allocation8 + $0xfb0] sm:$0xf0] }
 0x25a   :  { %v7231_v10 = vld [vmem:[#allocation8 + $0x914] sm:$0xf]  ;;  %v6836_v21 = vor.u32 %v7439_v13, %v6833_v57  ;;  %4305 = vmatpush.bf16.msrb.mxu2 %v6580_v16  ;;  %v7004_v16 = vld [vmem:[#allocation8 + $0x1f4] sm:$0xf0] }
 0x25b   :  { %v6001_v15 = vld [vmem:[#allocation8 + $0x930] sm:$0xf0] }
 0x25c   :  { %v7295_v19 = vld [vmem:[#allocation8 + $0xb14] sm:$0xf]  ;;  %v6004_v25 = vor.u32 %v7231_v10, %v6001_v15  ;;  %4318 = vmatpush.bf16.msrb.mxu3 %v6836_v21  ;;  %v5079_v15 = vld [vmem:[#allocation8 + $0x1d8] sm:$0xf] }
 0x25d   :  { %v6257_v20 = vld [vmem:[#allocation8 + $0xb30] sm:$0xf0] }
 0x25e   :  { %v7367_v23 = vld [vmem:[#allocation8 + $0xd54] sm:$0xf]  ;;  %v6260_v28 = vor.u32 %v7295_v19, %v6257_v20  ;;  %4281 = vmatpush.bf16.msrb.mxu0 %v6004_v25  ;;  %v5335_v19 = vld [vmem:[#allocation8 + $0x3d8] sm:$0xf]  ;;  %v7784_v20 = vpop.f32.mrf.mxu2 }
 0x25f   :  { %v6545_v18 = vld [vmem:[#allocation8 + $0xd70] sm:$0xf0] }
 0x260   :  { %v7431_v26 = vld [vmem:[#allocation8 + $0xf54] sm:$0xf]  ;;  %v6548_v53 = vor.u32 %v7367_v23, %v6545_v18  ;;  %4294 = vmatpush.bf16.msrb.mxu1 %v6260_v28  ;;  %v7068_v23 = vld [vmem:[#allocation8 + $0x3f4] sm:$0xf0] }
 0x261   :  { %v6801_v27 = vld [vmem:[#allocation8 + $0xf70] sm:$0xf0] }
 0x262   :  { %v7223_v35 = vld [vmem:[#allocation8 + $0x8d4] sm:$0xf]  ;;  %v6804_v34 = vor.u32 %v7431_v26, %v6801_v27  ;;  %4306 = vmatpush.bf16.msrb.mxu2 %v6548_v53  ;;  %v7786_v26 = vpop.f32.mrf.mxu3  ;;  %v5080_v53 = vor.u32 %v7004_v16, %v5079_v15  ;;  %v7044_v15 = vld [vmem:[#allocation8 + $0x334] sm:$0xf0] }
 0x263   :  { %v5969_v30 = vld [vmem:[#allocation8 + $0x8f0] sm:$0xf0] }
 0x264   :  { %v7287_v31 = vld [vmem:[#allocation8 + $0xad4] sm:$0xf]  ;;  %v5972_v40 = vor.u32 %v7223_v35, %v5969_v30  ;;  %4319 = vmatpush.bf16.msrb.mxu3 %v6804_v34 }
 0x265   :  { %v6225_v32 = vld [vmem:[#allocation8 + $0xaf0] sm:$0xf0] }
 0x266   :  { %v7359_v36 = vld [vmem:[#allocation8 + $0xd14] sm:$0xf]  ;;  %v6228_v42 = vor.u32 %v7287_v31, %v6225_v32  ;;  %4282 = vmatpush.bf16.msrb.mxu0 %v5972_v40  ;;  %v5047_v31 = vld [vmem:[#allocation8 + $0x198] sm:$0xf]  ;;  %v5336_v32 = vor.u32 %v7068_v23, %v5335_v19 }
 0x267   :  { %v6513_v38 = vld [vmem:[#allocation8 + $0xd30] sm:$0xf0]  ;;  %v7060_v40 = vld [vmem:[#allocation8 + $0x3b4] sm:$0xf0] }
 0x268   :  { %v7423_v37 = vld [vmem:[#allocation8 + $0xf14] sm:$0xf]  ;;  %v6516_v47 = vor.u32 %v7359_v36, %v6513_v38  ;;  %4295 = vmatpush.bf16.msrb.mxu1 %v6228_v42  ;;  %v6996_v36 = vld [vmem:[#allocation8 + $0x1b4] sm:$0xf0] }
 0x269   :  { %v6769_v50 = vld [vmem:[#allocation8 + $0xf30] sm:$0xf0]  ;;  %v5303_v38 = vld [vmem:[#allocation8 + $0x398] sm:$0xf] }
 0x26a   :  { %v7215_v45 = vld [vmem:[#allocation8 + $0x894] sm:$0xf]  ;;  %v6772_v48 = vor.u32 %v7423_v37, %v6769_v50  ;;  %4307 = vmatpush.bf16.msrb.mxu2 %v6516_v47  ;;  %v5591_v47 = vld [vmem:[#allocation8 + $0x5d8] sm:$0xf] }
 0x26b   :  { %v5937_v46 = vld [vmem:[#allocation8 + $0x8b0] sm:$0xf0]  ;;  %v5527_v19 = vld [vmem:[#allocation8 + $0x558] sm:$0xf] }
 0x26c   :  { %v7279_v39 = vld [vmem:[#allocation8 + $0xa94] sm:$0xf]  ;;  %v5940_v54 = vor.u32 %v7215_v45, %v5937_v46  ;;  %4320 = vmatpush.bf16.msrb.mxu3 %v6772_v48  ;;  %v5847_v48 = vld [vmem:[#allocation8 + $0x7d8] sm:$0xf] }
 0x26d   :  { %v6193_v58 = vld [vmem:[#allocation8 + $0xab0] sm:$0xf0] }
 0x26e   :  { %v7351_v51 = vld [vmem:[#allocation8 + $0xcd4] sm:$0xf]  ;;  %v6196_v24 = vor.u32 %v7279_v39, %v6193_v58  ;;  %4283 = vmatpush.bf16.msrb.mxu0 %v5940_v54  ;;  %v7132_v39 = vld [vmem:[#allocation8 + $0x5f4] sm:$0xf0]  ;;  %v5048_v58 = vor.u32 %v6996_v36, %v5047_v31 }
 0x26f   :  { %v6481_v52 = vld [vmem:[#allocation8 + $0xcf0] sm:$0xf0]  ;;  %v7036_v31 = vld [vmem:[#allocation8 + $0x2f4] sm:$0xf0] }
 0x270   :  { %v7415_v55 = vld [vmem:[#allocation8 + $0xed4] sm:$0xf]  ;;  %v6484_v60 = vor.u32 %v7351_v51, %v6481_v52  ;;  %4296 = vmatpush.bf16.msrb.mxu1 %v6196_v24  ;;  %v7196_v51 = vld [vmem:[#allocation8 + $0x7f4] sm:$0xf0]  ;;  %v5304_v52 = vor.u32 %v7060_v40, %v5303_v38  ;;  %v7788_v24 = vld [vmem:[#allocation10] sm:$0xff] }
 0x271   :  { %v6737_v56 = vld [vmem:[#allocation8 + $0xef0] sm:$0xf0]  ;;  %v5495_v36 = vld [vmem:[#allocation8 + $0x518] sm:$0xf] }
 0x272   :  { %v7207_v59 = vld [vmem:[#allocation8 + $0x854] sm:$0xf]  ;;  %v6740_v0 = vor.u32 %v7415_v55, %v6737_v56  ;;  %4308 = vmatpush.bf16.msrb.mxu2 %v6484_v60  ;;  %v5015_v55 = vld [vmem:[#allocation8 + $0x158] sm:$0xf] }
 0x273   :  { %v5905_v3 = vld [vmem:[#allocation8 + $0x870] sm:$0xf0]  ;;  %v6988_v56 = vld [vmem:[#allocation8 + $0x174] sm:$0xf0] }
 0x274   :  { %v7271_v61 = vld [vmem:[#allocation8 + $0xa54] sm:$0xf]  ;;  %v5908_v7 = vor.u32 %v7207_v59, %v5905_v3  ;;  %4321 = vmatpush.bf16.msrb.mxu3 %v6740_v0  ;;  %v1133_v59 = vperm.slane %v7788_v24, 3  ;;  %v4055_v3 = vpop.f32.mrf.mxu2  ;;  %v4068_v0 = vpop.f32.mrf.mxu3  ;;  %v7108_v38 = vld [vmem:[#allocation8 + $0x534] sm:$0xf0] }
 0x275   :  { %v6161_v62 = vld [vmem:[#allocation8 + $0xa70] sm:$0xf0]  ;;  %v5143_v0 = vld [vmem:[#allocation8 + $0x258] sm:$0xf] }
 0x276   :  { %v7343_v1 = vld [vmem:[#allocation8 + $0xc94] sm:$0xf]  ;;  %v6164_v29 = vor.u32 %v7271_v61, %v6161_v62  ;;  %4284 = vmatpush.bf16.msrb.mxu0 %v5908_v7  ;;  %v5592_v61 = vor.u32 %v7132_v39, %v5591_v47  ;;  %v5271_v62 = vld [vmem:[#allocation8 + $0x358] sm:$0xf]  ;;  %v5016_v7 = vor.u32 %v6988_v56, %v5015_v55  ;;  %v5496_v39 = vor.u32 %v7108_v38, %v5495_v36 }
 0x277   :  { %v6449_v4 = vld [vmem:[#allocation8 + $0xcb0] sm:$0xf0]  ;;  %v4919_v47 = vld [vmem:[#allocation8 + $0x98] sm:$0xf] }
 0x278   :  { %v7407_v8 = vld [vmem:[#allocation8 + $0xe94] sm:$0xf]  ;;  %v6452_v10 = vor.u32 %v7343_v1, %v6449_v4  ;;  %4297 = vmatpush.bf16.msrb.mxu1 %v6164_v29  ;;  %v5848_v1 = vor.u32 %v7196_v51, %v5847_v48  ;;  %v5559_v4 = vld [vmem:[#allocation8 + $0x598] sm:$0xf] }
 0x279   :  { %v6705_v11 = vld [vmem:[#allocation8 + $0xeb0] sm:$0xf0]  ;;  %v4983_v29 = vld [vmem:[#allocation8 + $0x118] sm:$0xf] }
 0x27a   :  { %v7199_v12 = vld [vmem:[#allocation8 + $0x814] sm:$0xf]  ;;  %v6708_v21 = vor.u32 %v7407_v8, %v6705_v11  ;;  %4309 = vmatpush.bf16.msrb.mxu2 %v6452_v10  ;;  %v5815_v8 = vld [vmem:[#allocation8 + $0x798] sm:$0xf] }
 0x27b   :  { %v5873_v13 = vld [vmem:[#allocation8 + $0x830] sm:$0xf0]  ;;  %v7188_v11 = vld [vmem:[#allocation8 + $0x7b4] sm:$0xf0] }
 0x27c   :  { %v7263_v57 = vld [vmem:[#allocation8 + $0xa14] sm:$0xf]  ;;  %v5876_v27 = vor.u32 %v7199_v12, %v5873_v13  ;;  %4322 = vmatpush.bf16.msrb.mxu3 %v6708_v21  ;;  %v5272_v12 = vor.u32 %v7052_v63, %v5271_v62  ;;  %v6980_v13 = vld [vmem:[#allocation8 + $0x134] sm:$0xf0]  ;;  %v5816_v16 = vor.u32 %v7188_v11, %v5815_v8 }
 0x27d   :  { %v6129_v14 = vld [vmem:[#allocation8 + $0xa30] sm:$0xf0]  ;;  %v5239_v10 = vld [vmem:[#allocation8 + $0x318] sm:$0xf]  ;;  %v4984_v23 = vor.u32 %v6980_v13, %v4983_v29 }
 0x27e   :  { %v7335_v18 = vld [vmem:[#allocation8 + $0xc54] sm:$0xf]  ;;  %v6132_v30 = vor.u32 %v7263_v57, %v6129_v14  ;;  %4285 = vmatpush.bf16.msrb.mxu0 %v5876_v27  ;;  %v4028_v57 = vadd.f32 %v7780_v33, %v1133_v59  ;;  %v5560_v14 = vor.u32 %v7124_v5, %v5559_v4  ;;  %v7116_v21 = vld [vmem:[#allocation8 + $0x574] sm:$0xf0]  ;;  %v5240_v27 = vor.u32 %v7044_v15, %v5239_v10 }
 0x27f   :  { %v6417_v25 = vld [vmem:[#allocation8 + $0xc70] sm:$0xf0]  ;;  %v4951_v33 = vld [vmem:[#allocation8 + $0xd8] sm:$0xf] }
 0x280   :  { %v7399_v28 = vld [vmem:[#allocation8 + $0xe54] sm:$0xf]  ;;  %v6420_v34 = vor.u32 %v7335_v18, %v6417_v25  ;;  %4298 = vmatpush.bf16.msrb.mxu1 %v6132_v30  ;;  %v5783_v18 = vld [vmem:[#allocation8 + $0x758] sm:$0xf]  ;;  %v5528_v30 = vor.u32 %v7116_v21, %v5527_v19 }
 0x281   :  { %v6673_v35 = vld [vmem:[#allocation8 + $0xe70] sm:$0xf0]  ;;  %4286 = vmatmul.bf16.vlgmr.msrb.gmra.mxu0 %v7699_v6  ;;  %v7180_v25 = vld [vmem:[#allocation8 + $0x774] sm:$0xf0] }
 0x282   :  { %v6676_v37 = vor.u32 %v7399_v28, %v6673_v35  ;;  %v7327_v50 = vld [vmem:[#allocation8 + $0xc14] sm:$0xf]  ;;  %4330 = vmatpush.bf16.msra.mxu0 %v5080_v53  ;;  %4310 = vmatpush.bf16.msrb.mxu2 %v6420_v34  ;;  %v6972_v28 = vld [vmem:[#allocation8 + $0xf4] sm:$0xf0]  ;;  %v4041_v35 = vadd.f32 %v7782_v2, %v4028_v57  ;;  %v5784_v34 = vor.u32 %v7180_v25, %v5783_v18  ;;  %v4105_v25 = vpop.f32.mrf.mxu2 }
 0x283   :  { %v6385_v42 = vld [vmem:[#allocation8 + $0xc30] sm:$0xf0]  ;;  %4299 = vmatmul.bf16.vlgmr.msrb.gmra.mxu1 %v7702_v9  ;;  %v5207_v53 = vld [vmem:[#allocation8 + $0x2d8] sm:$0xf] }
 0x284   :  { %v7391_v45 = vld [vmem:[#allocation8 + $0xe14] sm:$0xf]  ;;  %4343 = vmatpush.bf16.msra.mxu1 %v5336_v32  ;;  %v6388_v54 = vor.u32 %v7327_v50, %v6385_v42  ;;  %4323 = vmatpush.bf16.msrb.mxu3 %v6676_v37  ;;  %v4079_v32 = vpop.f32.mrf.mxu0  ;;  %v4054_v40 = vadd.f32 %v7784_v20, %v4041_v35  ;;  %v4092_v37 = vpop.f32.mrf.mxu1  ;;  %v4952_v50 = vor.u32 %v6972_v28, %v4951_v33  ;;  %v5751_v42 = vld [vmem:[#allocation8 + $0x718] sm:$0xf] }
 0x285   :  { %v6641_v46 = vld [vmem:[#allocation8 + $0xe30] sm:$0xf0]  ;;  %v6964_v2 = vld [vmem:[#allocation8 + $0xb4] sm:$0xf0] }
 0x286   :  { %v6644_v60 = vor.u32 %v7391_v45, %v6641_v46  ;;  %4331 = vmatpush.bf16.msra.mxu0 %v5048_v58  ;;  %4311 = vmatpush.bf16.msrb.mxu2 %v6388_v54  ;;  %v7172_v45 = vld [vmem:[#allocation8 + $0x734] sm:$0xf0]  ;;  %v5208_v46 = vor.u32 %v7036_v31, %v5207_v53  ;;  %v4067_v55 = vadd.f32 %v7786_v26, %v4054_v40  ;;  %v4118_v53 = vpop.f32.mrf.mxu3 }
 0x287   :  { %v5175_v58 = vld [vmem:[#allocation8 + $0x298] sm:$0xf]  ;;  %v5752_v51 = vor.u32 %v7172_v45, %v5751_v42  ;;  %v4920_v20 = vor.u32 %v6964_v2, %v4919_v47 }
 0x288   :  { %4344 = vmatpush.bf16.msra.mxu1 %v5304_v52  ;;  %4324 = vmatpush.bf16.msrb.mxu3 %v6644_v60  ;;  %v7028_v48 = vld [vmem:[#allocation8 + $0x2b4] sm:$0xf0]  ;;  %v4080_v62 = vadd.f32 %v4079_v32, %v4067_v55 }
 0x289   :  { %4312 = vmatmul.bf16.vlgmr.msrb.gmra.mxu2 %v7706_v41  ;;  %v5463_v52 = vld [vmem:[#allocation8 + $0x4d8] sm:$0xf]  ;;  %v5176_v3 = vor.u32 %v7028_v48, %v5175_v58 }
 0x28a   :  { %4356 = vmatpush.bf16.msra.mxu2 %v5592_v61  ;;  %4332 = vmatpush.bf16.msra.mxu0 %v5016_v7  ;;  %v7100_v54 = vld [vmem:[#allocation8 + $0x4f4] sm:$0xf0] }
 0x28b   :  { %4325 = vmatmul.bf16.vlgmr.msrb.gmra.mxu3 %v7708_v44  ;;  %v5719_v56 = vld [vmem:[#allocation8 + $0x6d8] sm:$0xf]  ;;  %v5464_v63 = vor.u32 %v7100_v54, %v5463_v52 }
 0x28c   :  { %4369 = vmatpush.bf16.msra.mxu3 %v5848_v1  ;;  %4345 = vmatpush.bf16.msra.mxu1 %v5272_v12  ;;  %v7164_v59 = vld [vmem:[#allocation8 + $0x6f4] sm:$0xf0]  ;;  %v4081_v4 = vpop.f32.mrf.mxu0  ;;  %v4094_v11 = vpop.f32.mrf.mxu1 }
 0x28d   :  { %v4887_v60 = vld [vmem:[#allocation8 + $0x58] sm:$0xf]  ;;  %v5720_v5 = vor.u32 %v7164_v59, %v5719_v56 }
 0x28e   :  { %4357 = vmatpush.bf16.msra.mxu2 %v5560_v14  ;;  %4333 = vmatpush.bf16.msra.mxu0 %v4984_v23  ;;  %v6956_v61 = vld [vmem:[#allocation8 + $0x74] sm:$0xf0] }
 0x28f   :  { %v7020_v1 = vld [vmem:[#allocation8 + $0x274] sm:$0xf0]  ;;  %v4888_v26 = vor.u32 %v6956_v61, %v4887_v60 }
 0x290   :  { %4370 = vmatpush.bf16.msra.mxu3 %v5816_v16  ;;  %4346 = vmatpush.bf16.msra.mxu1 %v5240_v27  ;;  %v5431_v7 = vld [vmem:[#allocation8 + $0x498] sm:$0xf]  ;;  %v5144_v57 = vor.u32 %v7020_v1, %v5143_v0  ;;  %v4093_v16 = vadd.f32 %v4092_v37, %v4080_v62 }
 0x291   :  { %v7092_v8 = vld [vmem:[#allocation8 + $0x4b4] sm:$0xf0] }
 0x292   :  { %4358 = vmatpush.bf16.msra.mxu2 %v5528_v30  ;;  %4334 = vmatpush.bf16.msra.mxu0 %v4952_v50  ;;  %v5687_v12 = vld [vmem:[#allocation8 + $0x698] sm:$0xf]  ;;  %v5432_v19 = vor.u32 %v7092_v8, %v5431_v7  ;;  %v4106_v30 = vadd.f32 %v4105_v25, %v4093_v16  ;;  %v4120_v7 = vpop.f32.mrf.mxu3 }
 0x293   :  { %v7156_v29 = vld [vmem:[#allocation8 + $0x6b4] sm:$0xf0] }
 0x294   :  { %4371 = vmatpush.bf16.msra.mxu3 %v5784_v34  ;;  %4347 = vmatpush.bf16.msra.mxu1 %v5208_v46  ;;  %v4855_v13 = vld [vmem:[#allocation8 + $0x18] sm:$0xf]  ;;  %v5688_v27 = vor.u32 %v7156_v29, %v5687_v12  ;;  %v4119_v50 = vadd.f32 %v4118_v53, %v4106_v30 }
 0x295   :  { %v6948_v14 = vld [vmem:[#allocation8 + $0x34] sm:$0xf0] }
 0x296   :  { %4359 = vmatpush.bf16.msra.mxu2 %v5496_v39  ;;  %4335 = vmatpush.bf16.msra.mxu0 %v4920_v20  ;;  %v5111_v10 = vld [vmem:[#allocation8 + $0x218] sm:$0xf]  ;;  %v4856_v31 = vor.u32 %v6948_v14, %v4855_v13  ;;  %v4541_v52 = vmax.f32 %v4119_v50, 0.0 }
 0x297   :  { %v7012_v15 = vld [vmem:[#allocation8 + $0x234] sm:$0xf0] }
 0x298   :  { %4372 = vmatpush.bf16.msra.mxu3 %v5752_v51  ;;  %4348 = vmatpush.bf16.msra.mxu1 %v5176_v3  ;;  %v6103_v21 = vld [vmem:[#allocation8 + $0x9d8] sm:$0xf]  ;;  %v5112_v36 = vor.u32 %v7012_v15, %v5111_v10  ;;  %4549 = vst [vmem:[#allocation11 + $0x18] sm:$0xff] %v4541_v52 }
 0x299   :  { %v7260_v23 = vld [vmem:[#allocation8 + $0x9f4] sm:$0xf0] }
 0x29a   :  { %4360 = vmatpush.bf16.msra.mxu2 %v5464_v63  ;;  %v6359_v18 = vld [vmem:[#allocation8 + $0xbd8] sm:$0xf]  ;;  %4336 = vmatpush.bf16.msra.mxu0 %v4888_v26  ;;  %v6104_v38 = vor.u32 %v7260_v23, %v6103_v21  ;;  %v4107_v63 = vpop.f32.mrf.mxu2 }
 0x29b   :  { %v7324_v33 = vld [vmem:[#allocation8 + $0xbf4] sm:$0xf0] }
 0x29c   :  { %4373 = vmatpush.bf16.msra.mxu3 %v5720_v5  ;;  %v5399_v28 = vld [vmem:[#allocation8 + $0x458] sm:$0xf]  ;;  %4349 = vmatpush.bf16.msra.mxu1 %v5144_v57  ;;  %v6360_v42 = vor.u32 %v7324_v33, %v6359_v18 }
 0x29d   :  { %v7084_v35 = vld [vmem:[#allocation8 + $0x474] sm:$0xf0] }
 0x29e   :  { %v5655_v32 = vld [vmem:[#allocation8 + $0x658] sm:$0xf]  ;;  %4361 = vmatpush.bf16.msra.mxu2 %v5432_v19  ;;  %v5400_v45 = vor.u32 %v7084_v35, %v5399_v28  ;;  %4337 = vmatpush.bf16.msra.mxu0 %v4856_v31 }
 0x29f   :  { %v7148_v34 = vld [vmem:[#allocation8 + $0x674] sm:$0xf0] }
 0x2a0   :  { %v6071_v40 = vld [vmem:[#allocation8 + $0x998] sm:$0xf]  ;;  %4374 = vmatpush.bf16.msra.mxu3 %v5688_v27  ;;  %v5656_v39 = vor.u32 %v7148_v34, %v5655_v32  ;;  %4350 = vmatpush.bf16.msra.mxu1 %v5112_v36  ;;  %v7803_v34 = vpop.f32.mrf.mxu0 }
 0x2a1   :  { %v7252_v37 = vld [vmem:[#allocation8 + $0x9b4] sm:$0xf0]  ;;  %4338 = vmatmul.bf16.vlgmr.msra.gmra.mxu0 %v7683_v17 }
 0x2a2   :  { %v6327_v46 = vld [vmem:[#allocation8 + $0xb98] sm:$0xf]  ;;  %4382 = vmatpush.bf16.msrb.mxu0 %v6104_v38  ;;  %v6072_v20 = vor.u32 %v7252_v37, %v6071_v40  ;;  %4362 = vmatpush.bf16.msra.mxu2 %v5400_v45  ;;  %v7805_v37 = vpop.f32.mrf.mxu1 }
 0x2a3   :  { %v7316_v47 = vld [vmem:[#allocation8 + $0xbb4] sm:$0xf0]  ;;  %4351 = vmatmul.bf16.vlgmr.msra.gmra.mxu1 %v7686_v22 }
 0x2a4   :  { %v5367_v2 = vld [vmem:[#allocation8 + $0x418] sm:$0xf]  ;;  %4395 = vmatpush.bf16.msrb.mxu1 %v6360_v42  ;;  %v6328_v3 = vor.u32 %v7316_v47, %v6327_v46  ;;  %4375 = vmatpush.bf16.msra.mxu3 %v5656_v39 }
 0x2a5   :  { %v7076_v58 = vld [vmem:[#allocation8 + $0x434] sm:$0xf0] }
 0x2a6   :  { %v5623_v48 = vld [vmem:[#allocation8 + $0x618] sm:$0xf]  ;;  %v5368_v60 = vor.u32 %v7076_v58, %v5367_v2  ;;  %4383 = vmatpush.bf16.msrb.mxu0 %v6072_v20 }
 0x2a7   :  { %v7140_v51 = vld [vmem:[#allocation8 + $0x634] sm:$0xf0] }
 0x2a8   :  { %v6615_v54 = vld [vmem:[#allocation8 + $0xdd8] sm:$0xf]  ;;  %v5624_v0 = vor.u32 %v7140_v51, %v5623_v48  ;;  %4396 = vmatpush.bf16.msrb.mxu1 %v6328_v3  ;;  %4363 = vmatpush.bf16.msra.mxu2 %v5368_v60 }
 0x2a9   :  { %v7388_v55 = vld [vmem:[#allocation8 + $0xdf4] sm:$0xf0] }
 0x2aa   :  { %v6871_v56 = vld [vmem:[#allocation8 + $0xfd8] sm:$0xf]  ;;  %v6616_v1 = vor.u32 %v7388_v55, %v6615_v54  ;;  %4376 = vmatpush.bf16.msra.mxu3 %v5624_v0  ;;  %v4133_v0 = vpop.f32.mrf.mxu0  ;;  %v4146_v7 = vpop.f32.mrf.mxu1 }
 0x2ab   :  { %v7452_v59 = vld [vmem:[#allocation8 + $0xff4] sm:$0xf0]  ;;  %4364 = vmatmul.bf16.vlgmr.msra.gmra.mxu2 %v7690_v43  ;;  %v5273_v0 = vld [vmem:[#allocation8 + $0x378] sm:$0xf0] }
 0x2ac   :  { %v6039_v61 = vld [vmem:[#allocation8 + $0x958] sm:$0xf]  ;;  %v6872_v8 = vor.u32 %v7452_v59, %v6871_v56  ;;  %4408 = vmatpush.bf16.msrb.mxu2 %v6616_v1  ;;  %v5561_v7 = vld [vmem:[#allocation8 + $0x5b8] sm:$0xf0] }
 0x2ad   :  { %v7244_v62 = vld [vmem:[#allocation8 + $0x974] sm:$0xf0]  ;;  %4377 = vmatmul.bf16.vlgmr.msra.gmra.mxu3 %v7692_v49 }
 0x2ae   :  { %v6295_v4 = vld [vmem:[#allocation8 + $0xb58] sm:$0xf]  ;;  %v6040_v12 = vor.u32 %v7244_v62, %v6039_v61  ;;  %4421 = vmatpush.bf16.msrb.mxu3 %v6872_v8 }
 0x2af   :  { %v7308_v5 = vld [vmem:[#allocation8 + $0xb74] sm:$0xf0] }
 0x2b0   :  { %v6583_v11 = vld [vmem:[#allocation8 + $0xd98] sm:$0xf]  ;;  %v6296_v57 = vor.u32 %v7308_v5, %v6295_v4  ;;  %4384 = vmatpush.bf16.msrb.mxu0 %v6040_v12 }
 0x2b1   :  { %v7380_v26 = vld [vmem:[#allocation8 + $0xdb4] sm:$0xf0] }
 0x2b2   :  { %v6839_v29 = vld [vmem:[#allocation8 + $0xf98] sm:$0xf]  ;;  %v6584_v15 = vor.u32 %v7380_v26, %v6583_v11  ;;  %4397 = vmatpush.bf16.msrb.mxu1 %v6296_v57 }
 0x2b3   :  { %v7444_v13 = vld [vmem:[#allocation8 + $0xfb4] sm:$0xf0] }
 0x2b4   :  { %v6007_v14 = vld [vmem:[#allocation8 + $0x918] sm:$0xf]  ;;  %v6840_v21 = vor.u32 %v7444_v13, %v6839_v29  ;;  %4409 = vmatpush.bf16.msrb.mxu2 %v6584_v15  ;;  %v7000_v15 = vld [vmem:[#allocation8 + $0x1dc] sm:$0xf] }
 0x2b5   :  { %v7236_v10 = vld [vmem:[#allocation8 + $0x934] sm:$0xf0] }
 0x2b6   :  { %v6263_v16 = vld [vmem:[#allocation8 + $0xb18] sm:$0xf]  ;;  %v6008_v25 = vor.u32 %v7236_v10, %v6007_v14  ;;  %4422 = vmatpush.bf16.msrb.mxu3 %v6840_v21  ;;  %v7807_v21 = vpop.f32.mrf.mxu2 }
 0x2b7   :  { %v7300_v19 = vld [vmem:[#allocation8 + $0xb34] sm:$0xf0] }
 0x2b8   :  { %v6551_v23 = vld [vmem:[#allocation8 + $0xd58] sm:$0xf]  ;;  %v6264_v28 = vor.u32 %v7300_v19, %v6263_v16  ;;  %4385 = vmatpush.bf16.msrb.mxu0 %v6008_v25  ;;  %v5081_v16 = vld [vmem:[#allocation8 + $0x1f8] sm:$0xf0] }
 0x2b9   :  { %v7372_v18 = vld [vmem:[#allocation8 + $0xd74] sm:$0xf0]  ;;  %v7064_v19 = vld [vmem:[#allocation8 + $0x3dc] sm:$0xf] }
 0x2ba   :  { %v6807_v27 = vld [vmem:[#allocation8 + $0xf58] sm:$0xf]  ;;  %v6552_v53 = vor.u32 %v7372_v18, %v6551_v23  ;;  %4398 = vmatpush.bf16.msrb.mxu1 %v6264_v28  ;;  %v5337_v18 = vld [vmem:[#allocation8 + $0x3f8] sm:$0xf0] }
 0x2bb   :  { %v7436_v33 = vld [vmem:[#allocation8 + $0xf74] sm:$0xf0] }
 0x2bc   :  { %v5975_v35 = vld [vmem:[#allocation8 + $0x8d8] sm:$0xf]  ;;  %v6808_v36 = vor.u32 %v7436_v33, %v6807_v27  ;;  %4410 = vmatpush.bf16.msrb.mxu2 %v6552_v53  ;;  %v7809_v33 = vpop.f32.mrf.mxu3 }
 0x2bd   :  { %v7228_v30 = vld [vmem:[#allocation8 + $0x8f4] sm:$0xf0] }
 0x2be   :  { %v6231_v31 = vld [vmem:[#allocation8 + $0xad8] sm:$0xf]  ;;  %v5976_v50 = vor.u32 %v7228_v30, %v5975_v35  ;;  %4423 = vmatpush.bf16.msrb.mxu3 %v6808_v36  ;;  %v5340_v36 = vor.u32 %v7064_v19, %v5337_v18  ;;  %v5529_v19 = vld [vmem:[#allocation8 + $0x578] sm:$0xf0] }
 0x2bf   :  { %v7292_v32 = vld [vmem:[#allocation8 + $0xaf4] sm:$0xf0]  ;;  %v7176_v18 = vld [vmem:[#allocation8 + $0x75c] sm:$0xf] }
 0x2c0   :  { %v6519_v38 = vld [vmem:[#allocation8 + $0xd18] sm:$0xf]  ;;  %v6232_v46 = vor.u32 %v7292_v32, %v6231_v31  ;;  %4386 = vmatpush.bf16.msrb.mxu0 %v5976_v50  ;;  %v5084_v31 = vor.u32 %v7000_v15, %v5081_v16  ;;  %v6992_v32 = vld [vmem:[#allocation8 + $0x19c] sm:$0xf] }
 0x2c1   :  { %v7364_v40 = vld [vmem:[#allocation8 + $0xd34] sm:$0xf0]  ;;  %v7056_v50 = vld [vmem:[#allocation8 + $0x39c] sm:$0xf] }
 0x2c2   :  { %v6775_v42 = vld [vmem:[#allocation8 + $0xf18] sm:$0xf]  ;;  %v6520_v39 = vor.u32 %v7364_v40, %v6519_v38  ;;  %4399 = vmatpush.bf16.msrb.mxu1 %v6232_v46  ;;  %v5049_v40 = vld [vmem:[#allocation8 + $0x1b8] sm:$0xf0] }
 0x2c3   :  { %v7428_v45 = vld [vmem:[#allocation8 + $0xf34] sm:$0xf0]  ;;  %v7112_v16 = vld [vmem:[#allocation8 + $0x55c] sm:$0xf] }
 0x2c4   :  { %v5943_v47 = vld [vmem:[#allocation8 + $0x898] sm:$0xf]  ;;  %v6776_v51 = vor.u32 %v7428_v45, %v6775_v42  ;;  %4411 = vmatpush.bf16.msrb.mxu2 %v6520_v39  ;;  %v5305_v42 = vld [vmem:[#allocation8 + $0x3b8] sm:$0xf0] }
 0x2c5   :  { %v7220_v2 = vld [vmem:[#allocation8 + $0x8b4] sm:$0xf0] }
 0x2c6   :  { %v6199_v58 = vld [vmem:[#allocation8 + $0xa98] sm:$0xf]  ;;  %v5944_v55 = vor.u32 %v7220_v2, %v5943_v47  ;;  %4424 = vmatpush.bf16.msrb.mxu3 %v6776_v51  ;;  %v5052_v51 = vor.u32 %v6992_v32, %v5049_v40  ;;  %v4183_v32 = vpop.f32.mrf.mxu0  ;;  %v5497_v40 = vld [vmem:[#allocation8 + $0x538] sm:$0xf0] }
 0x2c7   :  { %v7284_v48 = vld [vmem:[#allocation8 + $0xab4] sm:$0xf0] }
 0x2c8   :  { %v6487_v52 = vld [vmem:[#allocation8 + $0xcd8] sm:$0xf]  ;;  %v6200_v59 = vor.u32 %v7284_v48, %v6199_v58  ;;  %4387 = vmatpush.bf16.msrb.mxu0 %v5944_v55  ;;  %v7128_v58 = vld [vmem:[#allocation8 + $0x5dc] sm:$0xf]  ;;  %v5308_v55 = vor.u32 %v7056_v50, %v5305_v42  ;;  %v4196_v42 = vpop.f32.mrf.mxu1 }
 0x2c9   :  { %v7356_v54 = vld [vmem:[#allocation8 + $0xcf4] sm:$0xf0]  ;;  %v5593_v48 = vld [vmem:[#allocation8 + $0x5f8] sm:$0xf0] }
 0x2ca   :  { %v6743_v20 = vld [vmem:[#allocation8 + $0xed8] sm:$0xf]  ;;  %v6488_v61 = vor.u32 %v7356_v54, %v6487_v52  ;;  %4400 = vmatpush.bf16.msrb.mxu1 %v6200_v59  ;;  %v7192_v52 = vld [vmem:[#allocation8 + $0x7dc] sm:$0xf] }
 0x2cb   :  { %v7420_v56 = vld [vmem:[#allocation8 + $0xef4] sm:$0xf0]  ;;  %v5849_v54 = vld [vmem:[#allocation8 + $0x7f8] sm:$0xf0] }
 0x2cc   :  { %v5911_v3 = vld [vmem:[#allocation8 + $0x858] sm:$0xf]  ;;  %v6744_v1 = vor.u32 %v7420_v56, %v6743_v20  ;;  %4412 = vmatpush.bf16.msrb.mxu2 %v6488_v61  ;;  %v6984_v56 = vld [vmem:[#allocation8 + $0x15c] sm:$0xf] }
 0x2cd   :  { %v7212_v60 = vld [vmem:[#allocation8 + $0x874] sm:$0xf0]  ;;  %v5017_v59 = vld [vmem:[#allocation8 + $0x178] sm:$0xf0] }
 0x2ce   :  { %v6167_v62 = vld [vmem:[#allocation8 + $0xa58] sm:$0xf]  ;;  %v5912_v8 = vor.u32 %v7212_v60, %v5911_v3  ;;  %4425 = vmatpush.bf16.msrb.mxu3 %v6744_v1  ;;  %v1134_v3 = vperm.slane %v7788_v24, 4  ;;  %v4159_v60 = vpop.f32.mrf.mxu2  ;;  %v4172_v1 = vpop.f32.mrf.mxu3 }
 0x2cf   :  { %v7276_v63 = vld [vmem:[#allocation8 + $0xa74] sm:$0xf0]  ;;  %v6952_v60 = vld [vmem:[#allocation8 + $0x5c] sm:$0xf] }
 0x2d0   :  { %v6455_v4 = vld [vmem:[#allocation8 + $0xc98] sm:$0xf]  ;;  %v6168_v29 = vor.u32 %v7276_v63, %v6167_v62  ;;  %4388 = vmatpush.bf16.msrb.mxu0 %v5912_v8  ;;  %v5596_v62 = vor.u32 %v7128_v58, %v5593_v48  ;;  %v7048_v63 = vld [vmem:[#allocation8 + $0x35c] sm:$0xf]  ;;  %v5020_v8 = vor.u32 %v6984_v56, %v5017_v59 }
 0x2d1   :  { %v7348_v5 = vld [vmem:[#allocation8 + $0xcb4] sm:$0xf0]  ;;  %v5276_v24 = vor.u32 %v7048_v63, %v5273_v0  ;;  %v7024_v48 = vld [vmem:[#allocation8 + $0x29c] sm:$0xf] }
 0x2d2   :  { %v6711_v11 = vld [vmem:[#allocation8 + $0xe98] sm:$0xf]  ;;  %v6456_v10 = vor.u32 %v7348_v5, %v6455_v4  ;;  %4401 = vmatpush.bf16.msrb.mxu1 %v6168_v29  ;;  %v5852_v4 = vor.u32 %v7192_v52, %v5849_v54  ;;  %v7120_v5 = vld [vmem:[#allocation8 + $0x59c] sm:$0xf] }
 0x2d3   :  { %v7412_v26 = vld [vmem:[#allocation8 + $0xeb4] sm:$0xf0]  ;;  %v4985_v29 = vld [vmem:[#allocation8 + $0x138] sm:$0xf0] }
 0x2d4   :  { %v5879_v12 = vld [vmem:[#allocation8 + $0x818] sm:$0xf]  ;;  %v6712_v23 = vor.u32 %v7412_v26, %v6711_v11  ;;  %4413 = vmatpush.bf16.msrb.mxu2 %v6456_v10  ;;  %v7184_v11 = vld [vmem:[#allocation8 + $0x79c] sm:$0xf] }
 0x2d5   :  { %v7204_v13 = vld [vmem:[#allocation8 + $0x834] sm:$0xf0]  ;;  %v5817_v26 = vld [vmem:[#allocation8 + $0x7b8] sm:$0xf0] }
 0x2d6   :  { %v6135_v57 = vld [vmem:[#allocation8 + $0xa18] sm:$0xf]  ;;  %v5880_v28 = vor.u32 %v7204_v13, %v5879_v12  ;;  %4426 = vmatpush.bf16.msrb.mxu3 %v6712_v23  ;;  %v6976_v12 = vld [vmem:[#allocation8 + $0x11c] sm:$0xf]  ;;  %v4132_v13 = vadd.f32 %v7803_v34, %v1134_v3  ;;  %v5820_v15 = vor.u32 %v7184_v11, %v5817_v26  ;;  %v4198_v11 = vpop.f32.mrf.mxu1 }
 0x2d7   :  { %v7268_v14 = vld [vmem:[#allocation8 + $0xa34] sm:$0xf0]  ;;  %v5241_v10 = vld [vmem:[#allocation8 + $0x338] sm:$0xf0]  ;;  %v4988_v23 = vor.u32 %v6976_v12, %v4985_v29 }
 0x2d8   :  { %v6423_v25 = vld [vmem:[#allocation8 + $0xc58] sm:$0xf]  ;;  %v6136_v53 = vor.u32 %v7268_v14, %v6135_v57  ;;  %4389 = vmatpush.bf16.msrb.mxu0 %v5880_v28  ;;  %v5564_v57 = vor.u32 %v7120_v5, %v5561_v7  ;;  %v7040_v14 = vld [vmem:[#allocation8 + $0x31c] sm:$0xf] }
 0x2d9   :  { %v7340_v27 = vld [vmem:[#allocation8 + $0xc74] sm:$0xf0]  ;;  %v6968_v34 = vld [vmem:[#allocation8 + $0xdc] sm:$0xf] }
 0x2da   :  { %v6679_v35 = vld [vmem:[#allocation8 + $0xe58] sm:$0xf]  ;;  %v6424_v38 = vor.u32 %v7340_v27, %v6423_v25  ;;  %4402 = vmatpush.bf16.msrb.mxu1 %v6136_v53  ;;  %v5785_v25 = vld [vmem:[#allocation8 + $0x778] sm:$0xf0]  ;;  %v5244_v27 = vor.u32 %v7040_v14, %v5241_v10 }
 0x2db   :  { %v7404_v30 = vld [vmem:[#allocation8 + $0xe74] sm:$0xf0]  ;;  %4390 = vmatmul.bf16.vlgmr.msrb.gmra.mxu0 %v7699_v6  ;;  %v4953_v28 = vld [vmem:[#allocation8 + $0xf8] sm:$0xf0] }
 0x2dc   :  { %v6680_v45 = vor.u32 %v7404_v30, %v6679_v35  ;;  %v6391_v46 = vld [vmem:[#allocation8 + $0xc18] sm:$0xf]  ;;  %4434 = vmatpush.bf16.msra.mxu0 %v5084_v31  ;;  %4414 = vmatpush.bf16.msrb.mxu2 %v6424_v38  ;;  %v4145_v35 = vadd.f32 %v7805_v37, %v4132_v13  ;;  %v5532_v30 = vor.u32 %v7112_v16, %v5529_v19  ;;  %v7032_v53 = vld [vmem:[#allocation8 + $0x2dc] sm:$0xf] }
 0x2dd   :  { %v7332_v47 = vld [vmem:[#allocation8 + $0xc34] sm:$0xf0]  ;;  %4403 = vmatmul.bf16.vlgmr.msrb.gmra.mxu1 %v7702_v9  ;;  %v5209_v31 = vld [vmem:[#allocation8 + $0x2f8] sm:$0xf0] }
 0x2de   :  { %v6647_v2 = vld [vmem:[#allocation8 + $0xe18] sm:$0xf]  ;;  %4447 = vmatpush.bf16.msra.mxu1 %v5340_v36  ;;  %v6392_v20 = vor.u32 %v7332_v47, %v6391_v46  ;;  %4427 = vmatpush.bf16.msrb.mxu3 %v6680_v45  ;;  %v5788_v36 = vor.u32 %v7176_v18, %v5785_v25  ;;  %v7104_v38 = vld [vmem:[#allocation8 + $0x51c] sm:$0xf]  ;;  %v4158_v50 = vadd.f32 %v7807_v21, %v4145_v35  ;;  %v4209_v18 = vpop.f32.mrf.mxu2 }
 0x2df   :  { %v7396_v39 = vld [vmem:[#allocation8 + $0xe34] sm:$0xf0]  ;;  %v4956_v45 = vor.u32 %v6968_v34, %v4953_v28  ;;  %v7168_v46 = vld [vmem:[#allocation8 + $0x71c] sm:$0xf]  ;;  %v5500_v58 = vor.u32 %v7104_v38, %v5497_v40 }
 0x2e0   :  { %v6648_v61 = vor.u32 %v7396_v39, %v6647_v2  ;;  %4435 = vmatpush.bf16.msra.mxu0 %v5052_v51  ;;  %4415 = vmatpush.bf16.msrb.mxu2 %v6392_v20  ;;  %v5753_v47 = vld [vmem:[#allocation8 + $0x738] sm:$0xf0]  ;;  %v5212_v2 = vor.u32 %v7032_v53, %v5209_v31  ;;  %v4171_v20 = vadd.f32 %v7809_v33, %v4158_v50 }
 0x2e1   :  { %v6960_v39 = vld [vmem:[#allocation8 + $0x9c] sm:$0xf]  ;;  %v5756_v52 = vor.u32 %v7168_v46, %v5753_v47 }
 0x2e2   :  { %4448 = vmatpush.bf16.msra.mxu1 %v5308_v55  ;;  %4428 = vmatpush.bf16.msrb.mxu3 %v6648_v61  ;;  %v4921_v37 = vld [vmem:[#allocation8 + $0xb8] sm:$0xf0] }
 0x2e3   :  { %4416 = vmatmul.bf16.vlgmr.msrb.gmra.mxu2 %v7706_v41  ;;  %v5177_v51 = vld [vmem:[#allocation8 + $0x2b8] sm:$0xf0]  ;;  %v4924_v21 = vor.u32 %v6960_v39, %v4921_v37 }
 0x2e4   :  { %4460 = vmatpush.bf16.msra.mxu2 %v5596_v62  ;;  %4436 = vmatpush.bf16.msra.mxu0 %v5020_v8  ;;  %v7096_v54 = vld [vmem:[#allocation8 + $0x4dc] sm:$0xf]  ;;  %v5180_v3 = vor.u32 %v7024_v48, %v5177_v51  ;;  %v4184_v62 = vadd.f32 %v4183_v32, %v4171_v20 }
 0x2e5   :  { %4429 = vmatmul.bf16.vlgmr.msrb.gmra.mxu3 %v7708_v44  ;;  %v5465_v55 = vld [vmem:[#allocation8 + $0x4f8] sm:$0xf0] }
 0x2e6   :  { %4473 = vmatpush.bf16.msra.mxu3 %v5852_v4  ;;  %4449 = vmatpush.bf16.msra.mxu1 %v5276_v24  ;;  %v7160_v56 = vld [vmem:[#allocation8 + $0x6dc] sm:$0xf]  ;;  %v5468_v63 = vor.u32 %v7096_v54, %v5465_v55  ;;  %v4185_v4 = vpop.f32.mrf.mxu0  ;;  %v4197_v10 = vadd.f32 %v4196_v42, %v4184_v62  ;;  %v4211_v62 = vpop.f32.mrf.mxu2 }
 0x2e7   :  { %v5721_v59 = vld [vmem:[#allocation8 + $0x6f8] sm:$0xf0] }
 0x2e8   :  { %4461 = vmatpush.bf16.msra.mxu2 %v5564_v57  ;;  %4437 = vmatpush.bf16.msra.mxu0 %v4988_v23  ;;  %v4889_v61 = vld [vmem:[#allocation8 + $0x78] sm:$0xf0]  ;;  %v5724_v5 = vor.u32 %v7160_v56, %v5721_v59  ;;  %v4210_v35 = vadd.f32 %v4209_v18, %v4197_v10 }
 0x2e9   :  { %v7016_v0 = vld [vmem:[#allocation8 + $0x25c] sm:$0xf]  ;;  %v4892_v33 = vor.u32 %v6952_v60, %v4889_v61 }
 0x2ea   :  { %4474 = vmatpush.bf16.msra.mxu3 %v5820_v15  ;;  %4450 = vmatpush.bf16.msra.mxu1 %v5244_v27  ;;  %v5145_v1 = vld [vmem:[#allocation8 + $0x278] sm:$0xf0] }
 0x2eb   :  { %v7088_v7 = vld [vmem:[#allocation8 + $0x49c] sm:$0xf]  ;;  %v5148_v29 = vor.u32 %v7016_v0, %v5145_v1 }
 0x2ec   :  { %4462 = vmatpush.bf16.msra.mxu2 %v5532_v30  ;;  %4438 = vmatpush.bf16.msra.mxu0 %v4956_v45  ;;  %v5433_v8 = vld [vmem:[#allocation8 + $0x4b8] sm:$0xf0]  ;;  %v4222_v30 = vpop.f32.mrf.mxu3 }
 0x2ed   :  { %v7152_v26 = vld [vmem:[#allocation8 + $0x69c] sm:$0xf]  ;;  %v5436_v15 = vor.u32 %v7088_v7, %v5433_v8  ;;  %v4223_v42 = vadd.f32 %v4222_v30, %v4210_v35 }
 0x2ee   :  { %4475 = vmatpush.bf16.msra.mxu3 %v5788_v36  ;;  %4451 = vmatpush.bf16.msra.mxu1 %v5212_v2  ;;  %v5689_v24 = vld [vmem:[#allocation8 + $0x6b8] sm:$0xf0]  ;;  %v7824_v30 = vpop.f32.mrf.mxu0 }
 0x2ef   :  { %v6944_v12 = vld [vmem:[#allocation8 + $0x1c] sm:$0xf]  ;;  %v5692_v25 = vor.u32 %v7152_v26, %v5689_v24 }
 0x2f0   :  { %4463 = vmatpush.bf16.msra.mxu2 %v5500_v58  ;;  %4439 = vmatpush.bf16.msra.mxu0 %v4924_v21  ;;  %v4857_v13 = vld [vmem:[#allocation8 + $0x38] sm:$0xf0] }
 0x2f1   :  { %v7008_v57 = vld [vmem:[#allocation8 + $0x21c] sm:$0xf]  ;;  %v4860_v53 = vor.u32 %v6944_v12, %v4857_v13 }
 0x2f2   :  { %4476 = vmatpush.bf16.msra.mxu3 %v5756_v52  ;;  %4452 = vmatpush.bf16.msra.mxu1 %v5180_v3  ;;  %v5113_v14 = vld [vmem:[#allocation8 + $0x238] sm:$0xf0]  ;;  %v4542_v52 = vmax.f32 %v4223_v42, 0.0 }
 0x2f3   :  { %v7256_v16 = vld [vmem:[#allocation8 + $0x9dc] sm:$0xf]  ;;  %v5116_v36 = vor.u32 %v7008_v57, %v5113_v14 }
 0x2f4   :  { %4464 = vmatpush.bf16.msra.mxu2 %v5468_v63  ;;  %v6105_v19 = vld [vmem:[#allocation8 + $0x9f8] sm:$0xf0]  ;;  %4440 = vmatpush.bf16.msra.mxu0 %v4892_v33  ;;  %4550 = vst [vmem:[#allocation11 + $0x20] sm:$0xff] %v4542_v52 }
 0x2f5   :  { %v7320_v23 = vld [vmem:[#allocation8 + $0xbdc] sm:$0xf]  ;;  %v6108_v38 = vor.u32 %v7256_v16, %v6105_v19 }
 0x2f6   :  { %4477 = vmatpush.bf16.msra.mxu3 %v5724_v5  ;;  %v6361_v27 = vld [vmem:[#allocation8 + $0xbf8] sm:$0xf0]  ;;  %4453 = vmatpush.bf16.msra.mxu1 %v5148_v29  ;;  %v4224_v5 = vpop.f32.mrf.mxu3 }
 0x2f7   :  { %v7080_v34 = vld [vmem:[#allocation8 + $0x45c] sm:$0xf]  ;;  %v6364_v45 = vor.u32 %v7320_v23, %v6361_v27 }
 0x2f8   :  { %v5401_v28 = vld [vmem:[#allocation8 + $0x478] sm:$0xf0]  ;;  %4465 = vmatpush.bf16.msra.mxu2 %v5436_v15  ;;  %4441 = vmatpush.bf16.msra.mxu0 %v4860_v53 }
 0x2f9   :  { %v7144_v31 = vld [vmem:[#allocation8 + $0x65c] sm:$0xf]  ;;  %v5404_v46 = vor.u32 %v7080_v34, %v5401_v28 }
 0x2fa   :  { %v5657_v32 = vld [vmem:[#allocation8 + $0x678] sm:$0xf0]  ;;  %4478 = vmatpush.bf16.msra.mxu3 %v5692_v25  ;;  %4454 = vmatpush.bf16.msra.mxu1 %v5116_v36 }
 0x2fb   :  { %v7248_v40 = vld [vmem:[#allocation8 + $0x99c] sm:$0xf]  ;;  %v5660_v37 = vor.u32 %v7144_v31, %v5657_v32  ;;  %4442 = vmatmul.bf16.vlgmr.msra.gmra.mxu0 %v7683_v17  ;;  %v7826_v32 = vpop.f32.mrf.mxu1 }
 0x2fc   :  { %v6073_v50 = vld [vmem:[#allocation8 + $0x9b8] sm:$0xf0]  ;;  %4486 = vmatpush.bf16.msrb.mxu0 %v6108_v38  ;;  %4466 = vmatpush.bf16.msra.mxu2 %v5404_v46 }
 0x2fd   :  { %v7312_v47 = vld [vmem:[#allocation8 + $0xb9c] sm:$0xf]  ;;  %v6076_v20 = vor.u32 %v7248_v40, %v6073_v50  ;;  %4455 = vmatmul.bf16.vlgmr.msra.gmra.mxu1 %v7686_v22 }
 0x2fe   :  { %v6329_v2 = vld [vmem:[#allocation8 + $0xbb8] sm:$0xf0]  ;;  %4499 = vmatpush.bf16.msrb.mxu1 %v6364_v45  ;;  %4479 = vmatpush.bf16.msra.mxu3 %v5660_v37 }
 0x2ff   :  { %v7072_v39 = vld [vmem:[#allocation8 + $0x41c] sm:$0xf]  ;;  %v6332_v59 = vor.u32 %v7312_v47, %v6329_v2 }
 0x300   :  { %v5369_v58 = vld [vmem:[#allocation8 + $0x438] sm:$0xf0]  ;;  %4487 = vmatpush.bf16.msrb.mxu0 %v6076_v20 }
 0x301   :  { %v7136_v48 = vld [vmem:[#allocation8 + $0x61c] sm:$0xf]  ;;  %v5372_v3 = vor.u32 %v7072_v39, %v5369_v58 }
 0x302   :  { %v5625_v51 = vld [vmem:[#allocation8 + $0x638] sm:$0xf0]  ;;  %4500 = vmatpush.bf16.msrb.mxu1 %v6332_v59  ;;  %v4237_v59 = vpop.f32.mrf.mxu0 }
 0x303   :  { %v7384_v54 = vld [vmem:[#allocation8 + $0xddc] sm:$0xf]  ;;  %v5628_v63 = vor.u32 %v7136_v48, %v5625_v51  ;;  %4467 = vmatpush.bf16.msra.mxu2 %v5372_v3  ;;  %v4250_v62 = vpop.f32.mrf.mxu1 }
 0x304   :  { %v6617_v55 = vld [vmem:[#allocation8 + $0xdf8] sm:$0xf0] }
 0x305   :  { %v7448_v21 = vld [vmem:[#allocation8 + $0xfdc] sm:$0xf]  ;;  %v6620_v0 = vor.u32 %v7384_v54, %v6617_v55  ;;  %4480 = vmatpush.bf16.msra.mxu3 %v5628_v63 }
 0x306   :  { %v6873_v56 = vld [vmem:[#allocation8 + $0xff8] sm:$0xf0]  ;;  %4468 = vmatmul.bf16.vlgmr.msra.gmra.mxu2 %v7690_v43 }
 0x307   :  { %v7240_v60 = vld [vmem:[#allocation8 + $0x95c] sm:$0xf]  ;;  %v6876_v7 = vor.u32 %v7448_v21, %v6873_v56  ;;  %4512 = vmatpush.bf16.msrb.mxu2 %v6620_v0 }
 0x308   :  { %v6041_v61 = vld [vmem:[#allocation8 + $0x978] sm:$0xf0]  ;;  %4481 = vmatmul.bf16.vlgmr.msra.gmra.mxu3 %v7692_v49 }
 0x309   :  { %v7304_v1 = vld [vmem:[#allocation8 + $0xb5c] sm:$0xf]  ;;  %v6044_v33 = vor.u32 %v7240_v60, %v6041_v61  ;;  %4525 = vmatpush.bf16.msrb.mxu3 %v6876_v7 }
 0x30a   :  { %v6297_v4 = vld [vmem:[#allocation8 + $0xb78] sm:$0xf0] }
 0x30b   :  { %v7376_v8 = vld [vmem:[#allocation8 + $0xd9c] sm:$0xf]  ;;  %v6300_v12 = vor.u32 %v7304_v1, %v6297_v4  ;;  %4488 = vmatpush.bf16.msrb.mxu0 %v6044_v33 }
 0x30c   :  { %v6585_v11 = vld [vmem:[#allocation8 + $0xdb8] sm:$0xf0] }
 0x30d   :  { %v7440_v26 = vld [vmem:[#allocation8 + $0xf9c] sm:$0xf]  ;;  %v6588_v17 = vor.u32 %v7376_v8, %v6585_v11  ;;  %4501 = vmatpush.bf16.msrb.mxu1 %v6300_v12 }
 0x30e   :  { %v6841_v24 = vld [vmem:[#allocation8 + $0xfb8] sm:$0xf0] }
 0x30f   :  { %v7232_v29 = vld [vmem:[#allocation8 + $0x91c] sm:$0xf]  ;;  %v6844_v10 = vor.u32 %v7440_v26, %v6841_v24  ;;  %4513 = vmatpush.bf16.msrb.mxu2 %v6588_v17  ;;  %v4261_v26 = vpop.f32.mrf.mxu2 }
 0x310   :  { %v6009_v13 = vld [vmem:[#allocation8 + $0x938] sm:$0xf0] }
 0x311   :  { %v7296_v57 = vld [vmem:[#allocation8 + $0xb1c] sm:$0xf]  ;;  %v6012_v16 = vor.u32 %v7232_v29, %v6009_v13  ;;  %4526 = vmatpush.bf16.msrb.mxu3 %v6844_v10  ;;  %v4274_v13 = vpop.f32.mrf.mxu3 }
 0x312   :  { %v6265_v14 = vld [vmem:[#allocation8 + $0xb38] sm:$0xf0] }
 0x313   :  { %v7368_v22 = vld [vmem:[#allocation8 + $0xd5c] sm:$0xf]  ;;  %v6268_v18 = vor.u32 %v7296_v57, %v6265_v14  ;;  %4489 = vmatpush.bf16.msrb.mxu0 %v6012_v16 }
 0x314   :  { %v6553_v15 = vld [vmem:[#allocation8 + $0xd78] sm:$0xf0] }
 0x315   :  { %v7432_v19 = vld [vmem:[#allocation8 + $0xf5c] sm:$0xf]  ;;  %v6556_v34 = vor.u32 %v7368_v22, %v6553_v15  ;;  %4502 = vmatpush.bf16.msrb.mxu1 %v6268_v18 }
 0x316   :  { %v6809_v23 = vld [vmem:[#allocation8 + $0xf78] sm:$0xf0] }
 0x317   :  { %v7224_v25 = vld [vmem:[#allocation8 + $0x8dc] sm:$0xf]  ;;  %v6812_v53 = vor.u32 %v7432_v19, %v6809_v23  ;;  %4514 = vmatpush.bf16.msrb.mxu2 %v6556_v34 }
 0x318   :  { %v5977_v27 = vld [vmem:[#allocation8 + $0x8f8] sm:$0xf0] }
 0x319   :  { %v7288_v28 = vld [vmem:[#allocation8 + $0xadc] sm:$0xf]  ;;  %v5980_v36 = vor.u32 %v7224_v25, %v5977_v27  ;;  %4527 = vmatpush.bf16.msrb.mxu3 %v6812_v53  ;;  %v7828_v27 = vld [vmem:[#allocation10] sm:$0xff]  ;;  %v4276_v53 = vpop.f32.mrf.mxu3 }
 0x31a   :  { %v6233_v35 = vld [vmem:[#allocation8 + $0xaf8] sm:$0xf0]  ;;  %v1135_v34 = vperm.slane %v7828_v27, 5 }
 0x31b   :  { %v7360_v31 = vld [vmem:[#allocation8 + $0xd1c] sm:$0xf]  ;;  %v6236_v40 = vor.u32 %v7288_v28, %v6233_v35  ;;  %4490 = vmatpush.bf16.msrb.mxu0 %v5980_v36  ;;  %v4263_v28 = vpop.f32.mrf.mxu2  ;;  %v4287_v36 = vpop.f32.mrf.mxu0 }
 0x31c   :  { %v6521_v43 = vld [vmem:[#allocation8 + $0xd38] sm:$0xf0] }
 0x31d   :  { %v7424_v38 = vld [vmem:[#allocation8 + $0xf1c] sm:$0xf]  ;;  %v6524_v45 = vor.u32 %v7360_v31, %v6521_v43  ;;  %4503 = vmatpush.bf16.msrb.mxu1 %v6236_v40  ;;  %v4236_v31 = vadd.f32 %v7824_v30, %v1135_v34 }
 0x31e   :  { %v6777_v49 = vld [vmem:[#allocation8 + $0xf38] sm:$0xf0] }
 0x31f   :  { %v7216_v50 = vld [vmem:[#allocation8 + $0x89c] sm:$0xf]  ;;  %v6780_v2 = vor.u32 %v7424_v38, %v6777_v49  ;;  %4515 = vmatpush.bf16.msrb.mxu2 %v6524_v45  ;;  %v4249_v43 = vadd.f32 %v7826_v32, %v4236_v31  ;;  %v4300_v49 = vpop.f32.mrf.mxu1 }
 0x320   :  { %v5945_v42 = vld [vmem:[#allocation8 + $0x8b8] sm:$0xf0] }
 0x321   :  { %v7280_v46 = vld [vmem:[#allocation8 + $0xa9c] sm:$0xf]  ;;  %v5948_v58 = vor.u32 %v7216_v50, %v5945_v42  ;;  %4528 = vmatpush.bf16.msrb.mxu3 %v6780_v2  ;;  %v4262_v38 = vadd.f32 %v4261_v26, %v4249_v43 }
 0x322   :  { %v6201_v47 = vld [vmem:[#allocation8 + $0xab8] sm:$0xf0] }
 0x323   :  { %v7352_v39 = vld [vmem:[#allocation8 + $0xcdc] sm:$0xf]  ;;  %v6204_v52 = vor.u32 %v7280_v46, %v6201_v47  ;;  %4491 = vmatpush.bf16.msrb.mxu0 %v5948_v58  ;;  %v4275_v40 = vadd.f32 %v4274_v13, %v4262_v38  ;;  %v4313_v46 = vpop.f32.mrf.mxu2  ;;  %v4326_v47 = vpop.f32.mrf.mxu3 }
 0x324   :  { %v6489_v37 = vld [vmem:[#allocation8 + $0xcf8] sm:$0xf0] }
 0x325   :  { %v7416_v48 = vld [vmem:[#allocation8 + $0xedc] sm:$0xf]  ;;  %v6492_v20 = vor.u32 %v7352_v39, %v6489_v37  ;;  %4504 = vmatpush.bf16.msrb.mxu1 %v6204_v52  ;;  %v4288_v50 = vadd.f32 %v4287_v36, %v4275_v40  ;;  %v1136_v52 = vperm.slane %v7828_v27, 6 }
 0x326   :  { %v6745_v51 = vld [vmem:[#allocation8 + $0xef8] sm:$0xf0] }
 0x327   :  { %v7208_v54 = vld [vmem:[#allocation8 + $0x85c] sm:$0xf]  ;;  %v6748_v3 = vor.u32 %v7416_v48, %v6745_v51  ;;  %4516 = vmatpush.bf16.msrb.mxu2 %v6492_v20  ;;  %v4302_v42 = vpop.f32.mrf.mxu1  ;;  %v4301_v45 = vadd.f32 %v4300_v49, %v4288_v50 }
 0x328   :  { %v5913_v55 = vld [vmem:[#allocation8 + $0x878] sm:$0xf0] }
 0x329   :  { %v7272_v21 = vld [vmem:[#allocation8 + $0xa5c] sm:$0xf]  ;;  %v5916_v63 = vor.u32 %v7208_v54, %v5913_v55  ;;  %4529 = vmatpush.bf16.msrb.mxu3 %v6748_v3 }
 0x32a   :  { %v6169_v56 = vld [vmem:[#allocation8 + $0xa78] sm:$0xf0] }
 0x32b   :  { %v7344_v60 = vld [vmem:[#allocation8 + $0xc9c] sm:$0xf]  ;;  %v6172_v4 = vor.u32 %v7272_v21, %v6169_v56  ;;  %4492 = vmatpush.bf16.msrb.mxu0 %v5916_v63  ;;  %v4315_v39 = vpop.f32.mrf.mxu2 }
 0x32c   :  { %v6457_v61 = vld [vmem:[#allocation8 + $0xcb8] sm:$0xf0] }
 0x32d   :  { %v7408_v0 = vld [vmem:[#allocation8 + $0xe9c] sm:$0xf]  ;;  %v6460_v8 = vor.u32 %v7344_v60, %v6457_v61  ;;  %4505 = vmatpush.bf16.msrb.mxu1 %v6172_v4 }
 0x32e   :  { %v6713_v1 = vld [vmem:[#allocation8 + $0xeb8] sm:$0xf0] }
 0x32f   :  { %v7200_v5 = vld [vmem:[#allocation8 + $0x81c] sm:$0xf]  ;;  %v6716_v24 = vor.u32 %v7408_v0, %v6713_v1  ;;  %4517 = vmatpush.bf16.msrb.mxu2 %v6460_v8 }
 0x330   :  { %v5881_v7 = vld [vmem:[#allocation8 + $0x838] sm:$0xf0] }
 0x331   :  { %v7264_v11 = vld [vmem:[#allocation8 + $0xa1c] sm:$0xf]  ;;  %v5884_v17 = vor.u32 %v7200_v5, %v5881_v7  ;;  %4530 = vmatpush.bf16.msrb.mxu3 %v6716_v24 }
 0x332   :  { %v6137_v33 = vld [vmem:[#allocation8 + $0xa38] sm:$0xf0] }
 0x333   :  { %v7336_v12 = vld [vmem:[#allocation8 + $0xc5c] sm:$0xf]  ;;  %v6140_v10 = vor.u32 %v7264_v11, %v6137_v33  ;;  %4493 = vmatpush.bf16.msrb.mxu0 %v5884_v17  ;;  %v4365_v48 = vpop.f32.mrf.mxu2 }
 0x334   :  { %v6425_v29 = vld [vmem:[#allocation8 + $0xc78] sm:$0xf0] }
 0x335   :  { %v7400_v57 = vld [vmem:[#allocation8 + $0xe5c] sm:$0xf]  ;;  %v6428_v22 = vor.u32 %v7336_v12, %v6425_v29  ;;  %4506 = vmatpush.bf16.msrb.mxu1 %v6140_v10 }
 0x336   :  { %v6681_v14 = vld [vmem:[#allocation8 + $0xe78] sm:$0xf0]  ;;  %4494 = vmatmul.bf16.vlgmr.msrb.gmra.mxu0 %v7699_v6  ;;  %v4289_v6 = vpop.f32.mrf.mxu0 }
 0x337   :  { %v6684_v15 = vor.u32 %v7400_v57, %v6681_v14  ;;  %v7328_v16 = vld [vmem:[#allocation8 + $0xc1c] sm:$0xf]  ;;  %4518 = vmatpush.bf16.msrb.mxu2 %v6428_v22  ;;  %v1137_v57 = vperm.slane %v7828_v27, 7 }
 0x338   :  { %v6393_v19 = vld [vmem:[#allocation8 + $0xc38] sm:$0xf0]  ;;  %4507 = vmatmul.bf16.vlgmr.msrb.gmra.mxu1 %v7702_v9  ;;  %v4314_v9 = vadd.f32 %v4313_v46, %v4301_v45 }
 0x339   :  { %v7392_v23 = vld [vmem:[#allocation8 + $0xe1c] sm:$0xf]  ;;  %v6396_v25 = vor.u32 %v7328_v16, %v6393_v19  ;;  %4531 = vmatpush.bf16.msrb.mxu3 %v6684_v15 }
 0x33a   :  { %v6649_v18 = vld [vmem:[#allocation8 + $0xe38] sm:$0xf0]  ;;  %v4327_v2 = vadd.f32 %v4326_v47, %v4314_v9 }
 0x33b   :  { %v6652_v35 = vor.u32 %v7392_v23, %v6649_v18  ;;  %4519 = vmatpush.bf16.msrb.mxu2 %v6396_v25  ;;  %v4367_v54 = vpop.f32.mrf.mxu2 }
 0x33c   :  { %v4543_v30 = vmax.f32 %v4327_v2, 0.0 }
 0x33d   :  { %4532 = vmatpush.bf16.msrb.mxu3 %v6652_v35 }
 0x33e   :  { %4520 = vmatmul.bf16.vlgmr.msrb.gmra.mxu2 %v7706_v41  ;;  %4551 = vst [vmem:[#allocation11 + $0x28] sm:$0xff] %v4543_v30  ;;  %v4328_v41 = vpop.f32.mrf.mxu3  ;;  %v4339_v37 = vpop.f32.mrf.mxu0 }
 0x33f   :  { %v4340_v20 = vadd.f32 %v4339_v37, %v1136_v52 }
 0x340   :  { %4533 = vmatmul.bf16.vlgmr.msrb.gmra.mxu3 %v7708_v44  ;;  %v4352_v44 = vpop.f32.mrf.mxu1 }
 0x341   :  { %v4353_v21 = vadd.f32 %v4352_v44, %v4340_v20 }
 0x343   :  { %v4366_v59 = vadd.f32 %v4365_v48, %v4353_v21 }
 0x346   :  { %v4341_v58 = vpop.f32.mrf.mxu0  ;;  %v4378_v51 = vpop.f32.mrf.mxu3 }
 0x347   :  { %v4379_v60 = vadd.f32 %v4378_v51, %v4366_v59 }
 0x348   :  { %v4354_v32 = vpop.f32.mrf.mxu1 }
 0x34e   :  { %v4380_v55 = vpop.f32.mrf.mxu3 }
 0x358   :  { %v4391_v56 = vpop.f32.mrf.mxu0 }
 0x359   :  { %v4392_v61 = vadd.f32 %v4391_v56, %v4379_v60 }
 0x35a   :  { %v4404_v3 = vpop.f32.mrf.mxu1 }
 0x35b   :  { %v4405_v0 = vadd.f32 %v4404_v3, %v4392_v61 }
 0x360   :  { %v4393_v62 = vpop.f32.mrf.mxu0 }
 0x362   :  { %v4406_v63 = vpop.f32.mrf.mxu1 }
 0x366   :  { %v4417_v1 = vpop.f32.mrf.mxu2 }
 0x367   :  { %v4418_v4 = vadd.f32 %v4417_v1, %v4405_v0 }
 0x368   :  { %v4430_v5 = vpop.f32.mrf.mxu3 }
 0x369   :  { %v4431_v7 = vadd.f32 %v4430_v5, %v4418_v4 }
 0x36b   :  { %v4544_v8 = vmax.f32 %v4431_v7, 0.0 }
 0x36d   :  { %4552 = vst [vmem:[#allocation11 + $0x30] sm:$0xff] %v4544_v8 }
 0x36e   :  { %v4419_v11 = vpop.f32.mrf.mxu2 }
 0x370   :  { %v4432_v33 = vpop.f32.mrf.mxu3 }
 0x378   :  { %v4443_v26 = vpop.f32.mrf.mxu0 }
 0x379   :  { %v4444_v22 = vadd.f32 %v4443_v26, %v1137_v57 }
 0x37a   :  { %v4456_v24 = vpop.f32.mrf.mxu1 }
 0x37b   :  { %v4457_v15 = vadd.f32 %v4456_v24, %v4444_v22 }
 0x380   :  { %v4445_v12 = vpop.f32.mrf.mxu0 }
 0x382   :  { %v4458_v29 = vpop.f32.mrf.mxu1 }
 0x389   :  { %v4469_v13 = vpop.f32.mrf.mxu2 }
 0x38a   :  { %v4470_v19 = vadd.f32 %v4469_v13, %v4457_v15 }
 0x38b   :  { %v4482_v17 = vpop.f32.mrf.mxu3 }
 0x38c   :  { %v4483_v18 = vadd.f32 %v4482_v17, %v4470_v19 }
 0x391   :  { %v4471_v14 = vpop.f32.mrf.mxu2 }
 0x393   :  { %v4484_v10 = vpop.f32.mrf.mxu3 }
 0x3b3   :  { %v4495_v16 = vpop.f32.mrf.mxu0 }
 0x3b4   :  { %v4496_v25 = vadd.f32 %v4495_v16, %v4483_v18 }
 0x3b5   :  { %v4508_v23 = vpop.f32.mrf.mxu1 }
 0x3b6   :  { %v4509_v35 = vadd.f32 %v4508_v23, %v4496_v25 }
 0x3bb   :  { %v4497_v34 = vpop.f32.mrf.mxu0 }
 0x3bd   :  { %v4510_v28 = vpop.f32.mrf.mxu1 }
 0x3c1   :  { %v4521_v53 = vpop.f32.mrf.mxu2 }
 0x3c2   :  { %v4522_v31 = vadd.f32 %v4521_v53, %v4509_v35 }
 0x3c3   :  { %v4534_v43 = vpop.f32.mrf.mxu3 }
 0x3c4   :  { %v4535_v27 = vadd.f32 %v4534_v43, %v4522_v31 }
 0x3c6   :  { %v4545_v36 = vmax.f32 %v4535_v27, 0.0 }
 0x3c8   :  { %4553 = vst [vmem:[#allocation11 + $0x38] sm:$0xff] %v4545_v36 }
 0x3c9   :  { %v4523_v38 = vpop.f32.mrf.mxu2  ;;  %4564 = dma.vmem_to_hbm [thread:$0]  %s4560_s4, 1024, %s4562_s19, [#allocation4]  }
 0x3cb   :  { %v4536_v49 = vpop.f32.mrf.mxu3 }
 0x3cc   :  { %7613 = dma.done.wait [#allocation4], 1024  }
 0x3cd   :  { %7614 = vsyncadd [#allocation4], 4294966272 }
 0x3ce   :  { %4569 = vsyncpa [#allocation3], 1 }
 0x3cf   :  { %4570 = vsyncpa [#allocation6], 1 }
 0x3d0   :  { %4571 = vsyncpa [#allocation9], 1 }
 0x3d1   :  { %4572 = vsyncpa [#allocation4], 1 }

// kernel: tpu_custom_call.1
= control target key start
LH: loop header
LB: loop body
LE: loop exit
PB: predicated region body
PF: predicated region fallthrough
CT: control target
= control target key end

     0   :  { %10 = vsyncpa [#allocation3], 0  ;;  %s7842_s0 = inlined_call_operand.hbm [shape: bf16[8,128], index: 0, kind: input, shape index: {}]   ;;  %s7843_s1 = inlined_call_operand.hbm [shape: bf16[128,1024], index: 1, kind: input, shape index: {}]   ;;  %s7844_s2 = inlined_call_operand.hbm [shape: f32[1,1024], index: 2, kind: input, shape index: {}]   ;;  %s7845_s3 = inlined_call_operand.hbm [shape: bf16[1024,1024], index: 3, kind: input, shape index: {}]   ;;  %s7846_s4 = inlined_call_operand.hbm [shape: f32[1,1024], index: 4, kind: input, shape index: {}]   ;;  %s7847_s5 = inlined_call_operand.hbm [shape: f32[8,1024], index: 5, kind: output, shape index: {}]  }
   0x1   :  { %11 = vsyncpa [#allocation6], 0 }
   0x2   :  { %12 = vsyncpa [#allocation9], 0  ;;  %s29_s20 = sshll.u32 %s7843_s1, 4  ;;  %s30_s20 = int_to_ptr.hbm [resolvable:$true] %s29_s20 }
   0x3   :  { %13 = vsyncpa [#allocation4], 0  ;;  %s7615_s21 = smov [#allocation5]   ;;  %s53_s25 = sshll.u32 %s7845_s3, 4  ;;  %s54_s25 = int_to_ptr.hbm [resolvable:$true] %s53_s25 }
   0x4   :  { %s31_s22 = sshll.u32 %s7615_s21, 4  ;;  %s7616_s26 = smov 512   ;;  %s32_s22 = int_to_ptr.vmem [resolvable:$true] %s31_s22 }
   0x5   :  { %s7617_s27 = smov 32   ;;  %s7618_s28 = smov [#allocation8]  }
   0x6   :  { %37 = dma.hbm_to_vmem [thread:$0]  %s30_s20, 8192, %s32_s22, [#allocation6], %s7616_s26, %s7616_s26, %s7617_s27  }
   0x7   :  { %s55_s29 = sshll.u32 %s7618_s28, 4  ;;  %s19_s7 = sshll.u32 %s7842_s0, 4  ;;  %s56_s29 = int_to_ptr.vmem [resolvable:$true] %s55_s29  ;;  %s20_s7 = int_to_ptr.hbm [resolvable:$true] %s19_s7 }
   0x8   :  { %61 = dma.hbm_to_vmem [thread:$0]  %s54_s25, 65536, %s56_s29, [#allocation9], %s7616_s26, %s7616_s26, %s7617_s27  }
   0x9   :  { %s43_s9 = sshll.u32 %s7844_s2, 4  ;;  %s7619_s10 = smov [#allocation2]   ;;  %s44_s9 = int_to_ptr.hbm [resolvable:$true] %s43_s9 }
   0xa   :  { %s21_s11 = sshll.u32 %s7619_s10, 4  ;;  %s7620_s3 = smov [#allocation7]   ;;  %s22_s11 = int_to_ptr.vmem [resolvable:$true] %s21_s11 }
   0xb   :  { %24 = dma.hbm_to_vmem [thread:$0]  %s20_s7, 64, %s22_s11, [#allocation3]  }
   0xc   :  { %s45_s12 = sshll.u32 %s7620_s3, 4  ;;  %s67_s15 = sshll.u32 %s7846_s4, 4  ;;  %s46_s12 = int_to_ptr.vmem [resolvable:$true] %s45_s12  ;;  %s68_s15 = int_to_ptr.hbm [resolvable:$true] %s67_s15 }
   0xd   :  { %48 = dma.hbm_to_vmem [thread:$0]  %s44_s9, 128, %s46_s12, [#allocation6]  }
   0xe   :  { %s7621_s0 = smov [#allocation10]  }
   0xf   :  { %s69_s16 = sshll.u32 %s7621_s0, 4  ;;  %s70_s16 = int_to_ptr.vmem [resolvable:$true] %s69_s16 }
  0x10   :  { %72 = dma.hbm_to_vmem [thread:$0]  %s68_s15, 128, %s70_s16, [#allocation9]  }
  0x11   :  { %7607 = dma.done.wait [#allocation3], 64  }
  0x12   :  { %7608 = vsyncadd [#allocation3], 4294967232 }
  0x13   :  { %7609 = dma.done.wait [#allocation6], 8320  }
  0x14   :  { %7610 = vsyncadd [#allocation6], 4294958976 }
  0x15   :  { %7611 = dma.done.wait [#allocation9], 65664  }
  0x16   :  { %7612 = vsyncadd [#allocation9], 4294901632  ;;  %v4799_v0 = vld [vmem:[#allocation5 + $0x1c0] sm:$0xf]  ;;  %v6933_v2 = vld [vmem:[#allocation5 + $0x1c4] sm:$0xf] }
  0x17   :  { %v6937_v1 = vld [vmem:[#allocation5 + $0x1dc] sm:$0xf0]  ;;  %v4801_v4 = vld [vmem:[#allocation5 + $0x1e0] sm:$0xf0]  ;;  %v4807_v5 = vld [vmem:[#allocation5 + $0x1c8] sm:$0xf] }
  0x18   :  { %v4800_v3 = vor.u32 %v6937_v1, %v4799_v0  ;;  %v6938_v6 = vld [vmem:[#allocation5 + $0x1e4] sm:$0xf0]  ;;  %v4804_v7 = vor.u32 %v6933_v2, %v4801_v4  ;;  %v6934_v9 = vld [vmem:[#allocation5 + $0x1cc] sm:$0xf]  ;;  %v4767_v11 = vld [vmem:[#allocation5 + $0x180] sm:$0xf] }
  0x19   :  { %v4808_v8 = vor.u32 %v6938_v6, %v4807_v5  ;;  %v4809_v10 = vld [vmem:[#allocation5 + $0x1e8] sm:$0xf0]  ;;  %v6929_v13 = vld [vmem:[#allocation5 + $0x19c] sm:$0xf0]  ;;  %v6925_v14 = vld [vmem:[#allocation5 + $0x184] sm:$0xf] }
  0x1a   :  { %496 = vmatpush.bf16.msra.mxu0 %v4800_v3  ;;  %v4812_v12 = vor.u32 %v6934_v9, %v4809_v10  ;;  %v4769_v15 = vld [vmem:[#allocation5 + $0x1a0] sm:$0xf0]  ;;  %509 = vmatpush.bf16.msra.mxu1 %v4804_v7  ;;  %v4768_v16 = vor.u32 %v6929_v13, %v4767_v11  ;;  %v4775_v18 = vld [vmem:[#allocation5 + $0x188] sm:$0xf]  ;;  %v6926_v20 = vld [vmem:[#allocation5 + $0x18c] sm:$0xf] }
  0x1b   :  { %522 = vmatpush.bf16.msra.mxu2 %v4808_v8  ;;  %v4772_v17 = vor.u32 %v6925_v14, %v4769_v15  ;;  %v6930_v19 = vld [vmem:[#allocation5 + $0x1a4] sm:$0xf0]  ;;  %v4777_v22 = vld [vmem:[#allocation5 + $0x1a8] sm:$0xf0]  ;;  %v4735_v23 = vld [vmem:[#allocation5 + $0x140] sm:$0xf] }
  0x1c   :  { %535 = vmatpush.bf16.msra.mxu3 %v4812_v12  ;;  %v4776_v21 = vor.u32 %v6930_v19, %v4775_v18  ;;  %v6921_v24 = vld [vmem:[#allocation5 + $0x15c] sm:$0xf0]  ;;  %v4780_v25 = vor.u32 %v6926_v20, %v4777_v22  ;;  %v6917_v26 = vld [vmem:[#allocation5 + $0x144] sm:$0xf]  ;;  %v4743_v28 = vld [vmem:[#allocation5 + $0x148] sm:$0xf] }
  0x1d   :  { %v4737_v27 = vld [vmem:[#allocation5 + $0x160] sm:$0xf0]  ;;  %v4736_v29 = vor.u32 %v6921_v24, %v4735_v23  ;;  %v6922_v30 = vld [vmem:[#allocation5 + $0x164] sm:$0xf0]  ;;  %v6918_v31 = vld [vmem:[#allocation5 + $0x14c] sm:$0xf] }
  0x1e   :  { %497 = vmatpush.bf16.msra.mxu0 %v4768_v16  ;;  %v4745_v32 = vld [vmem:[#allocation5 + $0x168] sm:$0xf0]  ;;  %510 = vmatpush.bf16.msra.mxu1 %v4772_v17  ;;  %v4740_v33 = vor.u32 %v6917_v26, %v4737_v27  ;;  %v4744_v34 = vor.u32 %v6922_v30, %v4743_v28  ;;  %v4703_v35 = vld [vmem:[#allocation5 + $0x100] sm:$0xf]  ;;  %v6909_v37 = vld [vmem:[#allocation5 + $0x104] sm:$0xf] }
  0x1f   :  { %523 = vmatpush.bf16.msra.mxu2 %v4776_v21  ;;  %v6913_v36 = vld [vmem:[#allocation5 + $0x11c] sm:$0xf0]  ;;  %v4748_v38 = vor.u32 %v6918_v31, %v4745_v32  ;;  %v4705_v39 = vld [vmem:[#allocation5 + $0x120] sm:$0xf0]  ;;  %v4711_v40 = vld [vmem:[#allocation5 + $0x108] sm:$0xf] }
  0x20   :  { %536 = vmatpush.bf16.msra.mxu3 %v4780_v25  ;;  %v6914_v41 = vld [vmem:[#allocation5 + $0x124] sm:$0xf0]  ;;  %v6910_v42 = vld [vmem:[#allocation5 + $0x10c] sm:$0xf]  ;;  %v4704_v44 = vor.u32 %v6913_v36, %v4703_v35  ;;  %v4708_v45 = vor.u32 %v6909_v37, %v4705_v39  ;;  %v4671_v47 = vld [vmem:[#allocation5 + $0xc0] sm:$0xf] }
  0x21   :  { %v4713_v43 = vld [vmem:[#allocation5 + $0x128] sm:$0xf0]  ;;  %v4712_v46 = vor.u32 %v6914_v41, %v4711_v40  ;;  %v6905_v48 = vld [vmem:[#allocation5 + $0xdc] sm:$0xf0]  ;;  %v6901_v49 = vld [vmem:[#allocation5 + $0xc4] sm:$0xf] }
  0x22   :  { %498 = vmatpush.bf16.msra.mxu0 %v4736_v29  ;;  %511 = vmatpush.bf16.msra.mxu1 %v4740_v33  ;;  %v4716_v50 = vor.u32 %v6910_v42, %v4713_v43  ;;  %v4673_v51 = vld [vmem:[#allocation5 + $0xe0] sm:$0xf0]  ;;  %v4679_v52 = vld [vmem:[#allocation5 + $0xc8] sm:$0xf]  ;;  %v6902_v54 = vld [vmem:[#allocation5 + $0xcc] sm:$0xf]  ;;  %v4672_v56 = vor.u32 %v6905_v48, %v4671_v47 }
  0x23   :  { %524 = vmatpush.bf16.msra.mxu2 %v4744_v34  ;;  %v6906_v53 = vld [vmem:[#allocation5 + $0xe4] sm:$0xf0]  ;;  %v4681_v55 = vld [vmem:[#allocation5 + $0xe8] sm:$0xf0]  ;;  %v4676_v57 = vor.u32 %v6901_v49, %v4673_v51  ;;  %v4639_v59 = vld [vmem:[#allocation5 + $0x80] sm:$0xf] }
  0x24   :  { %537 = vmatpush.bf16.msra.mxu3 %v4748_v38  ;;  %v4680_v58 = vor.u32 %v6906_v53, %v4679_v52  ;;  %v6897_v60 = vld [vmem:[#allocation5 + $0x9c] sm:$0xf0]  ;;  %v6893_v61 = vld [vmem:[#allocation5 + $0x84] sm:$0xf]  ;;  %v4684_v62 = vor.u32 %v6902_v54, %v4681_v55  ;;  %v4647_v0 = vld [vmem:[#allocation5 + $0x88] sm:$0xf] }
  0x25   :  { %v4641_v63 = vld [vmem:[#allocation5 + $0xa0] sm:$0xf0]  ;;  %v6898_v1 = vld [vmem:[#allocation5 + $0xa4] sm:$0xf0]  ;;  %v6894_v2 = vld [vmem:[#allocation5 + $0x8c] sm:$0xf]  ;;  %v4640_v4 = vor.u32 %v6897_v60, %v4639_v59 }
  0x26   :  { %499 = vmatpush.bf16.msra.mxu0 %v4704_v44  ;;  %512 = vmatpush.bf16.msra.mxu1 %v4708_v45  ;;  %v4649_v3 = vld [vmem:[#allocation5 + $0xa8] sm:$0xf0]  ;;  %v4644_v5 = vor.u32 %v6893_v61, %v4641_v63  ;;  %v4648_v6 = vor.u32 %v6898_v1, %v4647_v0  ;;  %v4607_v7 = vld [vmem:[#allocation5 + $0x40] sm:$0xf]  ;;  %v6885_v9 = vld [vmem:[#allocation5 + $0x44] sm:$0xf] }
  0x27   :  { %525 = vmatpush.bf16.msra.mxu2 %v4712_v46  ;;  %v6889_v8 = vld [vmem:[#allocation5 + $0x5c] sm:$0xf0]  ;;  %v4652_v10 = vor.u32 %v6894_v2, %v4649_v3  ;;  %v4609_v11 = vld [vmem:[#allocation5 + $0x60] sm:$0xf0]  ;;  %v4615_v12 = vld [vmem:[#allocation5 + $0x48] sm:$0xf] }
  0x28   :  { %538 = vmatpush.bf16.msra.mxu3 %v4716_v50  ;;  %v6890_v13 = vld [vmem:[#allocation5 + $0x64] sm:$0xf0]  ;;  %v6886_v14 = vld [vmem:[#allocation5 + $0x4c] sm:$0xf]  ;;  %v4608_v16 = vor.u32 %v6889_v8, %v4607_v7  ;;  %v4575_v17 = vld [vmem:[#allocation5] sm:$0xf]  ;;  %v4612_v19 = vor.u32 %v6885_v9, %v4609_v11 }
  0x29   :  { %v4617_v15 = vld [vmem:[#allocation5 + $0x68] sm:$0xf0]  ;;  %v6881_v18 = vld [vmem:[#allocation5 + $0x1c] sm:$0xf0]  ;;  %v4616_v20 = vor.u32 %v6890_v13, %v4615_v12  ;;  %v6877_v21 = vld [vmem:[#allocation5 + $0x4] sm:$0xf] }
  0x2a   :  { %500 = vmatpush.bf16.msra.mxu0 %v4672_v56  ;;  %513 = vmatpush.bf16.msra.mxu1 %v4676_v57  ;;  %v4577_v22 = vld [vmem:[#allocation5 + $0x20] sm:$0xf0]  ;;  %v4583_v23 = vld [vmem:[#allocation5 + $0x8] sm:$0xf]  ;;  %v4620_v24 = vor.u32 %v6886_v14, %v4617_v15  ;;  %v6878_v26 = vld [vmem:[#allocation5 + $0xc] sm:$0xf]  ;;  %v4576_v31 = vor.u32 %v6881_v18, %v4575_v17 }
  0x2b   :  { %526 = vmatpush.bf16.msra.mxu2 %v4680_v58  ;;  %v6882_v25 = vld [vmem:[#allocation5 + $0x24] sm:$0xf0]  ;;  %v4585_v27 = vld [vmem:[#allocation5 + $0x28] sm:$0xf0]  ;;  %v4815_v28 = vld [vmem:[#allocation5 + $0x1d0] sm:$0xf]  ;;  %v4580_v35 = vor.u32 %v6877_v21, %v4577_v22 }
  0x2c   :  { %539 = vmatpush.bf16.msra.mxu3 %v4684_v62  ;;  %v6939_v29 = vld [vmem:[#allocation5 + $0x1ec] sm:$0xf0]  ;;  %v6935_v30 = vld [vmem:[#allocation5 + $0x1d4] sm:$0xf]  ;;  %v4823_v33 = vld [vmem:[#allocation5 + $0x1d8] sm:$0xf]  ;;  %v4584_v36 = vor.u32 %v6882_v25, %v4583_v23  ;;  %v4588_v39 = vor.u32 %v6878_v26, %v4585_v27 }
  0x2d   :  { %v4817_v32 = vld [vmem:[#allocation5 + $0x1f0] sm:$0xf0]  ;;  %v6940_v34 = vld [vmem:[#allocation5 + $0x1f4] sm:$0xf0]  ;;  %v6936_v37 = vld [vmem:[#allocation5 + $0x1dc] sm:$0xf]  ;;  %v4816_v40 = vor.u32 %v6939_v29, %v4815_v28 }
  0x2e   :  { %501 = vmatpush.bf16.msra.mxu0 %v4640_v4  ;;  %514 = vmatpush.bf16.msra.mxu1 %v4644_v5  ;;  %v4825_v38 = vld [vmem:[#allocation5 + $0x1f8] sm:$0xf0]  ;;  %v4820_v41 = vor.u32 %v6935_v30, %v4817_v32  ;;  %v4824_v42 = vor.u32 %v6940_v34, %v4823_v33  ;;  %v4783_v43 = vld [vmem:[#allocation5 + $0x190] sm:$0xf]  ;;  %v6927_v45 = vld [vmem:[#allocation5 + $0x194] sm:$0xf] }
  0x2f   :  { %527 = vmatpush.bf16.msra.mxu2 %v4648_v6  ;;  %v6931_v44 = vld [vmem:[#allocation5 + $0x1ac] sm:$0xf0]  ;;  %v4828_v46 = vor.u32 %v6936_v37, %v4825_v38  ;;  %v4785_v47 = vld [vmem:[#allocation5 + $0x1b0] sm:$0xf0]  ;;  %v4791_v48 = vld [vmem:[#allocation5 + $0x198] sm:$0xf] }
  0x30   :  { %540 = vmatpush.bf16.msra.mxu3 %v4652_v10  ;;  %v6932_v49 = vld [vmem:[#allocation5 + $0x1b4] sm:$0xf0]  ;;  %v7668_v50 = vld [vmem:[#allocation2] sm:$0xf]  ;;  %v4784_v53 = vor.u32 %v6931_v44, %v4783_v43  ;;  %v4788_v54 = vor.u32 %v6927_v45, %v4785_v47  ;;  %v4751_v56 = vld [vmem:[#allocation5 + $0x150] sm:$0xf] }
  0x31   :  { %v6928_v51 = vld [vmem:[#allocation5 + $0x19c] sm:$0xf]  ;;  %v4792_v55 = vor.u32 %v6932_v49, %v4791_v48  ;;  %v6923_v57 = vld [vmem:[#allocation5 + $0x16c] sm:$0xf0]  ;;  %v6919_v58 = vld [vmem:[#allocation5 + $0x154] sm:$0xf] }
  0x32   :  { %502 = vmatpush.bf16.msra.mxu0 %v4608_v16  ;;  %515 = vmatpush.bf16.msra.mxu1 %v4612_v19  ;;  %v4793_v52 = vld [vmem:[#allocation5 + $0x1b8] sm:$0xf0]  ;;  %v4753_v60 = vld [vmem:[#allocation5 + $0x170] sm:$0xf0]  ;;  %v4759_v61 = vld [vmem:[#allocation5 + $0x158] sm:$0xf]  ;;  %v4752_v1 = vor.u32 %v6923_v57, %v4751_v56 }
  0x33   :  { %528 = vmatpush.bf16.msra.mxu2 %v4616_v20  ;;  %v4796_v59 = vor.u32 %v6928_v51, %v4793_v52  ;;  %v6924_v62 = vld [vmem:[#allocation5 + $0x174] sm:$0xf0]  ;;  %v6920_v63 = vld [vmem:[#allocation5 + $0x15c] sm:$0xf]  ;;  %v4756_v2 = vor.u32 %v6919_v58, %v4753_v60  ;;  %v4719_v4 = vld [vmem:[#allocation5 + $0x110] sm:$0xf] }
  0x34   :  { %541 = vmatpush.bf16.msra.mxu3 %v4620_v24  ;;  %v4761_v0 = vld [vmem:[#allocation5 + $0x178] sm:$0xf0]  ;;  %v4760_v3 = vor.u32 %v6924_v62, %v4759_v61  ;;  %v6915_v5 = vld [vmem:[#allocation5 + $0x12c] sm:$0xf0]  ;;  %v6911_v6 = vld [vmem:[#allocation5 + $0x114] sm:$0xf] }
  0x35   :  { %v4764_v7 = vor.u32 %v6920_v63, %v4761_v0  ;;  %v4721_v8 = vld [vmem:[#allocation5 + $0x130] sm:$0xf0]  ;;  %v4727_v9 = vld [vmem:[#allocation5 + $0x118] sm:$0xf]  ;;  %v6912_v11 = vld [vmem:[#allocation5 + $0x11c] sm:$0xf]  ;;  %v4720_v13 = vor.u32 %v6915_v5, %v4719_v4 }
  0x36   :  { %503 = vmatpush.bf16.msra.mxu0 %v4576_v31  ;;  %516 = vmatpush.bf16.msra.mxu1 %v4580_v35  ;;  %v6916_v10 = vld [vmem:[#allocation5 + $0x134] sm:$0xf0]  ;;  %v4729_v12 = vld [vmem:[#allocation5 + $0x138] sm:$0xf0]  ;;  %v4724_v14 = vor.u32 %v6911_v6, %v4721_v8  ;;  %v4687_v16 = vld [vmem:[#allocation5 + $0xd0] sm:$0xf] }
  0x37   :  { %529 = vmatpush.bf16.msra.mxu2 %v4584_v36  ;;  %v4728_v15 = vor.u32 %v6916_v10, %v4727_v9  ;;  %v6907_v17 = vld [vmem:[#allocation5 + $0xec] sm:$0xf0]  ;;  %v6903_v18 = vld [vmem:[#allocation5 + $0xd4] sm:$0xf]  ;;  %v4732_v19 = vor.u32 %v6912_v11, %v4729_v12  ;;  %v4695_v21 = vld [vmem:[#allocation5 + $0xd8] sm:$0xf] }
  0x38   :  { %542 = vmatpush.bf16.msra.mxu3 %v4588_v39  ;;  %v4689_v20 = vld [vmem:[#allocation5 + $0xf0] sm:$0xf0]  ;;  %v6908_v22 = vld [vmem:[#allocation5 + $0xf4] sm:$0xf0]  ;;  %v6904_v23 = vld [vmem:[#allocation5 + $0xdc] sm:$0xf]  ;;  %v4688_v25 = vor.u32 %v6907_v17, %v4687_v16 }
  0x39   :  { %504 = vmatmul.bf16.vlgmr.msra.gmra.mxu0 %v7668_v50  ;;  %517 = vmatmul.bf16.vlgmr.msra.gmra.mxu1 %v7668_v50  ;;  %v4697_v24 = vld [vmem:[#allocation5 + $0xf8] sm:$0xf0]  ;;  %v4692_v26 = vor.u32 %v6903_v18, %v4689_v20  ;;  %v4696_v27 = vor.u32 %v6908_v22, %v4695_v21  ;;  %v4655_v28 = vld [vmem:[#allocation5 + $0x90] sm:$0xf]  ;;  %v6895_v30 = vld [vmem:[#allocation5 + $0x94] sm:$0xf] }
  0x3a   :  { %548 = vmatpush.bf16.msrb.mxu0 %v4816_v40  ;;  %561 = vmatpush.bf16.msrb.mxu1 %v4820_v41  ;;  %v6899_v29 = vld [vmem:[#allocation5 + $0xac] sm:$0xf0]  ;;  %v4700_v31 = vor.u32 %v6904_v23, %v4697_v24  ;;  %v4657_v32 = vld [vmem:[#allocation5 + $0xb0] sm:$0xf0]  ;;  %v4663_v33 = vld [vmem:[#allocation5 + $0x98] sm:$0xf] }
  0x3b   :  { %574 = vmatpush.bf16.msrb.mxu2 %v4824_v42  ;;  %543 = vmatmul.bf16.vlgmr.msra.gmra.mxu3 %v7668_v50  ;;  %v6900_v34 = vld [vmem:[#allocation5 + $0xb4] sm:$0xf0]  ;;  %v6896_v35 = vld [vmem:[#allocation5 + $0x9c] sm:$0xf]  ;;  %v4656_v37 = vor.u32 %v6899_v29, %v4655_v28  ;;  %v4660_v38 = vor.u32 %v6895_v30, %v4657_v32  ;;  %v4623_v40 = vld [vmem:[#allocation5 + $0x50] sm:$0xf] }
  0x3c   :  { %587 = vmatpush.bf16.msrb.mxu3 %v4828_v46  ;;  %530 = vmatmul.bf16.vlgmr.msra.gmra.mxu2 %v7668_v50  ;;  %v4665_v36 = vld [vmem:[#allocation5 + $0xb8] sm:$0xf0]  ;;  %v4664_v39 = vor.u32 %v6900_v34, %v4663_v33  ;;  %v6891_v41 = vld [vmem:[#allocation5 + $0x6c] sm:$0xf0]  ;;  %v6887_v42 = vld [vmem:[#allocation5 + $0x54] sm:$0xf] }
  0x3d   :  { %v4668_v43 = vor.u32 %v6896_v35, %v4665_v36  ;;  %v4625_v44 = vld [vmem:[#allocation5 + $0x70] sm:$0xf0]  ;;  %v4631_v45 = vld [vmem:[#allocation5 + $0x58] sm:$0xf]  ;;  %v6888_v47 = vld [vmem:[#allocation5 + $0x5c] sm:$0xf]  ;;  %v4624_v49 = vor.u32 %v6891_v41, %v4623_v40 }
  0x3e   :  { %549 = vmatpush.bf16.msrb.mxu0 %v4784_v53  ;;  %562 = vmatpush.bf16.msrb.mxu1 %v4788_v54  ;;  %v6892_v46 = vld [vmem:[#allocation5 + $0x74] sm:$0xf0]  ;;  %v4633_v48 = vld [vmem:[#allocation5 + $0x78] sm:$0xf0]  ;;  %v4591_v51 = vld [vmem:[#allocation5 + $0x10] sm:$0xf]  ;;  %v4628_v52 = vor.u32 %v6887_v42, %v4625_v44 }
  0x3f   :  { %575 = vmatpush.bf16.msrb.mxu2 %v4792_v55  ;;  %v4632_v53 = vor.u32 %v6892_v46, %v4631_v45  ;;  %v6883_v54 = vld [vmem:[#allocation5 + $0x2c] sm:$0xf0]  ;;  %v6879_v55 = vld [vmem:[#allocation5 + $0x14] sm:$0xf]  ;;  %v4636_v57 = vor.u32 %v6888_v47, %v4633_v48  ;;  %v4599_v58 = vld [vmem:[#allocation5 + $0x18] sm:$0xf] }
  0x40   :  { %588 = vmatpush.bf16.msrb.mxu3 %v4796_v59  ;;  %v4593_v56 = vld [vmem:[#allocation5 + $0x30] sm:$0xf0]  ;;  %v6884_v59 = vld [vmem:[#allocation5 + $0x34] sm:$0xf0]  ;;  %v6880_v60 = vld [vmem:[#allocation5 + $0x1c] sm:$0xf]  ;;  %v4592_v0 = vor.u32 %v6883_v54, %v4591_v51 }
  0x41   :  { %v4601_v61 = vld [vmem:[#allocation5 + $0x38] sm:$0xf0]  ;;  %v5055_v62 = vld [vmem:[#allocation8 + $0x1c0] sm:$0xf]  ;;  %v4600_v4 = vor.u32 %v6884_v59, %v4599_v58  ;;  %s7622_s2 = smov [#allocation11]   ;;  %s4561_s19 = sshll.u32 %s7847_s5, 4  ;;  %s4562_s19 = int_to_ptr.hbm [resolvable:$true] %s4561_s19 }
  0x42   :  { %550 = vmatpush.bf16.msrb.mxu0 %v4752_v1  ;;  %563 = vmatpush.bf16.msrb.mxu1 %v4756_v2  ;;  %v7001_v63 = vld [vmem:[#allocation8 + $0x1dc] sm:$0xf0]  ;;  %v4604_v5 = vor.u32 %v6880_v60, %v4601_v61  ;;  %s4559_s4 = sshll.u32 %s7622_s2, 4  ;;  %s4560_s4 = int_to_ptr.vmem [resolvable:$true] %s4559_s4 }
  0x43   :  { %576 = vmatpush.bf16.msrb.mxu2 %v4760_v3  ;;  %v5311_v1 = vld [vmem:[#allocation8 + $0x3c0] sm:$0xf]  ;;  %v4596_v3 = vor.u32 %v6879_v55, %v4593_v56  ;;  %v5056_v6 = vor.u32 %v7001_v63, %v5055_v62 }
  0x44   :  { %589 = vmatpush.bf16.msrb.mxu3 %v4764_v7  ;;  %v7065_v2 = vld [vmem:[#allocation8 + $0x3dc] sm:$0xf0] }
  0x45   :  { %v5023_v7 = vld [vmem:[#allocation8 + $0x180] sm:$0xf]  ;;  %v5312_v10 = vor.u32 %v7065_v2, %v5311_v1 }
  0x46   :  { %551 = vmatpush.bf16.msrb.mxu0 %v4720_v13  ;;  %564 = vmatpush.bf16.msrb.mxu1 %v4724_v14  ;;  %v5567_v8 = vld [vmem:[#allocation8 + $0x5c0] sm:$0xf] }
  0x47   :  { %577 = vmatpush.bf16.msrb.mxu2 %v4728_v15  ;;  %v7129_v9 = vld [vmem:[#allocation8 + $0x5dc] sm:$0xf0] }
  0x48   :  { %590 = vmatpush.bf16.msrb.mxu3 %v4732_v19  ;;  %v6993_v11 = vld [vmem:[#allocation8 + $0x19c] sm:$0xf0]  ;;  %v5568_v16 = vor.u32 %v7129_v9, %v5567_v8 }
  0x49   :  { %v5823_v12 = vld [vmem:[#allocation8 + $0x7c0] sm:$0xf]  ;;  %v5024_v17 = vor.u32 %v6993_v11, %v5023_v7 }
  0x4a   :  { %552 = vmatpush.bf16.msrb.mxu0 %v4688_v25  ;;  %565 = vmatpush.bf16.msrb.mxu1 %v4692_v26  ;;  %v7193_v13 = vld [vmem:[#allocation8 + $0x7dc] sm:$0xf0] }
  0x4b   :  { %578 = vmatpush.bf16.msrb.mxu2 %v4696_v27  ;;  %v5279_v14 = vld [vmem:[#allocation8 + $0x380] sm:$0xf]  ;;  %v5824_v18 = vor.u32 %v7193_v13, %v5823_v12 }
  0x4c   :  { %591 = vmatpush.bf16.msrb.mxu3 %v4700_v31  ;;  %v7057_v15 = vld [vmem:[#allocation8 + $0x39c] sm:$0xf0] }
  0x4d   :  { %v4991_v19 = vld [vmem:[#allocation8 + $0x140] sm:$0xf]  ;;  %v5280_v22 = vor.u32 %v7057_v15, %v5279_v14 }
  0x4e   :  { %553 = vmatpush.bf16.msrb.mxu0 %v4656_v37  ;;  %566 = vmatpush.bf16.msrb.mxu1 %v4660_v38  ;;  %v5535_v20 = vld [vmem:[#allocation8 + $0x580] sm:$0xf] }
  0x4f   :  { %579 = vmatpush.bf16.msrb.mxu2 %v4664_v39  ;;  %v7121_v21 = vld [vmem:[#allocation8 + $0x59c] sm:$0xf0] }
  0x50   :  { %592 = vmatpush.bf16.msrb.mxu3 %v4668_v43  ;;  %v6985_v23 = vld [vmem:[#allocation8 + $0x15c] sm:$0xf0]  ;;  %v5536_v28 = vor.u32 %v7121_v21, %v5535_v20 }
  0x51   :  { %v5791_v24 = vld [vmem:[#allocation8 + $0x780] sm:$0xf]  ;;  %v4992_v29 = vor.u32 %v6985_v23, %v4991_v19 }
  0x52   :  { %554 = vmatpush.bf16.msrb.mxu0 %v4624_v49  ;;  %567 = vmatpush.bf16.msrb.mxu1 %v4628_v52  ;;  %v7185_v25 = vld [vmem:[#allocation8 + $0x79c] sm:$0xf0] }
  0x53   :  { %580 = vmatpush.bf16.msrb.mxu2 %v4632_v53  ;;  %v5247_v26 = vld [vmem:[#allocation8 + $0x340] sm:$0xf]  ;;  %v5792_v30 = vor.u32 %v7185_v25, %v5791_v24 }
  0x54   :  { %593 = vmatpush.bf16.msrb.mxu3 %v4636_v57  ;;  %v7049_v27 = vld [vmem:[#allocation8 + $0x35c] sm:$0xf0] }
  0x55   :  { %v4959_v31 = vld [vmem:[#allocation8 + $0x100] sm:$0xf]  ;;  %v5248_v34 = vor.u32 %v7049_v27, %v5247_v26 }
  0x56   :  { %555 = vmatpush.bf16.msrb.mxu0 %v4592_v0  ;;  %568 = vmatpush.bf16.msrb.mxu1 %v4596_v3  ;;  %v5503_v32 = vld [vmem:[#allocation8 + $0x540] sm:$0xf] }
  0x57   :  { %581 = vmatpush.bf16.msrb.mxu2 %v4600_v4  ;;  %v7113_v33 = vld [vmem:[#allocation8 + $0x55c] sm:$0xf0] }
  0x58   :  { %594 = vmatpush.bf16.msrb.mxu3 %v4604_v5  ;;  %v6977_v35 = vld [vmem:[#allocation8 + $0x11c] sm:$0xf0]  ;;  %v5504_v40 = vor.u32 %v7113_v33, %v5503_v32 }
  0x59   :  { %556 = vmatmul.bf16.vlgmr.msrb.gmra.mxu0 %v7668_v50  ;;  %569 = vmatmul.bf16.vlgmr.msrb.gmra.mxu1 %v7668_v50  ;;  %v5759_v36 = vld [vmem:[#allocation8 + $0x740] sm:$0xf] }
  0x5a   :  { %3706 = vmatpush.bf16.msra.mxu0 %v5056_v6  ;;  %3719 = vmatpush.bf16.msra.mxu1 %v5312_v10  ;;  %v7177_v37 = vld [vmem:[#allocation8 + $0x75c] sm:$0xf0] }
  0x5b   :  { %582 = vmatmul.bf16.vlgmr.msrb.gmra.mxu2 %v7668_v50  ;;  %595 = vmatmul.bf16.vlgmr.msrb.gmra.mxu3 %v7668_v50  ;;  %v5215_v38 = vld [vmem:[#allocation8 + $0x300] sm:$0xf]  ;;  %v4960_v50 = vor.u32 %v6977_v35, %v4959_v31  ;;  %v5760_v41 = vor.u32 %v7177_v37, %v5759_v36 }
  0x5c   :  { %3732 = vmatpush.bf16.msra.mxu2 %v5568_v16  ;;  %3745 = vmatpush.bf16.msra.mxu3 %v5824_v18  ;;  %v7041_v39 = vld [vmem:[#allocation8 + $0x31c] sm:$0xf0] }
  0x5d   :  { %v4927_v42 = vld [vmem:[#allocation8 + $0xc0] sm:$0xf]  ;;  %v5216_v45 = vor.u32 %v7041_v39, %v5215_v38 }
  0x5e   :  { %3707 = vmatpush.bf16.msra.mxu0 %v5024_v17  ;;  %3720 = vmatpush.bf16.msra.mxu1 %v5280_v22  ;;  %v5471_v43 = vld [vmem:[#allocation8 + $0x500] sm:$0xf] }
  0x5f   :  { %v7105_v44 = vld [vmem:[#allocation8 + $0x51c] sm:$0xf0] }
  0x60   :  { %3733 = vmatpush.bf16.msra.mxu2 %v5536_v28  ;;  %3746 = vmatpush.bf16.msra.mxu3 %v5792_v30  ;;  %v6969_v46 = vld [vmem:[#allocation8 + $0xdc] sm:$0xf0]  ;;  %v5472_v52 = vor.u32 %v7105_v44, %v5471_v43 }
  0x61   :  { %v5727_v47 = vld [vmem:[#allocation8 + $0x700] sm:$0xf]  ;;  %v4928_v53 = vor.u32 %v6969_v46, %v4927_v42 }
  0x62   :  { %3708 = vmatpush.bf16.msra.mxu0 %v4992_v29  ;;  %3721 = vmatpush.bf16.msra.mxu1 %v5248_v34  ;;  %v7169_v48 = vld [vmem:[#allocation8 + $0x71c] sm:$0xf0] }
  0x63   :  { %v5183_v49 = vld [vmem:[#allocation8 + $0x2c0] sm:$0xf]  ;;  %v5728_v54 = vor.u32 %v7169_v48, %v5727_v47 }
  0x64   :  { %v7033_v51 = vld [vmem:[#allocation8 + $0x2dc] sm:$0xf0]  ;;  %3734 = vmatpush.bf16.msra.mxu2 %v5504_v40  ;;  %3747 = vmatpush.bf16.msra.mxu3 %v5760_v41 }
  0x65   :  { %v4895_v55 = vld [vmem:[#allocation8 + $0x80] sm:$0xf]  ;;  %v5184_v58 = vor.u32 %v7033_v51, %v5183_v49 }
  0x66   :  { %3709 = vmatpush.bf16.msra.mxu0 %v4960_v50  ;;  %v5439_v56 = vld [vmem:[#allocation8 + $0x4c0] sm:$0xf]  ;;  %3722 = vmatpush.bf16.msra.mxu1 %v5216_v45 }
  0x67   :  { %v7097_v57 = vld [vmem:[#allocation8 + $0x4dc] sm:$0xf0] }
  0x68   :  { %v6961_v59 = vld [vmem:[#allocation8 + $0x9c] sm:$0xf0]  ;;  %3735 = vmatpush.bf16.msra.mxu2 %v5472_v52  ;;  %v5440_v0 = vor.u32 %v7097_v57, %v5439_v56  ;;  %3748 = vmatpush.bf16.msra.mxu3 %v5728_v54 }
  0x69   :  { %v5695_v60 = vld [vmem:[#allocation8 + $0x6c0] sm:$0xf]  ;;  %v4896_v1 = vor.u32 %v6961_v59, %v4895_v55 }
  0x6a   :  { %v7161_v61 = vld [vmem:[#allocation8 + $0x6dc] sm:$0xf0]  ;;  %3710 = vmatpush.bf16.msra.mxu0 %v4928_v53  ;;  %3723 = vmatpush.bf16.msra.mxu1 %v5184_v58 }
  0x6b   :  { %v5151_v62 = vld [vmem:[#allocation8 + $0x280] sm:$0xf]  ;;  %v5696_v2 = vor.u32 %v7161_v61, %v5695_v60 }
  0x6c   :  { %v7025_v63 = vld [vmem:[#allocation8 + $0x29c] sm:$0xf0]  ;;  %3736 = vmatpush.bf16.msra.mxu2 %v5440_v0 }
  0x6d   :  { %v4863_v3 = vld [vmem:[#allocation8 + $0x40] sm:$0xf]  ;;  %v5152_v6 = vor.u32 %v7025_v63, %v5151_v62  ;;  %3749 = vmatpush.bf16.msra.mxu3 %v5696_v2 }
  0x6e   :  { %v5407_v4 = vld [vmem:[#allocation8 + $0x480] sm:$0xf]  ;;  %3711 = vmatpush.bf16.msra.mxu0 %v4896_v1 }
  0x6f   :  { %v7089_v5 = vld [vmem:[#allocation8 + $0x49c] sm:$0xf0]  ;;  %3724 = vmatpush.bf16.msra.mxu1 %v5152_v6 }
  0x70   :  { %v6953_v7 = vld [vmem:[#allocation8 + $0x5c] sm:$0xf0]  ;;  %v5408_v12 = vor.u32 %v7089_v5, %v5407_v4 }
  0x71   :  { %v5663_v8 = vld [vmem:[#allocation8 + $0x680] sm:$0xf]  ;;  %v4864_v14 = vor.u32 %v6953_v7, %v4863_v3 }
  0x72   :  { %v7153_v9 = vld [vmem:[#allocation8 + $0x69c] sm:$0xf0]  ;;  %3737 = vmatpush.bf16.msra.mxu2 %v5408_v12 }
  0x73   :  { %v5119_v10 = vld [vmem:[#allocation8 + $0x240] sm:$0xf]  ;;  %v5664_v15 = vor.u32 %v7153_v9, %v5663_v8  ;;  %3712 = vmatpush.bf16.msra.mxu0 %v4864_v14 }
  0x74   :  { %v7017_v11 = vld [vmem:[#allocation8 + $0x25c] sm:$0xf0] }
  0x75   :  { %v4831_v13 = vld [vmem:[#allocation8] sm:$0xf]  ;;  %v5120_v19 = vor.u32 %v7017_v11, %v5119_v10  ;;  %3750 = vmatpush.bf16.msra.mxu3 %v5664_v15 }
  0x76   :  { %v6945_v16 = vld [vmem:[#allocation8 + $0x1c] sm:$0xf0] }
  0x77   :  { %v5375_v17 = vld [vmem:[#allocation8 + $0x440] sm:$0xf]  ;;  %v4832_v29 = vor.u32 %v6945_v16, %v4831_v13  ;;  %3725 = vmatpush.bf16.msra.mxu1 %v5120_v19 }
  0x78   :  { %v7081_v18 = vld [vmem:[#allocation8 + $0x45c] sm:$0xf0] }
  0x79   :  { %v5087_v20 = vld [vmem:[#allocation8 + $0x200] sm:$0xf]  ;;  %v5376_v28 = vor.u32 %v7081_v18, %v5375_v17  ;;  %3713 = vmatpush.bf16.msra.mxu0 %v4832_v29 }
  0x7a   :  { %v5631_v21 = vld [vmem:[#allocation8 + $0x640] sm:$0xf] }
  0x7b   :  { %v7145_v22 = vld [vmem:[#allocation8 + $0x65c] sm:$0xf0]  ;;  %3738 = vmatpush.bf16.msra.mxu2 %v5376_v28 }
  0x7c   :  { %v7009_v23 = vld [vmem:[#allocation8 + $0x21c] sm:$0xf0]  ;;  %v5632_v30 = vor.u32 %v7145_v22, %v5631_v21 }
  0x7d   :  { %v6079_v24 = vld [vmem:[#allocation8 + $0x9c0] sm:$0xf]  ;;  %v5088_v35 = vor.u32 %v7009_v23, %v5087_v20 }
  0x7e   :  { %v7257_v25 = vld [vmem:[#allocation8 + $0x9dc] sm:$0xf0]  ;;  %3751 = vmatpush.bf16.msra.mxu3 %v5632_v30 }
  0x7f   :  { %v6335_v26 = vld [vmem:[#allocation8 + $0xbc0] sm:$0xf]  ;;  %v6080_v36 = vor.u32 %v7257_v25, %v6079_v24  ;;  %3726 = vmatpush.bf16.msra.mxu1 %v5088_v35 }
  0x80   :  { %v7321_v27 = vld [vmem:[#allocation8 + $0xbdc] sm:$0xf0] }
  0x81   :  { %v6047_v31 = vld [vmem:[#allocation8 + $0x980] sm:$0xf]  ;;  %v6336_v40 = vor.u32 %v7321_v27, %v6335_v26  ;;  %3758 = vmatpush.bf16.msrb.mxu0 %v6080_v36 }
  0x82   :  { %v5343_v32 = vld [vmem:[#allocation8 + $0x400] sm:$0xf] }
  0x83   :  { %v7073_v33 = vld [vmem:[#allocation8 + $0x41c] sm:$0xf0]  ;;  %3771 = vmatpush.bf16.msrb.mxu1 %v6336_v40 }
  0x84   :  { %v5599_v34 = vld [vmem:[#allocation8 + $0x600] sm:$0xf]  ;;  %v5344_v45 = vor.u32 %v7073_v33, %v5343_v32 }
  0x85   :  { %v7137_v37 = vld [vmem:[#allocation8 + $0x61c] sm:$0xf0] }
  0x86   :  { %v6591_v38 = vld [vmem:[#allocation8 + $0xdc0] sm:$0xf]  ;;  %v5600_v46 = vor.u32 %v7137_v37, %v5599_v34  ;;  %3739 = vmatpush.bf16.msra.mxu2 %v5344_v45 }
  0x87   :  { %v7385_v39 = vld [vmem:[#allocation8 + $0xddc] sm:$0xf0] }
  0x88   :  { %v7249_v50 = vld [vmem:[#allocation8 + $0x99c] sm:$0xf0]  ;;  %v6592_v47 = vor.u32 %v7385_v39, %v6591_v38  ;;  %3752 = vmatpush.bf16.msra.mxu3 %v5600_v46 }
  0x89   :  { %v6847_v41 = vld [vmem:[#allocation8 + $0xfc0] sm:$0xf]  ;;  %v6048_v48 = vor.u32 %v7249_v50, %v6047_v31 }
  0x8a   :  { %v7449_v42 = vld [vmem:[#allocation8 + $0xfdc] sm:$0xf0]  ;;  %3784 = vmatpush.bf16.msrb.mxu2 %v6592_v47 }
  0x8b   :  { %v6303_v43 = vld [vmem:[#allocation8 + $0xb80] sm:$0xf]  ;;  %v6848_v49 = vor.u32 %v7449_v42, %v6847_v41  ;;  %3759 = vmatpush.bf16.msrb.mxu0 %v6048_v48 }
  0x8c   :  { %v7313_v44 = vld [vmem:[#allocation8 + $0xb9c] sm:$0xf0] }
  0x8d   :  { %v6015_v51 = vld [vmem:[#allocation8 + $0x940] sm:$0xf]  ;;  %v6304_v54 = vor.u32 %v7313_v44, %v6303_v43  ;;  %3797 = vmatpush.bf16.msrb.mxu3 %v6848_v49 }
  0x8e   :  { %v6559_v52 = vld [vmem:[#allocation8 + $0xd80] sm:$0xf] }
  0x8f   :  { %v7377_v53 = vld [vmem:[#allocation8 + $0xd9c] sm:$0xf0]  ;;  %3772 = vmatpush.bf16.msrb.mxu1 %v6304_v54 }
  0x90   :  { %v7241_v55 = vld [vmem:[#allocation8 + $0x95c] sm:$0xf0]  ;;  %v6560_v60 = vor.u32 %v7377_v53, %v6559_v52 }
  0x91   :  { %v6815_v56 = vld [vmem:[#allocation8 + $0xf80] sm:$0xf]  ;;  %v6016_v61 = vor.u32 %v7241_v55, %v6015_v51 }
  0x92   :  { %v7441_v57 = vld [vmem:[#allocation8 + $0xf9c] sm:$0xf0]  ;;  %3785 = vmatpush.bf16.msrb.mxu2 %v6560_v60 }
  0x93   :  { %v6271_v58 = vld [vmem:[#allocation8 + $0xb40] sm:$0xf]  ;;  %v6816_v62 = vor.u32 %v7441_v57, %v6815_v56  ;;  %3760 = vmatpush.bf16.msrb.mxu0 %v6016_v61 }
  0x94   :  { %v7305_v59 = vld [vmem:[#allocation8 + $0xb5c] sm:$0xf0] }
  0x95   :  { %v5983_v63 = vld [vmem:[#allocation8 + $0x900] sm:$0xf]  ;;  %v6272_v2 = vor.u32 %v7305_v59, %v6271_v58  ;;  %3798 = vmatpush.bf16.msrb.mxu3 %v6816_v62 }
  0x96   :  { %v6527_v0 = vld [vmem:[#allocation8 + $0xd40] sm:$0xf] }
  0x97   :  { %v7369_v1 = vld [vmem:[#allocation8 + $0xd5c] sm:$0xf0]  ;;  %3773 = vmatpush.bf16.msrb.mxu1 %v6272_v2  ;;  %v7678_v2 = vld [vmem:[#allocation7] sm:$0xff] }
  0x98   :  { %v7233_v3 = vld [vmem:[#allocation8 + $0x91c] sm:$0xf0]  ;;  %v6528_v8 = vor.u32 %v7369_v1, %v6527_v0 }
  0x99   :  { %v6783_v4 = vld [vmem:[#allocation8 + $0xf40] sm:$0xf]  ;;  %v5984_v9 = vor.u32 %v7233_v3, %v5983_v63  ;;  %v160_v3 = vperm.slane %v7678_v2, 0 }
  0x9a   :  { %v7433_v5 = vld [vmem:[#allocation8 + $0xf5c] sm:$0xf0]  ;;  %3786 = vmatpush.bf16.msrb.mxu2 %v6528_v8  ;;  %v6997_v8 = vld [vmem:[#allocation8 + $0x1c4] sm:$0xf] }
  0x9b   :  { %v6239_v6 = vld [vmem:[#allocation8 + $0xb00] sm:$0xf]  ;;  %v6784_v10 = vor.u32 %v7433_v5, %v6783_v4  ;;  %3761 = vmatpush.bf16.msrb.mxu0 %v5984_v9  ;;  %v161_v4 = vperm.slane %v7678_v2, 1  ;;  %v5057_v9 = vld [vmem:[#allocation8 + $0x1e0] sm:$0xf0] }
  0x9c   :  { %v7297_v7 = vld [vmem:[#allocation8 + $0xb1c] sm:$0xf0] }
  0x9d   :  { %v5951_v11 = vld [vmem:[#allocation8 + $0x8c0] sm:$0xf]  ;;  %v6240_v14 = vor.u32 %v7297_v7, %v6239_v6  ;;  %3799 = vmatpush.bf16.msrb.mxu3 %v6784_v10 }
  0x9e   :  { %v6495_v12 = vld [vmem:[#allocation8 + $0xd00] sm:$0xf] }
  0x9f   :  { %v7361_v13 = vld [vmem:[#allocation8 + $0xd1c] sm:$0xf0]  ;;  %3774 = vmatpush.bf16.msrb.mxu1 %v6240_v14 }
  0xa0   :  { %v7225_v15 = vld [vmem:[#allocation8 + $0x8dc] sm:$0xf0]  ;;  %v6496_v20 = vor.u32 %v7361_v13, %v6495_v12  ;;  %v5313_v12 = vld [vmem:[#allocation8 + $0x3e0] sm:$0xf0] }
  0xa1   :  { %v6751_v16 = vld [vmem:[#allocation8 + $0xf00] sm:$0xf]  ;;  %v5952_v21 = vor.u32 %v7225_v15, %v5951_v11  ;;  %v7061_v11 = vld [vmem:[#allocation8 + $0x3c4] sm:$0xf]  ;;  %v162_v15 = vperm.slane %v7678_v2, 2 }
  0xa2   :  { %v7425_v17 = vld [vmem:[#allocation8 + $0xf1c] sm:$0xf0]  ;;  %3787 = vmatpush.bf16.msrb.mxu2 %v6496_v20  ;;  %v6989_v20 = vld [vmem:[#allocation8 + $0x184] sm:$0xf] }
  0xa3   :  { %v6207_v18 = vld [vmem:[#allocation8 + $0xac0] sm:$0xf]  ;;  %v6752_v22 = vor.u32 %v7425_v17, %v6751_v16  ;;  %3762 = vmatpush.bf16.msrb.mxu0 %v5952_v21  ;;  %v5060_v16 = vor.u32 %v6997_v8, %v5057_v9  ;;  %v5025_v21 = vld [vmem:[#allocation8 + $0x1a0] sm:$0xf0] }
  0xa4   :  { %v7289_v19 = vld [vmem:[#allocation8 + $0xadc] sm:$0xf0] }
  0xa5   :  { %v6208_v23 = vor.u32 %v7289_v19, %v6207_v18  ;;  %v5919_v24 = vld [vmem:[#allocation8 + $0x880] sm:$0xf]  ;;  %3800 = vmatpush.bf16.msrb.mxu3 %v6752_v22  ;;  %v163_v18 = vperm.slane %v7678_v2, 3  ;;  %v5316_v19 = vor.u32 %v7061_v11, %v5313_v12  ;;  %v7101_v11 = vld [vmem:[#allocation8 + $0x504] sm:$0xf] }
  0xa6   :  { %v7217_v25 = vld [vmem:[#allocation8 + $0x89c] sm:$0xf0]  ;;  %v5473_v12 = vld [vmem:[#allocation8 + $0x520] sm:$0xf0] }
  0xa7   :  { %v6175_v26 = vld [vmem:[#allocation8 + $0xa80] sm:$0xf]  ;;  %v5920_v28 = vor.u32 %v7217_v25, %v5919_v24  ;;  %3775 = vmatpush.bf16.msrb.mxu1 %v6208_v23  ;;  %v7053_v23 = vld [vmem:[#allocation8 + $0x384] sm:$0xf] }
  0xa8   :  { %v7281_v27 = vld [vmem:[#allocation8 + $0xa9c] sm:$0xf0]  ;;  %v5281_v24 = vld [vmem:[#allocation8 + $0x3a0] sm:$0xf0] }
  0xa9   :  { %v6176_v29 = vor.u32 %v7281_v27, %v6175_v26  ;;  %3763 = vmatpush.bf16.msrb.mxu0 %v5920_v28  ;;  %v6463_v30 = vld [vmem:[#allocation8 + $0xcc0] sm:$0xf] }
  0xaa   :  { %v7353_v31 = vld [vmem:[#allocation8 + $0xcdc] sm:$0xf0] }
  0xab   :  { %3776 = vmatpush.bf16.msrb.mxu1 %v6176_v29  ;;  %v6719_v32 = vld [vmem:[#allocation8 + $0xec0] sm:$0xf]  ;;  %v6464_v33 = vor.u32 %v7353_v31, %v6463_v30  ;;  %v5028_v29 = vor.u32 %v6989_v20, %v5025_v21  ;;  %v7125_v30 = vld [vmem:[#allocation8 + $0x5c4] sm:$0xf]  ;;  %v5476_v21 = vor.u32 %v7101_v11, %v5473_v12 }
  0xac   :  { %v7417_v34 = vld [vmem:[#allocation8 + $0xedc] sm:$0xf0]  ;;  %v5569_v31 = vld [vmem:[#allocation8 + $0x5e0] sm:$0xf0] }
  0xad   :  { %v6720_v35 = vor.u32 %v7417_v34, %v6719_v32  ;;  %v5887_v36 = vld [vmem:[#allocation8 + $0x840] sm:$0xf]  ;;  %3788 = vmatpush.bf16.msrb.mxu2 %v6464_v33  ;;  %v7189_v32 = vld [vmem:[#allocation8 + $0x7c4] sm:$0xf] }
  0xae   :  { %v7209_v37 = vld [vmem:[#allocation8 + $0x85c] sm:$0xf0]  ;;  %v5153_v20 = vld [vmem:[#allocation8 + $0x2a0] sm:$0xf0] }
  0xaf   :  { %v5888_v38 = vor.u32 %v7209_v37, %v5887_v36  ;;  %v6143_v39 = vld [vmem:[#allocation8 + $0xa40] sm:$0xf]  ;;  %3801 = vmatpush.bf16.msrb.mxu3 %v6720_v35  ;;  %v5284_v35 = vor.u32 %v7053_v23, %v5281_v24  ;;  %v5825_v36 = vld [vmem:[#allocation8 + $0x7e0] sm:$0xf0] }
  0xb0   :  { %v7273_v40 = vld [vmem:[#allocation8 + $0xa5c] sm:$0xf0]  ;;  %v6981_v37 = vld [vmem:[#allocation8 + $0x144] sm:$0xf] }
  0xb1   :  { %v6144_v50 = vor.u32 %v7273_v40, %v6143_v39  ;;  %v6431_v41 = vld [vmem:[#allocation8 + $0xc80] sm:$0xf]  ;;  %3764 = vmatpush.bf16.msrb.mxu0 %v5888_v38  ;;  %v4993_v38 = vld [vmem:[#allocation8 + $0x160] sm:$0xf0] }
  0xb2   :  { %v7345_v42 = vld [vmem:[#allocation8 + $0xc9c] sm:$0xf0]  ;;  %v7045_v40 = vld [vmem:[#allocation8 + $0x344] sm:$0xf] }
  0xb3   :  { %v6687_v43 = vld [vmem:[#allocation8 + $0xe80] sm:$0xf]  ;;  %v6432_v44 = vor.u32 %v7345_v42, %v6431_v41  ;;  %3777 = vmatpush.bf16.msrb.mxu1 %v6144_v50  ;;  %v5249_v50 = vld [vmem:[#allocation8 + $0x360] sm:$0xf0]  ;;  %v5572_v42 = vor.u32 %v7125_v30, %v5569_v31 }
  0xb4   :  { %v7409_v45 = vld [vmem:[#allocation8 + $0xe9c] sm:$0xf0]  ;;  %v6949_v30 = vld [vmem:[#allocation8 + $0x44] sm:$0xf] }
  0xb5   :  { %v6688_v46 = vor.u32 %v7409_v45, %v6687_v43  ;;  %v5855_v47 = vld [vmem:[#allocation8 + $0x800] sm:$0xf]  ;;  %3789 = vmatpush.bf16.msrb.mxu2 %v6432_v44  ;;  %v5828_v44 = vor.u32 %v7189_v32, %v5825_v36  ;;  %v4996_v45 = vor.u32 %v6981_v37, %v4993_v38  ;;  %v4865_v31 = vld [vmem:[#allocation8 + $0x60] sm:$0xf0]  ;;  %v164_v32 = vperm.slane %v7678_v2, 4 }
  0xb6   :  { %v7201_v48 = vld [vmem:[#allocation8 + $0x81c] sm:$0xf0]  ;;  %v505_v5 = vpop.f32.mrf.mxu0  ;;  %v518_v7 = vpop.f32.mrf.mxu1  ;;  %v4868_v38 = vor.u32 %v6949_v30, %v4865_v31  ;;  %v7245_v12 = vld [vmem:[#allocation8 + $0x984] sm:$0xf] }
  0xb7   :  { %v6111_v49 = vld [vmem:[#allocation8 + $0xa00] sm:$0xf]  ;;  %v5856_v51 = vor.u32 %v7201_v48, %v5855_v47  ;;  %3802 = vmatpush.bf16.msrb.mxu3 %v6688_v46  ;;  %v506_v6 = vadd.f32 %v505_v5, %v160_v3  ;;  %v519_v10 = vadd.f32 %v518_v7, %v161_v4  ;;  %v7117_v46 = vld [vmem:[#allocation8 + $0x584] sm:$0xf] }
  0xb8   :  { %v7265_v52 = vld [vmem:[#allocation8 + $0xa1c] sm:$0xf0]  ;;  %v5537_v47 = vld [vmem:[#allocation8 + $0x5a0] sm:$0xf0] }
  0xb9   :  { %v6112_v53 = vor.u32 %v7265_v52, %v6111_v49  ;;  %3765 = vmatpush.bf16.msrb.mxu0 %v5856_v51  ;;  %v6399_v54 = vld [vmem:[#allocation8 + $0xc40] sm:$0xf]  ;;  %v600_v13 = vmax.f32 %v506_v6, 0.0  ;;  %v601_v14 = vmax.f32 %v519_v10, 0.0  ;;  %v7181_v48 = vld [vmem:[#allocation8 + $0x784] sm:$0xf]  ;;  %v5252_v51 = vor.u32 %v7045_v40, %v5249_v50 }
  0xba   :  { %v7337_v55 = vld [vmem:[#allocation8 + $0xc5c] sm:$0xf0]  ;;  %v5793_v52 = vld [vmem:[#allocation8 + $0x7a0] sm:$0xf0] }
  0xbb   :  { %3778 = vmatpush.bf16.msrb.mxu1 %v6112_v53  ;;  %v6400_v56 = vor.u32 %v7337_v55, %v6399_v54  ;;  %v6655_v57 = vld [vmem:[#allocation8 + $0xe40] sm:$0xf]  ;;  %v7683_v17 = vpack.c.bf16 %v600_v13, %v600_v13  ;;  %v7686_v22 = vpack.c.bf16 %v601_v14, %v601_v14  ;;  %v6973_v53 = vld [vmem:[#allocation8 + $0x104] sm:$0xf] }
  0xbc   :  { %v7401_v58 = vld [vmem:[#allocation8 + $0xe5c] sm:$0xf0]  ;;  %v4961_v54 = vld [vmem:[#allocation8 + $0x120] sm:$0xf0] }
  0xbd   :  { %v6656_v59 = vor.u32 %v7401_v58, %v6655_v57  ;;  %3790 = vmatpush.bf16.msrb.mxu2 %v6400_v56  ;;  %v6367_v60 = vld [vmem:[#allocation8 + $0xc00] sm:$0xf]  ;;  %3714 = vmatmul.bf16.vlgmr.msra.gmra.mxu0 %v7683_v17  ;;  %v7037_v55 = vld [vmem:[#allocation8 + $0x304] sm:$0xf]  ;;  %v5540_v58 = vor.u32 %v7117_v46, %v5537_v47 }
  0xbe   :  { %v7329_v61 = vld [vmem:[#allocation8 + $0xc1c] sm:$0xf0]  ;;  %v544_v27 = vpop.f32.mrf.mxu3  ;;  %3727 = vmatmul.bf16.vlgmr.msra.gmra.mxu1 %v7686_v22  ;;  %3810 = vmatpush.bf16.msra.mxu0 %v5060_v16  ;;  %v507_v28 = vpop.f32.mrf.mxu0  ;;  %v5217_v56 = vld [vmem:[#allocation8 + $0x320] sm:$0xf0] }
  0xbf   :  { %3803 = vmatpush.bf16.msrb.mxu3 %v6656_v59  ;;  %v6368_v62 = vor.u32 %v7329_v61, %v6367_v60  ;;  %v6623_v63 = vld [vmem:[#allocation8 + $0xe00] sm:$0xf]  ;;  %v531_v25 = vpop.f32.mrf.mxu2  ;;  %v545_v33 = vadd.f32 %v544_v27, %v163_v18  ;;  %3823 = vmatpush.bf16.msra.mxu1 %v5316_v19  ;;  %v520_v34 = vpop.f32.mrf.mxu1  ;;  %v5796_v60 = vor.u32 %v7181_v48, %v5793_v52  ;;  %v5761_v3 = vld [vmem:[#allocation8 + $0x760] sm:$0xf0] }
  0xc0   :  { %v7393_v0 = vld [vmem:[#allocation8 + $0xe1c] sm:$0xf0]  ;;  %v532_v26 = vadd.f32 %v531_v25, %v162_v15  ;;  %v4964_v61 = vor.u32 %v6973_v53, %v4961_v54  ;;  %v6965_v4 = vld [vmem:[#allocation8 + $0xc4] sm:$0xf] }
  0xc1   :  { %v6624_v1 = vor.u32 %v7393_v0, %v6623_v63  ;;  %3791 = vmatpush.bf16.msrb.mxu2 %v6368_v62  ;;  %v603_v41 = vmax.f32 %v545_v33, 0.0  ;;  %v7109_v62 = vld [vmem:[#allocation8 + $0x544] sm:$0xf] }
  0xc2   :  { %v602_v39 = vmax.f32 %v532_v26, 0.0  ;;  %3811 = vmatpush.bf16.msra.mxu0 %v5028_v29  ;;  %v5505_v63 = vld [vmem:[#allocation8 + $0x560] sm:$0xf0] }
  0xc3   :  { %3804 = vmatpush.bf16.msrb.mxu3 %v6624_v1  ;;  %v7692_v49 = vpack.c.bf16 %v603_v41, %v603_v41  ;;  %3824 = vmatpush.bf16.msra.mxu1 %v5284_v35  ;;  %v7173_v0 = vld [vmem:[#allocation8 + $0x744] sm:$0xf]  ;;  %v5220_v1 = vor.u32 %v7037_v55, %v5217_v56  ;;  %v5508_v8 = vor.u32 %v7109_v62, %v5505_v63  ;;  %v165_v35 = vperm.slane %v7678_v2, 5 }
  0xc4   :  { %v7690_v43 = vpack.c.bf16 %v602_v39, %v602_v39  ;;  %v4929_v5 = vld [vmem:[#allocation8 + $0xe0] sm:$0xf0]  ;;  %v5764_v9 = vor.u32 %v7173_v0, %v5761_v3 }
  0xc5   :  { %3753 = vmatmul.bf16.vlgmr.msra.gmra.mxu3 %v7692_v49  ;;  %v7029_v6 = vld [vmem:[#allocation8 + $0x2c4] sm:$0xf]  ;;  %v4932_v10 = vor.u32 %v6965_v4, %v4929_v5 }
  0xc6   :  { %3740 = vmatmul.bf16.vlgmr.msra.gmra.mxu2 %v7690_v43  ;;  %v546_v59 = vpop.f32.mrf.mxu3  ;;  %3812 = vmatpush.bf16.msra.mxu0 %v4996_v45  ;;  %v5185_v7 = vld [vmem:[#allocation8 + $0x2e0] sm:$0xf0] }
  0xc7   :  { %3836 = vmatpush.bf16.msra.mxu2 %v5572_v42  ;;  %v533_v57 = vpop.f32.mrf.mxu2  ;;  %3849 = vmatpush.bf16.msra.mxu3 %v5828_v44  ;;  %v7165_v13 = vld [vmem:[#allocation8 + $0x704] sm:$0xf]  ;;  %v5188_v14 = vor.u32 %v7029_v6, %v5185_v7  ;;  %v167_v7 = vperm.slane %v7678_v2, 7 }
  0xc8   :  { %3825 = vmatpush.bf16.msra.mxu1 %v5252_v51  ;;  %v5729_v15 = vld [vmem:[#allocation8 + $0x720] sm:$0xf0] }
  0xc9   :  { %v6957_v16 = vld [vmem:[#allocation8 + $0x84] sm:$0xf]  ;;  %v5732_v23 = vor.u32 %v7165_v13, %v5729_v15 }
  0xca   :  { %3813 = vmatpush.bf16.msra.mxu0 %v4964_v61  ;;  %v4897_v18 = vld [vmem:[#allocation8 + $0xa0] sm:$0xf0] }
  0xcb   :  { %3837 = vmatpush.bf16.msra.mxu2 %v5540_v58  ;;  %3850 = vmatpush.bf16.msra.mxu3 %v5796_v60  ;;  %v7021_v19 = vld [vmem:[#allocation8 + $0x284] sm:$0xf]  ;;  %v4900_v24 = vor.u32 %v6957_v16, %v4897_v18 }
  0xcc   :  { %3826 = vmatpush.bf16.msra.mxu1 %v5220_v1  ;;  %v7093_v25 = vld [vmem:[#allocation8 + $0x4c4] sm:$0xf]  ;;  %v5156_v28 = vor.u32 %v7021_v19, %v5153_v20  ;;  %v166_v1 = vperm.slane %v7678_v2, 6 }
  0xcd   :  { %v5441_v26 = vld [vmem:[#allocation8 + $0x4e0] sm:$0xf0] }
  0xce   :  { %3814 = vmatpush.bf16.msra.mxu0 %v4932_v10  ;;  %v7157_v27 = vld [vmem:[#allocation8 + $0x6c4] sm:$0xf]  ;;  %v5444_v36 = vor.u32 %v7093_v25, %v5441_v26 }
  0xcf   :  { %3838 = vmatpush.bf16.msra.mxu2 %v5508_v8  ;;  %3851 = vmatpush.bf16.msra.mxu3 %v5764_v9  ;;  %v5697_v29 = vld [vmem:[#allocation8 + $0x6e0] sm:$0xf0] }
  0xd0   :  { %3827 = vmatpush.bf16.msra.mxu1 %v5188_v14  ;;  %v7013_v33 = vld [vmem:[#allocation8 + $0x244] sm:$0xf]  ;;  %v5700_v37 = vor.u32 %v7157_v27, %v5697_v29 }
  0xd1   :  { %v5121_v34 = vld [vmem:[#allocation8 + $0x260] sm:$0xf0] }
  0xd2   :  { %3815 = vmatpush.bf16.msra.mxu0 %v4900_v24  ;;  %v7085_v39 = vld [vmem:[#allocation8 + $0x484] sm:$0xf]  ;;  %v5124_v42 = vor.u32 %v7013_v33, %v5121_v34 }
  0xd3   :  { %3839 = vmatpush.bf16.msra.mxu2 %v5476_v21  ;;  %3852 = vmatpush.bf16.msra.mxu3 %v5732_v23  ;;  %v5409_v40 = vld [vmem:[#allocation8 + $0x4a0] sm:$0xf0] }
  0xd4   :  { %v7149_v50 = vld [vmem:[#allocation8 + $0x684] sm:$0xf]  ;;  %3828 = vmatpush.bf16.msra.mxu1 %v5156_v28  ;;  %v5412_v55 = vor.u32 %v7085_v39, %v5409_v40 }
  0xd5   :  { %v5665_v44 = vld [vmem:[#allocation8 + $0x6a0] sm:$0xf0] }
  0xd6   :  { %v557_v41 = vpop.f32.mrf.mxu0  ;;  %v6941_v45 = vld [vmem:[#allocation8 + $0x4] sm:$0xf]  ;;  %v570_v48 = vpop.f32.mrf.mxu1  ;;  %3816 = vmatpush.bf16.msra.mxu0 %v4868_v38  ;;  %v5668_v60 = vor.u32 %v7149_v50, %v5665_v44 }
  0xd7   :  { %v4833_v46 = vld [vmem:[#allocation8 + $0x20] sm:$0xf0]  ;;  %v558_v47 = vadd.f32 %v557_v41, %v164_v32  ;;  %v571_v54 = vadd.f32 %v570_v48, %v165_v35  ;;  %3840 = vmatpush.bf16.msra.mxu2 %v5444_v36  ;;  %3853 = vmatpush.bf16.msra.mxu3 %v5700_v37 }
  0xd8   :  { %v7005_v51 = vld [vmem:[#allocation8 + $0x204] sm:$0xf]  ;;  %v4836_v61 = vor.u32 %v6941_v45, %v4833_v46  ;;  %3829 = vmatpush.bf16.msra.mxu1 %v5124_v42 }
  0xd9   :  { %v5089_v52 = vld [vmem:[#allocation8 + $0x220] sm:$0xf0]  ;;  %v604_v59 = vmax.f32 %v558_v47, 0.0  ;;  %v605_v0 = vmax.f32 %v571_v54, 0.0 }
  0xda   :  { %v7253_v53 = vld [vmem:[#allocation8 + $0x9c4] sm:$0xf]  ;;  %v5092_v3 = vor.u32 %v7005_v51, %v5089_v52  ;;  %3817 = vmatpush.bf16.msra.mxu0 %v4836_v61 }
  0xdb   :  { %v6081_v56 = vld [vmem:[#allocation8 + $0x9e0] sm:$0xf0]  ;;  %v7699_v6 = vpack.c.bf16 %v604_v59, %v604_v59  ;;  %v7702_v9 = vpack.c.bf16 %v605_v0, %v605_v0  ;;  %3841 = vmatpush.bf16.msra.mxu2 %v5412_v55  ;;  %3854 = vmatpush.bf16.msra.mxu3 %v5668_v60 }
  0xdc   :  { %v7317_v57 = vld [vmem:[#allocation8 + $0xbc4] sm:$0xf]  ;;  %v6084_v8 = vor.u32 %v7253_v53, %v6081_v56  ;;  %3830 = vmatpush.bf16.msra.mxu1 %v5092_v3 }
  0xdd   :  { %v6337_v58 = vld [vmem:[#allocation8 + $0xbe0] sm:$0xf0]  ;;  %3766 = vmatmul.bf16.vlgmr.msrb.gmra.mxu0 %v7699_v6  ;;  %3779 = vmatmul.bf16.vlgmr.msrb.gmra.mxu1 %v7702_v9 }
  0xde   :  { %v7077_v62 = vld [vmem:[#allocation8 + $0x444] sm:$0xf]  ;;  %v6340_v10 = vor.u32 %v7317_v57, %v6337_v58  ;;  %v583_v15 = vpop.f32.mrf.mxu2  ;;  %v596_v23 = vpop.f32.mrf.mxu3  ;;  %3862 = vmatpush.bf16.msrb.mxu0 %v6084_v8 }
  0xdf   :  { %v5377_v63 = vld [vmem:[#allocation8 + $0x460] sm:$0xf0]  ;;  %v584_v21 = vadd.f32 %v583_v15, %v166_v1  ;;  %v559_v2 = vpop.f32.mrf.mxu0  ;;  %v597_v27 = vadd.f32 %v596_v23, %v167_v7  ;;  %v572_v28 = vpop.f32.mrf.mxu1 }
  0xe0   :  { %v7141_v4 = vld [vmem:[#allocation8 + $0x644] sm:$0xf]  ;;  %v5380_v11 = vor.u32 %v7077_v62, %v5377_v63  ;;  %3875 = vmatpush.bf16.msrb.mxu1 %v6340_v10 }
  0xe1   :  { %v5633_v5 = vld [vmem:[#allocation8 + $0x660] sm:$0xf0]  ;;  %v606_v33 = vmax.f32 %v584_v21, 0.0  ;;  %v607_v38 = vmax.f32 %v597_v27, 0.0 }
  0xe2   :  { %v6049_v13 = vld [vmem:[#allocation8 + $0x9a0] sm:$0xf0]  ;;  %v5636_v16 = vor.u32 %v7141_v4, %v5633_v5  ;;  %3842 = vmatpush.bf16.msra.mxu2 %v5380_v11 }
  0xe3   :  { %v7309_v14 = vld [vmem:[#allocation8 + $0xb84] sm:$0xf]  ;;  %v6052_v29 = vor.u32 %v7245_v12, %v6049_v13  ;;  %v7706_v41 = vpack.c.bf16 %v606_v33, %v606_v33  ;;  %v7708_v44 = vpack.c.bf16 %v607_v38, %v607_v38 }
  0xe4   :  { %v6305_v18 = vld [vmem:[#allocation8 + $0xba0] sm:$0xf0]  ;;  %3855 = vmatpush.bf16.msra.mxu3 %v5636_v16 }
  0xe5   :  { %v7069_v19 = vld [vmem:[#allocation8 + $0x404] sm:$0xf]  ;;  %v6308_v34 = vor.u32 %v7309_v14, %v6305_v18  ;;  %3863 = vmatpush.bf16.msrb.mxu0 %v6052_v29  ;;  %3792 = vmatmul.bf16.vlgmr.msrb.gmra.mxu2 %v7706_v41 }
  0xe6   :  { %v5345_v20 = vld [vmem:[#allocation8 + $0x420] sm:$0xf0]  ;;  %v585_v56 = vpop.f32.mrf.mxu2  ;;  %3805 = vmatmul.bf16.vlgmr.msrb.gmra.mxu3 %v7708_v44  ;;  %v598_v59 = vpop.f32.mrf.mxu3 }
  0xe7   :  { %v7133_v24 = vld [vmem:[#allocation8 + $0x604] sm:$0xf]  ;;  %v5348_v35 = vor.u32 %v7069_v19, %v5345_v20  ;;  %3876 = vmatpush.bf16.msrb.mxu1 %v6308_v34  ;;  %v7066_v56 = vld [vmem:[#allocation8 + $0x3e4] sm:$0xf0] }
  0xe8   :  { %v5601_v25 = vld [vmem:[#allocation8 + $0x620] sm:$0xf0] }
  0xe9   :  { %v7381_v26 = vld [vmem:[#allocation8 + $0xdc4] sm:$0xf]  ;;  %v5604_v39 = vor.u32 %v7133_v24, %v5601_v25  ;;  %3843 = vmatpush.bf16.msra.mxu2 %v5348_v35 }
  0xea   :  { %v6593_v30 = vld [vmem:[#allocation8 + $0xde0] sm:$0xf0] }
  0xeb   :  { %v7445_v31 = vld [vmem:[#allocation8 + $0xfc4] sm:$0xf]  ;;  %v6596_v42 = vor.u32 %v7381_v26, %v6593_v30  ;;  %3856 = vmatpush.bf16.msra.mxu3 %v5604_v39 }
  0xec   :  { %v6849_v32 = vld [vmem:[#allocation8 + $0xfe0] sm:$0xf0] }
  0xed   :  { %v7237_v36 = vld [vmem:[#allocation8 + $0x944] sm:$0xf]  ;;  %v6852_v45 = vor.u32 %v7445_v31, %v6849_v32  ;;  %3888 = vmatpush.bf16.msrb.mxu2 %v6596_v42  ;;  %3818 = vmatmul.bf16.vlgmr.msra.gmra.mxu0 %v7683_v17 }
  0xee   :  { %v6017_v37 = vld [vmem:[#allocation8 + $0x960] sm:$0xf0]  ;;  %3831 = vmatmul.bf16.vlgmr.msra.gmra.mxu1 %v7686_v22 }
  0xef   :  { %v7301_v40 = vld [vmem:[#allocation8 + $0xb44] sm:$0xf]  ;;  %v6020_v46 = vor.u32 %v7237_v36, %v6017_v37  ;;  %3901 = vmatpush.bf16.msrb.mxu3 %v6852_v45 }
  0xf0   :  { %v6273_v50 = vld [vmem:[#allocation8 + $0xb60] sm:$0xf0] }
  0xf1   :  { %v7373_v47 = vld [vmem:[#allocation8 + $0xd84] sm:$0xf]  ;;  %v6276_v52 = vor.u32 %v7301_v40, %v6273_v50  ;;  %3864 = vmatpush.bf16.msrb.mxu0 %v6020_v46 }
  0xf2   :  { %v6561_v48 = vld [vmem:[#allocation8 + $0xda0] sm:$0xf0] }
  0xf3   :  { %v7437_v51 = vld [vmem:[#allocation8 + $0xf84] sm:$0xf]  ;;  %v6564_v60 = vor.u32 %v7373_v47, %v6561_v48  ;;  %3877 = vmatpush.bf16.msrb.mxu1 %v6276_v52  ;;  %v5063_v52 = vld [vmem:[#allocation8 + $0x1c8] sm:$0xf] }
  0xf4   :  { %v6817_v53 = vld [vmem:[#allocation8 + $0xfa0] sm:$0xf0] }
  0xf5   :  { %v7229_v54 = vld [vmem:[#allocation8 + $0x904] sm:$0xf]  ;;  %v6820_v61 = vor.u32 %v7437_v51, %v6817_v53  ;;  %3889 = vmatpush.bf16.msrb.mxu2 %v6564_v60 }
  0xf6   :  { %v5985_v55 = vld [vmem:[#allocation8 + $0x920] sm:$0xf0]  ;;  %3844 = vmatmul.bf16.vlgmr.msra.gmra.mxu2 %v7690_v43  ;;  %3857 = vmatmul.bf16.vlgmr.msra.gmra.mxu3 %v7692_v49 }
  0xf7   :  { %v7293_v57 = vld [vmem:[#allocation8 + $0xb04] sm:$0xf]  ;;  %v5988_v62 = vor.u32 %v7229_v54, %v5985_v55  ;;  %3902 = vmatpush.bf16.msrb.mxu3 %v6820_v61  ;;  %v7002_v54 = vld [vmem:[#allocation8 + $0x1e4] sm:$0xf0] }
  0xf8   :  { %v6241_v58 = vld [vmem:[#allocation8 + $0xb20] sm:$0xf0]  ;;  %v5319_v55 = vld [vmem:[#allocation8 + $0x3c8] sm:$0xf] }
  0xf9   :  { %v7365_v63 = vld [vmem:[#allocation8 + $0xd44] sm:$0xf]  ;;  %v6244_v1 = vor.u32 %v7293_v57, %v6241_v58  ;;  %3865 = vmatpush.bf16.msrb.mxu0 %v5988_v62 }
  0xfa   :  { %v6529_v0 = vld [vmem:[#allocation8 + $0xd60] sm:$0xf0] }
  0xfb   :  { %v7429_v3 = vld [vmem:[#allocation8 + $0xf44] sm:$0xf]  ;;  %v6532_v11 = vor.u32 %v7365_v63, %v6529_v0  ;;  %3878 = vmatpush.bf16.msrb.mxu1 %v6244_v1  ;;  %v5064_v0 = vor.u32 %v7002_v54, %v5063_v52  ;;  %v5320_v1 = vor.u32 %v7066_v56, %v5319_v55  ;;  %v4935_v52 = vld [vmem:[#allocation8 + $0xc8] sm:$0xf] }
  0xfc   :  { %v6785_v4 = vld [vmem:[#allocation8 + $0xf60] sm:$0xf0]  ;;  %v5191_v54 = vld [vmem:[#allocation8 + $0x2c8] sm:$0xf] }
  0xfd   :  { %v7221_v5 = vld [vmem:[#allocation8 + $0x8c4] sm:$0xf]  ;;  %v6788_v12 = vor.u32 %v7429_v3, %v6785_v4  ;;  %3890 = vmatpush.bf16.msrb.mxu2 %v6532_v11  ;;  %v5031_v3 = vld [vmem:[#allocation8 + $0x188] sm:$0xf] }
  0xfe   :  { %v5953_v7 = vld [vmem:[#allocation8 + $0x8e0] sm:$0xf0]  ;;  %v7034_v55 = vld [vmem:[#allocation8 + $0x2e4] sm:$0xf0] }
  0xff   :  { %v7285_v8 = vld [vmem:[#allocation8 + $0xac4] sm:$0xf]  ;;  %v5956_v15 = vor.u32 %v7221_v5, %v5953_v7  ;;  %3903 = vmatpush.bf16.msrb.mxu3 %v6788_v12  ;;  %v6994_v5 = vld [vmem:[#allocation8 + $0x1a4] sm:$0xf0] }
 0x100   :  { %v6209_v10 = vld [vmem:[#allocation8 + $0xae0] sm:$0xf0]  ;;  %v5287_v7 = vld [vmem:[#allocation8 + $0x388] sm:$0xf] }
 0x101   :  { %v7357_v13 = vld [vmem:[#allocation8 + $0xd04] sm:$0xf]  ;;  %v6212_v16 = vor.u32 %v7285_v8, %v6209_v10  ;;  %3866 = vmatpush.bf16.msrb.mxu0 %v5956_v15  ;;  %v7058_v8 = vld [vmem:[#allocation8 + $0x3a4] sm:$0xf0] }
 0x102   :  { %v6497_v14 = vld [vmem:[#allocation8 + $0xd20] sm:$0xf0]  ;;  %v5575_v15 = vld [vmem:[#allocation8 + $0x5c8] sm:$0xf] }
 0x103   :  { %v7421_v18 = vld [vmem:[#allocation8 + $0xf04] sm:$0xf]  ;;  %v6500_v24 = vor.u32 %v7357_v13, %v6497_v14  ;;  %3879 = vmatpush.bf16.msrb.mxu1 %v6212_v16  ;;  %v7130_v16 = vld [vmem:[#allocation8 + $0x5e4] sm:$0xf0] }
 0x104   :  { %v6753_v19 = vld [vmem:[#allocation8 + $0xf20] sm:$0xf0] }
 0x105   :  { %v7213_v20 = vld [vmem:[#allocation8 + $0x884] sm:$0xf]  ;;  %v6756_v25 = vor.u32 %v7421_v18, %v6753_v19  ;;  %3891 = vmatpush.bf16.msrb.mxu2 %v6500_v24  ;;  %v5032_v18 = vor.u32 %v6994_v5, %v5031_v3  ;;  %v5288_v19 = vor.u32 %v7058_v8, %v5287_v7  ;;  %v6986_v24 = vld [vmem:[#allocation8 + $0x164] sm:$0xf0] }
 0x106   :  { %v5921_v21 = vld [vmem:[#allocation8 + $0x8a0] sm:$0xf0]  ;;  %v5159_v3 = vld [vmem:[#allocation8 + $0x288] sm:$0xf] }
 0x107   :  { %v7277_v23 = vld [vmem:[#allocation8 + $0xa84] sm:$0xf]  ;;  %v5924_v28 = vor.u32 %v7213_v20, %v5921_v21  ;;  %3904 = vmatpush.bf16.msrb.mxu3 %v6756_v25  ;;  %v5831_v20 = vld [vmem:[#allocation8 + $0x7c8] sm:$0xf] }
 0x108   :  { %v6177_v2 = vld [vmem:[#allocation8 + $0xaa0] sm:$0xf0]  ;;  %v7194_v21 = vld [vmem:[#allocation8 + $0x7e4] sm:$0xf0] }
 0x109   :  { %v7349_v26 = vld [vmem:[#allocation8 + $0xcc4] sm:$0xf]  ;;  %v6180_v29 = vor.u32 %v7277_v23, %v6177_v2  ;;  %3867 = vmatpush.bf16.msrb.mxu0 %v5924_v28  ;;  %v4999_v23 = vld [vmem:[#allocation8 + $0x148] sm:$0xf]  ;;  %v5576_v28 = vor.u32 %v7130_v16, %v5575_v15 }
 0x10a   :  { %v6465_v27 = vld [vmem:[#allocation8 + $0xce0] sm:$0xf0]  ;;  %v5255_v25 = vld [vmem:[#allocation8 + $0x348] sm:$0xf] }
 0x10b   :  { %v7413_v30 = vld [vmem:[#allocation8 + $0xec4] sm:$0xf]  ;;  %v6468_v36 = vor.u32 %v7349_v26, %v6465_v27  ;;  %3880 = vmatpush.bf16.msrb.mxu1 %v6180_v29  ;;  %v7050_v26 = vld [vmem:[#allocation8 + $0x364] sm:$0xf0]  ;;  %v5832_v29 = vor.u32 %v7194_v21, %v5831_v20 }
 0x10c   :  { %v6721_v31 = vld [vmem:[#allocation8 + $0xee0] sm:$0xf0]  ;;  %v5447_v8 = vld [vmem:[#allocation8 + $0x4c8] sm:$0xf] }
 0x10d   :  { %v7205_v32 = vld [vmem:[#allocation8 + $0x844] sm:$0xf]  ;;  %v6724_v37 = vor.u32 %v7413_v30, %v6721_v31  ;;  %3892 = vmatpush.bf16.msrb.mxu2 %v6468_v36  ;;  %v5543_v30 = vld [vmem:[#allocation8 + $0x588] sm:$0xf] }
 0x10e   :  { %v5889_v33 = vld [vmem:[#allocation8 + $0x860] sm:$0xf0]  ;;  %v7122_v31 = vld [vmem:[#allocation8 + $0x5a4] sm:$0xf0] }
 0x10f   :  { %v7269_v34 = vld [vmem:[#allocation8 + $0xa44] sm:$0xf]  ;;  %v5892_v50 = vor.u32 %v7205_v32, %v5889_v33  ;;  %3905 = vmatpush.bf16.msrb.mxu3 %v6724_v37  ;;  %v5000_v32 = vor.u32 %v6986_v24, %v4999_v23  ;;  %v5256_v33 = vor.u32 %v7050_v26, %v5255_v25  ;;  %v4967_v36 = vld [vmem:[#allocation8 + $0x108] sm:$0xf] }
 0x110   :  { %v6145_v35 = vld [vmem:[#allocation8 + $0xa60] sm:$0xf0]  ;;  %v6978_v37 = vld [vmem:[#allocation8 + $0x124] sm:$0xf0] }
 0x111   :  { %v7341_v38 = vld [vmem:[#allocation8 + $0xc84] sm:$0xf]  ;;  %v6148_v42 = vor.u32 %v7269_v34, %v6145_v35  ;;  %3868 = vmatpush.bf16.msrb.mxu0 %v5892_v50  ;;  %v5799_v34 = vld [vmem:[#allocation8 + $0x788] sm:$0xf] }
 0x112   :  { %v6433_v39 = vld [vmem:[#allocation8 + $0xca0] sm:$0xf0]  ;;  %v7186_v35 = vld [vmem:[#allocation8 + $0x7a4] sm:$0xf0] }
 0x113   :  { %v7405_v40 = vld [vmem:[#allocation8 + $0xe84] sm:$0xf]  ;;  %v6436_v53 = vor.u32 %v7341_v38, %v6433_v39  ;;  %3881 = vmatpush.bf16.msrb.mxu1 %v6148_v42  ;;  %v5223_v38 = vld [vmem:[#allocation8 + $0x308] sm:$0xf]  ;;  %v5800_v50 = vor.u32 %v7186_v35, %v5799_v34 }
 0x114   :  { %v6689_v45 = vld [vmem:[#allocation8 + $0xea0] sm:$0xf0]  ;;  %v7042_v39 = vld [vmem:[#allocation8 + $0x324] sm:$0xf0] }
 0x115   :  { %v7197_v46 = vld [vmem:[#allocation8 + $0x804] sm:$0xf]  ;;  %v6692_v57 = vor.u32 %v7405_v40, %v6689_v45  ;;  %3893 = vmatpush.bf16.msrb.mxu2 %v6436_v53  ;;  %v5544_v40 = vor.u32 %v7122_v31, %v5543_v30  ;;  %v5511_v42 = vld [vmem:[#allocation8 + $0x548] sm:$0xf] }
 0x116   :  { %v5857_v47 = vld [vmem:[#allocation8 + $0x820] sm:$0xf0]  ;;  %v7114_v45 = vld [vmem:[#allocation8 + $0x564] sm:$0xf0] }
 0x117   :  { %v7261_v48 = vld [vmem:[#allocation8 + $0xa04] sm:$0xf]  ;;  %v5860_v60 = vor.u32 %v7197_v46, %v5857_v47  ;;  %3906 = vmatpush.bf16.msrb.mxu3 %v6692_v57  ;;  %v4968_v46 = vor.u32 %v6978_v37, %v4967_v36  ;;  %v5224_v47 = vor.u32 %v7042_v39, %v5223_v38  ;;  %v6970_v53 = vld [vmem:[#allocation8 + $0xe4] sm:$0xf0]  ;;  %v5512_v56 = vor.u32 %v7114_v45, %v5511_v42 }
 0x118   :  { %v6113_v51 = vld [vmem:[#allocation8 + $0xa20] sm:$0xf0]  ;;  %v4871_v15 = vld [vmem:[#allocation8 + $0x48] sm:$0xf] }
 0x119   :  { %v7333_v58 = vld [vmem:[#allocation8 + $0xc44] sm:$0xf]  ;;  %v6116_v61 = vor.u32 %v7261_v48, %v6113_v51  ;;  %3869 = vmatpush.bf16.msrb.mxu0 %v5860_v60  ;;  %v5767_v48 = vld [vmem:[#allocation8 + $0x748] sm:$0xf]  ;;  %v4936_v60 = vor.u32 %v6970_v53, %v4935_v52 }
 0x11a   :  { %v6401_v59 = vld [vmem:[#allocation8 + $0xc60] sm:$0xf0]  ;;  %v7178_v51 = vld [vmem:[#allocation8 + $0x764] sm:$0xf0] }
 0x11b   :  { %v7397_v62 = vld [vmem:[#allocation8 + $0xe44] sm:$0xf]  ;;  %v6404_v4 = vor.u32 %v7333_v58, %v6401_v59  ;;  %3882 = vmatpush.bf16.msrb.mxu1 %v6116_v61  ;;  %v5768_v57 = vor.u32 %v7178_v51, %v5767_v48  ;;  %v5479_v58 = vld [vmem:[#allocation8 + $0x508] sm:$0xf]  ;;  %v5192_v61 = vor.u32 %v7034_v55, %v5191_v54 }
 0x11c   :  { %v6657_v63 = vld [vmem:[#allocation8 + $0xe60] sm:$0xf0]  ;;  %3870 = vmatmul.bf16.vlgmr.msrb.gmra.mxu0 %v7699_v6  ;;  %v7106_v59 = vld [vmem:[#allocation8 + $0x524] sm:$0xf0] }
 0x11d   :  { %v6660_v10 = vor.u32 %v7397_v62, %v6657_v63  ;;  %v7325_v11 = vld [vmem:[#allocation8 + $0xc04] sm:$0xf]  ;;  %3914 = vmatpush.bf16.msra.mxu0 %v5064_v0  ;;  %3894 = vmatpush.bf16.msrb.mxu2 %v6404_v4  ;;  %v5735_v62 = vld [vmem:[#allocation8 + $0x708] sm:$0xf]  ;;  %v5480_v5 = vor.u32 %v7106_v59, %v5479_v58 }
 0x11e   :  { %v6369_v12 = vld [vmem:[#allocation8 + $0xc20] sm:$0xf0]  ;;  %3883 = vmatmul.bf16.vlgmr.msrb.gmra.mxu1 %v7702_v9  ;;  %v7170_v63 = vld [vmem:[#allocation8 + $0x724] sm:$0xf0] }
 0x11f   :  { %v7389_v13 = vld [vmem:[#allocation8 + $0xe04] sm:$0xf]  ;;  %3927 = vmatpush.bf16.msra.mxu1 %v5320_v1  ;;  %v6372_v2 = vor.u32 %v7325_v11, %v6369_v12  ;;  %3907 = vmatpush.bf16.msrb.mxu3 %v6660_v10  ;;  %v4903_v0 = vld [vmem:[#allocation8 + $0x88] sm:$0xf]  ;;  %v5736_v7 = vor.u32 %v7170_v63, %v5735_v62 }
 0x120   :  { %v6625_v14 = vld [vmem:[#allocation8 + $0xe20] sm:$0xf0]  ;;  %v6962_v1 = vld [vmem:[#allocation8 + $0xa4] sm:$0xf0] }
 0x121   :  { %v6628_v27 = vor.u32 %v7389_v13, %v6625_v14  ;;  %3915 = vmatpush.bf16.msra.mxu0 %v5032_v18  ;;  %3895 = vmatpush.bf16.msrb.mxu2 %v6372_v2  ;;  %v7026_v4 = vld [vmem:[#allocation8 + $0x2a4] sm:$0xf0]  ;;  %v4904_v11 = vor.u32 %v6962_v1, %v4903_v0 }
 0x122   :  { %v7098_v10 = vld [vmem:[#allocation8 + $0x4e4] sm:$0xf0]  ;;  %v5160_v12 = vor.u32 %v7026_v4, %v5159_v3 }
 0x123   :  { %3928 = vmatpush.bf16.msra.mxu1 %v5288_v19  ;;  %3908 = vmatpush.bf16.msrb.mxu3 %v6628_v27  ;;  %v5703_v13 = vld [vmem:[#allocation8 + $0x6c8] sm:$0xf]  ;;  %v5448_v20 = vor.u32 %v7098_v10, %v5447_v8 }
 0x124   :  { %3896 = vmatmul.bf16.vlgmr.msrb.gmra.mxu2 %v7706_v41  ;;  %v7162_v14 = vld [vmem:[#allocation8 + $0x6e4] sm:$0xf0] }
 0x125   :  { %3940 = vmatpush.bf16.msra.mxu2 %v5576_v28  ;;  %3916 = vmatpush.bf16.msra.mxu0 %v5000_v32  ;;  %v6954_v16 = vld [vmem:[#allocation8 + $0x64] sm:$0xf0]  ;;  %v5704_v21 = vor.u32 %v7162_v14, %v5703_v13 }
 0x126   :  { %3909 = vmatmul.bf16.vlgmr.msrb.gmra.mxu3 %v7708_v44  ;;  %v5127_v18 = vld [vmem:[#allocation8 + $0x248] sm:$0xf]  ;;  %v4872_v25 = vor.u32 %v6954_v16, %v4871_v15 }
 0x127   :  { %3953 = vmatpush.bf16.msra.mxu3 %v5832_v29  ;;  %3929 = vmatpush.bf16.msra.mxu1 %v5256_v33  ;;  %v7018_v19 = vld [vmem:[#allocation8 + $0x264] sm:$0xf0] }
 0x128   :  { %v5415_v23 = vld [vmem:[#allocation8 + $0x488] sm:$0xf]  ;;  %v5128_v26 = vor.u32 %v7018_v19, %v5127_v18 }
 0x129   :  { %3941 = vmatpush.bf16.msra.mxu2 %v5544_v40  ;;  %3917 = vmatpush.bf16.msra.mxu0 %v4968_v46  ;;  %v7090_v2 = vld [vmem:[#allocation8 + $0x4a4] sm:$0xf0] }
 0x12a   :  { %v5671_v24 = vld [vmem:[#allocation8 + $0x688] sm:$0xf]  ;;  %v5416_v33 = vor.u32 %v7090_v2, %v5415_v23 }
 0x12b   :  { %3954 = vmatpush.bf16.msra.mxu3 %v5800_v50  ;;  %3930 = vmatpush.bf16.msra.mxu1 %v5224_v47  ;;  %v7154_v27 = vld [vmem:[#allocation8 + $0x6a4] sm:$0xf0] }
 0x12c   :  { %v4839_v28 = vld [vmem:[#allocation8 + $0x8] sm:$0xf]  ;;  %v5672_v37 = vor.u32 %v7154_v27, %v5671_v24 }
 0x12d   :  { %3942 = vmatpush.bf16.msra.mxu2 %v5512_v56  ;;  %3918 = vmatpush.bf16.msra.mxu0 %v4936_v60  ;;  %v6946_v29 = vld [vmem:[#allocation8 + $0x24] sm:$0xf0] }
 0x12e   :  { %v5095_v30 = vld [vmem:[#allocation8 + $0x208] sm:$0xf]  ;;  %v4840_v40 = vor.u32 %v6946_v29, %v4839_v28 }
 0x12f   :  { %3955 = vmatpush.bf16.msra.mxu3 %v5768_v57  ;;  %3931 = vmatpush.bf16.msra.mxu1 %v5192_v61  ;;  %v7010_v31 = vld [vmem:[#allocation8 + $0x224] sm:$0xf0] }
 0x130   :  { %v6087_v32 = vld [vmem:[#allocation8 + $0x9c8] sm:$0xf]  ;;  %v5096_v50 = vor.u32 %v7010_v31, %v5095_v30 }
 0x131   :  { %3943 = vmatpush.bf16.msra.mxu2 %v5480_v5  ;;  %3919 = vmatpush.bf16.msra.mxu0 %v4904_v11  ;;  %v7258_v34 = vld [vmem:[#allocation8 + $0x9e4] sm:$0xf0] }
 0x132   :  { %v6343_v35 = vld [vmem:[#allocation8 + $0xbc8] sm:$0xf]  ;;  %v6088_v46 = vor.u32 %v7258_v34, %v6087_v32 }
 0x133   :  { %3956 = vmatpush.bf16.msra.mxu3 %v5736_v7  ;;  %3932 = vmatpush.bf16.msra.mxu1 %v5160_v12  ;;  %v7322_v36 = vld [vmem:[#allocation8 + $0xbe4] sm:$0xf0] }
 0x134   :  { %v5383_v38 = vld [vmem:[#allocation8 + $0x448] sm:$0xf]  ;;  %v6344_v47 = vor.u32 %v7322_v36, %v6343_v35 }
 0x135   :  { %3944 = vmatpush.bf16.msra.mxu2 %v5448_v20  ;;  %v7082_v39 = vld [vmem:[#allocation8 + $0x464] sm:$0xf0]  ;;  %3920 = vmatpush.bf16.msra.mxu0 %v4872_v25 }
 0x136   :  { %v5639_v42 = vld [vmem:[#allocation8 + $0x648] sm:$0xf]  ;;  %v5384_v51 = vor.u32 %v7082_v39, %v5383_v38 }
 0x137   :  { %3957 = vmatpush.bf16.msra.mxu3 %v5704_v21  ;;  %3933 = vmatpush.bf16.msra.mxu1 %v5128_v26  ;;  %v7146_v45 = vld [vmem:[#allocation8 + $0x664] sm:$0xf0] }
 0x138   :  { %v6055_v48 = vld [vmem:[#allocation8 + $0x988] sm:$0xf]  ;;  %v5640_v55 = vor.u32 %v7146_v45, %v5639_v42 }
 0x139   :  { %3945 = vmatpush.bf16.msra.mxu2 %v5416_v33  ;;  %v7250_v52 = vld [vmem:[#allocation8 + $0x9a4] sm:$0xf0]  ;;  %3921 = vmatpush.bf16.msra.mxu0 %v4840_v40 }
 0x13a   :  { %v6311_v53 = vld [vmem:[#allocation8 + $0xb88] sm:$0xf]  ;;  %v6056_v62 = vor.u32 %v7250_v52, %v6055_v48 }
 0x13b   :  { %v7314_v54 = vld [vmem:[#allocation8 + $0xba4] sm:$0xf0]  ;;  %3958 = vmatpush.bf16.msra.mxu3 %v5672_v37  ;;  %3934 = vmatpush.bf16.msra.mxu1 %v5096_v50 }
 0x13c   :  { %v5351_v56 = vld [vmem:[#allocation8 + $0x408] sm:$0xf]  ;;  %v6312_v63 = vor.u32 %v7314_v54, %v6311_v53  ;;  %3922 = vmatmul.bf16.vlgmr.msra.gmra.mxu0 %v7683_v17 }
 0x13d   :  { %v7074_v57 = vld [vmem:[#allocation8 + $0x424] sm:$0xf0]  ;;  %3966 = vmatpush.bf16.msrb.mxu0 %v6088_v46  ;;  %3946 = vmatpush.bf16.msra.mxu2 %v5384_v51 }
 0x13e   :  { %v5607_v58 = vld [vmem:[#allocation8 + $0x608] sm:$0xf]  ;;  %v5352_v3 = vor.u32 %v7074_v57, %v5351_v56  ;;  %3935 = vmatmul.bf16.vlgmr.msra.gmra.mxu1 %v7686_v22 }
 0x13f   :  { %v7138_v59 = vld [vmem:[#allocation8 + $0x624] sm:$0xf0]  ;;  %3979 = vmatpush.bf16.msrb.mxu1 %v6344_v47  ;;  %3959 = vmatpush.bf16.msra.mxu3 %v5640_v55 }
 0x140   :  { %v6599_v60 = vld [vmem:[#allocation8 + $0xdc8] sm:$0xf]  ;;  %v5608_v7 = vor.u32 %v7138_v59, %v5607_v58 }
 0x141   :  { %v7386_v61 = vld [vmem:[#allocation8 + $0xde4] sm:$0xf0]  ;;  %3967 = vmatpush.bf16.msrb.mxu0 %v6056_v62  ;;  %3947 = vmatpush.bf16.msra.mxu2 %v5352_v3 }
 0x142   :  { %v6855_v0 = vld [vmem:[#allocation8 + $0xfc8] sm:$0xf]  ;;  %v6600_v8 = vor.u32 %v7386_v61, %v6599_v60 }
 0x143   :  { %v7450_v1 = vld [vmem:[#allocation8 + $0xfe4] sm:$0xf0]  ;;  %3980 = vmatpush.bf16.msrb.mxu1 %v6312_v63  ;;  %3960 = vmatpush.bf16.msra.mxu3 %v5608_v7 }
 0x144   :  { %v6023_v4 = vld [vmem:[#allocation8 + $0x948] sm:$0xf]  ;;  %v6856_v12 = vor.u32 %v7450_v1, %v6855_v0  ;;  %3948 = vmatmul.bf16.vlgmr.msra.gmra.mxu2 %v7690_v43 }
 0x145   :  { %v7242_v5 = vld [vmem:[#allocation8 + $0x964] sm:$0xf0]  ;;  %3992 = vmatpush.bf16.msrb.mxu2 %v6600_v8 }
 0x146   :  { %v6279_v10 = vld [vmem:[#allocation8 + $0xb48] sm:$0xf]  ;;  %v6024_v15 = vor.u32 %v7242_v5, %v6023_v4  ;;  %3961 = vmatmul.bf16.vlgmr.msra.gmra.mxu3 %v7692_v49 }
 0x147   :  { %v7306_v11 = vld [vmem:[#allocation8 + $0xb64] sm:$0xf0]  ;;  %4005 = vmatpush.bf16.msrb.mxu3 %v6856_v12 }
 0x148   :  { %v6567_v13 = vld [vmem:[#allocation8 + $0xd88] sm:$0xf]  ;;  %v6280_v19 = vor.u32 %v7306_v11, %v6279_v10  ;;  %3968 = vmatpush.bf16.msrb.mxu0 %v6024_v15 }
 0x149   :  { %v7378_v14 = vld [vmem:[#allocation8 + $0xda4] sm:$0xf0] }
 0x14a   :  { %v6823_v16 = vld [vmem:[#allocation8 + $0xf88] sm:$0xf]  ;;  %v6568_v23 = vor.u32 %v7378_v14, %v6567_v13  ;;  %3981 = vmatpush.bf16.msrb.mxu1 %v6280_v19  ;;  %v7062_v19 = vld [vmem:[#allocation8 + $0x3cc] sm:$0xf] }
 0x14b   :  { %v7442_v18 = vld [vmem:[#allocation8 + $0xfa4] sm:$0xf0] }
 0x14c   :  { %v5991_v20 = vld [vmem:[#allocation8 + $0x908] sm:$0xf]  ;;  %v6824_v25 = vor.u32 %v7442_v18, %v6823_v16  ;;  %3993 = vmatpush.bf16.msrb.mxu2 %v6568_v23  ;;  %v6998_v16 = vld [vmem:[#allocation8 + $0x1cc] sm:$0xf] }
 0x14d   :  { %v7234_v21 = vld [vmem:[#allocation8 + $0x924] sm:$0xf0]  ;;  %v5065_v18 = vld [vmem:[#allocation8 + $0x1e8] sm:$0xf0] }
 0x14e   :  { %v6247_v2 = vld [vmem:[#allocation8 + $0xb08] sm:$0xf]  ;;  %v5992_v28 = vor.u32 %v7234_v21, %v5991_v20  ;;  %4006 = vmatpush.bf16.msrb.mxu3 %v6824_v25  ;;  %v5321_v21 = vld [vmem:[#allocation8 + $0x3e8] sm:$0xf0] }
 0x14f   :  { %v7298_v24 = vld [vmem:[#allocation8 + $0xb24] sm:$0xf0] }
 0x150   :  { %v6535_v26 = vld [vmem:[#allocation8 + $0xd48] sm:$0xf]  ;;  %v6248_v31 = vor.u32 %v7298_v24, %v6247_v2  ;;  %3969 = vmatpush.bf16.msrb.mxu0 %v5992_v28  ;;  %v5068_v28 = vor.u32 %v6998_v16, %v5065_v18  ;;  %v6966_v18 = vld [vmem:[#allocation8 + $0xcc] sm:$0xf] }
 0x151   :  { %v7370_v27 = vld [vmem:[#allocation8 + $0xd64] sm:$0xf0] }
 0x152   :  { %v6791_v29 = vld [vmem:[#allocation8 + $0xf48] sm:$0xf]  ;;  %v6536_v34 = vor.u32 %v7370_v27, %v6535_v26  ;;  %3982 = vmatpush.bf16.msrb.mxu1 %v6248_v31 }
 0x153   :  { %v7434_v30 = vld [vmem:[#allocation8 + $0xf64] sm:$0xf0] }
 0x154   :  { %v5959_v32 = vld [vmem:[#allocation8 + $0x8c8] sm:$0xf]  ;;  %v6792_v37 = vor.u32 %v7434_v30, %v6791_v29  ;;  %3994 = vmatpush.bf16.msrb.mxu2 %v6536_v34  ;;  %v6990_v29 = vld [vmem:[#allocation8 + $0x18c] sm:$0xf]  ;;  %v5324_v30 = vor.u32 %v7062_v19, %v5321_v21 }
 0x155   :  { %v7226_v33 = vld [vmem:[#allocation8 + $0x8e4] sm:$0xf0]  ;;  %v5289_v34 = vld [vmem:[#allocation8 + $0x3a8] sm:$0xf0] }
 0x156   :  { %v6215_v35 = vld [vmem:[#allocation8 + $0xac8] sm:$0xf]  ;;  %v5960_v40 = vor.u32 %v7226_v33, %v5959_v32  ;;  %4007 = vmatpush.bf16.msrb.mxu3 %v6792_v37  ;;  %v5033_v32 = vld [vmem:[#allocation8 + $0x1a8] sm:$0xf0] }
 0x157   :  { %v7290_v36 = vld [vmem:[#allocation8 + $0xae4] sm:$0xf0]  ;;  %v7054_v33 = vld [vmem:[#allocation8 + $0x38c] sm:$0xf] }
 0x158   :  { %v6503_v38 = vld [vmem:[#allocation8 + $0xd08] sm:$0xf]  ;;  %v6216_v45 = vor.u32 %v7290_v36, %v6215_v35  ;;  %3970 = vmatpush.bf16.msrb.mxu0 %v5960_v40  ;;  %v7126_v40 = vld [vmem:[#allocation8 + $0x5cc] sm:$0xf] }
 0x159   :  { %v7362_v39 = vld [vmem:[#allocation8 + $0xd24] sm:$0xf0]  ;;  %v4937_v19 = vld [vmem:[#allocation8 + $0xe8] sm:$0xf0] }
 0x15a   :  { %v6759_v50 = vld [vmem:[#allocation8 + $0xf08] sm:$0xf]  ;;  %v6504_v48 = vor.u32 %v7362_v39, %v6503_v38  ;;  %3983 = vmatpush.bf16.msrb.mxu1 %v6216_v45  ;;  %v7190_v45 = vld [vmem:[#allocation8 + $0x7cc] sm:$0xf] }
 0x15b   :  { %v7426_v42 = vld [vmem:[#allocation8 + $0xf24] sm:$0xf0]  ;;  %v7030_v21 = vld [vmem:[#allocation8 + $0x2cc] sm:$0xf] }
 0x15c   :  { %v5927_v46 = vld [vmem:[#allocation8 + $0x888] sm:$0xf]  ;;  %v6760_v53 = vor.u32 %v7426_v42, %v6759_v50  ;;  %3995 = vmatpush.bf16.msrb.mxu2 %v6504_v48  ;;  %v5577_v50 = vld [vmem:[#allocation8 + $0x5e8] sm:$0xf0]  ;;  %v5036_v42 = vor.u32 %v6990_v29, %v5033_v32 }
 0x15d   :  { %v7218_v47 = vld [vmem:[#allocation8 + $0x8a4] sm:$0xf0] }
 0x15e   :  { %v6183_v51 = vld [vmem:[#allocation8 + $0xa88] sm:$0xf]  ;;  %v5928_v56 = vor.u32 %v7218_v47, %v5927_v46  ;;  %4008 = vmatpush.bf16.msrb.mxu3 %v6760_v53  ;;  %v5833_v46 = vld [vmem:[#allocation8 + $0x7e8] sm:$0xf0]  ;;  %v5292_v47 = vor.u32 %v7054_v33, %v5289_v34 }
 0x15f   :  { %v7282_v52 = vld [vmem:[#allocation8 + $0xaa4] sm:$0xf0]  ;;  %v7022_v34 = vld [vmem:[#allocation8 + $0x28c] sm:$0xf] }
 0x160   :  { %v6471_v54 = vld [vmem:[#allocation8 + $0xcc8] sm:$0xf]  ;;  %v6184_v59 = vor.u32 %v7282_v52, %v6183_v51  ;;  %3971 = vmatpush.bf16.msrb.mxu0 %v5928_v56  ;;  %v6982_v51 = vld [vmem:[#allocation8 + $0x14c] sm:$0xf] }
 0x161   :  { %v7354_v55 = vld [vmem:[#allocation8 + $0xce4] sm:$0xf0]  ;;  %v5001_v52 = vld [vmem:[#allocation8 + $0x168] sm:$0xf0] }
 0x162   :  { %v6727_v57 = vld [vmem:[#allocation8 + $0xec8] sm:$0xf]  ;;  %v6472_v62 = vor.u32 %v7354_v55, %v6471_v54  ;;  %3984 = vmatpush.bf16.msrb.mxu1 %v6184_v59  ;;  %v5580_v54 = vor.u32 %v7126_v40, %v5577_v50  ;;  %v7046_v55 = vld [vmem:[#allocation8 + $0x34c] sm:$0xf] }
 0x163   :  { %v7418_v58 = vld [vmem:[#allocation8 + $0xee4] sm:$0xf0]  ;;  %v5257_v56 = vld [vmem:[#allocation8 + $0x368] sm:$0xf0] }
 0x164   :  { %v5895_v60 = vld [vmem:[#allocation8 + $0x848] sm:$0xf]  ;;  %v6728_v1 = vor.u32 %v7418_v58, %v6727_v57  ;;  %3996 = vmatpush.bf16.msrb.mxu2 %v6472_v62  ;;  %v5836_v57 = vor.u32 %v7190_v45, %v5833_v46  ;;  %v7118_v58 = vld [vmem:[#allocation8 + $0x58c] sm:$0xf] }
 0x165   :  { %v7210_v61 = vld [vmem:[#allocation8 + $0x864] sm:$0xf0]  ;;  %v5545_v59 = vld [vmem:[#allocation8 + $0x5a8] sm:$0xf0] }
 0x166   :  { %v6151_v63 = vld [vmem:[#allocation8 + $0xa48] sm:$0xf]  ;;  %v5896_v5 = vor.u32 %v7210_v61, %v5895_v60  ;;  %4009 = vmatpush.bf16.msrb.mxu3 %v6728_v1  ;;  %v5004_v60 = vor.u32 %v6982_v51, %v5001_v52  ;;  %v7182_v61 = vld [vmem:[#allocation8 + $0x78c] sm:$0xf] }
 0x167   :  { %v7274_v0 = vld [vmem:[#allocation8 + $0xa64] sm:$0xf0]  ;;  %v5801_v62 = vld [vmem:[#allocation8 + $0x7a8] sm:$0xf0] }
 0x168   :  { %v6439_v3 = vld [vmem:[#allocation8 + $0xc88] sm:$0xf]  ;;  %v6152_v11 = vor.u32 %v7274_v0, %v6151_v63  ;;  %3972 = vmatpush.bf16.msrb.mxu0 %v5896_v5  ;;  %v5260_v63 = vor.u32 %v7046_v55, %v5257_v56  ;;  %v6974_v0 = vld [vmem:[#allocation8 + $0x10c] sm:$0xf] }
 0x169   :  { %v7346_v4 = vld [vmem:[#allocation8 + $0xca4] sm:$0xf0]  ;;  %v4969_v1 = vld [vmem:[#allocation8 + $0x128] sm:$0xf0] }
 0x16a   :  { %v6695_v7 = vld [vmem:[#allocation8 + $0xe88] sm:$0xf]  ;;  %v6440_v15 = vor.u32 %v7346_v4, %v6439_v3  ;;  %3985 = vmatpush.bf16.msrb.mxu1 %v6152_v11  ;;  %v7726_v3 = vpop.f32.mrf.mxu0  ;;  %v5548_v4 = vor.u32 %v7118_v58, %v5545_v59  ;;  %v7038_v5 = vld [vmem:[#allocation8 + $0x30c] sm:$0xf]  ;;  %v7736_v58 = vpop.f32.mrf.mxu3 }
 0x16b   :  { %v7410_v8 = vld [vmem:[#allocation8 + $0xea4] sm:$0xf0]  ;;  %v7110_v11 = vld [vmem:[#allocation8 + $0x54c] sm:$0xf] }
 0x16c   :  { %v5863_v10 = vld [vmem:[#allocation8 + $0x808] sm:$0xf]  ;;  %v6696_v20 = vor.u32 %v7410_v8, %v6695_v7  ;;  %3997 = vmatpush.bf16.msrb.mxu2 %v6440_v15  ;;  %v5225_v7 = vld [vmem:[#allocation8 + $0x328] sm:$0xf0]  ;;  %v5804_v8 = vor.u32 %v7182_v61, %v5801_v62 }
 0x16d   :  { %v7202_v12 = vld [vmem:[#allocation8 + $0x824] sm:$0xf0]  ;;  %v5769_v15 = vld [vmem:[#allocation8 + $0x768] sm:$0xf0]  ;;  %v5228_v16 = vor.u32 %v7038_v5, %v5225_v7 }
 0x16e   :  { %v6119_v13 = vld [vmem:[#allocation8 + $0xa08] sm:$0xf]  ;;  %v5864_v24 = vor.u32 %v7202_v12, %v5863_v10  ;;  %4010 = vmatpush.bf16.msrb.mxu3 %v6696_v20  ;;  %v7728_v10 = vpop.f32.mrf.mxu1  ;;  %v5513_v12 = vld [vmem:[#allocation8 + $0x568] sm:$0xf0] }
 0x16f   :  { %v7266_v14 = vld [vmem:[#allocation8 + $0xa24] sm:$0xf0]  ;;  %v5516_v20 = vor.u32 %v7110_v11, %v5513_v12  ;;  %v7158_v50 = vld [vmem:[#allocation8 + $0x6cc] sm:$0xf] }
 0x170   :  { %v6407_v23 = vld [vmem:[#allocation8 + $0xc48] sm:$0xf]  ;;  %v6120_v27 = vor.u32 %v7266_v14, %v6119_v13  ;;  %3973 = vmatpush.bf16.msrb.mxu0 %v5864_v24  ;;  %v4972_v13 = vor.u32 %v6974_v0, %v4969_v1  ;;  %v7174_v14 = vld [vmem:[#allocation8 + $0x74c] sm:$0xf] }
 0x171   :  { %v7338_v2 = vld [vmem:[#allocation8 + $0xc64] sm:$0xf0]  ;;  %v7102_v24 = vld [vmem:[#allocation8 + $0x50c] sm:$0xf] }
 0x172   :  { %v6663_v25 = vld [vmem:[#allocation8 + $0xe48] sm:$0xf]  ;;  %v6408_v31 = vor.u32 %v7338_v2, %v6407_v23  ;;  %3986 = vmatpush.bf16.msrb.mxu1 %v6120_v27  ;;  %v5193_v23 = vld [vmem:[#allocation8 + $0x2e8] sm:$0xf0]  ;;  %v5772_v2 = vor.u32 %v7174_v14, %v5769_v15  ;;  %v3717_v32 = vpop.f32.mrf.mxu0 }
 0x173   :  { %v7402_v26 = vld [vmem:[#allocation8 + $0xe64] sm:$0xf0]  ;;  %3974 = vmatmul.bf16.vlgmr.msrb.gmra.mxu0 %v7699_v6  ;;  %v7166_v27 = vld [vmem:[#allocation8 + $0x70c] sm:$0xf]  ;;  %v5196_v29 = vor.u32 %v7030_v21, %v5193_v23 }
 0x174   :  { %v6664_v35 = vor.u32 %v7402_v26, %v6663_v25  ;;  %v6375_v36 = vld [vmem:[#allocation8 + $0xc08] sm:$0xf]  ;;  %4018 = vmatpush.bf16.msra.mxu0 %v5068_v28  ;;  %3998 = vmatpush.bf16.msrb.mxu2 %v6408_v31  ;;  %v5481_v25 = vld [vmem:[#allocation8 + $0x528] sm:$0xf0]  ;;  %v4940_v26 = vor.u32 %v6966_v18, %v4937_v19 }
 0x175   :  { %v7330_v37 = vld [vmem:[#allocation8 + $0xc24] sm:$0xf0]  ;;  %3987 = vmatmul.bf16.vlgmr.msrb.gmra.mxu1 %v7702_v9  ;;  %v5737_v28 = vld [vmem:[#allocation8 + $0x728] sm:$0xf0]  ;;  %v5484_v33 = vor.u32 %v7102_v24, %v5481_v25 }
 0x176   :  { %v6631_v38 = vld [vmem:[#allocation8 + $0xe08] sm:$0xf]  ;;  %4031 = vmatpush.bf16.msra.mxu1 %v5324_v30  ;;  %v6376_v48 = vor.u32 %v7330_v37, %v6375_v36  ;;  %4011 = vmatpush.bf16.msrb.mxu3 %v6664_v35  ;;  %v6958_v30 = vld [vmem:[#allocation8 + $0x8c] sm:$0xf]  ;;  %v5740_v36 = vor.u32 %v7166_v27, %v5737_v28  ;;  %v3730_v37 = vpop.f32.mrf.mxu1 }
 0x177   :  { %v7394_v39 = vld [vmem:[#allocation8 + $0xe24] sm:$0xf0]  ;;  %v4905_v31 = vld [vmem:[#allocation8 + $0xa8] sm:$0xf0] }
 0x178   :  { %v6632_v53 = vor.u32 %v7394_v39, %v6631_v38  ;;  %4019 = vmatpush.bf16.msra.mxu0 %v5036_v42  ;;  %3999 = vmatpush.bf16.msrb.mxu2 %v6376_v48  ;;  %v5161_v35 = vld [vmem:[#allocation8 + $0x2a8] sm:$0xf0]  ;;  %v4908_v40 = vor.u32 %v6958_v30, %v4905_v31 }
 0x179   :  { %v7094_v38 = vld [vmem:[#allocation8 + $0x4cc] sm:$0xf]  ;;  %v5164_v45 = vor.u32 %v7022_v34, %v5161_v35  ;;  %v3756_v34 = vpop.f32.mrf.mxu3 }
 0x17a   :  { %4032 = vmatpush.bf16.msra.mxu1 %v5292_v47  ;;  %4012 = vmatpush.bf16.msrb.mxu3 %v6632_v53  ;;  %v5449_v39 = vld [vmem:[#allocation8 + $0x4e8] sm:$0xf0]  ;;  %v7732_v53 = vpop.f32.mrf.mxu2 }
 0x17b   :  { %4000 = vmatmul.bf16.vlgmr.msrb.gmra.mxu2 %v7706_v41  ;;  %v5705_v42 = vld [vmem:[#allocation8 + $0x6e8] sm:$0xf0]  ;;  %v5452_v48 = vor.u32 %v7094_v38, %v5449_v39 }
 0x17c   :  { %4044 = vmatpush.bf16.msra.mxu2 %v5580_v54  ;;  %4020 = vmatpush.bf16.msra.mxu0 %v5004_v60  ;;  %v6950_v46 = vld [vmem:[#allocation8 + $0x4c] sm:$0xf]  ;;  %v5708_v54 = vor.u32 %v7158_v50, %v5705_v42 }
 0x17d   :  { %4013 = vmatmul.bf16.vlgmr.msrb.gmra.mxu3 %v7708_v44  ;;  %v4873_v47 = vld [vmem:[#allocation8 + $0x68] sm:$0xf0] }
 0x17e   :  { %4057 = vmatpush.bf16.msra.mxu3 %v5836_v57  ;;  %4033 = vmatpush.bf16.msra.mxu1 %v5260_v63  ;;  %v7014_v51 = vld [vmem:[#allocation8 + $0x24c] sm:$0xf]  ;;  %v7734_v57 = vld [vmem:[#allocation10] sm:$0xff]  ;;  %v4876_v59 = vor.u32 %v6950_v46, %v4873_v47 }
 0x17f   :  { %v5129_v52 = vld [vmem:[#allocation8 + $0x268] sm:$0xf0] }
 0x180   :  { %4045 = vmatpush.bf16.msra.mxu2 %v5548_v4  ;;  %4021 = vmatpush.bf16.msra.mxu0 %v4972_v13  ;;  %v7086_v55 = vld [vmem:[#allocation8 + $0x48c] sm:$0xf]  ;;  %v5132_v63 = vor.u32 %v7014_v51, %v5129_v52 }
 0x181   :  { %v5417_v56 = vld [vmem:[#allocation8 + $0x4a8] sm:$0xf0] }
 0x182   :  { %4058 = vmatpush.bf16.msra.mxu3 %v5804_v8  ;;  %4034 = vmatpush.bf16.msra.mxu1 %v5228_v16  ;;  %v7150_v60 = vld [vmem:[#allocation8 + $0x68c] sm:$0xf]  ;;  %v5420_v5 = vor.u32 %v7086_v55, %v5417_v56 }
 0x183   :  { %v5673_v61 = vld [vmem:[#allocation8 + $0x6a8] sm:$0xf0] }
 0x184   :  { %4046 = vmatpush.bf16.msra.mxu2 %v5516_v20  ;;  %4022 = vmatpush.bf16.msra.mxu0 %v4940_v26  ;;  %v6942_v62 = vld [vmem:[#allocation8 + $0xc] sm:$0xf]  ;;  %v5676_v12 = vor.u32 %v7150_v60, %v5673_v61  ;;  %v1130_v20 = vperm.slane %v7734_v57, 0 }
 0x185   :  { %v4841_v0 = vld [vmem:[#allocation8 + $0x28] sm:$0xf0] }
 0x186   :  { %4059 = vmatpush.bf16.msra.mxu3 %v5772_v2  ;;  %4035 = vmatpush.bf16.msra.mxu1 %v5196_v29  ;;  %v7006_v1 = vld [vmem:[#allocation8 + $0x20c] sm:$0xf]  ;;  %v4844_v16 = vor.u32 %v6942_v62, %v4841_v0  ;;  %v3743_v29 = vpop.f32.mrf.mxu2  ;;  %v3716_v50 = vadd.f32 %v7726_v3, %v1130_v20 }
 0x187   :  { %v5097_v4 = vld [vmem:[#allocation8 + $0x228] sm:$0xf0] }
 0x188   :  { %4047 = vmatpush.bf16.msra.mxu2 %v5484_v33  ;;  %4023 = vmatpush.bf16.msra.mxu0 %v4908_v40  ;;  %v7254_v7 = vld [vmem:[#allocation8 + $0x9cc] sm:$0xf]  ;;  %v5100_v21 = vor.u32 %v7006_v1, %v5097_v4  ;;  %v3729_v62 = vadd.f32 %v7728_v10, %v3716_v50 }
 0x189   :  { %v6089_v8 = vld [vmem:[#allocation8 + $0x9e8] sm:$0xf0] }
 0x18a   :  { %4060 = vmatpush.bf16.msra.mxu3 %v5740_v36  ;;  %4036 = vmatpush.bf16.msra.mxu1 %v5164_v45  ;;  %v7318_v11 = vld [vmem:[#allocation8 + $0xbcc] sm:$0xf]  ;;  %v6092_v23 = vor.u32 %v7254_v7, %v6089_v8  ;;  %v3767_v8 = vpop.f32.mrf.mxu0 }
 0x18b   :  { %v6345_v13 = vld [vmem:[#allocation8 + $0xbe8] sm:$0xf0] }
 0x18c   :  { %4048 = vmatpush.bf16.msra.mxu2 %v5452_v48  ;;  %v7078_v14 = vld [vmem:[#allocation8 + $0x44c] sm:$0xf]  ;;  %4024 = vmatpush.bf16.msra.mxu0 %v4876_v59  ;;  %v6348_v24 = vor.u32 %v7318_v11, %v6345_v13 }
 0x18d   :  { %v5385_v15 = vld [vmem:[#allocation8 + $0x468] sm:$0xf0] }
 0x18e   :  { %4061 = vmatpush.bf16.msra.mxu3 %v5708_v54  ;;  %v7142_v18 = vld [vmem:[#allocation8 + $0x64c] sm:$0xf]  ;;  %4037 = vmatpush.bf16.msra.mxu1 %v5132_v63  ;;  %v5388_v25 = vor.u32 %v7078_v14, %v5385_v15  ;;  %v3780_v14 = vpop.f32.mrf.mxu1 }
 0x18f   :  { %v5641_v19 = vld [vmem:[#allocation8 + $0x668] sm:$0xf0] }
 0x190   :  { %v7246_v2 = vld [vmem:[#allocation8 + $0x98c] sm:$0xf]  ;;  %4049 = vmatpush.bf16.msra.mxu2 %v5420_v5  ;;  %v5644_v30 = vor.u32 %v7142_v18, %v5641_v19  ;;  %4025 = vmatpush.bf16.msra.mxu0 %v4844_v16  ;;  %v3742_v18 = vadd.f32 %v7732_v53, %v3729_v62 }
 0x191   :  { %v6057_v26 = vld [vmem:[#allocation8 + $0x9a8] sm:$0xf0] }
 0x192   :  { %v7310_v27 = vld [vmem:[#allocation8 + $0xb8c] sm:$0xf]  ;;  %4062 = vmatpush.bf16.msra.mxu3 %v5676_v12  ;;  %4038 = vmatpush.bf16.msra.mxu1 %v5100_v21  ;;  %v6060_v38 = vor.u32 %v7246_v2, %v6057_v26  ;;  %v3755_v53 = vadd.f32 %v7736_v58, %v3742_v18 }
 0x193   :  { %v6313_v28 = vld [vmem:[#allocation8 + $0xba8] sm:$0xf0]  ;;  %4026 = vmatmul.bf16.vlgmr.msra.gmra.mxu0 %v7683_v17 }
 0x194   :  { %v7070_v31 = vld [vmem:[#allocation8 + $0x40c] sm:$0xf]  ;;  %4070 = vmatpush.bf16.msrb.mxu0 %v6092_v23  ;;  %4050 = vmatpush.bf16.msra.mxu2 %v5388_v25  ;;  %v6316_v42 = vor.u32 %v7310_v27, %v6313_v28 }
 0x195   :  { %v5353_v32 = vld [vmem:[#allocation8 + $0x428] sm:$0xf0]  ;;  %4039 = vmatmul.bf16.vlgmr.msra.gmra.mxu1 %v7686_v22 }
 0x196   :  { %v7134_v33 = vld [vmem:[#allocation8 + $0x60c] sm:$0xf]  ;;  %4083 = vmatpush.bf16.msrb.mxu1 %v6348_v24  ;;  %v5356_v45 = vor.u32 %v7070_v31, %v5353_v32  ;;  %4063 = vmatpush.bf16.msra.mxu3 %v5644_v30 }
 0x197   :  { %v5609_v35 = vld [vmem:[#allocation8 + $0x628] sm:$0xf0] }
 0x198   :  { %v7382_v36 = vld [vmem:[#allocation8 + $0xdcc] sm:$0xf]  ;;  %v5612_v48 = vor.u32 %v7134_v33, %v5609_v35  ;;  %4071 = vmatpush.bf16.msrb.mxu0 %v6060_v38  ;;  %4051 = vmatpush.bf16.msra.mxu2 %v5356_v45  ;;  %v3769_v38 = vpop.f32.mrf.mxu0 }
 0x199   :  { %v6601_v37 = vld [vmem:[#allocation8 + $0xde8] sm:$0xf0] }
 0x19a   :  { %v7446_v39 = vld [vmem:[#allocation8 + $0xfcc] sm:$0xf]  ;;  %v6604_v51 = vor.u32 %v7382_v36, %v6601_v37  ;;  %4084 = vmatpush.bf16.msrb.mxu1 %v6316_v42  ;;  %4064 = vmatpush.bf16.msra.mxu3 %v5612_v48  ;;  %v3768_v37 = vadd.f32 %v3767_v8, %v3755_v53  ;;  %v3782_v42 = vpop.f32.mrf.mxu1  ;;  %v6995_v53 = vld [vmem:[#allocation8 + $0x1ac] sm:$0xf0] }
 0x19b   :  { %v6857_v40 = vld [vmem:[#allocation8 + $0xfe8] sm:$0xf0]  ;;  %4052 = vmatmul.bf16.vlgmr.msra.gmra.mxu2 %v7690_v43  ;;  %v7131_v42 = vld [vmem:[#allocation8 + $0x5ec] sm:$0xf0] }
 0x19c   :  { %v7238_v46 = vld [vmem:[#allocation8 + $0x94c] sm:$0xf]  ;;  %v6860_v55 = vor.u32 %v7446_v39, %v6857_v40  ;;  %4096 = vmatpush.bf16.msrb.mxu2 %v6604_v51 }
 0x19d   :  { %v6025_v47 = vld [vmem:[#allocation8 + $0x968] sm:$0xf0]  ;;  %4065 = vmatmul.bf16.vlgmr.msra.gmra.mxu3 %v7692_v49 }
 0x19e   :  { %v7302_v52 = vld [vmem:[#allocation8 + $0xb4c] sm:$0xf]  ;;  %v6028_v3 = vor.u32 %v7238_v46, %v6025_v47  ;;  %4109 = vmatpush.bf16.msrb.mxu3 %v6860_v55 }
 0x19f   :  { %v6281_v54 = vld [vmem:[#allocation8 + $0xb68] sm:$0xf0] }
 0x1a0   :  { %v7374_v56 = vld [vmem:[#allocation8 + $0xd8c] sm:$0xf]  ;;  %v6284_v63 = vor.u32 %v7302_v52, %v6281_v54  ;;  %4072 = vmatpush.bf16.msrb.mxu0 %v6028_v3  ;;  %v3819_v18 = vpop.f32.mrf.mxu0 }
 0x1a1   :  { %v6569_v59 = vld [vmem:[#allocation8 + $0xda8] sm:$0xf0] }
 0x1a2   :  { %v7438_v60 = vld [vmem:[#allocation8 + $0xf8c] sm:$0xf]  ;;  %v6572_v4 = vor.u32 %v7374_v56, %v6569_v59  ;;  %4085 = vmatpush.bf16.msrb.mxu1 %v6284_v63  ;;  %v3781_v56 = vadd.f32 %v3780_v14, %v3768_v37  ;;  %v5071_v14 = vld [vmem:[#allocation8 + $0x1d0] sm:$0xf] }
 0x1a3   :  { %v6825_v61 = vld [vmem:[#allocation8 + $0xfa8] sm:$0xf0] }
 0x1a4   :  { %v7230_v0 = vld [vmem:[#allocation8 + $0x90c] sm:$0xf]  ;;  %v6828_v11 = vor.u32 %v7438_v60, %v6825_v61  ;;  %4097 = vmatpush.bf16.msrb.mxu2 %v6572_v4  ;;  %v3793_v61 = vpop.f32.mrf.mxu2 }
 0x1a5   :  { %v5993_v1 = vld [vmem:[#allocation8 + $0x928] sm:$0xf0]  ;;  %v3794_v4 = vadd.f32 %v3793_v61, %v3781_v56  ;;  %v7051_v61 = vld [vmem:[#allocation8 + $0x36c] sm:$0xf0] }
 0x1a6   :  { %v7294_v5 = vld [vmem:[#allocation8 + $0xb0c] sm:$0xf]  ;;  %v5996_v10 = vor.u32 %v7230_v0, %v5993_v1  ;;  %4110 = vmatpush.bf16.msrb.mxu3 %v6828_v11 }
 0x1a7   :  { %v6249_v7 = vld [vmem:[#allocation8 + $0xb28] sm:$0xf0] }
 0x1a8   :  { %v7366_v12 = vld [vmem:[#allocation8 + $0xd4c] sm:$0xf]  ;;  %v6252_v19 = vor.u32 %v7294_v5, %v6249_v7  ;;  %4073 = vmatpush.bf16.msrb.mxu0 %v5996_v10  ;;  %v3806_v5 = vpop.f32.mrf.mxu3  ;;  %v7003_v10 = vld [vmem:[#allocation8 + $0x1ec] sm:$0xf0]  ;;  %v3821_v56 = vpop.f32.mrf.mxu0 }
 0x1a9   :  { %v6537_v13 = vld [vmem:[#allocation8 + $0xd68] sm:$0xf0] }
 0x1aa   :  { %v7430_v15 = vld [vmem:[#allocation8 + $0xf4c] sm:$0xf]  ;;  %v6540_v23 = vor.u32 %v7366_v12, %v6537_v13  ;;  %4086 = vmatpush.bf16.msrb.mxu1 %v6252_v19 }
 0x1ab   :  { %v6793_v16 = vld [vmem:[#allocation8 + $0xf68] sm:$0xf0] }
 0x1ac   :  { %v7222_v20 = vld [vmem:[#allocation8 + $0x8cc] sm:$0xf]  ;;  %v6796_v25 = vor.u32 %v7430_v15, %v6793_v16  ;;  %4098 = vmatpush.bf16.msrb.mxu2 %v6540_v23  ;;  %v5327_v15 = vld [vmem:[#allocation8 + $0x3d0] sm:$0xf]  ;;  %v3807_v16 = vadd.f32 %v3806_v5, %v3794_v4 }
 0x1ad   :  { %v5961_v21 = vld [vmem:[#allocation8 + $0x8e8] sm:$0xf0]  ;;  %v5807_v5 = vld [vmem:[#allocation8 + $0x790] sm:$0xf] }
 0x1ae   :  { %v7286_v2 = vld [vmem:[#allocation8 + $0xacc] sm:$0xf]  ;;  %v5964_v28 = vor.u32 %v7222_v20, %v5961_v21  ;;  %4111 = vmatpush.bf16.msrb.mxu3 %v6796_v25  ;;  %v7067_v20 = vld [vmem:[#allocation8 + $0x3ec] sm:$0xf0] }
 0x1af   :  { %v6217_v24 = vld [vmem:[#allocation8 + $0xae8] sm:$0xf0] }
 0x1b0   :  { %v7358_v26 = vld [vmem:[#allocation8 + $0xd0c] sm:$0xf]  ;;  %v6220_v31 = vor.u32 %v7286_v2, %v6217_v24  ;;  %4074 = vmatpush.bf16.msrb.mxu0 %v5964_v28  ;;  %v7747_v2 = vpop.f32.mrf.mxu1 }
 0x1b1   :  { %v6505_v27 = vld [vmem:[#allocation8 + $0xd28] sm:$0xf0] }
 0x1b2   :  { %v7422_v29 = vld [vmem:[#allocation8 + $0xf0c] sm:$0xf]  ;;  %v6508_v34 = vor.u32 %v7358_v26, %v6505_v27  ;;  %4087 = vmatpush.bf16.msrb.mxu1 %v6220_v31  ;;  %v4538_v27 = vmax.f32 %v3807_v16, 0.0  ;;  %v5328_v31 = vor.u32 %v7067_v20, %v5327_v15  ;;  %v7043_v15 = vld [vmem:[#allocation8 + $0x32c] sm:$0xf0] }
 0x1b3   :  { %v6761_v30 = vld [vmem:[#allocation8 + $0xf28] sm:$0xf0]  ;;  %v5519_v20 = vld [vmem:[#allocation8 + $0x550] sm:$0xf] }
 0x1b4   :  { %v7214_v32 = vld [vmem:[#allocation8 + $0x88c] sm:$0xf]  ;;  %v6764_v39 = vor.u32 %v7422_v29, %v6761_v30  ;;  %4099 = vmatpush.bf16.msrb.mxu2 %v6508_v34  ;;  %v5072_v29 = vor.u32 %v7003_v10, %v5071_v14  ;;  %v5039_v30 = vld [vmem:[#allocation8 + $0x190] sm:$0xf]  ;;  %4546 = vst [vmem:[#allocation11] sm:$0xff] %v4538_v27 }
 0x1b5   :  { %v5929_v33 = vld [vmem:[#allocation8 + $0x8a8] sm:$0xf0]  ;;  %v7059_v34 = vld [vmem:[#allocation8 + $0x3ac] sm:$0xf0] }
 0x1b6   :  { %v7278_v35 = vld [vmem:[#allocation8 + $0xa8c] sm:$0xf]  ;;  %v5932_v45 = vor.u32 %v7214_v32, %v5929_v33  ;;  %4112 = vmatpush.bf16.msrb.mxu3 %v6764_v39  ;;  %v5295_v33 = vld [vmem:[#allocation8 + $0x390] sm:$0xf]  ;;  %v3795_v39 = vpop.f32.mrf.mxu2 }
 0x1b7   :  { %v6185_v36 = vld [vmem:[#allocation8 + $0xaa8] sm:$0xf0]  ;;  %v5231_v10 = vld [vmem:[#allocation8 + $0x310] sm:$0xf] }
 0x1b8   :  { %v7350_v40 = vld [vmem:[#allocation8 + $0xccc] sm:$0xf]  ;;  %v6188_v58 = vor.u32 %v7278_v35, %v6185_v36  ;;  %4075 = vmatpush.bf16.msrb.mxu0 %v5932_v45  ;;  %v3808_v45 = vpop.f32.mrf.mxu3  ;;  %v5232_v27 = vor.u32 %v7043_v15, %v5231_v10  ;;  %v7171_v39 = vld [vmem:[#allocation8 + $0x72c] sm:$0xf0] }
 0x1b9   :  { %v6473_v50 = vld [vmem:[#allocation8 + $0xce8] sm:$0xf0]  ;;  %v7155_v10 = vld [vmem:[#allocation8 + $0x6ac] sm:$0xf0] }
 0x1ba   :  { %v7414_v46 = vld [vmem:[#allocation8 + $0xecc] sm:$0xf]  ;;  %v6476_v52 = vor.u32 %v7350_v40, %v6473_v50  ;;  %4088 = vmatpush.bf16.msrb.mxu1 %v6188_v58  ;;  %v5583_v50 = vld [vmem:[#allocation8 + $0x5d0] sm:$0xf] }
 0x1bb   :  { %v6729_v47 = vld [vmem:[#allocation8 + $0xee8] sm:$0xf0]  ;;  %v7195_v58 = vld [vmem:[#allocation8 + $0x7ec] sm:$0xf0] }
 0x1bc   :  { %v7206_v48 = vld [vmem:[#allocation8 + $0x84c] sm:$0xf]  ;;  %v6732_v59 = vor.u32 %v7414_v46, %v6729_v47  ;;  %4100 = vmatpush.bf16.msrb.mxu2 %v6476_v52  ;;  %v5040_v46 = vor.u32 %v6995_v53, %v5039_v30  ;;  %v5839_v47 = vld [vmem:[#allocation8 + $0x7d0] sm:$0xf] }
 0x1bd   :  { %v5897_v51 = vld [vmem:[#allocation8 + $0x868] sm:$0xf0]  ;;  %v5199_v53 = vld [vmem:[#allocation8 + $0x2d0] sm:$0xf] }
 0x1be   :  { %v7270_v54 = vld [vmem:[#allocation8 + $0xa4c] sm:$0xf]  ;;  %v5900_v62 = vor.u32 %v7206_v48, %v5897_v51  ;;  %4113 = vmatpush.bf16.msrb.mxu3 %v6732_v59  ;;  %v1131_v48 = vperm.slane %v7734_v57, 1  ;;  %v5296_v51 = vor.u32 %v7059_v34, %v5295_v33  ;;  %v3845_v16 = vpop.f32.mrf.mxu2  ;;  %v3871_v33 = vpop.f32.mrf.mxu0  ;;  %v4847_v15 = vld [vmem:[#allocation8 + $0x10] sm:$0xf] }
 0x1bf   :  { %v6153_v55 = vld [vmem:[#allocation8 + $0xa68] sm:$0xf0] }
 0x1c0   :  { %v7342_v3 = vld [vmem:[#allocation8 + $0xc8c] sm:$0xf]  ;;  %v6156_v7 = vor.u32 %v7270_v54, %v6153_v55  ;;  %4076 = vmatpush.bf16.msrb.mxu0 %v5900_v62  ;;  %v5007_v54 = vld [vmem:[#allocation8 + $0x150] sm:$0xf]  ;;  %v3834_v62 = vpop.f32.mrf.mxu1 }
 0x1c1   :  { %v6441_v60 = vld [vmem:[#allocation8 + $0xca8] sm:$0xf0]  ;;  %v6987_v55 = vld [vmem:[#allocation8 + $0x16c] sm:$0xf0] }
 0x1c2   :  { %v7406_v63 = vld [vmem:[#allocation8 + $0xe8c] sm:$0xf]  ;;  %v6444_v13 = vor.u32 %v7342_v3, %v6441_v60  ;;  %4089 = vmatpush.bf16.msrb.mxu1 %v6156_v7  ;;  %v5584_v3 = vor.u32 %v7131_v42, %v5583_v50  ;;  %v5263_v60 = vld [vmem:[#allocation8 + $0x350] sm:$0xf]  ;;  %v5008_v4 = vor.u32 %v6987_v55, %v5007_v54 }
 0x1c3   :  { %v6697_v0 = vld [vmem:[#allocation8 + $0xea8] sm:$0xf0]  ;;  %v7187_v7 = vld [vmem:[#allocation8 + $0x7ac] sm:$0xf0] }
 0x1c4   :  { %v7198_v1 = vld [vmem:[#allocation8 + $0x80c] sm:$0xf]  ;;  %v6700_v19 = vor.u32 %v7406_v63, %v6697_v0  ;;  %4101 = vmatpush.bf16.msrb.mxu2 %v6444_v13  ;;  %v5840_v63 = vor.u32 %v7195_v58, %v5839_v47  ;;  %v5551_v0 = vld [vmem:[#allocation8 + $0x590] sm:$0xf] }
 0x1c5   :  { %v5865_v8 = vld [vmem:[#allocation8 + $0x828] sm:$0xf0]  ;;  %v6979_v13 = vld [vmem:[#allocation8 + $0x12c] sm:$0xf0] }
 0x1c6   :  { %v7262_v11 = vld [vmem:[#allocation8 + $0xa0c] sm:$0xf]  ;;  %v5868_v24 = vor.u32 %v7198_v1, %v5865_v8  ;;  %4114 = vmatpush.bf16.msrb.mxu3 %v6700_v19  ;;  %v7123_v1 = vld [vmem:[#allocation8 + $0x5ac] sm:$0xf0]  ;;  %v3820_v8 = vadd.f32 %v3819_v18, %v1131_v48  ;;  %v5808_v19 = vor.u32 %v7187_v7, %v5807_v5  ;;  %v3847_v48 = vpop.f32.mrf.mxu2  ;;  %v3873_v5 = vpop.f32.mrf.mxu0 }
 0x1c7   :  { %v6121_v12 = vld [vmem:[#allocation8 + $0xa28] sm:$0xf0]  ;;  %v5552_v14 = vor.u32 %v7123_v1, %v5551_v0  ;;  %v4911_v50 = vld [vmem:[#allocation8 + $0x90] sm:$0xf] }
 0x1c8   :  { %v7334_v21 = vld [vmem:[#allocation8 + $0xc4c] sm:$0xf]  ;;  %v6124_v28 = vor.u32 %v7262_v11, %v6121_v12  ;;  %4077 = vmatpush.bf16.msrb.mxu0 %v5868_v24  ;;  %v5264_v11 = vor.u32 %v7051_v61, %v5263_v60  ;;  %v4975_v12 = vld [vmem:[#allocation8 + $0x110] sm:$0xf] }
 0x1c9   :  { %v6409_v23 = vld [vmem:[#allocation8 + $0xc68] sm:$0xf0]  ;;  %v4976_v18 = vor.u32 %v6979_v13, %v4975_v12  ;;  %v5775_v24 = vld [vmem:[#allocation8 + $0x750] sm:$0xf] }
 0x1ca   :  { %v7398_v25 = vld [vmem:[#allocation8 + $0xe4c] sm:$0xf]  ;;  %v6412_v32 = vor.u32 %v7334_v21, %v6409_v23  ;;  %4090 = vmatpush.bf16.msrb.mxu1 %v6124_v28  ;;  %v7115_v21 = vld [vmem:[#allocation8 + $0x56c] sm:$0xf0]  ;;  %v3858_v23 = vpop.f32.mrf.mxu3 }
 0x1cb   :  { %v6665_v26 = vld [vmem:[#allocation8 + $0xe68] sm:$0xf0]  ;;  %4078 = vmatmul.bf16.vlgmr.msrb.gmra.mxu0 %v7699_v6  ;;  %v4943_v28 = vld [vmem:[#allocation8 + $0xd0] sm:$0xf]  ;;  %v5520_v30 = vor.u32 %v7115_v21, %v5519_v20 }
 0x1cc   :  { %v7326_v35 = vld [vmem:[#allocation8 + $0xc0c] sm:$0xf]  ;;  %v6668_v36 = vor.u32 %v7398_v25, %v6665_v26  ;;  %4122 = vmatpush.bf16.msra.mxu0 %v5072_v29  ;;  %4102 = vmatpush.bf16.msrb.mxu2 %v6412_v32  ;;  %v7179_v25 = vld [vmem:[#allocation8 + $0x76c] sm:$0xf0]  ;;  %v3833_v26 = vadd.f32 %v7747_v2, %v3820_v8 }
 0x1cd   :  { %v6377_v37 = vld [vmem:[#allocation8 + $0xc28] sm:$0xf0]  ;;  %4091 = vmatmul.bf16.vlgmr.msrb.gmra.mxu1 %v7702_v9  ;;  %v6971_v29 = vld [vmem:[#allocation8 + $0xec] sm:$0xf0]  ;;  %v5776_v34 = vor.u32 %v7179_v25, %v5775_v24 }
 0x1ce   :  { %v7390_v38 = vld [vmem:[#allocation8 + $0xe0c] sm:$0xf]  ;;  %4135 = vmatpush.bf16.msra.mxu1 %v5328_v31  ;;  %v6380_v52 = vor.u32 %v7326_v35, %v6377_v37  ;;  %4115 = vmatpush.bf16.msrb.mxu3 %v6668_v36  ;;  %v7035_v31 = vld [vmem:[#allocation8 + $0x2ec] sm:$0xf0]  ;;  %v3846_v32 = vadd.f32 %v3845_v16, %v3833_v26  ;;  %v3884_v37 = vpop.f32.mrf.mxu1 }
 0x1cf   :  { %v6633_v40 = vld [vmem:[#allocation8 + $0xe28] sm:$0xf0]  ;;  %v5487_v35 = vld [vmem:[#allocation8 + $0x510] sm:$0xf] }
 0x1d0   :  { %v6636_v59 = vor.u32 %v7390_v38, %v6633_v40  ;;  %4123 = vmatpush.bf16.msra.mxu0 %v5040_v46  ;;  %4103 = vmatpush.bf16.msrb.mxu2 %v6380_v52  ;;  %v7107_v36 = vld [vmem:[#allocation8 + $0x52c] sm:$0xf0]  ;;  %v4944_v38 = vor.u32 %v6971_v29, %v4943_v28  ;;  %v5200_v40 = vor.u32 %v7035_v31, %v5199_v53  ;;  %v3897_v53 = vpop.f32.mrf.mxu2 }
 0x1d1   :  { %v5743_v2 = vld [vmem:[#allocation8 + $0x710] sm:$0xf]  ;;  %v5488_v45 = vor.u32 %v7107_v36, %v5487_v35  ;;  %v3859_v58 = vadd.f32 %v3858_v23, %v3846_v32 }
 0x1d2   :  { %4136 = vmatpush.bf16.msra.mxu1 %v5296_v51  ;;  %4116 = vmatpush.bf16.msrb.mxu3 %v6636_v59  ;;  %v6963_v42 = vld [vmem:[#allocation8 + $0xac] sm:$0xf0]  ;;  %v5744_v51 = vor.u32 %v7171_v39, %v5743_v2  ;;  %v3860_v55 = vpop.f32.mrf.mxu3 }
 0x1d3   :  { %4104 = vmatmul.bf16.vlgmr.msrb.gmra.mxu2 %v7706_v41  ;;  %v5167_v46 = vld [vmem:[#allocation8 + $0x290] sm:$0xf]  ;;  %v4912_v56 = vor.u32 %v6963_v42, %v4911_v50 }
 0x1d4   :  { %4148 = vmatpush.bf16.msra.mxu2 %v5584_v3  ;;  %4124 = vmatpush.bf16.msra.mxu0 %v5008_v4  ;;  %v7027_v47 = vld [vmem:[#allocation8 + $0x2ac] sm:$0xf0]  ;;  %v3872_v4 = vadd.f32 %v3871_v33, %v3859_v58 }
 0x1d5   :  { %4117 = vmatmul.bf16.vlgmr.msrb.gmra.mxu3 %v7708_v44  ;;  %v5455_v52 = vld [vmem:[#allocation8 + $0x4d0] sm:$0xf]  ;;  %v5168_v60 = vor.u32 %v7027_v47, %v5167_v46 }
 0x1d6   :  { %4161 = vmatpush.bf16.msra.mxu3 %v5840_v63  ;;  %4137 = vmatpush.bf16.msra.mxu1 %v5264_v11  ;;  %v7099_v54 = vld [vmem:[#allocation8 + $0x4ec] sm:$0xf0]  ;;  %v3886_v12 = vpop.f32.mrf.mxu1  ;;  %v3885_v26 = vadd.f32 %v3884_v37, %v3872_v4 }
 0x1d7   :  { %v5711_v59 = vld [vmem:[#allocation8 + $0x6d0] sm:$0xf]  ;;  %v5456_v63 = vor.u32 %v7099_v54, %v5455_v52 }
 0x1d8   :  { %4149 = vmatpush.bf16.msra.mxu2 %v5552_v14  ;;  %4125 = vmatpush.bf16.msra.mxu0 %v4976_v18  ;;  %v7163_v3 = vld [vmem:[#allocation8 + $0x6ec] sm:$0xf0]  ;;  %v3898_v35 = vadd.f32 %v3897_v53, %v3885_v26 }
 0x1d9   :  { %v4879_v61 = vld [vmem:[#allocation8 + $0x50] sm:$0xf]  ;;  %v5712_v7 = vor.u32 %v7163_v3, %v5711_v59 }
 0x1da   :  { %4162 = vmatpush.bf16.msra.mxu3 %v5808_v19  ;;  %4138 = vmatpush.bf16.msra.mxu1 %v5232_v27  ;;  %v6955_v62 = vld [vmem:[#allocation8 + $0x6c] sm:$0xf0]  ;;  %v3910_v31 = vpop.f32.mrf.mxu3 }
 0x1db   :  { %v5135_v0 = vld [vmem:[#allocation8 + $0x250] sm:$0xf]  ;;  %v4880_v13 = vor.u32 %v6955_v62, %v4879_v61 }
 0x1dc   :  { %4150 = vmatpush.bf16.msra.mxu2 %v5520_v30  ;;  %4126 = vmatpush.bf16.msra.mxu0 %v4944_v38  ;;  %v7019_v1 = vld [vmem:[#allocation8 + $0x26c] sm:$0xf0] }
 0x1dd   :  { %v5423_v8 = vld [vmem:[#allocation8 + $0x490] sm:$0xf]  ;;  %v5136_v16 = vor.u32 %v7019_v1, %v5135_v0 }
 0x1de   :  { %4163 = vmatpush.bf16.msra.mxu3 %v5776_v34  ;;  %4139 = vmatpush.bf16.msra.mxu1 %v5200_v40  ;;  %v7091_v11 = vld [vmem:[#allocation8 + $0x4ac] sm:$0xf0] }
 0x1df   :  { %v5679_v14 = vld [vmem:[#allocation8 + $0x690] sm:$0xf]  ;;  %v5424_v23 = vor.u32 %v7091_v11, %v5423_v8 }
 0x1e0   :  { %4151 = vmatpush.bf16.msra.mxu2 %v5488_v45  ;;  %4127 = vmatpush.bf16.msra.mxu0 %v4912_v56  ;;  %v6947_v19 = vld [vmem:[#allocation8 + $0x2c] sm:$0xf0]  ;;  %v5680_v27 = vor.u32 %v7155_v10, %v5679_v14  ;;  %v3911_v45 = vadd.f32 %v3910_v31, %v3898_v35  ;;  %v7759_v35 = vpop.f32.mrf.mxu0 }
 0x1e1   :  { %v5103_v20 = vld [vmem:[#allocation8 + $0x210] sm:$0xf]  ;;  %v4848_v32 = vor.u32 %v6947_v19, %v4847_v15 }
 0x1e2   :  { %4164 = vmatpush.bf16.msra.mxu3 %v5744_v51  ;;  %4140 = vmatpush.bf16.msra.mxu1 %v5168_v60  ;;  %v7011_v21 = vld [vmem:[#allocation8 + $0x22c] sm:$0xf0]  ;;  %v4539_v55 = vmax.f32 %v3911_v45, 0.0  ;;  %v3912_v8 = vpop.f32.mrf.mxu3 }
 0x1e3   :  { %v6095_v18 = vld [vmem:[#allocation8 + $0x9d0] sm:$0xf]  ;;  %v5104_v36 = vor.u32 %v7011_v21, %v5103_v20 }
 0x1e4   :  { %4152 = vmatpush.bf16.msra.mxu2 %v5456_v63  ;;  %v7259_v24 = vld [vmem:[#allocation8 + $0x9ec] sm:$0xf0]  ;;  %4128 = vmatpush.bf16.msra.mxu0 %v4880_v13  ;;  %4547 = vst [vmem:[#allocation11 + $0x8] sm:$0xff] %v4539_v55 }
 0x1e5   :  { %v6351_v25 = vld [vmem:[#allocation8 + $0xbd0] sm:$0xf]  ;;  %v6096_v38 = vor.u32 %v7259_v24, %v6095_v18 }
 0x1e6   :  { %4165 = vmatpush.bf16.msra.mxu3 %v5712_v7  ;;  %v7323_v28 = vld [vmem:[#allocation8 + $0xbec] sm:$0xf0]  ;;  %4141 = vmatpush.bf16.msra.mxu1 %v5136_v16  ;;  %v3899_v7 = vpop.f32.mrf.mxu2 }
 0x1e7   :  { %v5391_v29 = vld [vmem:[#allocation8 + $0x450] sm:$0xf]  ;;  %v6352_v39 = vor.u32 %v7323_v28, %v6351_v25 }
 0x1e8   :  { %v7083_v30 = vld [vmem:[#allocation8 + $0x46c] sm:$0xf0]  ;;  %4153 = vmatpush.bf16.msra.mxu2 %v5424_v23  ;;  %4129 = vmatpush.bf16.msra.mxu0 %v4848_v32 }
 0x1e9   :  { %v5647_v33 = vld [vmem:[#allocation8 + $0x650] sm:$0xf]  ;;  %v5392_v40 = vor.u32 %v7083_v30, %v5391_v29 }
 0x1ea   :  { %v7147_v34 = vld [vmem:[#allocation8 + $0x66c] sm:$0xf0]  ;;  %4166 = vmatpush.bf16.msra.mxu3 %v5680_v27  ;;  %4142 = vmatpush.bf16.msra.mxu1 %v5104_v36 }
 0x1eb   :  { %v6063_v2 = vld [vmem:[#allocation8 + $0x990] sm:$0xf]  ;;  %v5648_v46 = vor.u32 %v7147_v34, %v5647_v33  ;;  %4130 = vmatmul.bf16.vlgmr.msra.gmra.mxu0 %v7683_v17 }
 0x1ec   :  { %v7251_v37 = vld [vmem:[#allocation8 + $0x9ac] sm:$0xf0]  ;;  %4174 = vmatpush.bf16.msrb.mxu0 %v6096_v38  ;;  %4154 = vmatpush.bf16.msra.mxu2 %v5392_v40 }
 0x1ed   :  { %v6319_v50 = vld [vmem:[#allocation8 + $0xb90] sm:$0xf]  ;;  %v6064_v56 = vor.u32 %v7251_v37, %v6063_v2  ;;  %4143 = vmatmul.bf16.vlgmr.msra.gmra.mxu1 %v7686_v22 }
 0x1ee   :  { %v7315_v42 = vld [vmem:[#allocation8 + $0xbac] sm:$0xf0]  ;;  %4187 = vmatpush.bf16.msrb.mxu1 %v6352_v39  ;;  %4167 = vmatpush.bf16.msra.mxu3 %v5648_v46  ;;  %v7761_v39 = vpop.f32.mrf.mxu1 }
 0x1ef   :  { %v5359_v47 = vld [vmem:[#allocation8 + $0x410] sm:$0xf]  ;;  %v6320_v60 = vor.u32 %v7315_v42, %v6319_v50 }
 0x1f0   :  { %v7075_v58 = vld [vmem:[#allocation8 + $0x42c] sm:$0xf0]  ;;  %4175 = vmatpush.bf16.msrb.mxu0 %v6064_v56 }
 0x1f1   :  { %v5615_v48 = vld [vmem:[#allocation8 + $0x610] sm:$0xf]  ;;  %v5360_v61 = vor.u32 %v7075_v58, %v5359_v47 }
 0x1f2   :  { %v7139_v51 = vld [vmem:[#allocation8 + $0x62c] sm:$0xf0]  ;;  %4188 = vmatpush.bf16.msrb.mxu1 %v6320_v60 }
 0x1f3   :  { %v6607_v52 = vld [vmem:[#allocation8 + $0xdd0] sm:$0xf]  ;;  %v5616_v0 = vor.u32 %v7139_v51, %v5615_v48  ;;  %4155 = vmatpush.bf16.msra.mxu2 %v5360_v61 }
 0x1f4   :  { %v7387_v54 = vld [vmem:[#allocation8 + $0xdec] sm:$0xf0] }
 0x1f5   :  { %v6863_v59 = vld [vmem:[#allocation8 + $0xfd0] sm:$0xf]  ;;  %v6608_v1 = vor.u32 %v7387_v54, %v6607_v52  ;;  %4168 = vmatpush.bf16.msra.mxu3 %v5616_v0 }
 0x1f6   :  { %v7451_v3 = vld [vmem:[#allocation8 + $0xfec] sm:$0xf0]  ;;  %4156 = vmatmul.bf16.vlgmr.msra.gmra.mxu2 %v7690_v43  ;;  %v3938_v8 = vpop.f32.mrf.mxu1 }
 0x1f7   :  { %v6031_v62 = vld [vmem:[#allocation8 + $0x950] sm:$0xf]  ;;  %v6864_v11 = vor.u32 %v7451_v3, %v6863_v59  ;;  %4200 = vmatpush.bf16.msrb.mxu2 %v6608_v1  ;;  %v3925_v1 = vpop.f32.mrf.mxu0  ;;  %v5553_v8 = vld [vmem:[#allocation8 + $0x5b0] sm:$0xf0] }
 0x1f8   :  { %v7243_v63 = vld [vmem:[#allocation8 + $0x96c] sm:$0xf0]  ;;  %4169 = vmatmul.bf16.vlgmr.msra.gmra.mxu3 %v7692_v49  ;;  %v5265_v1 = vld [vmem:[#allocation8 + $0x370] sm:$0xf0] }
 0x1f9   :  { %v6287_v4 = vld [vmem:[#allocation8 + $0xb50] sm:$0xf]  ;;  %v6032_v14 = vor.u32 %v7243_v63, %v6031_v62  ;;  %4213 = vmatpush.bf16.msrb.mxu3 %v6864_v11 }
 0x1fa   :  { %v7307_v5 = vld [vmem:[#allocation8 + $0xb6c] sm:$0xf0] }
 0x1fb   :  { %v6575_v12 = vld [vmem:[#allocation8 + $0xd90] sm:$0xf]  ;;  %v6288_v16 = vor.u32 %v7307_v5, %v6287_v4  ;;  %4176 = vmatpush.bf16.msrb.mxu0 %v6032_v14 }
 0x1fc   :  { %v7379_v13 = vld [vmem:[#allocation8 + $0xdac] sm:$0xf0] }
 0x1fd   :  { %v6831_v10 = vld [vmem:[#allocation8 + $0xf90] sm:$0xf]  ;;  %v6576_v21 = vor.u32 %v7379_v13, %v6575_v12  ;;  %4189 = vmatpush.bf16.msrb.mxu1 %v6288_v16 }
 0x1fe   :  { %v7443_v15 = vld [vmem:[#allocation8 + $0xfac] sm:$0xf0] }
 0x1ff   :  { %v5999_v19 = vld [vmem:[#allocation8 + $0x910] sm:$0xf]  ;;  %v6832_v24 = vor.u32 %v7443_v15, %v6831_v10  ;;  %4201 = vmatpush.bf16.msrb.mxu2 %v6576_v21  ;;  %v6999_v21 = vld [vmem:[#allocation8 + $0x1d4] sm:$0xf] }
 0x200   :  { %v7235_v20 = vld [vmem:[#allocation8 + $0x92c] sm:$0xf0] }
 0x201   :  { %v6255_v23 = vld [vmem:[#allocation8 + $0xb10] sm:$0xf]  ;;  %v6000_v27 = vor.u32 %v7235_v20, %v5999_v19  ;;  %4214 = vmatpush.bf16.msrb.mxu3 %v6832_v24  ;;  %v7763_v24 = vpop.f32.mrf.mxu2 }
 0x202   :  { %v7299_v18 = vld [vmem:[#allocation8 + $0xb2c] sm:$0xf0] }
 0x203   :  { %v6543_v25 = vld [vmem:[#allocation8 + $0xd50] sm:$0xf]  ;;  %v6256_v30 = vor.u32 %v7299_v18, %v6255_v23  ;;  %4177 = vmatpush.bf16.msrb.mxu0 %v6000_v27  ;;  %v5073_v23 = vld [vmem:[#allocation8 + $0x1f0] sm:$0xf0] }
 0x204   :  { %v7371_v26 = vld [vmem:[#allocation8 + $0xd6c] sm:$0xf0]  ;;  %v7063_v18 = vld [vmem:[#allocation8 + $0x3d4] sm:$0xf] }
 0x205   :  { %v6799_v28 = vld [vmem:[#allocation8 + $0xf50] sm:$0xf]  ;;  %v6544_v32 = vor.u32 %v7371_v26, %v6543_v25  ;;  %4190 = vmatpush.bf16.msrb.mxu1 %v6256_v30  ;;  %v5329_v26 = vld [vmem:[#allocation8 + $0x3f0] sm:$0xf0] }
 0x206   :  { %v7435_v29 = vld [vmem:[#allocation8 + $0xf6c] sm:$0xf0] }
 0x207   :  { %v5967_v53 = vld [vmem:[#allocation8 + $0x8d0] sm:$0xf]  ;;  %v6800_v36 = vor.u32 %v7435_v29, %v6799_v28  ;;  %4202 = vmatpush.bf16.msrb.mxu2 %v6544_v32  ;;  %v7765_v29 = vpop.f32.mrf.mxu3 }
 0x208   :  { %v7227_v31 = vld [vmem:[#allocation8 + $0x8ec] sm:$0xf0] }
 0x209   :  { %v6223_v33 = vld [vmem:[#allocation8 + $0xad0] sm:$0xf]  ;;  %v5968_v40 = vor.u32 %v7227_v31, %v5967_v53  ;;  %4215 = vmatpush.bf16.msrb.mxu3 %v6800_v36  ;;  %v5332_v36 = vor.u32 %v7063_v18, %v5329_v26  ;;  %v5521_v18 = vld [vmem:[#allocation8 + $0x570] sm:$0xf0] }
 0x20a   :  { %v7291_v34 = vld [vmem:[#allocation8 + $0xaec] sm:$0xf0]  ;;  %v7175_v26 = vld [vmem:[#allocation8 + $0x754] sm:$0xf] }
 0x20b   :  { %v6511_v38 = vld [vmem:[#allocation8 + $0xd10] sm:$0xf]  ;;  %v6224_v42 = vor.u32 %v7291_v34, %v6223_v33  ;;  %4178 = vmatpush.bf16.msrb.mxu0 %v5968_v40  ;;  %v5076_v33 = vor.u32 %v6999_v21, %v5073_v23  ;;  %v6991_v34 = vld [vmem:[#allocation8 + $0x194] sm:$0xf] }
 0x20c   :  { %v7363_v2 = vld [vmem:[#allocation8 + $0xd2c] sm:$0xf0]  ;;  %v7055_v40 = vld [vmem:[#allocation8 + $0x394] sm:$0xf] }
 0x20d   :  { %v6767_v37 = vld [vmem:[#allocation8 + $0xf10] sm:$0xf]  ;;  %v6512_v47 = vor.u32 %v7363_v2, %v6511_v38  ;;  %4191 = vmatpush.bf16.msrb.mxu1 %v6224_v42  ;;  %v5041_v2 = vld [vmem:[#allocation8 + $0x1b0] sm:$0xf0] }
 0x20e   :  { %v7427_v50 = vld [vmem:[#allocation8 + $0xf2c] sm:$0xf0]  ;;  %v7111_v23 = vld [vmem:[#allocation8 + $0x554] sm:$0xf] }
 0x20f   :  { %v5935_v45 = vld [vmem:[#allocation8 + $0x890] sm:$0xf]  ;;  %v6768_v51 = vor.u32 %v7427_v50, %v6767_v37  ;;  %4203 = vmatpush.bf16.msrb.mxu2 %v6512_v47  ;;  %v5297_v37 = vld [vmem:[#allocation8 + $0x3b0] sm:$0xf0] }
 0x210   :  { %v7219_v46 = vld [vmem:[#allocation8 + $0x8ac] sm:$0xf0] }
 0x211   :  { %v6191_v58 = vld [vmem:[#allocation8 + $0xa90] sm:$0xf]  ;;  %v5936_v55 = vor.u32 %v7219_v46, %v5935_v45  ;;  %4216 = vmatpush.bf16.msrb.mxu3 %v6768_v51  ;;  %v5044_v51 = vor.u32 %v6991_v34, %v5041_v2  ;;  %v3975_v34 = vpop.f32.mrf.mxu0  ;;  %v5489_v2 = vld [vmem:[#allocation8 + $0x530] sm:$0xf0] }
 0x212   :  { %v7283_v48 = vld [vmem:[#allocation8 + $0xaac] sm:$0xf0] }
 0x213   :  { %v6479_v52 = vld [vmem:[#allocation8 + $0xcd0] sm:$0xf]  ;;  %v6192_v3 = vor.u32 %v7283_v48, %v6191_v58  ;;  %4179 = vmatpush.bf16.msrb.mxu0 %v5936_v55  ;;  %v7127_v58 = vld [vmem:[#allocation8 + $0x5d4] sm:$0xf]  ;;  %v5300_v55 = vor.u32 %v7055_v40, %v5297_v37  ;;  %v3988_v37 = vpop.f32.mrf.mxu1 }
 0x214   :  { %v7355_v54 = vld [vmem:[#allocation8 + $0xcec] sm:$0xf0]  ;;  %v5585_v48 = vld [vmem:[#allocation8 + $0x5f0] sm:$0xf0] }
 0x215   :  { %v6735_v56 = vld [vmem:[#allocation8 + $0xed0] sm:$0xf]  ;;  %v6480_v62 = vor.u32 %v7355_v54, %v6479_v52  ;;  %4192 = vmatpush.bf16.msrb.mxu1 %v6192_v3  ;;  %v7191_v52 = vld [vmem:[#allocation8 + $0x7d4] sm:$0xf] }
 0x216   :  { %v7419_v59 = vld [vmem:[#allocation8 + $0xeec] sm:$0xf0]  ;;  %v5841_v54 = vld [vmem:[#allocation8 + $0x7f0] sm:$0xf0] }
 0x217   :  { %v5903_v60 = vld [vmem:[#allocation8 + $0x850] sm:$0xf]  ;;  %v6736_v4 = vor.u32 %v7419_v59, %v6735_v56  ;;  %4204 = vmatpush.bf16.msrb.mxu2 %v6480_v62  ;;  %v6983_v59 = vld [vmem:[#allocation8 + $0x154] sm:$0xf] }
 0x218   :  { %v7211_v61 = vld [vmem:[#allocation8 + $0x86c] sm:$0xf0]  ;;  %v5009_v3 = vld [vmem:[#allocation8 + $0x170] sm:$0xf0] }
 0x219   :  { %v6159_v63 = vld [vmem:[#allocation8 + $0xa50] sm:$0xf]  ;;  %v5904_v11 = vor.u32 %v7211_v61, %v5903_v60  ;;  %4217 = vmatpush.bf16.msrb.mxu3 %v6736_v4  ;;  %v1132_v60 = vperm.slane %v7734_v57, 2  ;;  %v3951_v61 = vpop.f32.mrf.mxu2  ;;  %v3964_v4 = vpop.f32.mrf.mxu3 }
 0x21a   :  { %v7275_v0 = vld [vmem:[#allocation8 + $0xa6c] sm:$0xf0]  ;;  %v6951_v61 = vld [vmem:[#allocation8 + $0x54] sm:$0xf] }
 0x21b   :  { %v6447_v5 = vld [vmem:[#allocation8 + $0xc90] sm:$0xf]  ;;  %v6160_v10 = vor.u32 %v7275_v0, %v6159_v63  ;;  %4180 = vmatpush.bf16.msrb.mxu0 %v5904_v11  ;;  %v5588_v63 = vor.u32 %v7127_v58, %v5585_v48  ;;  %v7047_v0 = vld [vmem:[#allocation8 + $0x354] sm:$0xf]  ;;  %v5012_v11 = vor.u32 %v6983_v59, %v5009_v3 }
 0x21c   :  { %v7347_v7 = vld [vmem:[#allocation8 + $0xcac] sm:$0xf0]  ;;  %v5268_v57 = vor.u32 %v7047_v0, %v5265_v1  ;;  %v7023_v48 = vld [vmem:[#allocation8 + $0x294] sm:$0xf] }
 0x21d   :  { %v6703_v12 = vld [vmem:[#allocation8 + $0xe90] sm:$0xf]  ;;  %v6448_v20 = vor.u32 %v7347_v7, %v6447_v5  ;;  %4193 = vmatpush.bf16.msrb.mxu1 %v6160_v10  ;;  %v5844_v5 = vor.u32 %v7191_v52, %v5841_v54  ;;  %v7119_v7 = vld [vmem:[#allocation8 + $0x594] sm:$0xf] }
 0x21e   :  { %v7411_v13 = vld [vmem:[#allocation8 + $0xeac] sm:$0xf0]  ;;  %v4977_v10 = vld [vmem:[#allocation8 + $0x130] sm:$0xf0] }
 0x21f   :  { %v5871_v14 = vld [vmem:[#allocation8 + $0x810] sm:$0xf]  ;;  %v6704_v25 = vor.u32 %v7411_v13, %v6703_v12  ;;  %4205 = vmatpush.bf16.msrb.mxu2 %v6448_v20  ;;  %v7183_v12 = vld [vmem:[#allocation8 + $0x794] sm:$0xf] }
 0x220   :  { %v7203_v15 = vld [vmem:[#allocation8 + $0x82c] sm:$0xf0]  ;;  %v5809_v13 = vld [vmem:[#allocation8 + $0x7b0] sm:$0xf0] }
 0x221   :  { %v6127_v16 = vld [vmem:[#allocation8 + $0xa10] sm:$0xf]  ;;  %v5872_v30 = vor.u32 %v7203_v15, %v5871_v14  ;;  %4218 = vmatpush.bf16.msrb.mxu3 %v6704_v25  ;;  %v6975_v14 = vld [vmem:[#allocation8 + $0x114] sm:$0xf]  ;;  %v3924_v15 = vadd.f32 %v7759_v35, %v1132_v60  ;;  %v5812_v21 = vor.u32 %v7183_v12, %v5809_v13  ;;  %v3990_v12 = vpop.f32.mrf.mxu1 }
 0x222   :  { %v7267_v19 = vld [vmem:[#allocation8 + $0xa2c] sm:$0xf0]  ;;  %v5233_v20 = vld [vmem:[#allocation8 + $0x330] sm:$0xf0]  ;;  %v4980_v25 = vor.u32 %v6975_v14, %v4977_v10 }
 0x223   :  { %v6415_v27 = vld [vmem:[#allocation8 + $0xc50] sm:$0xf]  ;;  %v6128_v32 = vor.u32 %v7267_v19, %v6127_v16  ;;  %4181 = vmatpush.bf16.msrb.mxu0 %v5872_v30  ;;  %v5556_v16 = vor.u32 %v7119_v7, %v5553_v8  ;;  %v7039_v19 = vld [vmem:[#allocation8 + $0x314] sm:$0xf] }
 0x224   :  { %v7339_v28 = vld [vmem:[#allocation8 + $0xc6c] sm:$0xf0]  ;;  %v6967_v35 = vld [vmem:[#allocation8 + $0xd4] sm:$0xf] }
 0x225   :  { %v6671_v53 = vld [vmem:[#allocation8 + $0xe50] sm:$0xf]  ;;  %v6416_v38 = vor.u32 %v7339_v28, %v6415_v27  ;;  %4194 = vmatpush.bf16.msrb.mxu1 %v6128_v32  ;;  %v5777_v27 = vld [vmem:[#allocation8 + $0x770] sm:$0xf0]  ;;  %v5236_v28 = vor.u32 %v7039_v19, %v5233_v20 }
 0x226   :  { %v7403_v31 = vld [vmem:[#allocation8 + $0xe6c] sm:$0xf0]  ;;  %4182 = vmatmul.bf16.vlgmr.msrb.gmra.mxu0 %v7699_v6  ;;  %v4945_v30 = vld [vmem:[#allocation8 + $0xf0] sm:$0xf0] }
 0x227   :  { %v6672_v50 = vor.u32 %v7403_v31, %v6671_v53  ;;  %v6383_v42 = vld [vmem:[#allocation8 + $0xc10] sm:$0xf]  ;;  %4226 = vmatpush.bf16.msra.mxu0 %v5076_v33  ;;  %4206 = vmatpush.bf16.msrb.mxu2 %v6416_v38  ;;  %v3937_v53 = vadd.f32 %v7761_v39, %v3924_v15  ;;  %v5524_v31 = vor.u32 %v7111_v23, %v5521_v18  ;;  %v7031_v32 = vld [vmem:[#allocation8 + $0x2d4] sm:$0xf] }
 0x228   :  { %v7331_v45 = vld [vmem:[#allocation8 + $0xc2c] sm:$0xf0]  ;;  %4195 = vmatmul.bf16.vlgmr.msrb.gmra.mxu1 %v7702_v9  ;;  %v5201_v33 = vld [vmem:[#allocation8 + $0x2f0] sm:$0xf0] }
 0x229   :  { %v6639_v46 = vld [vmem:[#allocation8 + $0xe10] sm:$0xf]  ;;  %4239 = vmatpush.bf16.msra.mxu1 %v5332_v36  ;;  %v6384_v56 = vor.u32 %v7331_v45, %v6383_v42  ;;  %4219 = vmatpush.bf16.msrb.mxu3 %v6672_v50  ;;  %v5780_v36 = vor.u32 %v7175_v26, %v5777_v27  ;;  %v7103_v38 = vld [vmem:[#allocation8 + $0x514] sm:$0xf]  ;;  %v3950_v40 = vadd.f32 %v7763_v24, %v3937_v53  ;;  %v4001_v26 = vpop.f32.mrf.mxu2 }
 0x22a   :  { %v7395_v47 = vld [vmem:[#allocation8 + $0xe2c] sm:$0xf0]  ;;  %v4948_v50 = vor.u32 %v6967_v35, %v4945_v30  ;;  %v7167_v42 = vld [vmem:[#allocation8 + $0x714] sm:$0xf]  ;;  %v5492_v58 = vor.u32 %v7103_v38, %v5489_v2 }
 0x22b   :  { %v6640_v62 = vor.u32 %v7395_v47, %v6639_v46  ;;  %4227 = vmatpush.bf16.msra.mxu0 %v5044_v51  ;;  %4207 = vmatpush.bf16.msrb.mxu2 %v6384_v56  ;;  %v5745_v45 = vld [vmem:[#allocation8 + $0x730] sm:$0xf0]  ;;  %v5204_v46 = vor.u32 %v7031_v32, %v5201_v33  ;;  %v3963_v56 = vadd.f32 %v7765_v29, %v3950_v40 }
 0x22c   :  { %v6959_v47 = vld [vmem:[#allocation8 + $0x94] sm:$0xf]  ;;  %v5748_v52 = vor.u32 %v7167_v42, %v5745_v45 }
 0x22d   :  { %4240 = vmatpush.bf16.msra.mxu1 %v5300_v55  ;;  %4220 = vmatpush.bf16.msrb.mxu3 %v6640_v62  ;;  %v4913_v39 = vld [vmem:[#allocation8 + $0xb0] sm:$0xf0] }
 0x22e   :  { %4208 = vmatmul.bf16.vlgmr.msrb.gmra.mxu2 %v7706_v41  ;;  %v5169_v51 = vld [vmem:[#allocation8 + $0x2b0] sm:$0xf0]  ;;  %v4916_v24 = vor.u32 %v6959_v47, %v4913_v39 }
 0x22f   :  { %4252 = vmatpush.bf16.msra.mxu2 %v5588_v63  ;;  %4228 = vmatpush.bf16.msra.mxu0 %v5012_v11  ;;  %v7095_v54 = vld [vmem:[#allocation8 + $0x4d4] sm:$0xf]  ;;  %v5172_v60 = vor.u32 %v7023_v48, %v5169_v51  ;;  %v3976_v63 = vadd.f32 %v3975_v34, %v3963_v56 }
 0x230   :  { %4221 = vmatmul.bf16.vlgmr.msrb.gmra.mxu3 %v7708_v44  ;;  %v5457_v55 = vld [vmem:[#allocation8 + $0x4f0] sm:$0xf0] }
 0x231   :  { %4265 = vmatpush.bf16.msra.mxu3 %v5844_v5  ;;  %4241 = vmatpush.bf16.msra.mxu1 %v5268_v57  ;;  %v7159_v59 = vld [vmem:[#allocation8 + $0x6d4] sm:$0xf]  ;;  %v5460_v0 = vor.u32 %v7095_v54, %v5457_v55  ;;  %v3977_v5 = vpop.f32.mrf.mxu0  ;;  %v3989_v20 = vadd.f32 %v3988_v37, %v3976_v63  ;;  %v4003_v63 = vpop.f32.mrf.mxu2 }
 0x232   :  { %v5713_v3 = vld [vmem:[#allocation8 + $0x6f0] sm:$0xf0] }
 0x233   :  { %4253 = vmatpush.bf16.msra.mxu2 %v5556_v16  ;;  %4229 = vmatpush.bf16.msra.mxu0 %v4980_v25  ;;  %v4881_v62 = vld [vmem:[#allocation8 + $0x70] sm:$0xf0]  ;;  %v5716_v7 = vor.u32 %v7159_v59, %v5713_v3  ;;  %v4002_v53 = vadd.f32 %v4001_v26, %v3989_v20 }
 0x234   :  { %v7015_v1 = vld [vmem:[#allocation8 + $0x254] sm:$0xf]  ;;  %v4884_v29 = vor.u32 %v6951_v61, %v4881_v62 }
 0x235   :  { %4266 = vmatpush.bf16.msra.mxu3 %v5812_v21  ;;  %4242 = vmatpush.bf16.msra.mxu1 %v5236_v28  ;;  %v5137_v4 = vld [vmem:[#allocation8 + $0x270] sm:$0xf0] }
 0x236   :  { %v7087_v8 = vld [vmem:[#allocation8 + $0x494] sm:$0xf]  ;;  %v5140_v10 = vor.u32 %v7015_v1, %v5137_v4 }
 0x237   :  { %4254 = vmatpush.bf16.msra.mxu2 %v5524_v31  ;;  %4230 = vmatpush.bf16.msra.mxu0 %v4948_v50  ;;  %v5425_v11 = vld [vmem:[#allocation8 + $0x4b0] sm:$0xf0]  ;;  %v4014_v31 = vpop.f32.mrf.mxu3 }
 0x238   :  { %v7151_v13 = vld [vmem:[#allocation8 + $0x694] sm:$0xf]  ;;  %v5428_v21 = vor.u32 %v7087_v8, %v5425_v11  ;;  %v4015_v37 = vadd.f32 %v4014_v31, %v4002_v53 }
 0x239   :  { %4267 = vmatpush.bf16.msra.mxu3 %v5780_v36  ;;  %4243 = vmatpush.bf16.msra.mxu1 %v5204_v46  ;;  %v5681_v57 = vld [vmem:[#allocation8 + $0x6b0] sm:$0xf0] }
 0x23a   :  { %v6943_v14 = vld [vmem:[#allocation8 + $0x14] sm:$0xf]  ;;  %v5684_v27 = vor.u32 %v7151_v13, %v5681_v57 }
 0x23b   :  { %4255 = vmatpush.bf16.msra.mxu2 %v5492_v58  ;;  %4231 = vmatpush.bf16.msra.mxu0 %v4916_v24  ;;  %v4849_v15 = vld [vmem:[#allocation8 + $0x30] sm:$0xf0] }
 0x23c   :  { %v7007_v16 = vld [vmem:[#allocation8 + $0x214] sm:$0xf]  ;;  %v4852_v32 = vor.u32 %v6943_v14, %v4849_v15 }
 0x23d   :  { %4268 = vmatpush.bf16.msra.mxu3 %v5748_v52  ;;  %4244 = vmatpush.bf16.msra.mxu1 %v5172_v60  ;;  %v5105_v19 = vld [vmem:[#allocation8 + $0x230] sm:$0xf0]  ;;  %v4540_v52 = vmax.f32 %v4015_v37, 0.0 }
 0x23e   :  { %v7255_v23 = vld [vmem:[#allocation8 + $0x9d4] sm:$0xf]  ;;  %v5108_v36 = vor.u32 %v7007_v16, %v5105_v19 }
 0x23f   :  { %4256 = vmatpush.bf16.msra.mxu2 %v5460_v0  ;;  %v6097_v18 = vld [vmem:[#allocation8 + $0x9f0] sm:$0xf0]  ;;  %4232 = vmatpush.bf16.msra.mxu0 %v4884_v29  ;;  %4548 = vst [vmem:[#allocation11 + $0x10] sm:$0xff] %v4540_v52 }
 0x240   :  { %v7319_v25 = vld [vmem:[#allocation8 + $0xbd4] sm:$0xf]  ;;  %v6100_v38 = vor.u32 %v7255_v23, %v6097_v18 }
 0x241   :  { %4269 = vmatpush.bf16.msra.mxu3 %v5716_v7  ;;  %v6353_v28 = vld [vmem:[#allocation8 + $0xbf0] sm:$0xf0]  ;;  %4245 = vmatpush.bf16.msra.mxu1 %v5140_v10  ;;  %v4016_v7 = vpop.f32.mrf.mxu3 }
 0x242   :  { %v7079_v35 = vld [vmem:[#allocation8 + $0x454] sm:$0xf]  ;;  %v6356_v50 = vor.u32 %v7319_v25, %v6353_v28 }
 0x243   :  { %v5393_v30 = vld [vmem:[#allocation8 + $0x470] sm:$0xf0]  ;;  %4257 = vmatpush.bf16.msra.mxu2 %v5428_v21  ;;  %4233 = vmatpush.bf16.msra.mxu0 %v4852_v32 }
 0x244   :  { %v7143_v33 = vld [vmem:[#allocation8 + $0x654] sm:$0xf]  ;;  %v5396_v42 = vor.u32 %v7079_v35, %v5393_v30 }
 0x245   :  { %v5649_v34 = vld [vmem:[#allocation8 + $0x670] sm:$0xf0]  ;;  %4270 = vmatpush.bf16.msra.mxu3 %v5684_v27  ;;  %4246 = vmatpush.bf16.msra.mxu1 %v5108_v36 }
 0x246   :  { %v7247_v2 = vld [vmem:[#allocation8 + $0x994] sm:$0xf]  ;;  %v5652_v39 = vor.u32 %v7143_v33, %v5649_v34  ;;  %4234 = vmatmul.bf16.vlgmr.msra.gmra.mxu0 %v7683_v17  ;;  %v7780_v33 = vpop.f32.mrf.mxu0 }
 0x247   :  { %v6065_v40 = vld [vmem:[#allocation8 + $0x9b0] sm:$0xf0]  ;;  %4278 = vmatpush.bf16.msrb.mxu0 %v6100_v38  ;;  %4258 = vmatpush.bf16.msra.mxu2 %v5396_v42 }
 0x248   :  { %v7311_v45 = vld [vmem:[#allocation8 + $0xb94] sm:$0xf]  ;;  %v6068_v56 = vor.u32 %v7247_v2, %v6065_v40  ;;  %4247 = vmatmul.bf16.vlgmr.msra.gmra.mxu1 %v7686_v22  ;;  %v7782_v2 = vpop.f32.mrf.mxu1 }
 0x249   :  { %v6321_v46 = vld [vmem:[#allocation8 + $0xbb0] sm:$0xf0]  ;;  %4291 = vmatpush.bf16.msrb.mxu1 %v6356_v50  ;;  %4271 = vmatpush.bf16.msra.mxu3 %v5652_v39 }
 0x24a   :  { %v7071_v47 = vld [vmem:[#allocation8 + $0x414] sm:$0xf]  ;;  %v6324_v3 = vor.u32 %v7311_v45, %v6321_v46 }
 0x24b   :  { %v5361_v58 = vld [vmem:[#allocation8 + $0x430] sm:$0xf0]  ;;  %4279 = vmatpush.bf16.msrb.mxu0 %v6068_v56 }
 0x24c   :  { %v7135_v48 = vld [vmem:[#allocation8 + $0x614] sm:$0xf]  ;;  %v5364_v60 = vor.u32 %v7071_v47, %v5361_v58 }
 0x24d   :  { %v5617_v51 = vld [vmem:[#allocation8 + $0x630] sm:$0xf0]  ;;  %4292 = vmatpush.bf16.msrb.mxu1 %v6324_v3 }
 0x24e   :  { %v7383_v54 = vld [vmem:[#allocation8 + $0xdd4] sm:$0xf]  ;;  %v5620_v0 = vor.u32 %v7135_v48, %v5617_v51  ;;  %4259 = vmatpush.bf16.msra.mxu2 %v5364_v60  ;;  %v4029_v63 = vpop.f32.mrf.mxu0 }
 0x24f   :  { %v6609_v55 = vld [vmem:[#allocation8 + $0xdf0] sm:$0xf0]  ;;  %v7052_v63 = vld [vmem:[#allocation8 + $0x374] sm:$0xf0] }
 0x250   :  { %v7447_v24 = vld [vmem:[#allocation8 + $0xfd4] sm:$0xf]  ;;  %v6612_v1 = vor.u32 %v7383_v54, %v6609_v55  ;;  %4272 = vmatpush.bf16.msra.mxu3 %v5620_v0 }
 0x251   :  { %v6865_v59 = vld [vmem:[#allocation8 + $0xff0] sm:$0xf0]  ;;  %4260 = vmatmul.bf16.vlgmr.msra.gmra.mxu2 %v7690_v43 }
 0x252   :  { %v7239_v61 = vld [vmem:[#allocation8 + $0x954] sm:$0xf]  ;;  %v6868_v8 = vor.u32 %v7447_v24, %v6865_v59  ;;  %4304 = vmatpush.bf16.msrb.mxu2 %v6612_v1 }
 0x253   :  { %v6033_v62 = vld [vmem:[#allocation8 + $0x970] sm:$0xf0]  ;;  %4273 = vmatmul.bf16.vlgmr.msra.gmra.mxu3 %v7692_v49 }
 0x254   :  { %v7303_v4 = vld [vmem:[#allocation8 + $0xb54] sm:$0xf]  ;;  %v6036_v29 = vor.u32 %v7239_v61, %v6033_v62  ;;  %4317 = vmatpush.bf16.msrb.mxu3 %v6868_v8 }
 0x255   :  { %v6289_v5 = vld [vmem:[#allocation8 + $0xb70] sm:$0xf0] }
 0x256   :  { %v7375_v11 = vld [vmem:[#allocation8 + $0xd94] sm:$0xf]  ;;  %v6292_v14 = vor.u32 %v7303_v4, %v6289_v5  ;;  %4280 = vmatpush.bf16.msrb.mxu0 %v6036_v29  ;;  %v4042_v5 = vpop.f32.mrf.mxu1 }
 0x257   :  { %v6577_v12 = vld [vmem:[#allocation8 + $0xdb0] sm:$0xf0]  ;;  %v7124_v5 = vld [vmem:[#allocation8 + $0x5b4] sm:$0xf0] }
 0x258   :  { %v7439_v13 = vld [vmem:[#allocation8 + $0xf94] sm:$0xf]  ;;  %v6580_v16 = vor.u32 %v7375_v11, %v6577_v12  ;;  %4293 = vmatpush.bf16.msrb.mxu1 %v6292_v14 }
 0x259   :  { %v6833_v57 = vld [vmem:[#allocation8 + $0xfb0] sm:$0xf0] }
 0x25a   :  { %v7231_v10 = vld [vmem:[#allocation8 + $0x914] sm:$0xf]  ;;  %v6836_v21 = vor.u32 %v7439_v13, %v6833_v57  ;;  %4305 = vmatpush.bf16.msrb.mxu2 %v6580_v16  ;;  %v7004_v16 = vld [vmem:[#allocation8 + $0x1f4] sm:$0xf0] }
 0x25b   :  { %v6001_v15 = vld [vmem:[#allocation8 + $0x930] sm:$0xf0] }
 0x25c   :  { %v7295_v19 = vld [vmem:[#allocation8 + $0xb14] sm:$0xf]  ;;  %v6004_v25 = vor.u32 %v7231_v10, %v6001_v15  ;;  %4318 = vmatpush.bf16.msrb.mxu3 %v6836_v21  ;;  %v5079_v15 = vld [vmem:[#allocation8 + $0x1d8] sm:$0xf] }
 0x25d   :  { %v6257_v20 = vld [vmem:[#allocation8 + $0xb30] sm:$0xf0] }
 0x25e   :  { %v7367_v23 = vld [vmem:[#allocation8 + $0xd54] sm:$0xf]  ;;  %v6260_v28 = vor.u32 %v7295_v19, %v6257_v20  ;;  %4281 = vmatpush.bf16.msrb.mxu0 %v6004_v25  ;;  %v5335_v19 = vld [vmem:[#allocation8 + $0x3d8] sm:$0xf]  ;;  %v7784_v20 = vpop.f32.mrf.mxu2 }
 0x25f   :  { %v6545_v18 = vld [vmem:[#allocation8 + $0xd70] sm:$0xf0] }
 0x260   :  { %v7431_v26 = vld [vmem:[#allocation8 + $0xf54] sm:$0xf]  ;;  %v6548_v53 = vor.u32 %v7367_v23, %v6545_v18  ;;  %4294 = vmatpush.bf16.msrb.mxu1 %v6260_v28  ;;  %v7068_v23 = vld [vmem:[#allocation8 + $0x3f4] sm:$0xf0] }
 0x261   :  { %v6801_v27 = vld [vmem:[#allocation8 + $0xf70] sm:$0xf0] }
 0x262   :  { %v7223_v35 = vld [vmem:[#allocation8 + $0x8d4] sm:$0xf]  ;;  %v6804_v34 = vor.u32 %v7431_v26, %v6801_v27  ;;  %4306 = vmatpush.bf16.msrb.mxu2 %v6548_v53  ;;  %v7786_v26 = vpop.f32.mrf.mxu3  ;;  %v5080_v53 = vor.u32 %v7004_v16, %v5079_v15  ;;  %v7044_v15 = vld [vmem:[#allocation8 + $0x334] sm:$0xf0] }
 0x263   :  { %v5969_v30 = vld [vmem:[#allocation8 + $0x8f0] sm:$0xf0] }
 0x264   :  { %v7287_v31 = vld [vmem:[#allocation8 + $0xad4] sm:$0xf]  ;;  %v5972_v40 = vor.u32 %v7223_v35, %v5969_v30  ;;  %4319 = vmatpush.bf16.msrb.mxu3 %v6804_v34 }
 0x265   :  { %v6225_v32 = vld [vmem:[#allocation8 + $0xaf0] sm:$0xf0] }
 0x266   :  { %v7359_v36 = vld [vmem:[#allocation8 + $0xd14] sm:$0xf]  ;;  %v6228_v42 = vor.u32 %v7287_v31, %v6225_v32  ;;  %4282 = vmatpush.bf16.msrb.mxu0 %v5972_v40  ;;  %v5047_v31 = vld [vmem:[#allocation8 + $0x198] sm:$0xf]  ;;  %v5336_v32 = vor.u32 %v7068_v23, %v5335_v19 }
 0x267   :  { %v6513_v38 = vld [vmem:[#allocation8 + $0xd30] sm:$0xf0]  ;;  %v7060_v40 = vld [vmem:[#allocation8 + $0x3b4] sm:$0xf0] }
 0x268   :  { %v7423_v37 = vld [vmem:[#allocation8 + $0xf14] sm:$0xf]  ;;  %v6516_v47 = vor.u32 %v7359_v36, %v6513_v38  ;;  %4295 = vmatpush.bf16.msrb.mxu1 %v6228_v42  ;;  %v6996_v36 = vld [vmem:[#allocation8 + $0x1b4] sm:$0xf0] }
 0x269   :  { %v6769_v50 = vld [vmem:[#allocation8 + $0xf30] sm:$0xf0]  ;;  %v5303_v38 = vld [vmem:[#allocation8 + $0x398] sm:$0xf] }
 0x26a   :  { %v7215_v45 = vld [vmem:[#allocation8 + $0x894] sm:$0xf]  ;;  %v6772_v48 = vor.u32 %v7423_v37, %v6769_v50  ;;  %4307 = vmatpush.bf16.msrb.mxu2 %v6516_v47  ;;  %v5591_v47 = vld [vmem:[#allocation8 + $0x5d8] sm:$0xf] }
 0x26b   :  { %v5937_v46 = vld [vmem:[#allocation8 + $0x8b0] sm:$0xf0]  ;;  %v5527_v19 = vld [vmem:[#allocation8 + $0x558] sm:$0xf] }
 0x26c   :  { %v7279_v39 = vld [vmem:[#allocation8 + $0xa94] sm:$0xf]  ;;  %v5940_v54 = vor.u32 %v7215_v45, %v5937_v46  ;;  %4320 = vmatpush.bf16.msrb.mxu3 %v6772_v48  ;;  %v5847_v48 = vld [vmem:[#allocation8 + $0x7d8] sm:$0xf] }
 0x26d   :  { %v6193_v58 = vld [vmem:[#allocation8 + $0xab0] sm:$0xf0] }
 0x26e   :  { %v7351_v51 = vld [vmem:[#allocation8 + $0xcd4] sm:$0xf]  ;;  %v6196_v24 = vor.u32 %v7279_v39, %v6193_v58  ;;  %4283 = vmatpush.bf16.msrb.mxu0 %v5940_v54  ;;  %v7132_v39 = vld [vmem:[#allocation8 + $0x5f4] sm:$0xf0]  ;;  %v5048_v58 = vor.u32 %v6996_v36, %v5047_v31 }
 0x26f   :  { %v6481_v52 = vld [vmem:[#allocation8 + $0xcf0] sm:$0xf0]  ;;  %v7036_v31 = vld [vmem:[#allocation8 + $0x2f4] sm:$0xf0] }
 0x270   :  { %v7415_v55 = vld [vmem:[#allocation8 + $0xed4] sm:$0xf]  ;;  %v6484_v60 = vor.u32 %v7351_v51, %v6481_v52  ;;  %4296 = vmatpush.bf16.msrb.mxu1 %v6196_v24  ;;  %v7196_v51 = vld [vmem:[#allocation8 + $0x7f4] sm:$0xf0]  ;;  %v5304_v52 = vor.u32 %v7060_v40, %v5303_v38  ;;  %v7788_v24 = vld [vmem:[#allocation10] sm:$0xff] }
 0x271   :  { %v6737_v56 = vld [vmem:[#allocation8 + $0xef0] sm:$0xf0]  ;;  %v5495_v36 = vld [vmem:[#allocation8 + $0x518] sm:$0xf] }
 0x272   :  { %v7207_v59 = vld [vmem:[#allocation8 + $0x854] sm:$0xf]  ;;  %v6740_v0 = vor.u32 %v7415_v55, %v6737_v56  ;;  %4308 = vmatpush.bf16.msrb.mxu2 %v6484_v60  ;;  %v5015_v55 = vld [vmem:[#allocation8 + $0x158] sm:$0xf] }
 0x273   :  { %v5905_v3 = vld [vmem:[#allocation8 + $0x870] sm:$0xf0]  ;;  %v6988_v56 = vld [vmem:[#allocation8 + $0x174] sm:$0xf0] }
 0x274   :  { %v7271_v61 = vld [vmem:[#allocation8 + $0xa54] sm:$0xf]  ;;  %v5908_v7 = vor.u32 %v7207_v59, %v5905_v3  ;;  %4321 = vmatpush.bf16.msrb.mxu3 %v6740_v0  ;;  %v1133_v59 = vperm.slane %v7788_v24, 3  ;;  %v4055_v3 = vpop.f32.mrf.mxu2  ;;  %v4068_v0 = vpop.f32.mrf.mxu3  ;;  %v7108_v38 = vld [vmem:[#allocation8 + $0x534] sm:$0xf0] }
 0x275   :  { %v6161_v62 = vld [vmem:[#allocation8 + $0xa70] sm:$0xf0]  ;;  %v5143_v0 = vld [vmem:[#allocation8 + $0x258] sm:$0xf] }
 0x276   :  { %v7343_v1 = vld [vmem:[#allocation8 + $0xc94] sm:$0xf]  ;;  %v6164_v29 = vor.u32 %v7271_v61, %v6161_v62  ;;  %4284 = vmatpush.bf16.msrb.mxu0 %v5908_v7  ;;  %v5592_v61 = vor.u32 %v7132_v39, %v5591_v47  ;;  %v5271_v62 = vld [vmem:[#allocation8 + $0x358] sm:$0xf]  ;;  %v5016_v7 = vor.u32 %v6988_v56, %v5015_v55  ;;  %v5496_v39 = vor.u32 %v7108_v38, %v5495_v36 }
 0x277   :  { %v6449_v4 = vld [vmem:[#allocation8 + $0xcb0] sm:$0xf0]  ;;  %v4919_v47 = vld [vmem:[#allocation8 + $0x98] sm:$0xf] }
 0x278   :  { %v7407_v8 = vld [vmem:[#allocation8 + $0xe94] sm:$0xf]  ;;  %v6452_v10 = vor.u32 %v7343_v1, %v6449_v4  ;;  %4297 = vmatpush.bf16.msrb.mxu1 %v6164_v29  ;;  %v5848_v1 = vor.u32 %v7196_v51, %v5847_v48  ;;  %v5559_v4 = vld [vmem:[#allocation8 + $0x598] sm:$0xf] }
 0x279   :  { %v6705_v11 = vld [vmem:[#allocation8 + $0xeb0] sm:$0xf0]  ;;  %v4983_v29 = vld [vmem:[#allocation8 + $0x118] sm:$0xf] }
 0x27a   :  { %v7199_v12 = vld [vmem:[#allocation8 + $0x814] sm:$0xf]  ;;  %v6708_v21 = vor.u32 %v7407_v8, %v6705_v11  ;;  %4309 = vmatpush.bf16.msrb.mxu2 %v6452_v10  ;;  %v5815_v8 = vld [vmem:[#allocation8 + $0x798] sm:$0xf] }
 0x27b   :  { %v5873_v13 = vld [vmem:[#allocation8 + $0x830] sm:$0xf0]  ;;  %v7188_v11 = vld [vmem:[#allocation8 + $0x7b4] sm:$0xf0] }
 0x27c   :  { %v7263_v57 = vld [vmem:[#allocation8 + $0xa14] sm:$0xf]  ;;  %v5876_v27 = vor.u32 %v7199_v12, %v5873_v13  ;;  %4322 = vmatpush.bf16.msrb.mxu3 %v6708_v21  ;;  %v5272_v12 = vor.u32 %v7052_v63, %v5271_v62  ;;  %v6980_v13 = vld [vmem:[#allocation8 + $0x134] sm:$0xf0]  ;;  %v5816_v16 = vor.u32 %v7188_v11, %v5815_v8 }
 0x27d   :  { %v6129_v14 = vld [vmem:[#allocation8 + $0xa30] sm:$0xf0]  ;;  %v5239_v10 = vld [vmem:[#allocation8 + $0x318] sm:$0xf]  ;;  %v4984_v23 = vor.u32 %v6980_v13, %v4983_v29 }
 0x27e   :  { %v7335_v18 = vld [vmem:[#allocation8 + $0xc54] sm:$0xf]  ;;  %v6132_v30 = vor.u32 %v7263_v57, %v6129_v14  ;;  %4285 = vmatpush.bf16.msrb.mxu0 %v5876_v27  ;;  %v4028_v57 = vadd.f32 %v7780_v33, %v1133_v59  ;;  %v5560_v14 = vor.u32 %v7124_v5, %v5559_v4  ;;  %v7116_v21 = vld [vmem:[#allocation8 + $0x574] sm:$0xf0]  ;;  %v5240_v27 = vor.u32 %v7044_v15, %v5239_v10 }
 0x27f   :  { %v6417_v25 = vld [vmem:[#allocation8 + $0xc70] sm:$0xf0]  ;;  %v4951_v33 = vld [vmem:[#allocation8 + $0xd8] sm:$0xf] }
 0x280   :  { %v7399_v28 = vld [vmem:[#allocation8 + $0xe54] sm:$0xf]  ;;  %v6420_v34 = vor.u32 %v7335_v18, %v6417_v25  ;;  %4298 = vmatpush.bf16.msrb.mxu1 %v6132_v30  ;;  %v5783_v18 = vld [vmem:[#allocation8 + $0x758] sm:$0xf]  ;;  %v5528_v30 = vor.u32 %v7116_v21, %v5527_v19 }
 0x281   :  { %v6673_v35 = vld [vmem:[#allocation8 + $0xe70] sm:$0xf0]  ;;  %4286 = vmatmul.bf16.vlgmr.msrb.gmra.mxu0 %v7699_v6  ;;  %v7180_v25 = vld [vmem:[#allocation8 + $0x774] sm:$0xf0] }
 0x282   :  { %v6676_v37 = vor.u32 %v7399_v28, %v6673_v35  ;;  %v7327_v50 = vld [vmem:[#allocation8 + $0xc14] sm:$0xf]  ;;  %4330 = vmatpush.bf16.msra.mxu0 %v5080_v53  ;;  %4310 = vmatpush.bf16.msrb.mxu2 %v6420_v34  ;;  %v6972_v28 = vld [vmem:[#allocation8 + $0xf4] sm:$0xf0]  ;;  %v4041_v35 = vadd.f32 %v7782_v2, %v4028_v57  ;;  %v5784_v34 = vor.u32 %v7180_v25, %v5783_v18  ;;  %v4105_v25 = vpop.f32.mrf.mxu2 }
 0x283   :  { %v6385_v42 = vld [vmem:[#allocation8 + $0xc30] sm:$0xf0]  ;;  %4299 = vmatmul.bf16.vlgmr.msrb.gmra.mxu1 %v7702_v9  ;;  %v5207_v53 = vld [vmem:[#allocation8 + $0x2d8] sm:$0xf] }
 0x284   :  { %v7391_v45 = vld [vmem:[#allocation8 + $0xe14] sm:$0xf]  ;;  %4343 = vmatpush.bf16.msra.mxu1 %v5336_v32  ;;  %v6388_v54 = vor.u32 %v7327_v50, %v6385_v42  ;;  %4323 = vmatpush.bf16.msrb.mxu3 %v6676_v37  ;;  %v4079_v32 = vpop.f32.mrf.mxu0  ;;  %v4054_v40 = vadd.f32 %v7784_v20, %v4041_v35  ;;  %v4092_v37 = vpop.f32.mrf.mxu1  ;;  %v4952_v50 = vor.u32 %v6972_v28, %v4951_v33  ;;  %v5751_v42 = vld [vmem:[#allocation8 + $0x718] sm:$0xf] }
 0x285   :  { %v6641_v46 = vld [vmem:[#allocation8 + $0xe30] sm:$0xf0]  ;;  %v6964_v2 = vld [vmem:[#allocation8 + $0xb4] sm:$0xf0] }
 0x286   :  { %v6644_v60 = vor.u32 %v7391_v45, %v6641_v46  ;;  %4331 = vmatpush.bf16.msra.mxu0 %v5048_v58  ;;  %4311 = vmatpush.bf16.msrb.mxu2 %v6388_v54  ;;  %v7172_v45 = vld [vmem:[#allocation8 + $0x734] sm:$0xf0]  ;;  %v5208_v46 = vor.u32 %v7036_v31, %v5207_v53  ;;  %v4067_v55 = vadd.f32 %v7786_v26, %v4054_v40  ;;  %v4118_v53 = vpop.f32.mrf.mxu3 }
 0x287   :  { %v5175_v58 = vld [vmem:[#allocation8 + $0x298] sm:$0xf]  ;;  %v5752_v51 = vor.u32 %v7172_v45, %v5751_v42  ;;  %v4920_v20 = vor.u32 %v6964_v2, %v4919_v47 }
 0x288   :  { %4344 = vmatpush.bf16.msra.mxu1 %v5304_v52  ;;  %4324 = vmatpush.bf16.msrb.mxu3 %v6644_v60  ;;  %v7028_v48 = vld [vmem:[#allocation8 + $0x2b4] sm:$0xf0]  ;;  %v4080_v62 = vadd.f32 %v4079_v32, %v4067_v55 }
 0x289   :  { %4312 = vmatmul.bf16.vlgmr.msrb.gmra.mxu2 %v7706_v41  ;;  %v5463_v52 = vld [vmem:[#allocation8 + $0x4d8] sm:$0xf]  ;;  %v5176_v3 = vor.u32 %v7028_v48, %v5175_v58 }
 0x28a   :  { %4356 = vmatpush.bf16.msra.mxu2 %v5592_v61  ;;  %4332 = vmatpush.bf16.msra.mxu0 %v5016_v7  ;;  %v7100_v54 = vld [vmem:[#allocation8 + $0x4f4] sm:$0xf0] }
 0x28b   :  { %4325 = vmatmul.bf16.vlgmr.msrb.gmra.mxu3 %v7708_v44  ;;  %v5719_v56 = vld [vmem:[#allocation8 + $0x6d8] sm:$0xf]  ;;  %v5464_v63 = vor.u32 %v7100_v54, %v5463_v52 }
 0x28c   :  { %4369 = vmatpush.bf16.msra.mxu3 %v5848_v1  ;;  %4345 = vmatpush.bf16.msra.mxu1 %v5272_v12  ;;  %v7164_v59 = vld [vmem:[#allocation8 + $0x6f4] sm:$0xf0]  ;;  %v4081_v4 = vpop.f32.mrf.mxu0  ;;  %v4094_v11 = vpop.f32.mrf.mxu1 }
 0x28d   :  { %v4887_v60 = vld [vmem:[#allocation8 + $0x58] sm:$0xf]  ;;  %v5720_v5 = vor.u32 %v7164_v59, %v5719_v56 }
 0x28e   :  { %4357 = vmatpush.bf16.msra.mxu2 %v5560_v14  ;;  %4333 = vmatpush.bf16.msra.mxu0 %v4984_v23  ;;  %v6956_v61 = vld [vmem:[#allocation8 + $0x74] sm:$0xf0] }
 0x28f   :  { %v7020_v1 = vld [vmem:[#allocation8 + $0x274] sm:$0xf0]  ;;  %v4888_v26 = vor.u32 %v6956_v61, %v4887_v60 }
 0x290   :  { %4370 = vmatpush.bf16.msra.mxu3 %v5816_v16  ;;  %4346 = vmatpush.bf16.msra.mxu1 %v5240_v27  ;;  %v5431_v7 = vld [vmem:[#allocation8 + $0x498] sm:$0xf]  ;;  %v5144_v57 = vor.u32 %v7020_v1, %v5143_v0  ;;  %v4093_v16 = vadd.f32 %v4092_v37, %v4080_v62 }
 0x291   :  { %v7092_v8 = vld [vmem:[#allocation8 + $0x4b4] sm:$0xf0] }
 0x292   :  { %4358 = vmatpush.bf16.msra.mxu2 %v5528_v30  ;;  %4334 = vmatpush.bf16.msra.mxu0 %v4952_v50  ;;  %v5687_v12 = vld [vmem:[#allocation8 + $0x698] sm:$0xf]  ;;  %v5432_v19 = vor.u32 %v7092_v8, %v5431_v7  ;;  %v4106_v30 = vadd.f32 %v4105_v25, %v4093_v16  ;;  %v4120_v7 = vpop.f32.mrf.mxu3 }
 0x293   :  { %v7156_v29 = vld [vmem:[#allocation8 + $0x6b4] sm:$0xf0] }
 0x294   :  { %4371 = vmatpush.bf16.msra.mxu3 %v5784_v34  ;;  %4347 = vmatpush.bf16.msra.mxu1 %v5208_v46  ;;  %v4855_v13 = vld [vmem:[#allocation8 + $0x18] sm:$0xf]  ;;  %v5688_v27 = vor.u32 %v7156_v29, %v5687_v12  ;;  %v4119_v50 = vadd.f32 %v4118_v53, %v4106_v30 }
 0x295   :  { %v6948_v14 = vld [vmem:[#allocation8 + $0x34] sm:$0xf0] }
 0x296   :  { %4359 = vmatpush.bf16.msra.mxu2 %v5496_v39  ;;  %4335 = vmatpush.bf16.msra.mxu0 %v4920_v20  ;;  %v5111_v10 = vld [vmem:[#allocation8 + $0x218] sm:$0xf]  ;;  %v4856_v31 = vor.u32 %v6948_v14, %v4855_v13  ;;  %v4541_v52 = vmax.f32 %v4119_v50, 0.0 }
 0x297   :  { %v7012_v15 = vld [vmem:[#allocation8 + $0x234] sm:$0xf0] }
 0x298   :  { %4372 = vmatpush.bf16.msra.mxu3 %v5752_v51  ;;  %4348 = vmatpush.bf16.msra.mxu1 %v5176_v3  ;;  %v6103_v21 = vld [vmem:[#allocation8 + $0x9d8] sm:$0xf]  ;;  %v5112_v36 = vor.u32 %v7012_v15, %v5111_v10  ;;  %4549 = vst [vmem:[#allocation11 + $0x18] sm:$0xff] %v4541_v52 }
 0x299   :  { %v7260_v23 = vld [vmem:[#allocation8 + $0x9f4] sm:$0xf0] }
 0x29a   :  { %4360 = vmatpush.bf16.msra.mxu2 %v5464_v63  ;;  %v6359_v18 = vld [vmem:[#allocation8 + $0xbd8] sm:$0xf]  ;;  %4336 = vmatpush.bf16.msra.mxu0 %v4888_v26  ;;  %v6104_v38 = vor.u32 %v7260_v23, %v6103_v21  ;;  %v4107_v63 = vpop.f32.mrf.mxu2 }
 0x29b   :  { %v7324_v33 = vld [vmem:[#allocation8 + $0xbf4] sm:$0xf0] }
 0x29c   :  { %4373 = vmatpush.bf16.msra.mxu3 %v5720_v5  ;;  %v5399_v28 = vld [vmem:[#allocation8 + $0x458] sm:$0xf]  ;;  %4349 = vmatpush.bf16.msra.mxu1 %v5144_v57  ;;  %v6360_v42 = vor.u32 %v7324_v33, %v6359_v18 }
 0x29d   :  { %v7084_v35 = vld [vmem:[#allocation8 + $0x474] sm:$0xf0] }
 0x29e   :  { %v5655_v32 = vld [vmem:[#allocation8 + $0x658] sm:$0xf]  ;;  %4361 = vmatpush.bf16.msra.mxu2 %v5432_v19  ;;  %v5400_v45 = vor.u32 %v7084_v35, %v5399_v28  ;;  %4337 = vmatpush.bf16.msra.mxu0 %v4856_v31 }
 0x29f   :  { %v7148_v34 = vld [vmem:[#allocation8 + $0x674] sm:$0xf0] }
 0x2a0   :  { %v6071_v40 = vld [vmem:[#allocation8 + $0x998] sm:$0xf]  ;;  %4374 = vmatpush.bf16.msra.mxu3 %v5688_v27  ;;  %v5656_v39 = vor.u32 %v7148_v34, %v5655_v32  ;;  %4350 = vmatpush.bf16.msra.mxu1 %v5112_v36  ;;  %v7803_v34 = vpop.f32.mrf.mxu0 }
 0x2a1   :  { %v7252_v37 = vld [vmem:[#allocation8 + $0x9b4] sm:$0xf0]  ;;  %4338 = vmatmul.bf16.vlgmr.msra.gmra.mxu0 %v7683_v17 }
 0x2a2   :  { %v6327_v46 = vld [vmem:[#allocation8 + $0xb98] sm:$0xf]  ;;  %4382 = vmatpush.bf16.msrb.mxu0 %v6104_v38  ;;  %v6072_v20 = vor.u32 %v7252_v37, %v6071_v40  ;;  %4362 = vmatpush.bf16.msra.mxu2 %v5400_v45  ;;  %v7805_v37 = vpop.f32.mrf.mxu1 }
 0x2a3   :  { %v7316_v47 = vld [vmem:[#allocation8 + $0xbb4] sm:$0xf0]  ;;  %4351 = vmatmul.bf16.vlgmr.msra.gmra.mxu1 %v7686_v22 }
 0x2a4   :  { %v5367_v2 = vld [vmem:[#allocation8 + $0x418] sm:$0xf]  ;;  %4395 = vmatpush.bf16.msrb.mxu1 %v6360_v42  ;;  %v6328_v3 = vor.u32 %v7316_v47, %v6327_v46  ;;  %4375 = vmatpush.bf16.msra.mxu3 %v5656_v39 }
 0x2a5   :  { %v7076_v58 = vld [vmem:[#allocation8 + $0x434] sm:$0xf0] }
 0x2a6   :  { %v5623_v48 = vld [vmem:[#allocation8 + $0x618] sm:$0xf]  ;;  %v5368_v60 = vor.u32 %v7076_v58, %v5367_v2  ;;  %4383 = vmatpush.bf16.msrb.mxu0 %v6072_v20 }
 0x2a7   :  { %v7140_v51 = vld [vmem:[#allocation8 + $0x634] sm:$0xf0] }
 0x2a8   :  { %v6615_v54 = vld [vmem:[#allocation8 + $0xdd8] sm:$0xf]  ;;  %v5624_v0 = vor.u32 %v7140_v51, %v5623_v48  ;;  %4396 = vmatpush.bf16.msrb.mxu1 %v6328_v3  ;;  %4363 = vmatpush.bf16.msra.mxu2 %v5368_v60 }
 0x2a9   :  { %v7388_v55 = vld [vmem:[#allocation8 + $0xdf4] sm:$0xf0] }
 0x2aa   :  { %v6871_v56 = vld [vmem:[#allocation8 + $0xfd8] sm:$0xf]  ;;  %v6616_v1 = vor.u32 %v7388_v55, %v6615_v54  ;;  %4376 = vmatpush.bf16.msra.mxu3 %v5624_v0  ;;  %v4133_v0 = vpop.f32.mrf.mxu0  ;;  %v4146_v7 = vpop.f32.mrf.mxu1 }
 0x2ab   :  { %v7452_v59 = vld [vmem:[#allocation8 + $0xff4] sm:$0xf0]  ;;  %4364 = vmatmul.bf16.vlgmr.msra.gmra.mxu2 %v7690_v43  ;;  %v5273_v0 = vld [vmem:[#allocation8 + $0x378] sm:$0xf0] }
 0x2ac   :  { %v6039_v61 = vld [vmem:[#allocation8 + $0x958] sm:$0xf]  ;;  %v6872_v8 = vor.u32 %v7452_v59, %v6871_v56  ;;  %4408 = vmatpush.bf16.msrb.mxu2 %v6616_v1  ;;  %v5561_v7 = vld [vmem:[#allocation8 + $0x5b8] sm:$0xf0] }
 0x2ad   :  { %v7244_v62 = vld [vmem:[#allocation8 + $0x974] sm:$0xf0]  ;;  %4377 = vmatmul.bf16.vlgmr.msra.gmra.mxu3 %v7692_v49 }
 0x2ae   :  { %v6295_v4 = vld [vmem:[#allocation8 + $0xb58] sm:$0xf]  ;;  %v6040_v12 = vor.u32 %v7244_v62, %v6039_v61  ;;  %4421 = vmatpush.bf16.msrb.mxu3 %v6872_v8 }
 0x2af   :  { %v7308_v5 = vld [vmem:[#allocation8 + $0xb74] sm:$0xf0] }
 0x2b0   :  { %v6583_v11 = vld [vmem:[#allocation8 + $0xd98] sm:$0xf]  ;;  %v6296_v57 = vor.u32 %v7308_v5, %v6295_v4  ;;  %4384 = vmatpush.bf16.msrb.mxu0 %v6040_v12 }
 0x2b1   :  { %v7380_v26 = vld [vmem:[#allocation8 + $0xdb4] sm:$0xf0] }
 0x2b2   :  { %v6839_v29 = vld [vmem:[#allocation8 + $0xf98] sm:$0xf]  ;;  %v6584_v15 = vor.u32 %v7380_v26, %v6583_v11  ;;  %4397 = vmatpush.bf16.msrb.mxu1 %v6296_v57 }
 0x2b3   :  { %v7444_v13 = vld [vmem:[#allocation8 + $0xfb4] sm:$0xf0] }
 0x2b4   :  { %v6007_v14 = vld [vmem:[#allocation8 + $0x918] sm:$0xf]  ;;  %v6840_v21 = vor.u32 %v7444_v13, %v6839_v29  ;;  %4409 = vmatpush.bf16.msrb.mxu2 %v6584_v15  ;;  %v7000_v15 = vld [vmem:[#allocation8 + $0x1dc] sm:$0xf] }
 0x2b5   :  { %v7236_v10 = vld [vmem:[#allocation8 + $0x934] sm:$0xf0] }
 0x2b6   :  { %v6263_v16 = vld [vmem:[#allocation8 + $0xb18] sm:$0xf]  ;;  %v6008_v25 = vor.u32 %v7236_v10, %v6007_v14  ;;  %4422 = vmatpush.bf16.msrb.mxu3 %v6840_v21  ;;  %v7807_v21 = vpop.f32.mrf.mxu2 }
 0x2b7   :  { %v7300_v19 = vld [vmem:[#allocation8 + $0xb34] sm:$0xf0] }
 0x2b8   :  { %v6551_v23 = vld [vmem:[#allocation8 + $0xd58] sm:$0xf]  ;;  %v6264_v28 = vor.u32 %v7300_v19, %v6263_v16  ;;  %4385 = vmatpush.bf16.msrb.mxu0 %v6008_v25  ;;  %v5081_v16 = vld [vmem:[#allocation8 + $0x1f8] sm:$0xf0] }
 0x2b9   :  { %v7372_v18 = vld [vmem:[#allocation8 + $0xd74] sm:$0xf0]  ;;  %v7064_v19 = vld [vmem:[#allocation8 + $0x3dc] sm:$0xf] }
 0x2ba   :  { %v6807_v27 = vld [vmem:[#allocation8 + $0xf58] sm:$0xf]  ;;  %v6552_v53 = vor.u32 %v7372_v18, %v6551_v23  ;;  %4398 = vmatpush.bf16.msrb.mxu1 %v6264_v28  ;;  %v5337_v18 = vld [vmem:[#allocation8 + $0x3f8] sm:$0xf0] }
 0x2bb   :  { %v7436_v33 = vld [vmem:[#allocation8 + $0xf74] sm:$0xf0] }
 0x2bc   :  { %v5975_v35 = vld [vmem:[#allocation8 + $0x8d8] sm:$0xf]  ;;  %v6808_v36 = vor.u32 %v7436_v33, %v6807_v27  ;;  %4410 = vmatpush.bf16.msrb.mxu2 %v6552_v53  ;;  %v7809_v33 = vpop.f32.mrf.mxu3 }
 0x2bd   :  { %v7228_v30 = vld [vmem:[#allocation8 + $0x8f4] sm:$0xf0] }
 0x2be   :  { %v6231_v31 = vld [vmem:[#allocation8 + $0xad8] sm:$0xf]  ;;  %v5976_v50 = vor.u32 %v7228_v30, %v5975_v35  ;;  %4423 = vmatpush.bf16.msrb.mxu3 %v6808_v36  ;;  %v5340_v36 = vor.u32 %v7064_v19, %v5337_v18  ;;  %v5529_v19 = vld [vmem:[#allocation8 + $0x578] sm:$0xf0] }
 0x2bf   :  { %v7292_v32 = vld [vmem:[#allocation8 + $0xaf4] sm:$0xf0]  ;;  %v7176_v18 = vld [vmem:[#allocation8 + $0x75c] sm:$0xf] }
 0x2c0   :  { %v6519_v38 = vld [vmem:[#allocation8 + $0xd18] sm:$0xf]  ;;  %v6232_v46 = vor.u32 %v7292_v32, %v6231_v31  ;;  %4386 = vmatpush.bf16.msrb.mxu0 %v5976_v50  ;;  %v5084_v31 = vor.u32 %v7000_v15, %v5081_v16  ;;  %v6992_v32 = vld [vmem:[#allocation8 + $0x19c] sm:$0xf] }
 0x2c1   :  { %v7364_v40 = vld [vmem:[#allocation8 + $0xd34] sm:$0xf0]  ;;  %v7056_v50 = vld [vmem:[#allocation8 + $0x39c] sm:$0xf] }
 0x2c2   :  { %v6775_v42 = vld [vmem:[#allocation8 + $0xf18] sm:$0xf]  ;;  %v6520_v39 = vor.u32 %v7364_v40, %v6519_v38  ;;  %4399 = vmatpush.bf16.msrb.mxu1 %v6232_v46  ;;  %v5049_v40 = vld [vmem:[#allocation8 + $0x1b8] sm:$0xf0] }
 0x2c3   :  { %v7428_v45 = vld [vmem:[#allocation8 + $0xf34] sm:$0xf0]  ;;  %v7112_v16 = vld [vmem:[#allocation8 + $0x55c] sm:$0xf] }
 0x2c4   :  { %v5943_v47 = vld [vmem:[#allocation8 + $0x898] sm:$0xf]  ;;  %v6776_v51 = vor.u32 %v7428_v45, %v6775_v42  ;;  %4411 = vmatpush.bf16.msrb.mxu2 %v6520_v39  ;;  %v5305_v42 = vld [vmem:[#allocation8 + $0x3b8] sm:$0xf0] }
 0x2c5   :  { %v7220_v2 = vld [vmem:[#allocation8 + $0x8b4] sm:$0xf0] }
 0x2c6   :  { %v6199_v58 = vld [vmem:[#allocation8 + $0xa98] sm:$0xf]  ;;  %v5944_v55 = vor.u32 %v7220_v2, %v5943_v47  ;;  %4424 = vmatpush.bf16.msrb.mxu3 %v6776_v51  ;;  %v5052_v51 = vor.u32 %v6992_v32, %v5049_v40  ;;  %v4183_v32 = vpop.f32.mrf.mxu0  ;;  %v5497_v40 = vld [vmem:[#allocation8 + $0x538] sm:$0xf0] }
 0x2c7   :  { %v7284_v48 = vld [vmem:[#allocation8 + $0xab4] sm:$0xf0] }
 0x2c8   :  { %v6487_v52 = vld [vmem:[#allocation8 + $0xcd8] sm:$0xf]  ;;  %v6200_v59 = vor.u32 %v7284_v48, %v6199_v58  ;;  %4387 = vmatpush.bf16.msrb.mxu0 %v5944_v55  ;;  %v7128_v58 = vld [vmem:[#allocation8 + $0x5dc] sm:$0xf]  ;;  %v5308_v55 = vor.u32 %v7056_v50, %v5305_v42  ;;  %v4196_v42 = vpop.f32.mrf.mxu1 }
 0x2c9   :  { %v7356_v54 = vld [vmem:[#allocation8 + $0xcf4] sm:$0xf0]  ;;  %v5593_v48 = vld [vmem:[#allocation8 + $0x5f8] sm:$0xf0] }
 0x2ca   :  { %v6743_v20 = vld [vmem:[#allocation8 + $0xed8] sm:$0xf]  ;;  %v6488_v61 = vor.u32 %v7356_v54, %v6487_v52  ;;  %4400 = vmatpush.bf16.msrb.mxu1 %v6200_v59  ;;  %v7192_v52 = vld [vmem:[#allocation8 + $0x7dc] sm:$0xf] }
 0x2cb   :  { %v7420_v56 = vld [vmem:[#allocation8 + $0xef4] sm:$0xf0]  ;;  %v5849_v54 = vld [vmem:[#allocation8 + $0x7f8] sm:$0xf0] }
 0x2cc   :  { %v5911_v3 = vld [vmem:[#allocation8 + $0x858] sm:$0xf]  ;;  %v6744_v1 = vor.u32 %v7420_v56, %v6743_v20  ;;  %4412 = vmatpush.bf16.msrb.mxu2 %v6488_v61  ;;  %v6984_v56 = vld [vmem:[#allocation8 + $0x15c] sm:$0xf] }
 0x2cd   :  { %v7212_v60 = vld [vmem:[#allocation8 + $0x874] sm:$0xf0]  ;;  %v5017_v59 = vld [vmem:[#allocation8 + $0x178] sm:$0xf0] }
 0x2ce   :  { %v6167_v62 = vld [vmem:[#allocation8 + $0xa58] sm:$0xf]  ;;  %v5912_v8 = vor.u32 %v7212_v60, %v5911_v3  ;;  %4425 = vmatpush.bf16.msrb.mxu3 %v6744_v1  ;;  %v1134_v3 = vperm.slane %v7788_v24, 4  ;;  %v4159_v60 = vpop.f32.mrf.mxu2  ;;  %v4172_v1 = vpop.f32.mrf.mxu3 }
 0x2cf   :  { %v7276_v63 = vld [vmem:[#allocation8 + $0xa74] sm:$0xf0]  ;;  %v6952_v60 = vld [vmem:[#allocation8 + $0x5c] sm:$0xf] }
 0x2d0   :  { %v6455_v4 = vld [vmem:[#allocation8 + $0xc98] sm:$0xf]  ;;  %v6168_v29 = vor.u32 %v7276_v63, %v6167_v62  ;;  %4388 = vmatpush.bf16.msrb.mxu0 %v5912_v8  ;;  %v5596_v62 = vor.u32 %v7128_v58, %v5593_v48  ;;  %v7048_v63 = vld [vmem:[#allocation8 + $0x35c] sm:$0xf]  ;;  %v5020_v8 = vor.u32 %v6984_v56, %v5017_v59 }
 0x2d1   :  { %v7348_v5 = vld [vmem:[#allocation8 + $0xcb4] sm:$0xf0]  ;;  %v5276_v24 = vor.u32 %v7048_v63, %v5273_v0  ;;  %v7024_v48 = vld [vmem:[#allocation8 + $0x29c] sm:$0xf] }
 0x2d2   :  { %v6711_v11 = vld [vmem:[#allocation8 + $0xe98] sm:$0xf]  ;;  %v6456_v10 = vor.u32 %v7348_v5, %v6455_v4  ;;  %4401 = vmatpush.bf16.msrb.mxu1 %v6168_v29  ;;  %v5852_v4 = vor.u32 %v7192_v52, %v5849_v54  ;;  %v7120_v5 = vld [vmem:[#allocation8 + $0x59c] sm:$0xf] }
 0x2d3   :  { %v7412_v26 = vld [vmem:[#allocation8 + $0xeb4] sm:$0xf0]  ;;  %v4985_v29 = vld [vmem:[#allocation8 + $0x138] sm:$0xf0] }
 0x2d4   :  { %v5879_v12 = vld [vmem:[#allocation8 + $0x818] sm:$0xf]  ;;  %v6712_v23 = vor.u32 %v7412_v26, %v6711_v11  ;;  %4413 = vmatpush.bf16.msrb.mxu2 %v6456_v10  ;;  %v7184_v11 = vld [vmem:[#allocation8 + $0x79c] sm:$0xf] }
 0x2d5   :  { %v7204_v13 = vld [vmem:[#allocation8 + $0x834] sm:$0xf0]  ;;  %v5817_v26 = vld [vmem:[#allocation8 + $0x7b8] sm:$0xf0] }
 0x2d6   :  { %v6135_v57 = vld [vmem:[#allocation8 + $0xa18] sm:$0xf]  ;;  %v5880_v28 = vor.u32 %v7204_v13, %v5879_v12  ;;  %4426 = vmatpush.bf16.msrb.mxu3 %v6712_v23  ;;  %v6976_v12 = vld [vmem:[#allocation8 + $0x11c] sm:$0xf]  ;;  %v4132_v13 = vadd.f32 %v7803_v34, %v1134_v3  ;;  %v5820_v15 = vor.u32 %v7184_v11, %v5817_v26  ;;  %v4198_v11 = vpop.f32.mrf.mxu1 }
 0x2d7   :  { %v7268_v14 = vld [vmem:[#allocation8 + $0xa34] sm:$0xf0]  ;;  %v5241_v10 = vld [vmem:[#allocation8 + $0x338] sm:$0xf0]  ;;  %v4988_v23 = vor.u32 %v6976_v12, %v4985_v29 }
 0x2d8   :  { %v6423_v25 = vld [vmem:[#allocation8 + $0xc58] sm:$0xf]  ;;  %v6136_v53 = vor.u32 %v7268_v14, %v6135_v57  ;;  %4389 = vmatpush.bf16.msrb.mxu0 %v5880_v28  ;;  %v5564_v57 = vor.u32 %v7120_v5, %v5561_v7  ;;  %v7040_v14 = vld [vmem:[#allocation8 + $0x31c] sm:$0xf] }
 0x2d9   :  { %v7340_v27 = vld [vmem:[#allocation8 + $0xc74] sm:$0xf0]  ;;  %v6968_v34 = vld [vmem:[#allocation8 + $0xdc] sm:$0xf] }
 0x2da   :  { %v6679_v35 = vld [vmem:[#allocation8 + $0xe58] sm:$0xf]  ;;  %v6424_v38 = vor.u32 %v7340_v27, %v6423_v25  ;;  %4402 = vmatpush.bf16.msrb.mxu1 %v6136_v53  ;;  %v5785_v25 = vld [vmem:[#allocation8 + $0x778] sm:$0xf0]  ;;  %v5244_v27 = vor.u32 %v7040_v14, %v5241_v10 }
 0x2db   :  { %v7404_v30 = vld [vmem:[#allocation8 + $0xe74] sm:$0xf0]  ;;  %4390 = vmatmul.bf16.vlgmr.msrb.gmra.mxu0 %v7699_v6  ;;  %v4953_v28 = vld [vmem:[#allocation8 + $0xf8] sm:$0xf0] }
 0x2dc   :  { %v6680_v45 = vor.u32 %v7404_v30, %v6679_v35  ;;  %v6391_v46 = vld [vmem:[#allocation8 + $0xc18] sm:$0xf]  ;;  %4434 = vmatpush.bf16.msra.mxu0 %v5084_v31  ;;  %4414 = vmatpush.bf16.msrb.mxu2 %v6424_v38  ;;  %v4145_v35 = vadd.f32 %v7805_v37, %v4132_v13  ;;  %v5532_v30 = vor.u32 %v7112_v16, %v5529_v19  ;;  %v7032_v53 = vld [vmem:[#allocation8 + $0x2dc] sm:$0xf] }
 0x2dd   :  { %v7332_v47 = vld [vmem:[#allocation8 + $0xc34] sm:$0xf0]  ;;  %4403 = vmatmul.bf16.vlgmr.msrb.gmra.mxu1 %v7702_v9  ;;  %v5209_v31 = vld [vmem:[#allocation8 + $0x2f8] sm:$0xf0] }
 0x2de   :  { %v6647_v2 = vld [vmem:[#allocation8 + $0xe18] sm:$0xf]  ;;  %4447 = vmatpush.bf16.msra.mxu1 %v5340_v36  ;;  %v6392_v20 = vor.u32 %v7332_v47, %v6391_v46  ;;  %4427 = vmatpush.bf16.msrb.mxu3 %v6680_v45  ;;  %v5788_v36 = vor.u32 %v7176_v18, %v5785_v25  ;;  %v7104_v38 = vld [vmem:[#allocation8 + $0x51c] sm:$0xf]  ;;  %v4158_v50 = vadd.f32 %v7807_v21, %v4145_v35  ;;  %v4209_v18 = vpop.f32.mrf.mxu2 }
 0x2df   :  { %v7396_v39 = vld [vmem:[#allocation8 + $0xe34] sm:$0xf0]  ;;  %v4956_v45 = vor.u32 %v6968_v34, %v4953_v28  ;;  %v7168_v46 = vld [vmem:[#allocation8 + $0x71c] sm:$0xf]  ;;  %v5500_v58 = vor.u32 %v7104_v38, %v5497_v40 }
 0x2e0   :  { %v6648_v61 = vor.u32 %v7396_v39, %v6647_v2  ;;  %4435 = vmatpush.bf16.msra.mxu0 %v5052_v51  ;;  %4415 = vmatpush.bf16.msrb.mxu2 %v6392_v20  ;;  %v5753_v47 = vld [vmem:[#allocation8 + $0x738] sm:$0xf0]  ;;  %v5212_v2 = vor.u32 %v7032_v53, %v5209_v31  ;;  %v4171_v20 = vadd.f32 %v7809_v33, %v4158_v50 }
 0x2e1   :  { %v6960_v39 = vld [vmem:[#allocation8 + $0x9c] sm:$0xf]  ;;  %v5756_v52 = vor.u32 %v7168_v46, %v5753_v47 }
 0x2e2   :  { %4448 = vmatpush.bf16.msra.mxu1 %v5308_v55  ;;  %4428 = vmatpush.bf16.msrb.mxu3 %v6648_v61  ;;  %v4921_v37 = vld [vmem:[#allocation8 + $0xb8] sm:$0xf0] }
 0x2e3   :  { %4416 = vmatmul.bf16.vlgmr.msrb.gmra.mxu2 %v7706_v41  ;;  %v5177_v51 = vld [vmem:[#allocation8 + $0x2b8] sm:$0xf0]  ;;  %v4924_v21 = vor.u32 %v6960_v39, %v4921_v37 }
 0x2e4   :  { %4460 = vmatpush.bf16.msra.mxu2 %v5596_v62  ;;  %4436 = vmatpush.bf16.msra.mxu0 %v5020_v8  ;;  %v7096_v54 = vld [vmem:[#allocation8 + $0x4dc] sm:$0xf]  ;;  %v5180_v3 = vor.u32 %v7024_v48, %v5177_v51  ;;  %v4184_v62 = vadd.f32 %v4183_v32, %v4171_v20 }
 0x2e5   :  { %4429 = vmatmul.bf16.vlgmr.msrb.gmra.mxu3 %v7708_v44  ;;  %v5465_v55 = vld [vmem:[#allocation8 + $0x4f8] sm:$0xf0] }
 0x2e6   :  { %4473 = vmatpush.bf16.msra.mxu3 %v5852_v4  ;;  %4449 = vmatpush.bf16.msra.mxu1 %v5276_v24  ;;  %v7160_v56 = vld [vmem:[#allocation8 + $0x6dc] sm:$0xf]  ;;  %v5468_v63 = vor.u32 %v7096_v54, %v5465_v55  ;;  %v4185_v4 = vpop.f32.mrf.mxu0  ;;  %v4197_v10 = vadd.f32 %v4196_v42, %v4184_v62  ;;  %v4211_v62 = vpop.f32.mrf.mxu2 }
 0x2e7   :  { %v5721_v59 = vld [vmem:[#allocation8 + $0x6f8] sm:$0xf0] }
 0x2e8   :  { %4461 = vmatpush.bf16.msra.mxu2 %v5564_v57  ;;  %4437 = vmatpush.bf16.msra.mxu0 %v4988_v23  ;;  %v4889_v61 = vld [vmem:[#allocation8 + $0x78] sm:$0xf0]  ;;  %v5724_v5 = vor.u32 %v7160_v56, %v5721_v59  ;;  %v4210_v35 = vadd.f32 %v4209_v18, %v4197_v10 }
 0x2e9   :  { %v7016_v0 = vld [vmem:[#allocation8 + $0x25c] sm:$0xf]  ;;  %v4892_v33 = vor.u32 %v6952_v60, %v4889_v61 }
 0x2ea   :  { %4474 = vmatpush.bf16.msra.mxu3 %v5820_v15  ;;  %4450 = vmatpush.bf16.msra.mxu1 %v5244_v27  ;;  %v5145_v1 = vld [vmem:[#allocation8 + $0x278] sm:$0xf0] }
 0x2eb   :  { %v7088_v7 = vld [vmem:[#allocation8 + $0x49c] sm:$0xf]  ;;  %v5148_v29 = vor.u32 %v7016_v0, %v5145_v1 }
 0x2ec   :  { %4462 = vmatpush.bf16.msra.mxu2 %v5532_v30  ;;  %4438 = vmatpush.bf16.msra.mxu0 %v4956_v45  ;;  %v5433_v8 = vld [vmem:[#allocation8 + $0x4b8] sm:$0xf0]  ;;  %v4222_v30 = vpop.f32.mrf.mxu3 }
 0x2ed   :  { %v7152_v26 = vld [vmem:[#allocation8 + $0x69c] sm:$0xf]  ;;  %v5436_v15 = vor.u32 %v7088_v7, %v5433_v8  ;;  %v4223_v42 = vadd.f32 %v4222_v30, %v4210_v35 }
 0x2ee   :  { %4475 = vmatpush.bf16.msra.mxu3 %v5788_v36  ;;  %4451 = vmatpush.bf16.msra.mxu1 %v5212_v2  ;;  %v5689_v24 = vld [vmem:[#allocation8 + $0x6b8] sm:$0xf0]  ;;  %v7824_v30 = vpop.f32.mrf.mxu0 }
 0x2ef   :  { %v6944_v12 = vld [vmem:[#allocation8 + $0x1c] sm:$0xf]  ;;  %v5692_v25 = vor.u32 %v7152_v26, %v5689_v24 }
 0x2f0   :  { %4463 = vmatpush.bf16.msra.mxu2 %v5500_v58  ;;  %4439 = vmatpush.bf16.msra.mxu0 %v4924_v21  ;;  %v4857_v13 = vld [vmem:[#allocation8 + $0x38] sm:$0xf0] }
 0x2f1   :  { %v7008_v57 = vld [vmem:[#allocation8 + $0x21c] sm:$0xf]  ;;  %v4860_v53 = vor.u32 %v6944_v12, %v4857_v13 }
 0x2f2   :  { %4476 = vmatpush.bf16.msra.mxu3 %v5756_v52  ;;  %4452 = vmatpush.bf16.msra.mxu1 %v5180_v3  ;;  %v5113_v14 = vld [vmem:[#allocation8 + $0x238] sm:$0xf0]  ;;  %v4542_v52 = vmax.f32 %v4223_v42, 0.0 }
 0x2f3   :  { %v7256_v16 = vld [vmem:[#allocation8 + $0x9dc] sm:$0xf]  ;;  %v5116_v36 = vor.u32 %v7008_v57, %v5113_v14 }
 0x2f4   :  { %4464 = vmatpush.bf16.msra.mxu2 %v5468_v63  ;;  %v6105_v19 = vld [vmem:[#allocation8 + $0x9f8] sm:$0xf0]  ;;  %4440 = vmatpush.bf16.msra.mxu0 %v4892_v33  ;;  %4550 = vst [vmem:[#allocation11 + $0x20] sm:$0xff] %v4542_v52 }
 0x2f5   :  { %v7320_v23 = vld [vmem:[#allocation8 + $0xbdc] sm:$0xf]  ;;  %v6108_v38 = vor.u32 %v7256_v16, %v6105_v19 }
 0x2f6   :  { %4477 = vmatpush.bf16.msra.mxu3 %v5724_v5  ;;  %v6361_v27 = vld [vmem:[#allocation8 + $0xbf8] sm:$0xf0]  ;;  %4453 = vmatpush.bf16.msra.mxu1 %v5148_v29  ;;  %v4224_v5 = vpop.f32.mrf.mxu3 }
 0x2f7   :  { %v7080_v34 = vld [vmem:[#allocation8 + $0x45c] sm:$0xf]  ;;  %v6364_v45 = vor.u32 %v7320_v23, %v6361_v27 }
 0x2f8   :  { %v5401_v28 = vld [vmem:[#allocation8 + $0x478] sm:$0xf0]  ;;  %4465 = vmatpush.bf16.msra.mxu2 %v5436_v15  ;;  %4441 = vmatpush.bf16.msra.mxu0 %v4860_v53 }
 0x2f9   :  { %v7144_v31 = vld [vmem:[#allocation8 + $0x65c] sm:$0xf]  ;;  %v5404_v46 = vor.u32 %v7080_v34, %v5401_v28 }
 0x2fa   :  { %v5657_v32 = vld [vmem:[#allocation8 + $0x678] sm:$0xf0]  ;;  %4478 = vmatpush.bf16.msra.mxu3 %v5692_v25  ;;  %4454 = vmatpush.bf16.msra.mxu1 %v5116_v36 }
 0x2fb   :  { %v7248_v40 = vld [vmem:[#allocation8 + $0x99c] sm:$0xf]  ;;  %v5660_v37 = vor.u32 %v7144_v31, %v5657_v32  ;;  %4442 = vmatmul.bf16.vlgmr.msra.gmra.mxu0 %v7683_v17  ;;  %v7826_v32 = vpop.f32.mrf.mxu1 }
 0x2fc   :  { %v6073_v50 = vld [vmem:[#allocation8 + $0x9b8] sm:$0xf0]  ;;  %4486 = vmatpush.bf16.msrb.mxu0 %v6108_v38  ;;  %4466 = vmatpush.bf16.msra.mxu2 %v5404_v46 }
 0x2fd   :  { %v7312_v47 = vld [vmem:[#allocation8 + $0xb9c] sm:$0xf]  ;;  %v6076_v20 = vor.u32 %v7248_v40, %v6073_v50  ;;  %4455 = vmatmul.bf16.vlgmr.msra.gmra.mxu1 %v7686_v22 }
 0x2fe   :  { %v6329_v2 = vld [vmem:[#allocation8 + $0xbb8] sm:$0xf0]  ;;  %4499 = vmatpush.bf16.msrb.mxu1 %v6364_v45  ;;  %4479 = vmatpush.bf16.msra.mxu3 %v5660_v37 }
 0x2ff   :  { %v7072_v39 = vld [vmem:[#allocation8 + $0x41c] sm:$0xf]  ;;  %v6332_v59 = vor.u32 %v7312_v47, %v6329_v2 }
 0x300   :  { %v5369_v58 = vld [vmem:[#allocation8 + $0x438] sm:$0xf0]  ;;  %4487 = vmatpush.bf16.msrb.mxu0 %v6076_v20 }
 0x301   :  { %v7136_v48 = vld [vmem:[#allocation8 + $0x61c] sm:$0xf]  ;;  %v5372_v3 = vor.u32 %v7072_v39, %v5369_v58 }
 0x302   :  { %v5625_v51 = vld [vmem:[#allocation8 + $0x638] sm:$0xf0]  ;;  %4500 = vmatpush.bf16.msrb.mxu1 %v6332_v59  ;;  %v4237_v59 = vpop.f32.mrf.mxu0 }
 0x303   :  { %v7384_v54 = vld [vmem:[#allocation8 + $0xddc] sm:$0xf]  ;;  %v5628_v63 = vor.u32 %v7136_v48, %v5625_v51  ;;  %4467 = vmatpush.bf16.msra.mxu2 %v5372_v3  ;;  %v4250_v62 = vpop.f32.mrf.mxu1 }
 0x304   :  { %v6617_v55 = vld [vmem:[#allocation8 + $0xdf8] sm:$0xf0] }
 0x305   :  { %v7448_v21 = vld [vmem:[#allocation8 + $0xfdc] sm:$0xf]  ;;  %v6620_v0 = vor.u32 %v7384_v54, %v6617_v55  ;;  %4480 = vmatpush.bf16.msra.mxu3 %v5628_v63 }
 0x306   :  { %v6873_v56 = vld [vmem:[#allocation8 + $0xff8] sm:$0xf0]  ;;  %4468 = vmatmul.bf16.vlgmr.msra.gmra.mxu2 %v7690_v43 }
 0x307   :  { %v7240_v60 = vld [vmem:[#allocation8 + $0x95c] sm:$0xf]  ;;  %v6876_v7 = vor.u32 %v7448_v21, %v6873_v56  ;;  %4512 = vmatpush.bf16.msrb.mxu2 %v6620_v0 }
 0x308   :  { %v6041_v61 = vld [vmem:[#allocation8 + $0x978] sm:$0xf0]  ;;  %4481 = vmatmul.bf16.vlgmr.msra.gmra.mxu3 %v7692_v49 }
 0x309   :  { %v7304_v1 = vld [vmem:[#allocation8 + $0xb5c] sm:$0xf]  ;;  %v6044_v33 = vor.u32 %v7240_v60, %v6041_v61  ;;  %4525 = vmatpush.bf16.msrb.mxu3 %v6876_v7 }
 0x30a   :  { %v6297_v4 = vld [vmem:[#allocation8 + $0xb78] sm:$0xf0] }
 0x30b   :  { %v7376_v8 = vld [vmem:[#allocation8 + $0xd9c] sm:$0xf]  ;;  %v6300_v12 = vor.u32 %v7304_v1, %v6297_v4  ;;  %4488 = vmatpush.bf16.msrb.mxu0 %v6044_v33 }
 0x30c   :  { %v6585_v11 = vld [vmem:[#allocation8 + $0xdb8] sm:$0xf0] }
 0x30d   :  { %v7440_v26 = vld [vmem:[#allocation8 + $0xf9c] sm:$0xf]  ;;  %v6588_v17 = vor.u32 %v7376_v8, %v6585_v11  ;;  %4501 = vmatpush.bf16.msrb.mxu1 %v6300_v12 }
 0x30e   :  { %v6841_v24 = vld [vmem:[#allocation8 + $0xfb8] sm:$0xf0] }
 0x30f   :  { %v7232_v29 = vld [vmem:[#allocation8 + $0x91c] sm:$0xf]  ;;  %v6844_v10 = vor.u32 %v7440_v26, %v6841_v24  ;;  %4513 = vmatpush.bf16.msrb.mxu2 %v6588_v17  ;;  %v4261_v26 = vpop.f32.mrf.mxu2 }
 0x310   :  { %v6009_v13 = vld [vmem:[#allocation8 + $0x938] sm:$0xf0] }
 0x311   :  { %v7296_v57 = vld [vmem:[#allocation8 + $0xb1c] sm:$0xf]  ;;  %v6012_v16 = vor.u32 %v7232_v29, %v6009_v13  ;;  %4526 = vmatpush.bf16.msrb.mxu3 %v6844_v10  ;;  %v4274_v13 = vpop.f32.mrf.mxu3 }
 0x312   :  { %v6265_v14 = vld [vmem:[#allocation8 + $0xb38] sm:$0xf0] }
 0x313   :  { %v7368_v22 = vld [vmem:[#allocation8 + $0xd5c] sm:$0xf]  ;;  %v6268_v18 = vor.u32 %v7296_v57, %v6265_v14  ;;  %4489 = vmatpush.bf16.msrb.mxu0 %v6012_v16 }
 0x314   :  { %v6553_v15 = vld [vmem:[#allocation8 + $0xd78] sm:$0xf0] }
 0x315   :  { %v7432_v19 = vld [vmem:[#allocation8 + $0xf5c] sm:$0xf]  ;;  %v6556_v34 = vor.u32 %v7368_v22, %v6553_v15  ;;  %4502 = vmatpush.bf16.msrb.mxu1 %v6268_v18 }
 0x316   :  { %v6809_v23 = vld [vmem:[#allocation8 + $0xf78] sm:$0xf0] }
 0x317   :  { %v7224_v25 = vld [vmem:[#allocation8 + $0x8dc] sm:$0xf]  ;;  %v6812_v53 = vor.u32 %v7432_v19, %v6809_v23  ;;  %4514 = vmatpush.bf16.msrb.mxu2 %v6556_v34 }
 0x318   :  { %v5977_v27 = vld [vmem:[#allocation8 + $0x8f8] sm:$0xf0] }
 0x319   :  { %v7288_v28 = vld [vmem:[#allocation8 + $0xadc] sm:$0xf]  ;;  %v5980_v36 = vor.u32 %v7224_v25, %v5977_v27  ;;  %4527 = vmatpush.bf16.msrb.mxu3 %v6812_v53  ;;  %v7828_v27 = vld [vmem:[#allocation10] sm:$0xff]  ;;  %v4276_v53 = vpop.f32.mrf.mxu3 }
 0x31a   :  { %v6233_v35 = vld [vmem:[#allocation8 + $0xaf8] sm:$0xf0]  ;;  %v1135_v34 = vperm.slane %v7828_v27, 5 }
 0x31b   :  { %v7360_v31 = vld [vmem:[#allocation8 + $0xd1c] sm:$0xf]  ;;  %v6236_v40 = vor.u32 %v7288_v28, %v6233_v35  ;;  %4490 = vmatpush.bf16.msrb.mxu0 %v5980_v36  ;;  %v4263_v28 = vpop.f32.mrf.mxu2  ;;  %v4287_v36 = vpop.f32.mrf.mxu0 }
 0x31c   :  { %v6521_v43 = vld [vmem:[#allocation8 + $0xd38] sm:$0xf0] }
 0x31d   :  { %v7424_v38 = vld [vmem:[#allocation8 + $0xf1c] sm:$0xf]  ;;  %v6524_v45 = vor.u32 %v7360_v31, %v6521_v43  ;;  %4503 = vmatpush.bf16.msrb.mxu1 %v6236_v40  ;;  %v4236_v31 = vadd.f32 %v7824_v30, %v1135_v34 }
 0x31e   :  { %v6777_v49 = vld [vmem:[#allocation8 + $0xf38] sm:$0xf0] }
 0x31f   :  { %v7216_v50 = vld [vmem:[#allocation8 + $0x89c] sm:$0xf]  ;;  %v6780_v2 = vor.u32 %v7424_v38, %v6777_v49  ;;  %4515 = vmatpush.bf16.msrb.mxu2 %v6524_v45  ;;  %v4249_v43 = vadd.f32 %v7826_v32, %v4236_v31  ;;  %v4300_v49 = vpop.f32.mrf.mxu1 }
 0x320   :  { %v5945_v42 = vld [vmem:[#allocation8 + $0x8b8] sm:$0xf0] }
 0x321   :  { %v7280_v46 = vld [vmem:[#allocation8 + $0xa9c] sm:$0xf]  ;;  %v5948_v58 = vor.u32 %v7216_v50, %v5945_v42  ;;  %4528 = vmatpush.bf16.msrb.mxu3 %v6780_v2  ;;  %v4262_v38 = vadd.f32 %v4261_v26, %v4249_v43 }
 0x322   :  { %v6201_v47 = vld [vmem:[#allocation8 + $0xab8] sm:$0xf0] }
 0x323   :  { %v7352_v39 = vld [vmem:[#allocation8 + $0xcdc] sm:$0xf]  ;;  %v6204_v52 = vor.u32 %v7280_v46, %v6201_v47  ;;  %4491 = vmatpush.bf16.msrb.mxu0 %v5948_v58  ;;  %v4275_v40 = vadd.f32 %v4274_v13, %v4262_v38  ;;  %v4313_v46 = vpop.f32.mrf.mxu2  ;;  %v4326_v47 = vpop.f32.mrf.mxu3 }
 0x324   :  { %v6489_v37 = vld [vmem:[#allocation8 + $0xcf8] sm:$0xf0] }
 0x325   :  { %v7416_v48 = vld [vmem:[#allocation8 + $0xedc] sm:$0xf]  ;;  %v6492_v20 = vor.u32 %v7352_v39, %v6489_v37  ;;  %4504 = vmatpush.bf16.msrb.mxu1 %v6204_v52  ;;  %v4288_v50 = vadd.f32 %v4287_v36, %v4275_v40  ;;  %v1136_v52 = vperm.slane %v7828_v27, 6 }
 0x326   :  { %v6745_v51 = vld [vmem:[#allocation8 + $0xef8] sm:$0xf0] }
 0x327   :  { %v7208_v54 = vld [vmem:[#allocation8 + $0x85c] sm:$0xf]  ;;  %v6748_v3 = vor.u32 %v7416_v48, %v6745_v51  ;;  %4516 = vmatpush.bf16.msrb.mxu2 %v6492_v20  ;;  %v4302_v42 = vpop.f32.mrf.mxu1  ;;  %v4301_v45 = vadd.f32 %v4300_v49, %v4288_v50 }
 0x328   :  { %v5913_v55 = vld [vmem:[#allocation8 + $0x878] sm:$0xf0] }
 0x329   :  { %v7272_v21 = vld [vmem:[#allocation8 + $0xa5c] sm:$0xf]  ;;  %v5916_v63 = vor.u32 %v7208_v54, %v5913_v55  ;;  %4529 = vmatpush.bf16.msrb.mxu3 %v6748_v3 }
 0x32a   :  { %v6169_v56 = vld [vmem:[#allocation8 + $0xa78] sm:$0xf0] }
 0x32b   :  { %v7344_v60 = vld [vmem:[#allocation8 + $0xc9c] sm:$0xf]  ;;  %v6172_v4 = vor.u32 %v7272_v21, %v6169_v56  ;;  %4492 = vmatpush.bf16.msrb.mxu0 %v5916_v63  ;;  %v4315_v39 = vpop.f32.mrf.mxu2 }
 0x32c   :  { %v6457_v61 = vld [vmem:[#allocation8 + $0xcb8] sm:$0xf0] }
 0x32d   :  { %v7408_v0 = vld [vmem:[#allocation8 + $0xe9c] sm:$0xf]  ;;  %v6460_v8 = vor.u32 %v7344_v60, %v6457_v61  ;;  %4505 = vmatpush.bf16.msrb.mxu1 %v6172_v4 }
 0x32e   :  { %v6713_v1 = vld [vmem:[#allocation8 + $0xeb8] sm:$0xf0] }
 0x32f   :  { %v7200_v5 = vld [vmem:[#allocation8 + $0x81c] sm:$0xf]  ;;  %v6716_v24 = vor.u32 %v7408_v0, %v6713_v1  ;;  %4517 = vmatpush.bf16.msrb.mxu2 %v6460_v8 }
 0x330   :  { %v5881_v7 = vld [vmem:[#allocation8 + $0x838] sm:$0xf0] }
 0x331   :  { %v7264_v11 = vld [vmem:[#allocation8 + $0xa1c] sm:$0xf]  ;;  %v5884_v17 = vor.u32 %v7200_v5, %v5881_v7  ;;  %4530 = vmatpush.bf16.msrb.mxu3 %v6716_v24 }
 0x332   :  { %v6137_v33 = vld [vmem:[#allocation8 + $0xa38] sm:$0xf0] }
 0x333   :  { %v7336_v12 = vld [vmem:[#allocation8 + $0xc5c] sm:$0xf]  ;;  %v6140_v10 = vor.u32 %v7264_v11, %v6137_v33  ;;  %4493 = vmatpush.bf16.msrb.mxu0 %v5884_v17  ;;  %v4365_v48 = vpop.f32.mrf.mxu2 }
 0x334   :  { %v6425_v29 = vld [vmem:[#allocation8 + $0xc78] sm:$0xf0] }
 0x335   :  { %v7400_v57 = vld [vmem:[#allocation8 + $0xe5c] sm:$0xf]  ;;  %v6428_v22 = vor.u32 %v7336_v12, %v6425_v29  ;;  %4506 = vmatpush.bf16.msrb.mxu1 %v6140_v10 }
 0x336   :  { %v6681_v14 = vld [vmem:[#allocation8 + $0xe78] sm:$0xf0]  ;;  %4494 = vmatmul.bf16.vlgmr.msrb.gmra.mxu0 %v7699_v6  ;;  %v4289_v6 = vpop.f32.mrf.mxu0 }
 0x337   :  { %v6684_v15 = vor.u32 %v7400_v57, %v6681_v14  ;;  %v7328_v16 = vld [vmem:[#allocation8 + $0xc1c] sm:$0xf]  ;;  %4518 = vmatpush.bf16.msrb.mxu2 %v6428_v22  ;;  %v1137_v57 = vperm.slane %v7828_v27, 7 }
 0x338   :  { %v6393_v19 = vld [vmem:[#allocation8 + $0xc38] sm:$0xf0]  ;;  %4507 = vmatmul.bf16.vlgmr.msrb.gmra.mxu1 %v7702_v9  ;;  %v4314_v9 = vadd.f32 %v4313_v46, %v4301_v45 }
 0x339   :  { %v7392_v23 = vld [vmem:[#allocation8 + $0xe1c] sm:$0xf]  ;;  %v6396_v25 = vor.u32 %v7328_v16, %v6393_v19  ;;  %4531 = vmatpush.bf16.msrb.mxu3 %v6684_v15 }
 0x33a   :  { %v6649_v18 = vld [vmem:[#allocation8 + $0xe38] sm:$0xf0]  ;;  %v4327_v2 = vadd.f32 %v4326_v47, %v4314_v9 }
 0x33b   :  { %v6652_v35 = vor.u32 %v7392_v23, %v6649_v18  ;;  %4519 = vmatpush.bf16.msrb.mxu2 %v6396_v25  ;;  %v4367_v54 = vpop.f32.mrf.mxu2 }
 0x33c   :  { %v4543_v30 = vmax.f32 %v4327_v2, 0.0 }
 0x33d   :  { %4532 = vmatpush.bf16.msrb.mxu3 %v6652_v35 }
 0x33e   :  { %4520 = vmatmul.bf16.vlgmr.msrb.gmra.mxu2 %v7706_v41  ;;  %4551 = vst [vmem:[#allocation11 + $0x28] sm:$0xff] %v4543_v30  ;;  %v4328_v41 = vpop.f32.mrf.mxu3  ;;  %v4339_v37 = vpop.f32.mrf.mxu0 }
 0x33f   :  { %v4340_v20 = vadd.f32 %v4339_v37, %v1136_v52 }
 0x340   :  { %4533 = vmatmul.bf16.vlgmr.msrb.gmra.mxu3 %v7708_v44  ;;  %v4352_v44 = vpop.f32.mrf.mxu1 }
 0x341   :  { %v4353_v21 = vadd.f32 %v4352_v44, %v4340_v20 }
 0x343   :  { %v4366_v59 = vadd.f32 %v4365_v48, %v4353_v21 }
 0x346   :  { %v4341_v58 = vpop.f32.mrf.mxu0  ;;  %v4378_v51 = vpop.f32.mrf.mxu3 }
 0x347   :  { %v4379_v60 = vadd.f32 %v4378_v51, %v4366_v59 }
 0x348   :  { %v4354_v32 = vpop.f32.mrf.mxu1 }
 0x34e   :  { %v4380_v55 = vpop.f32.mrf.mxu3 }
 0x358   :  { %v4391_v56 = vpop.f32.mrf.mxu0 }
 0x359   :  { %v4392_v61 = vadd.f32 %v4391_v56, %v4379_v60 }
 0x35a   :  { %v4404_v3 = vpop.f32.mrf.mxu1 }
 0x35b   :  { %v4405_v0 = vadd.f32 %v4404_v3, %v4392_v61 }
 0x360   :  { %v4393_v62 = vpop.f32.mrf.mxu0 }
 0x362   :  { %v4406_v63 = vpop.f32.mrf.mxu1 }
 0x366   :  { %v4417_v1 = vpop.f32.mrf.mxu2 }
 0x367   :  { %v4418_v4 = vadd.f32 %v4417_v1, %v4405_v0 }
 0x368   :  { %v4430_v5 = vpop.f32.mrf.mxu3 }
 0x369   :  { %v4431_v7 = vadd.f32 %v4430_v5, %v4418_v4 }
 0x36b   :  { %v4544_v8 = vmax.f32 %v4431_v7, 0.0 }
 0x36d   :  { %4552 = vst [vmem:[#allocation11 + $0x30] sm:$0xff] %v4544_v8 }
 0x36e   :  { %v4419_v11 = vpop.f32.mrf.mxu2 }
 0x370   :  { %v4432_v33 = vpop.f32.mrf.mxu3 }
 0x378   :  { %v4443_v26 = vpop.f32.mrf.mxu0 }
 0x379   :  { %v4444_v22 = vadd.f32 %v4443_v26, %v1137_v57 }
 0x37a   :  { %v4456_v24 = vpop.f32.mrf.mxu1 }
 0x37b   :  { %v4457_v15 = vadd.f32 %v4456_v24, %v4444_v22 }
 0x380   :  { %v4445_v12 = vpop.f32.mrf.mxu0 }
 0x382   :  { %v4458_v29 = vpop.f32.mrf.mxu1 }
 0x389   :  { %v4469_v13 = vpop.f32.mrf.mxu2 }
 0x38a   :  { %v4470_v19 = vadd.f32 %v4469_v13, %v4457_v15 }
 0x38b   :  { %v4482_v17 = vpop.f32.mrf.mxu3 }
 0x38c   :  { %v4483_v18 = vadd.f32 %v4482_v17, %v4470_v19 }
 0x391   :  { %v4471_v14 = vpop.f32.mrf.mxu2 }
 0x393   :  { %v4484_v10 = vpop.f32.mrf.mxu3 }
 0x3b3   :  { %v4495_v16 = vpop.f32.mrf.mxu0 }
 0x3b4   :  { %v4496_v25 = vadd.f32 %v4495_v16, %v4483_v18 }
 0x3b5   :  { %v4508_v23 = vpop.f32.mrf.mxu1 }
 0x3b6   :  { %v4509_v35 = vadd.f32 %v4508_v23, %v4496_v25 }
 0x3bb   :  { %v4497_v34 = vpop.f32.mrf.mxu0 }
 0x3bd   :  { %v4510_v28 = vpop.f32.mrf.mxu1 }
 0x3c1   :  { %v4521_v53 = vpop.f32.mrf.mxu2 }
 0x3c2   :  { %v4522_v31 = vadd.f32 %v4521_v53, %v4509_v35 }
 0x3c3   :  { %v4534_v43 = vpop.f32.mrf.mxu3 }
 0x3c4   :  { %v4535_v27 = vadd.f32 %v4534_v43, %v4522_v31 }
 0x3c6   :  { %v4545_v36 = vmax.f32 %v4535_v27, 0.0 }
 0x3c8   :  { %4553 = vst [vmem:[#allocation11 + $0x38] sm:$0xff] %v4545_v36 }
 0x3c9   :  { %v4523_v38 = vpop.f32.mrf.mxu2  ;;  %4564 = dma.vmem_to_hbm [thread:$0]  %s4560_s4, 1024, %s4562_s19, [#allocation4]  }
 0x3cb   :  { %v4536_v49 = vpop.f32.mrf.mxu3 }
 0x3cc   :  { %7613 = dma.done.wait [#allocation4], 1024  }
 0x3cd   :  { %7614 = vsyncadd [#allocation4], 4294966272 }
 0x3ce   :  { %4569 = vsyncpa [#allocation3], 1 }
 0x3cf   :  { %4570 = vsyncpa [#allocation6], 1 }
 0x3d0   :  { %4571 = vsyncpa [#allocation9], 1 }
 0x3d1   :  { %4572 = vsyncpa [#allocation4], 1 }

</bundles_post_ra>
